<compile_context>
chip_gen: v7x
topology: tpu7x:2x2x1
jax: 0.10.0
libtpu: 0.0.40
codegen_flags: <defaults>
</compile_context>

<pallas_src>
import functools
import math

import jax
import jax.numpy as jnp
from jax.experimental import pallas as pl
from jax.experimental.pallas import tpu as pltpu

D_MODEL = 128          # small-shape stand-in for the original d_model=512
NHEAD = 4              # stand-in for nhead=8 (head_dim stays a clean multiple)
HEAD_DIM = D_MODEL // NHEAD
D_FFN = 4 * D_MODEL
LN_EPS = 1e-5

# Row-tile target for the fused (B*S, D) matmuls. 256 matches the 256-wide
# MXU of v6e/v7x; 128 already fills v5e's 4x128^2 MXU.
ROW_TILE = 256


def _layer_norm(h, gamma, beta):
    # One-pass variance: E[h^2] - mu^2 (saves a VPU pass over (R, D)).
    mu = jnp.mean(h, axis=-1, keepdims=True)
    var = jnp.mean(h * h, axis=-1, keepdims=True) - mu * mu
    return (h - mu) * jax.lax.rsqrt(var + LN_EPS) * gamma + beta


def _decoder_layer_kernel(x_ref, wqkv_ref, bqkv_ref, wo_ref, bo_ref,
                          g1_ref, beta1_ref, w1_ref, b1_ref, w2_ref, b2_ref,
                          g2_ref, beta2_ref, o_ref, *, seq_len):
    # One row-block (= several whole sequences) per grid step, so every
    # projection / FFN matmul has a large, MXU-filling M dimension.
    R = x_ref.shape[0]                     # rows in this block
    G = R // seq_len                       # sequences in this block

    x = x_ref[...]                         # (R, D) f32 residual stream
    xb = x.astype(jnp.bfloat16)

    # ---- fused QKV projection: one (R, D) @ (D, 3D) bf16 matmul ----
    qkv = jnp.dot(xb, wqkv_ref[...],
                  preferred_element_type=jnp.float32) + bqkv_ref[...]
    qkv_b = qkv.astype(jnp.bfloat16)

    # ---- per-head attention, batched over the G sequences in the block ----
    # Head outputs stay in registers and are concatenated along lanes (no
    # VMEM scratch, no masked partial-lane stores, no reload).
    scale = 1.0 / math.sqrt(HEAD_DIM)
    head_outs = []
    for h in range(NHEAD):                 # static unroll over heads
        q_lo = h * HEAD_DIM
        k_lo = D_MODEL + h * HEAD_DIM
        v_lo = 2 * D_MODEL + h * HEAD_DIM
        qh = qkv_b[:, q_lo:q_lo + HEAD_DIM].reshape(G, seq_len, HEAD_DIM)
        kh = qkv_b[:, k_lo:k_lo + HEAD_DIM].reshape(G, seq_len, HEAD_DIM)
        vh = qkv_b[:, v_lo:v_lo + HEAD_DIM].reshape(G, seq_len, HEAD_DIM)

        # scores: sequence-batched; the contraction handles the transpose.
        s = jnp.einsum("gqd,gkd->gqk", qh, kh,
                       preferred_element_type=jnp.float32) * scale
        s = s - jnp.max(s, axis=-1, keepdims=True)
        p = jnp.exp(s)
        # Exact f32 divide (better PyTorch parity than approx reciprocal).
        p = p / jnp.sum(p, axis=-1, keepdims=True)

        oh = jnp.einsum("gqk,gkd->gqd", p.astype(jnp.bfloat16), vh,
                        preferred_element_type=jnp.float32)
        head_outs.append(oh.reshape(R, HEAD_DIM))

    attn = jnp.concatenate(head_outs, axis=-1)          # (R, D), in-register

    attn = jnp.dot(attn.astype(jnp.bfloat16), wo_ref[...],
                   preferred_element_type=jnp.float32) + bo_ref[...]

    # ---- residual + LayerNorm 1 ----
    h1 = _layer_norm(x + attn, g1_ref[...], beta1_ref[...])

    # ---- FFN: Linear(D -> 4D) -> ReLU -> Linear(4D -> D) ----
    f = jnp.dot(h1.astype(jnp.bfloat16), w1_ref[...],
                preferred_element_type=jnp.float32) + b1_ref[...]
    f = jnp.maximum(f, 0.0)
    f = jnp.dot(f.astype(jnp.bfloat16), w2_ref[...],
                preferred_element_type=jnp.float32) + b2_ref[...]

    # ---- residual + LayerNorm 2 ----
    out = _layer_norm(h1 + f, g2_ref[...], beta2_ref[...])
    o_ref[...] = out.astype(o_ref.dtype)


def decoder_layer(x, params, *, row_tile=ROW_TILE, min_blocks=2,
                  vmem_limit_bytes=48 * 1024 * 1024):
    B, S, D = x.shape
    assert D == D_MODEL
    rows = B * S

    # Fold batch & sequence into the matmul M dimension; tile the grid over
    # row blocks made of whole sequences (attention never crosses a block).
    # Prefer a split with >= min_blocks blocks so the "parallel" grid axis
    # can shard across both v7x TensorCores.
    base = [c for c in range(1, B + 1)
            if B % c == 0 and c * S <= row_tile and (c * S) % 8 == 0]
    pref = [c for c in base if B // c >= min_blocks]
    if pref:
        seqs_per_block = max(pref)
    elif base:
        seqs_per_block = max(base)
    else:
        seqs_per_block = B
    block_rows = seqs_per_block * S
    # Explicit (8,128)-rule guard: a row block must be a sublane multiple or
    # cover the whole array.
    assert block_rows % 8 == 0 or block_rows == rows, (
        f"illegal row block {block_rows} for rows={rows}")
    grid = (B // seqs_per_block,)

    # bf16 matmul weights (MXU-native); biases / LN params stay f32.
    # TODO(synk): on v7x, w1/w2 could be stored as fp8 with per-tensor scales
    # (native fp8 MXU) if the relaxed tolerance is acceptable.
    args = [
        params["wqkv"].astype(jnp.bfloat16), params["bqkv"],
        params["wo"].astype(jnp.bfloat16), params["bo"],
        params["g1"], params["beta1"],
        params["w1"].astype(jnp.bfloat16), params["b1"],
        params["w2"].astype(jnp.bfloat16), params["b2"],
        params["g2"], params["beta2"],
    ]

    in_specs = [pl.BlockSpec((block_rows, D), lambda i: (i, 0))]
    # Weights/biases: whole array, constant index -> DMA'd once and kept
    # VMEM-resident; single-buffered (no pointless double-buffer allocation).
    in_specs += [pl.BlockSpec(a.shape, lambda i: (0, 0),
                              pipeline_mode=pl.Buffered(1)) for a in args]

    out = pl.pallas_call(
        functools.partial(_decoder_layer_kernel, seq_len=S),
        out_shape=jax.ShapeDtypeStruct((rows, D), x.dtype),
        grid_spec=pltpu.PrefetchScalarGridSpec(
            num_scalar_prefetch=0,
            grid=grid,
            in_specs=in_specs,
            out_specs=pl.BlockSpec((block_rows, D), lambda i: (i, 0)),
        ),
        compiler_params=pltpu.CompilerParams(
            dimension_semantics=("parallel",),   # row blocks are independent
            vmem_limit_bytes=vmem_limit_bytes,   # <= 64 MiB phys on v7x
        ),
    )(x.reshape(rows, D), *args)
    return out.reshape(B, S, D)


def init_params(key):
    """Deterministic synthetic parameters (PyTorch shapes, transposed storage)."""
    ks = jax.random.split(key, 8)

    def w(k, shape, scale=0.02):
        return (scale * jax.random.normal(k, shape)).astype(jnp.float32)

    return {
        # nn.MultiheadAttention: in_proj (3D, D) + bias, out_proj (D, D) + bias
        "wqkv": w(ks[0], (D_MODEL, 3 * D_MODEL)),
        "bqkv": w(ks[1], (1, 3 * D_MODEL)),
        "wo":   w(ks[2], (D_MODEL, D_MODEL)),
        "bo":   w(ks[3], (1, D_MODEL)),
        # LayerNorm 1 (gamma=1, beta=0 like PyTorch default init)
        "g1":    jnp.ones((1, D_MODEL), jnp.float32),
        "beta1": jnp.zeros((1, D_MODEL), jnp.float32),
        # FFN: Linear(D, 4D), Linear(4D, D)
        "w1":   w(ks[4], (D_MODEL, D_FFN)),
        "b1":   w(ks[5], (1, D_FFN)),
        "w2":   w(ks[6], (D_FFN, D_MODEL)),
        "b2":   w(ks[7], (1, D_MODEL)),
        # LayerNorm 2
        "g2":    jnp.ones((1, D_MODEL), jnp.float32),
        "beta2": jnp.zeros((1, D_MODEL), jnp.float32),
    }


def reference(x, p):
    """Pure-JAX f32 reference (same math as the PyTorch forward)."""
    B, S, _ = x.shape
    qkv = x @ p["wqkv"] + p["bqkv"][0]
    q, k, v = jnp.split(qkv, 3, axis=-1)
    qh = q.reshape(B, S, NHEAD, HEAD_DIM)
    kh = k.reshape(B, S, NHEAD, HEAD_DIM)
    vh = v.reshape(B, S, NHEAD, HEAD_DIM)
    s = jnp.einsum("bqhd,bkhd->bhqk", qh, kh) / math.sqrt(HEAD_DIM)
    pmat = jax.nn.softmax(s, axis=-1)
    attn = jnp.einsum("bhqk,bkhd->bqhd", pmat, vh).reshape(B, S, D_MODEL)
    attn = attn @ p["wo"] + p["bo"][0]

    def ln(h, g, b):
        mu = h.mean(-1, keepdims=True)
        var = ((h - mu) ** 2).mean(-1, keepdims=True)
        return (h - mu) * jax.lax.rsqrt(var + LN_EPS) * g[0] + b[0]

    h1 = ln(x + attn, p["g1"], p["beta1"])
    f = jnp.maximum(h1 @ p["w1"] + p["b1"][0], 0.0) @ p["w2"] + p["b2"][0]
    return ln(h1 + f, p["g2"], p["beta2"])


if __name__ == "__main__":
    key = jax.random.PRNGKey(0)
    kx, kp = jax.random.split(key)

    B, S = 32, 8                      # small stand-in for the spec's (32, 64, 512)
    x = jax.random.normal(kx, (B, S, D_MODEL), dtype=jnp.float32)
    params = init_params(kp)

    ref = reference(x, params)

    # Default path: 2 x 128-row blocks -> both v7x TensorCores busy; bf16
    # matmul operands loosen the achievable tolerance vs. the f32 reference.
    out = decoder_layer(x, params)
    jax.block_until_ready(out)
    assert out.shape == (B, S, D_MODEL)
    err = float(jnp.max(jnp.abs(out - ref)))
    assert jnp.allclose(out, ref, rtol=3e-2, atol=3e-2), f"max abs err = {err}"

    # Smaller tiles (4 x 64-row blocks) exercise the grid tiling path.
    out_tiled = decoder_layer(x, params, row_tile=64)
    jax.block_until_ready(out_tiled)
    err2 = float(jnp.max(jnp.abs(out_tiled - ref)))
    assert jnp.allclose(out_tiled, ref, rtol=3e-2, atol=3e-2), f"max abs err = {err2}"

    print("KERNEL_OK")
</pallas_src>

<mosaic_0001>
module attributes {stable_mosaic.version = 11 : i64} {
  func.func @_decoder_layer_kernel(%arg0: i32, %arg1: memref<128x128xf32, #tpu.memory_space<vmem>>, %arg2: memref<128x384xbf16, #tpu.memory_space<vmem>>, %arg3: memref<1x384xf32, #tpu.memory_space<vmem>>, %arg4: memref<128x128xbf16, #tpu.memory_space<vmem>>, %arg5: memref<1x128xf32, #tpu.memory_space<vmem>>, %arg6: memref<1x128xf32, #tpu.memory_space<vmem>>, %arg7: memref<1x128xf32, #tpu.memory_space<vmem>>, %arg8: memref<128x512xbf16, #tpu.memory_space<vmem>>, %arg9: memref<1x512xf32, #tpu.memory_space<vmem>>, %arg10: memref<512x128xbf16, #tpu.memory_space<vmem>>, %arg11: memref<1x128xf32, #tpu.memory_space<vmem>>, %arg12: memref<1x128xf32, #tpu.memory_space<vmem>>, %arg13: memref<1x128xf32, #tpu.memory_space<vmem>>, %arg14: memref<128x128xf32, #tpu.memory_space<vmem>>) attributes {dimension_semantics = [#tpu.dimension_semantics<parallel>], iteration_bounds = array<i64: 2>, scalar_prefetch = 0 : i64, scratch_operands = 0 : i64, tpu.core_type = #tpu.core_type<tc>, window_params = [{transform_indices = @transform_0, window_bounds = array<i64: 128, 128>}, {pipeline_mode = #tpu.pipeline_mode<synchronous>, transform_indices = @transform_1, window_bounds = array<i64: 128, 384>}, {pipeline_mode = #tpu.pipeline_mode<synchronous>, transform_indices = @transform_2, window_bounds = array<i64: 1, 384>}, {pipeline_mode = #tpu.pipeline_mode<synchronous>, transform_indices = @transform_3, window_bounds = array<i64: 128, 128>}, {pipeline_mode = #tpu.pipeline_mode<synchronous>, transform_indices = @transform_4, window_bounds = array<i64: 1, 128>}, {pipeline_mode = #tpu.pipeline_mode<synchronous>, transform_indices = @transform_5, window_bounds = array<i64: 1, 128>}, {pipeline_mode = #tpu.pipeline_mode<synchronous>, transform_indices = @transform_6, window_bounds = array<i64: 1, 128>}, {pipeline_mode = #tpu.pipeline_mode<synchronous>, transform_indices = @transform_7, window_bounds = array<i64: 128, 512>}, {pipeline_mode = #tpu.pipeline_mode<synchronous>, transform_indices = @transform_8, window_bounds = array<i64: 1, 512>}, {pipeline_mode = #tpu.pipeline_mode<synchronous>, transform_indices = @transform_9, window_bounds = array<i64: 512, 128>}, {pipeline_mode = #tpu.pipeline_mode<synchronous>, transform_indices = @transform_10, window_bounds = array<i64: 1, 128>}, {pipeline_mode = #tpu.pipeline_mode<synchronous>, transform_indices = @transform_11, window_bounds = array<i64: 1, 128>}, {pipeline_mode = #tpu.pipeline_mode<synchronous>, transform_indices = @transform_12, window_bounds = array<i64: 1, 128>}, {transform_indices = @transform_13, window_bounds = array<i64: 128, 128>}]} {
    %c0 = arith.constant 0 : index
    %c0_0 = arith.constant 0 : index
    %0 = vector.load %arg1[%c0, %c0_0] : memref<128x128xf32, #tpu.memory_space<vmem>>, vector<128x128xf32>
    %1 = arith.truncf %0 : vector<128x128xf32> to vector<128x128xbf16>
    %c0_1 = arith.constant 0 : index
    %c0_2 = arith.constant 0 : index
    %2 = vector.load %arg2[%c0_1, %c0_2] : memref<128x384xbf16, #tpu.memory_space<vmem>>, vector<128x384xbf16>
    %cst = arith.constant dense<0.000000e+00> : vector<128x384xf32>
    %3 = tpu.matmul %1, %2, %cst {dimension_numbers = #tpu.dot_dimension_numbers<[1], [0], [0], [1], [0, 0, 1, 1], [], []>} : vector<128x128xbf16>, vector<128x384xbf16>, vector<128x384xf32> -> vector<128x384xf32>
    %c0_3 = arith.constant 0 : index
    %c0_4 = arith.constant 0 : index
    %4 = vector.load %arg3[%c0_3, %c0_4] : memref<1x384xf32, #tpu.memory_space<vmem>>, vector<1x384xf32>
    %5 = vector.broadcast %4 : vector<1x384xf32> to vector<128x384xf32>
    %6 = arith.addf %3, %5 : vector<128x384xf32>
    %7 = arith.truncf %6 : vector<128x384xf32> to vector<128x384xbf16>
    %8 = vector.extract_strided_slice %7 {offsets = [0, 0], sizes = [128, 32], strides = [1, 1]} : vector<128x384xbf16> to vector<128x32xbf16>
    %9 = vector.shape_cast %8 : vector<128x32xbf16> to vector<16x8x32xbf16>
    %10 = vector.extract_strided_slice %7 {offsets = [0, 128], sizes = [128, 32], strides = [1, 1]} : vector<128x384xbf16> to vector<128x32xbf16>
    %11 = vector.shape_cast %10 : vector<128x32xbf16> to vector<16x8x32xbf16>
    %12 = vector.extract_strided_slice %7 {offsets = [0, 256], sizes = [128, 32], strides = [1, 1]} : vector<128x384xbf16> to vector<128x32xbf16>
    %13 = vector.shape_cast %12 : vector<128x32xbf16> to vector<16x8x32xbf16>
    "tpu.trace_start"() <{level = 10 : i32, message = "gqd,gkd->gqk"}> : () -> ()
    %cst_5 = arith.constant dense<0.000000e+00> : vector<16x8x8xf32>
    %14 = tpu.matmul %9, %11, %cst_5 {dimension_numbers = #tpu.dot_dimension_numbers<[2], [2], [1], [1], [0, 0, 0, 1, 1, 1], [0], [0]>} : vector<16x8x32xbf16>, vector<16x8x32xbf16>, vector<16x8x8xf32> -> vector<16x8x8xf32>
    "tpu.trace_stop"() : () -> ()
    %cst_6 = arith.constant 0.176776692 : f32
    %15 = vector.broadcast %cst_6 : f32 to vector<16x8x8xf32>
    %16 = arith.mulf %14, %15 : vector<16x8x8xf32>
    %cst_7 = arith.constant dense<0xFF800000> : vector<16x8xf32>
    %17 = vector.multi_reduction <maximumf>, %16, %cst_7 [2] : vector<16x8x8xf32> to vector<16x8xf32>
    %18 = vector.shape_cast %17 : vector<16x8xf32> to vector<16x8x1xf32>
    %19 = vector.broadcast %18 : vector<16x8x1xf32> to vector<16x8x8xf32>
    %20 = arith.subf %16, %19 : vector<16x8x8xf32>
    %21 = math.exp %20 : vector<16x8x8xf32>
    %cst_8 = arith.constant dense<0.000000e+00> : vector<16x8xf32>
    %22 = vector.multi_reduction <add>, %21, %cst_8 [2] : vector<16x8x8xf32> to vector<16x8xf32>
    %23 = vector.shape_cast %22 : vector<16x8xf32> to vector<16x8x1xf32>
    %24 = vector.broadcast %23 : vector<16x8x1xf32> to vector<16x8x8xf32>
    %25 = arith.divf %21, %24 : vector<16x8x8xf32>
    %26 = arith.truncf %25 : vector<16x8x8xf32> to vector<16x8x8xbf16>
    "tpu.trace_start"() <{level = 10 : i32, message = "gqk,gkd->gqd"}> : () -> ()
    %cst_9 = arith.constant dense<0.000000e+00> : vector<16x8x32xf32>
    %27 = tpu.matmul %26, %13, %cst_9 {dimension_numbers = #tpu.dot_dimension_numbers<[2], [1], [1], [2], [0, 0, 0, 1, 1, 2], [0], [0]>} : vector<16x8x8xbf16>, vector<16x8x32xbf16>, vector<16x8x32xf32> -> vector<16x8x32xf32>
    "tpu.trace_stop"() : () -> ()
    %28 = vector.shape_cast %27 : vector<16x8x32xf32> to vector<128x32xf32>
    %29 = vector.extract_strided_slice %7 {offsets = [0, 32], sizes = [128, 32], strides = [1, 1]} : vector<128x384xbf16> to vector<128x32xbf16>
    %30 = vector.shape_cast %29 : vector<128x32xbf16> to vector<16x8x32xbf16>
    %31 = vector.extract_strided_slice %7 {offsets = [0, 160], sizes = [128, 32], strides = [1, 1]} : vector<128x384xbf16> to vector<128x32xbf16>
    %32 = vector.shape_cast %31 : vector<128x32xbf16> to vector<16x8x32xbf16>
    %33 = vector.extract_strided_slice %7 {offsets = [0, 288], sizes = [128, 32], strides = [1, 1]} : vector<128x384xbf16> to vector<128x32xbf16>
    %34 = vector.shape_cast %33 : vector<128x32xbf16> to vector<16x8x32xbf16>
    "tpu.trace_start"() <{level = 10 : i32, message = "gqd,gkd->gqk"}> : () -> ()
    %cst_10 = arith.constant dense<0.000000e+00> : vector<16x8x8xf32>
    %35 = tpu.matmul %30, %32, %cst_10 {dimension_numbers = #tpu.dot_dimension_numbers<[2], [2], [1], [1], [0, 0, 0, 1, 1, 1], [0], [0]>} : vector<16x8x32xbf16>, vector<16x8x32xbf16>, vector<16x8x8xf32> -> vector<16x8x8xf32>
    "tpu.trace_stop"() : () -> ()
    %cst_11 = arith.constant 0.176776692 : f32
    %36 = vector.broadcast %cst_11 : f32 to vector<16x8x8xf32>
    %37 = arith.mulf %35, %36 : vector<16x8x8xf32>
    %cst_12 = arith.constant dense<0xFF800000> : vector<16x8xf32>
    %38 = vector.multi_reduction <maximumf>, %37, %cst_12 [2] : vector<16x8x8xf32> to vector<16x8xf32>
    %39 = vector.shape_cast %38 : vector<16x8xf32> to vector<16x8x1xf32>
    %40 = vector.broadcast %39 : vector<16x8x1xf32> to vector<16x8x8xf32>
    %41 = arith.subf %37, %40 : vector<16x8x8xf32>
    %42 = math.exp %41 : vector<16x8x8xf32>
    %cst_13 = arith.constant dense<0.000000e+00> : vector<16x8xf32>
    %43 = vector.multi_reduction <add>, %42, %cst_13 [2] : vector<16x8x8xf32> to vector<16x8xf32>
    %44 = vector.shape_cast %43 : vector<16x8xf32> to vector<16x8x1xf32>
    %45 = vector.broadcast %44 : vector<16x8x1xf32> to vector<16x8x8xf32>
    %46 = arith.divf %42, %45 : vector<16x8x8xf32>
    %47 = arith.truncf %46 : vector<16x8x8xf32> to vector<16x8x8xbf16>
    "tpu.trace_start"() <{level = 10 : i32, message = "gqk,gkd->gqd"}> : () -> ()
    %cst_14 = arith.constant dense<0.000000e+00> : vector<16x8x32xf32>
    %48 = tpu.matmul %47, %34, %cst_14 {dimension_numbers = #tpu.dot_dimension_numbers<[2], [1], [1], [2], [0, 0, 0, 1, 1, 2], [0], [0]>} : vector<16x8x8xbf16>, vector<16x8x32xbf16>, vector<16x8x32xf32> -> vector<16x8x32xf32>
    "tpu.trace_stop"() : () -> ()
    %49 = vector.shape_cast %48 : vector<16x8x32xf32> to vector<128x32xf32>
    %50 = vector.extract_strided_slice %7 {offsets = [0, 64], sizes = [128, 32], strides = [1, 1]} : vector<128x384xbf16> to vector<128x32xbf16>
    %51 = vector.shape_cast %50 : vector<128x32xbf16> to vector<16x8x32xbf16>
    %52 = vector.extract_strided_slice %7 {offsets = [0, 192], sizes = [128, 32], strides = [1, 1]} : vector<128x384xbf16> to vector<128x32xbf16>
    %53 = vector.shape_cast %52 : vector<128x32xbf16> to vector<16x8x32xbf16>
    %54 = vector.extract_strided_slice %7 {offsets = [0, 320], sizes = [128, 32], strides = [1, 1]} : vector<128x384xbf16> to vector<128x32xbf16>
    %55 = vector.shape_cast %54 : vector<128x32xbf16> to vector<16x8x32xbf16>
    "tpu.trace_start"() <{level = 10 : i32, message = "gqd,gkd->gqk"}> : () -> ()
    %cst_15 = arith.constant dense<0.000000e+00> : vector<16x8x8xf32>
    %56 = tpu.matmul %51, %53, %cst_15 {dimension_numbers = #tpu.dot_dimension_numbers<[2], [2], [1], [1], [0, 0, 0, 1, 1, 1], [0], [0]>} : vector<16x8x32xbf16>, vector<16x8x32xbf16>, vector<16x8x8xf32> -> vector<16x8x8xf32>
    "tpu.trace_stop"() : () -> ()
    %cst_16 = arith.constant 0.176776692 : f32
    %57 = vector.broadcast %cst_16 : f32 to vector<16x8x8xf32>
    %58 = arith.mulf %56, %57 : vector<16x8x8xf32>
    %cst_17 = arith.constant dense<0xFF800000> : vector<16x8xf32>
    %59 = vector.multi_reduction <maximumf>, %58, %cst_17 [2] : vector<16x8x8xf32> to vector<16x8xf32>
    %60 = vector.shape_cast %59 : vector<16x8xf32> to vector<16x8x1xf32>
    %61 = vector.broadcast %60 : vector<16x8x1xf32> to vector<16x8x8xf32>
    %62 = arith.subf %58, %61 : vector<16x8x8xf32>
    %63 = math.exp %62 : vector<16x8x8xf32>
    %cst_18 = arith.constant dense<0.000000e+00> : vector<16x8xf32>
    %64 = vector.multi_reduction <add>, %63, %cst_18 [2] : vector<16x8x8xf32> to vector<16x8xf32>
    %65 = vector.shape_cast %64 : vector<16x8xf32> to vector<16x8x1xf32>
    %66 = vector.broadcast %65 : vector<16x8x1xf32> to vector<16x8x8xf32>
    %67 = arith.divf %63, %66 : vector<16x8x8xf32>
    %68 = arith.truncf %67 : vector<16x8x8xf32> to vector<16x8x8xbf16>
    "tpu.trace_start"() <{level = 10 : i32, message = "gqk,gkd->gqd"}> : () -> ()
    %cst_19 = arith.constant dense<0.000000e+00> : vector<16x8x32xf32>
    %69 = tpu.matmul %68, %55, %cst_19 {dimension_numbers = #tpu.dot_dimension_numbers<[2], [1], [1], [2], [0, 0, 0, 1, 1, 2], [0], [0]>} : vector<16x8x8xbf16>, vector<16x8x32xbf16>, vector<16x8x32xf32> -> vector<16x8x32xf32>
    "tpu.trace_stop"() : () -> ()
    %70 = vector.shape_cast %69 : vector<16x8x32xf32> to vector<128x32xf32>
    %71 = vector.extract_strided_slice %7 {offsets = [0, 96], sizes = [128, 32], strides = [1, 1]} : vector<128x384xbf16> to vector<128x32xbf16>
    %72 = vector.shape_cast %71 : vector<128x32xbf16> to vector<16x8x32xbf16>
    %73 = vector.extract_strided_slice %7 {offsets = [0, 224], sizes = [128, 32], strides = [1, 1]} : vector<128x384xbf16> to vector<128x32xbf16>
    %74 = vector.shape_cast %73 : vector<128x32xbf16> to vector<16x8x32xbf16>
    %75 = vector.extract_strided_slice %7 {offsets = [0, 352], sizes = [128, 32], strides = [1, 1]} : vector<128x384xbf16> to vector<128x32xbf16>
    %76 = vector.shape_cast %75 : vector<128x32xbf16> to vector<16x8x32xbf16>
    "tpu.trace_start"() <{level = 10 : i32, message = "gqd,gkd->gqk"}> : () -> ()
    %cst_20 = arith.constant dense<0.000000e+00> : vector<16x8x8xf32>
    %77 = tpu.matmul %72, %74, %cst_20 {dimension_numbers = #tpu.dot_dimension_numbers<[2], [2], [1], [1], [0, 0, 0, 1, 1, 1], [0], [0]>} : vector<16x8x32xbf16>, vector<16x8x32xbf16>, vector<16x8x8xf32> -> vector<16x8x8xf32>
    "tpu.trace_stop"() : () -> ()
    %cst_21 = arith.constant 0.176776692 : f32
    %78 = vector.broadcast %cst_21 : f32 to vector<16x8x8xf32>
    %79 = arith.mulf %77, %78 : vector<16x8x8xf32>
    %cst_22 = arith.constant dense<0xFF800000> : vector<16x8xf32>
    %80 = vector.multi_reduction <maximumf>, %79, %cst_22 [2] : vector<16x8x8xf32> to vector<16x8xf32>
    %81 = vector.shape_cast %80 : vector<16x8xf32> to vector<16x8x1xf32>
    %82 = vector.broadcast %81 : vector<16x8x1xf32> to vector<16x8x8xf32>
    %83 = arith.subf %79, %82 : vector<16x8x8xf32>
    %84 = math.exp %83 : vector<16x8x8xf32>
    %cst_23 = arith.constant dense<0.000000e+00> : vector<16x8xf32>
    %85 = vector.multi_reduction <add>, %84, %cst_23 [2] : vector<16x8x8xf32> to vector<16x8xf32>
    %86 = vector.shape_cast %85 : vector<16x8xf32> to vector<16x8x1xf32>
    %87 = vector.broadcast %86 : vector<16x8x1xf32> to vector<16x8x8xf32>
    %88 = arith.divf %84, %87 : vector<16x8x8xf32>
    %89 = arith.truncf %88 : vector<16x8x8xf32> to vector<16x8x8xbf16>
    "tpu.trace_start"() <{level = 10 : i32, message = "gqk,gkd->gqd"}> : () -> ()
    %cst_24 = arith.constant dense<0.000000e+00> : vector<16x8x32xf32>
    %90 = tpu.matmul %89, %76, %cst_24 {dimension_numbers = #tpu.dot_dimension_numbers<[2], [1], [1], [2], [0, 0, 0, 1, 1, 2], [0], [0]>} : vector<16x8x8xbf16>, vector<16x8x32xbf16>, vector<16x8x32xf32> -> vector<16x8x32xf32>
    "tpu.trace_stop"() : () -> ()
    %91 = vector.shape_cast %90 : vector<16x8x32xf32> to vector<128x32xf32>
    %92 = tpu.concatenate %28, %49, %70, %91 in 1 : vector<128x32xf32>, vector<128x32xf32>, vector<128x32xf32>, vector<128x32xf32> -> vector<128x128xf32>
    %93 = arith.truncf %92 : vector<128x128xf32> to vector<128x128xbf16>
    %c0_25 = arith.constant 0 : index
    %c0_26 = arith.constant 0 : index
    %94 = vector.load %arg4[%c0_25, %c0_26] : memref<128x128xbf16, #tpu.memory_space<vmem>>, vector<128x128xbf16>
    %cst_27 = arith.constant dense<0.000000e+00> : vector<128x128xf32>
    %95 = tpu.matmul %93, %94, %cst_27 {dimension_numbers = #tpu.dot_dimension_numbers<[1], [0], [0], [1], [0, 0, 1, 1], [], []>} : vector<128x128xbf16>, vector<128x128xbf16>, vector<128x128xf32> -> vector<128x128xf32>
    %c0_28 = arith.constant 0 : index
    %c0_29 = arith.constant 0 : index
    %96 = vector.load %arg5[%c0_28, %c0_29] : memref<1x128xf32, #tpu.memory_space<vmem>>, vector<1x128xf32>
    %97 = vector.broadcast %96 : vector<1x128xf32> to vector<128x128xf32>
    %98 = arith.addf %95, %97 : vector<128x128xf32>
    %99 = arith.addf %0, %98 : vector<128x128xf32>
    %c0_30 = arith.constant 0 : index
    %c0_31 = arith.constant 0 : index
    %100 = vector.load %arg6[%c0_30, %c0_31] : memref<1x128xf32, #tpu.memory_space<vmem>>, vector<1x128xf32>
    %c0_32 = arith.constant 0 : index
    %c0_33 = arith.constant 0 : index
    %101 = vector.load %arg7[%c0_32, %c0_33] : memref<1x128xf32, #tpu.memory_space<vmem>>, vector<1x128xf32>
    %cst_34 = arith.constant dense<0.000000e+00> : vector<128xf32>
    %102 = vector.multi_reduction <add>, %99, %cst_34 [1] : vector<128x128xf32> to vector<128xf32>
    %103 = vector.shape_cast %102 : vector<128xf32> to vector<128x1xf32>
    %cst_35 = arith.constant 1.280000e+02 : f32
    %104 = vector.broadcast %cst_35 : f32 to vector<128x1xf32>
    %105 = arith.divf %103, %104 : vector<128x1xf32>
    %106 = arith.mulf %99, %99 : vector<128x128xf32>
    %cst_36 = arith.constant dense<0.000000e+00> : vector<128xf32>
    %107 = vector.multi_reduction <add>, %106, %cst_36 [1] : vector<128x128xf32> to vector<128xf32>
    %108 = vector.shape_cast %107 : vector<128xf32> to vector<128x1xf32>
    %cst_37 = arith.constant 1.280000e+02 : f32
    %109 = vector.broadcast %cst_37 : f32 to vector<128x1xf32>
    %110 = arith.divf %108, %109 : vector<128x1xf32>
    %111 = arith.mulf %105, %105 : vector<128x1xf32>
    %112 = arith.subf %110, %111 : vector<128x1xf32>
    %113 = vector.broadcast %105 : vector<128x1xf32> to vector<128x128xf32>
    %114 = arith.subf %99, %113 : vector<128x128xf32>
    %cst_38 = arith.constant 9.99999974E-6 : f32
    %115 = vector.broadcast %cst_38 : f32 to vector<128x1xf32>
    %116 = arith.addf %112, %115 : vector<128x1xf32>
    %117 = math.rsqrt %116 : vector<128x1xf32>
    %118 = vector.broadcast %117 : vector<128x1xf32> to vector<128x128xf32>
    %119 = arith.mulf %114, %118 : vector<128x128xf32>
    %120 = vector.broadcast %100 : vector<1x128xf32> to vector<128x128xf32>
    %121 = arith.mulf %119, %120 : vector<128x128xf32>
    %122 = vector.broadcast %101 : vector<1x128xf32> to vector<128x128xf32>
    %123 = arith.addf %121, %122 : vector<128x128xf32>
    %124 = arith.truncf %123 : vector<128x128xf32> to vector<128x128xbf16>
    %c0_39 = arith.constant 0 : index
    %c0_40 = arith.constant 0 : index
    %125 = vector.load %arg8[%c0_39, %c0_40] : memref<128x512xbf16, #tpu.memory_space<vmem>>, vector<128x512xbf16>
    %cst_41 = arith.constant dense<0.000000e+00> : vector<128x512xf32>
    %126 = tpu.matmul %124, %125, %cst_41 {dimension_numbers = #tpu.dot_dimension_numbers<[1], [0], [0], [1], [0, 0, 1, 1], [], []>} : vector<128x128xbf16>, vector<128x512xbf16>, vector<128x512xf32> -> vector<128x512xf32>
    %c0_42 = arith.constant 0 : index
    %c0_43 = arith.constant 0 : index
    %127 = vector.load %arg9[%c0_42, %c0_43] : memref<1x512xf32, #tpu.memory_space<vmem>>, vector<1x512xf32>
    %128 = vector.broadcast %127 : vector<1x512xf32> to vector<128x512xf32>
    %129 = arith.addf %126, %128 : vector<128x512xf32>
    %cst_44 = arith.constant 0.000000e+00 : f32
    %130 = vector.broadcast %cst_44 : f32 to vector<128x512xf32>
    %131 = arith.maximumf %129, %130 : vector<128x512xf32>
    %132 = arith.truncf %131 : vector<128x512xf32> to vector<128x512xbf16>
    %c0_45 = arith.constant 0 : index
    %c0_46 = arith.constant 0 : index
    %133 = vector.load %arg10[%c0_45, %c0_46] : memref<512x128xbf16, #tpu.memory_space<vmem>>, vector<512x128xbf16>
    %cst_47 = arith.constant dense<0.000000e+00> : vector<128x128xf32>
    %134 = tpu.matmul %132, %133, %cst_47 {dimension_numbers = #tpu.dot_dimension_numbers<[1], [0], [0], [1], [0, 0, 1, 1], [], []>} : vector<128x512xbf16>, vector<512x128xbf16>, vector<128x128xf32> -> vector<128x128xf32>
    %c0_48 = arith.constant 0 : index
    %c0_49 = arith.constant 0 : index
    %135 = vector.load %arg11[%c0_48, %c0_49] : memref<1x128xf32, #tpu.memory_space<vmem>>, vector<1x128xf32>
    %136 = vector.broadcast %135 : vector<1x128xf32> to vector<128x128xf32>
    %137 = arith.addf %134, %136 : vector<128x128xf32>
    %138 = arith.addf %123, %137 : vector<128x128xf32>
    %c0_50 = arith.constant 0 : index
    %c0_51 = arith.constant 0 : index
    %139 = vector.load %arg12[%c0_50, %c0_51] : memref<1x128xf32, #tpu.memory_space<vmem>>, vector<1x128xf32>
    %c0_52 = arith.constant 0 : index
    %c0_53 = arith.constant 0 : index
    %140 = vector.load %arg13[%c0_52, %c0_53] : memref<1x128xf32, #tpu.memory_space<vmem>>, vector<1x128xf32>
    %cst_54 = arith.constant dense<0.000000e+00> : vector<128xf32>
    %141 = vector.multi_reduction <add>, %138, %cst_54 [1] : vector<128x128xf32> to vector<128xf32>
    %142 = vector.shape_cast %141 : vector<128xf32> to vector<128x1xf32>
    %cst_55 = arith.constant 1.280000e+02 : f32
    %143 = vector.broadcast %cst_55 : f32 to vector<128x1xf32>
    %144 = arith.divf %142, %143 : vector<128x1xf32>
    %145 = arith.mulf %138, %138 : vector<128x128xf32>
    %cst_56 = arith.constant dense<0.000000e+00> : vector<128xf32>
    %146 = vector.multi_reduction <add>, %145, %cst_56 [1] : vector<128x128xf32> to vector<128xf32>
    %147 = vector.shape_cast %146 : vector<128xf32> to vector<128x1xf32>
    %cst_57 = arith.constant 1.280000e+02 : f32
    %148 = vector.broadcast %cst_57 : f32 to vector<128x1xf32>
    %149 = arith.divf %147, %148 : vector<128x1xf32>
    %150 = arith.mulf %144, %144 : vector<128x1xf32>
    %151 = arith.subf %149, %150 : vector<128x1xf32>
    %152 = vector.broadcast %144 : vector<128x1xf32> to vector<128x128xf32>
    %153 = arith.subf %138, %152 : vector<128x128xf32>
    %cst_58 = arith.constant 9.99999974E-6 : f32
    %154 = vector.broadcast %cst_58 : f32 to vector<128x1xf32>
    %155 = arith.addf %151, %154 : vector<128x1xf32>
    %156 = math.rsqrt %155 : vector<128x1xf32>
    %157 = vector.broadcast %156 : vector<128x1xf32> to vector<128x128xf32>
    %158 = arith.mulf %153, %157 : vector<128x128xf32>
    %159 = vector.broadcast %139 : vector<1x128xf32> to vector<128x128xf32>
    %160 = arith.mulf %158, %159 : vector<128x128xf32>
    %161 = vector.broadcast %140 : vector<1x128xf32> to vector<128x128xf32>
    %162 = arith.addf %160, %161 : vector<128x128xf32>
    %c0_59 = arith.constant 0 : index
    %c0_60 = arith.constant 0 : index
    %163 = vector.load %arg14[%c0_59, %c0_60] : memref<128x128xf32, #tpu.memory_space<vmem>>, vector<128x128xf32>
    tpu.vector_store %arg14[%c0_59, %c0_60], %162 {strides = array<i32>} : memref<128x128xf32, #tpu.memory_space<vmem>>, vector<128x128xf32>,
    return
  }
  func.func @transform_0(%arg0: i32) -> (i32, i32) {
    %c0_i32 = arith.constant 0 : i32
    %c0_i32_0 = arith.constant 0 : i32
    return %arg0, %c0_i32 : i32, i32
  }
  func.func @transform_1(%arg0: i32) -> (i32, i32) {
    %c0_i32 = arith.constant 0 : i32
    %c0_i32_0 = arith.constant 0 : i32
    %c0_i32_1 = arith.constant 0 : i32
    return %c0_i32, %c0_i32_0 : i32, i32
  }
  func.func @transform_2(%arg0: i32) -> (i32, i32) {
    %c0_i32 = arith.constant 0 : i32
    %c0_i32_0 = arith.constant 0 : i32
    %c0_i32_1 = arith.constant 0 : i32
    return %c0_i32, %c0_i32_0 : i32, i32
  }
  func.func @transform_3(%arg0: i32) -> (i32, i32) {
    %c0_i32 = arith.constant 0 : i32
    %c0_i32_0 = arith.constant 0 : i32
    %c0_i32_1 = arith.constant 0 : i32
    return %c0_i32, %c0_i32_0 : i32, i32
  }
  func.func @transform_4(%arg0: i32) -> (i32, i32) {
    %c0_i32 = arith.constant 0 : i32
    %c0_i32_0 = arith.constant 0 : i32
    %c0_i32_1 = arith.constant 0 : i32
    return %c0_i32, %c0_i32_0 : i32, i32
  }
  func.func @transform_5(%arg0: i32) -> (i32, i32) {
    %c0_i32 = arith.constant 0 : i32
    %c0_i32_0 = arith.constant 0 : i32
    %c0_i32_1 = arith.constant 0 : i32
    return %c0_i32, %c0_i32_0 : i32, i32
  }
  func.func @transform_6(%arg0: i32) -> (i32, i32) {
    %c0_i32 = arith.constant 0 : i32
    %c0_i32_0 = arith.constant 0 : i32
    %c0_i32_1 = arith.constant 0 : i32
    return %c0_i32, %c0_i32_0 : i32, i32
  }
  func.func @transform_7(%arg0: i32) -> (i32, i32) {
    %c0_i32 = arith.constant 0 : i32
    %c0_i32_0 = arith.constant 0 : i32
    %c0_i32_1 = arith.constant 0 : i32
    return %c0_i32, %c0_i32_0 : i32, i32
  }
  func.func @transform_8(%arg0: i32) -> (i32, i32) {
    %c0_i32 = arith.constant 0 : i32
    %c0_i32_0 = arith.constant 0 : i32
    %c0_i32_1 = arith.constant 0 : i32
    return %c0_i32, %c0_i32_0 : i32, i32
  }
  func.func @transform_9(%arg0: i32) -> (i32, i32) {
    %c0_i32 = arith.constant 0 : i32
    %c0_i32_0 = arith.constant 0 : i32
    %c0_i32_1 = arith.constant 0 : i32
    return %c0_i32, %c0_i32_0 : i32, i32
  }
  func.func @transform_10(%arg0: i32) -> (i32, i32) {
    %c0_i32 = arith.constant 0 : i32
    %c0_i32_0 = arith.constant 0 : i32
    %c0_i32_1 = arith.constant 0 : i32
    return %c0_i32, %c0_i32_0 : i32, i32
  }
  func.func @transform_11(%arg0: i32) -> (i32, i32) {
    %c0_i32 = arith.constant 0 : i32
    %c0_i32_0 = arith.constant 0 : i32
    %c0_i32_1 = arith.constant 0 : i32
    return %c0_i32, %c0_i32_0 : i32, i32
  }
  func.func @transform_12(%arg0: i32) -> (i32, i32) {
    %c0_i32 = arith.constant 0 : i32
    %c0_i32_0 = arith.constant 0 : i32
    %c0_i32_1 = arith.constant 0 : i32
    return %c0_i32, %c0_i32_0 : i32, i32
  }
  func.func @transform_13(%arg0: i32) -> (i32, i32) {
    %c0_i32 = arith.constant 0 : i32
    %c0_i32_0 = arith.constant 0 : i32
    return %arg0, %c0_i32 : i32, i32
  }
}

</mosaic_0001>

<bundles_post_ra>
// kernel: tpu_custom_call.1
= control target key start
LH: loop header
LB: loop body
LE: loop exit
PB: predicated region body
PF: predicated region fallthrough
CT: control target
= control target key end

     0   :  { %s15971_s0 = inlined_call_operand.hbm [shape: f32[256,128], index: 0, kind: input, shape index: {}]   ;;  %s15972_s1 = inlined_call_operand.hbm [shape: bf16[128,384], index: 1, kind: input, shape index: {}]   ;;  %s15973_s2 = inlined_call_operand.vmem [shape: f32[1,384], index: 2, kind: input, shape index: {}]   ;;  %s15974_s3 = inlined_call_operand.hbm [shape: bf16[128,128], index: 3, kind: input, shape index: {}]   ;;  %s15975_s4 = inlined_call_operand.vmem [shape: f32[1,128], index: 4, kind: input, shape index: {}]   ;;  %s15976_s5 = inlined_call_operand.vmem [shape: f32[1,128], index: 5, kind: input, shape index: {}]   ;;  %s15977_s6 = inlined_call_operand.vmem [shape: f32[1,128], index: 6, kind: input, shape index: {}]   ;;  %s15978_s7 = inlined_call_operand.hbm [shape: bf16[128,512], index: 7, kind: input, shape index: {}]   ;;  %s15979_s8 = inlined_call_operand.vmem [shape: f32[1,512], index: 8, kind: input, shape index: {}]   ;;  %s15980_s9 = inlined_call_operand.hbm [shape: bf16[512,128], index: 9, kind: input, shape index: {}]   ;;  %s15981_s10 = inlined_call_operand.vmem [shape: f32[1,128], index: 10, kind: input, shape index: {}]   ;;  %s15982_s11 = inlined_call_operand.vmem [shape: f32[1,128], index: 11, kind: input, shape index: {}]   ;;  %s15983_s12 = inlined_call_operand.vmem [shape: f32[1,128], index: 12, kind: input, shape index: {}]   ;;  %s15984_s13 = inlined_call_operand.hbm [shape: f32[256,128], index: 13, kind: output, shape index: {}]  }
   0x1   :  { %16068 = sst [smem:[#allocation73_spill]] %s15972_s1 }
   0x2   :  { %16069 = sst [smem:[#allocation74_spill]] %s15981_s10 }
   0x3   :  { %16070 = sst [smem:[#allocation75_spill]] %s15982_s11 }
   0x4   :  { %16071 = sst [smem:[#allocation76_spill]] %s15983_s12 }
   0x5   :  { %16072 = sst [smem:[#allocation77_spill]] %s15984_s13 }
   0x6   :  { %18 = vsyncpa [#allocation3], 0 }
   0x7   :  { %20 = vsyncpa [#allocation3 + $0x1], 0 }
   0x8   :  { %21 = vsyncpa [#allocation6], 0 }
   0x9   :  { %22 = vsyncpa [#allocation9], 0 }
   0xa   :  { %23 = vsyncpa [#allocation4], 0 }
   0xb   :  { %25 = vsyncpa [#allocation4 + $0x1], 0  ;;  %s12790_s25 = smov 0   ;;  %s12792_s26 = smov 0  }
   0xc   :  { %s12794_s27 = smov 0   ;;  %s12796_s28 = smov 0  }
   0xd LB: > { %16073 = sst [smem:[#allocation16_spill]] %s12684_s25  ;;  %s12811_s29 = sadd.s32 4294967295, %s12696_s28   ;;  %s12696_s28 = sphi %s12796_s28, %s16277_s28   ;;  %s12692_s27 = sphi %s12794_s27, %s16276_s27   ;;  %s12688_s26 = sphi %s12792_s26, %s16275_s26   ;;  %s12684_s25 = sphi %s12790_s25, %s16274_s25  }
   0xe   : > { %s10187_s30 = sadd.s32 4294967294, %s12696_s28   ;;  %p51_p0 = scmp.ne.s32.totalorder %s12688_s26, %s12684_s25 }
   0xf   : > { %p15987_p1 = scmp.eq.s32.totalorder %s12811_s29, 0  ;;  %p333_p3 = scmp.eq.s32.totalorder %s10187_s30, 1 }
  0x10   : > { %p10188_p5 = scmp.ge.s32.totalorder %s12696_s28, 1  ;;  %p340_p7 = scmp.lt.s32.totalorder %s12696_s28, 3 }
  0x11   : > { %p12820_p4 = por %p15987_p1, %p51_p0  ;;  %p12825_p6 = por %p333_p3, %p51_p0 }
  0x12   : > { %p12830_p8 = pnand %p10188_p5, %p340_p7  ;;  %s12698_s17 = smov [#allocation5]  }
  0x13   : > { %s16074_s14 = scalar_select %p12820_p4, 1, 0 }
  0x14   : > { %s16075_s15 = scalar_select %p12825_p6, 1, 0 }
  0x15   : > { %s16077_s16 = scalar_select %p12830_p8, 1, 0 }
  0x16   : > { %16076 = sst [smem:[#allocation17_spill]] %s16075_s15  ;;  %s352_s18 = sshll.u32 %s12698_s17, 4  ;;  %s12834_s18 = int_to_ptr.vmem [resolvable:$true] %s352_s18 }
  0x17   : > { %p11821_p9 = pneg %p12830_p8  ;;  %s12699_s20 = smov [#allocation8]  }
  0x18   : > { %s390_s21 = sshll.u32 %s12699_s20, 4  ;;  %s16079_s1 = sld [smem:[#allocation73_spill]]  ;;  %s12845_s21 = int_to_ptr.vmem [resolvable:$true] %s390_s21 }
  0x19   : > { %p12841_p11 = pnand %p11821_p9, %p15987_p1 }
  0x1b   : > { %p12855_p13 = pneg %p12841_p11 }
  0x1e   : > { %s12480_s24 = scalar_lea.hbm %s16079_s1, 3072 }
  0x1f   : > { %p12481_p12 = scmp.ne.s32.totalorder %s16079_s1, %s12480_s24  ;;  %p12487_p5 = scmp.lt.u32.totalorder %s12480_s24, %s16079_s1 }
  0x21   : > { %p12483_p0 = pnand %p12855_p13, %p12481_p12 }
  0x23   : > { %p12484_p3 = pneg %p12483_p0 }
  0x25   : > { %p12489_p7 = pnand %p12487_p5, %p12484_p3 }
  0x27   : > { %12492 = shalt.err (!%p12489_p7)
}
  0x28   : > { %s12493_s22 = scalar_lea.vmem %s12834_s18, 3072  ;;  %p12501_p2 = scmp.lt.s32.totalorder %s12834_s18, %s12834_s18 }
  0x29   : > { %p12494_p9 = scmp.ne.s32.totalorder %s12834_s18, %s12493_s22  ;;  %p12502_p6 = scmp.lt.s32.totalorder %s12493_s22, %s12493_s22 }
  0x2b   : > { %p12496_p10 = pnand %p12494_p9, %p12855_p13  ;;  %p12503_p12 = por %p12502_p6, %p12501_p2 }
  0x2d   : > { %p12497_p1 = pneg %p12496_p10 }
  0x2f   : > { %p12504_p0 = pnand %p12503_p12, %p12497_p1 }
  0x31   : > { %12507 = shalt.err (!%p12504_p0)
}
  0x32   : > { %s12700_s23 = smov 192   ;;  %s12701_s25 = smov 12  }
  0x33   : > { %11824 = dma.hbm_to_vmem [thread:$0]  (!%p12841_p11), %s16079_s1, 3072, %s12834_s18, [#allocation6], %s12700_s23, %s12700_s23, %s12701_s25  }
  0x34   : > { %s12508_s13 = scalar_lea.hbm %s15978_s7, 4096 }
  0x35   : > { %p12509_p2 = scmp.ne.s32.totalorder %s15978_s7, %s12508_s13  ;;  %p12515_p10 = scmp.lt.u32.totalorder %s12508_s13, %s15978_s7 }
  0x37   : > { %p12511_p1 = pnand %p12509_p2, %p12855_p13 }
  0x39   : > { %p12512_p6 = pneg %p12511_p1 }
  0x3b   : > { %p12517_p3 = pnand %p12515_p10, %p12512_p6 }
  0x3d   : > { %12520 = shalt.err (!%p12517_p3)
}
  0x3e   : > { %s12521_s18 = scalar_lea.vmem %s12845_s21, 4096  ;;  %p12529_p12 = scmp.lt.s32.totalorder %s12845_s21, %s12845_s21 }
  0x3f   : > { %p12522_p5 = scmp.ne.s32.totalorder %s12845_s21, %s12521_s18  ;;  %p12530_p0 = scmp.lt.s32.totalorder %s12521_s18, %s12521_s18 }
  0x41   : > { %p12524_p7 = pnand %p12522_p5, %p12855_p13  ;;  %p12531_p2 = por %p12530_p0, %p12529_p12 }
  0x43   : > { %p12525_p9 = pneg %p12524_p7 }
  0x45   : > { %p12532_p1 = pnand %p12531_p2, %p12525_p9 }
  0x47   : > { %12535 = shalt.err (!%p12532_p1)
}
  0x48   : > { %s12702_s11 = smov 256   ;;  %s12703_s10 = smov 16  }
  0x49   : > { %11830 = dma.hbm_to_vmem [thread:$0]  (!%p12841_p11), %s15978_s7, 4096, %s12845_s21, [#allocation9], %s12702_s11, %s12702_s11, %s12703_s10  }
  0x4a   : > { %s12704_s23 = smov [#allocation7]   ;;  %s12536_s17 = scalar_lea.hbm %s15974_s3, 1024 }
  0x4b   : > { %s368_s25 = sshll.u32 %s12704_s23, 4  ;;  %p12537_p6 = scmp.ne.s32.totalorder %s15974_s3, %s12536_s17  ;;  %s369_s25 = int_to_ptr.vmem [resolvable:$true] %s368_s25 }
  0x4c   : > { %p12543_p5 = scmp.lt.u32.totalorder %s12536_s17, %s15974_s3 }
  0x4d   : > { %p12539_p10 = pnand %p12537_p6, %p12855_p13 }
  0x4f   : > { %p12540_p3 = pneg %p12539_p10 }
  0x51   : > { %p12545_p7 = pnand %p12543_p5, %p12540_p3 }
  0x53   : > { %12548 = shalt.err (!%p12545_p7)
}
  0x54   : > { %s12549_s21 = scalar_lea.vmem %s369_s25, 1024  ;;  %p12557_p2 = scmp.lt.s32.totalorder %s369_s25, %s369_s25 }
  0x55   : > { %p12550_p9 = scmp.ne.s32.totalorder %s369_s25, %s12549_s21  ;;  %p12558_p1 = scmp.lt.s32.totalorder %s12549_s21, %s12549_s21 }
  0x57   : > { %p12552_p12 = pnand %p12550_p9, %p12855_p13  ;;  %p12559_p4 = por %p12558_p1, %p12557_p2 }
  0x59   : > { %p12553_p0 = pneg %p12552_p12 }
  0x5b   : > { %p12560_p8 = pnand %p12559_p4, %p12553_p0 }
  0x5d   : > { %12563 = shalt.err (!%p12560_p8)
}
  0x5e   : > { %s12705_s11 = smov 64   ;;  %s12706_s10 = smov 4  }
  0x5f   : > { %11827 = dma.hbm_to_vmem [thread:$0]  (!%p12841_p11), %s15974_s3, 1024, %s369_s25, [#allocation6], %s12705_s11, %s12705_s11, %s12706_s10  }
  0x60   : > { %s12707_s13 = smov [#allocation10]   ;;  %s12564_s17 = scalar_lea.hbm %s15980_s9, 4096 }
  0x61   : > { %s406_s23 = sshll.u32 %s12707_s13, 4  ;;  %p12565_p4 = scmp.ne.s32.totalorder %s15980_s9, %s12564_s17  ;;  %s407_s23 = int_to_ptr.vmem [resolvable:$true] %s406_s23 }
  0x62   : > { %p12571_p10 = scmp.lt.u32.totalorder %s12564_s17, %s15980_s9 }
  0x63   : > { %p12567_p8 = pnand %p12565_p4, %p12855_p13 }
  0x65   : > { %p12568_p6 = pneg %p12567_p8 }
  0x67   : > { %p12573_p3 = pnand %p12571_p10, %p12568_p6 }
  0x69   : > { %12576 = shalt.err (!%p12573_p3)
}
  0x6a   : > { %s12577_s25 = scalar_lea.vmem %s407_s23, 4096  ;;  %p12585_p12 = scmp.lt.s32.totalorder %s407_s23, %s407_s23 }
  0x6b   : > { %p12578_p5 = scmp.ne.s32.totalorder %s407_s23, %s12577_s25  ;;  %p12586_p0 = scmp.lt.s32.totalorder %s12577_s25, %s12577_s25 }
  0x6d   : > { %p12580_p7 = pnand %p12578_p5, %p12855_p13  ;;  %p12587_p2 = por %p12586_p0, %p12585_p12 }
  0x6f   : > { %p12581_p9 = pneg %p12580_p7 }
  0x71   : > { %p12588_p1 = pnand %p12587_p2, %p12581_p9 }
  0x73   : > { %12591 = shalt.err (!%p12588_p1)
}
  0x74   : > { %11833 = dma.hbm_to_vmem [thread:$0]  (!%p12841_p11), %s15980_s9, 4096, %s407_s23, [#allocation9], %s12705_s11, %s12705_s11, %s12706_s10  }
  0x75   : > { %s12936_s15 = sadd.s32 1, %s12696_s28   ;;  %s38_s13 = sadd.s32 1, %s12692_s27 }
  0x76   : > { %s35_s19 = ssub.s32 %s12696_s28, %s12936_s15  ;;  %p45_p13 = scmp.ne.s32.totalorder %s12692_s27, %s12688_s26 }
  0x77   : > { %p36_p4 = scmp.eq.s32.totalorder %s35_s19, 0  ;;  %p46_p8 = scmp.eq.s32.totalorder %s12696_s28, 0 }
  0x78   : > { %p16081_p6 = scmp.eq.s32.totalorder %s12811_s29, 1  ;;  %p11846_p3 = scmp.lt.s32.totalorder %s12696_s28, 2 }
  0x79   : > { %s12952_s30 = scalar_select %p36_p4, %s12692_s27, %s38_s13  }
  0x7a   : > { %p12946_p10 = por %p16081_p6, %p45_p13  ;;  %p47_p5 = por %p46_p8, %p45_p13 }
  0x7b   : > { %s429_s17 = sand.u32 1, %s12692_s27   ;;  %s10487_s11 = sshll.u32 %s12696_s28, 11 }
  0x7c   : > { %s10194_s20 = sshll.u32 %s429_s17, 7  ;;  %s12959_s22 = scalar_lea.hbm %s15971_s0, %s10487_s11 }
  0x7d   : > { %s433_s18 = scalar_lea.vmem [#allocation2], %s10194_s20  ;;  %p12963_p11 = pnand %p11846_p3, %p47_p5 }
  0x7e   : > { %s440_s21 = sshll.u32 %s433_s18, 4  ;;  %s12967_s1 = scalar_lea.sflag [#allocation3], %s429_s17  ;;  %s12961_s21 = int_to_ptr.vmem [resolvable:$true] %s440_s21 }
  0x7f   : > { %s12592_s12 = scalar_lea.hbm %s12959_s22, 2048  ;;  %p12594_p9 = pneg %p12963_p11 }
  0x80   : > { %p12593_p7 = scmp.ne.s32.totalorder %s12959_s22, %s12592_s12  ;;  %s12597_s20 = scalar_lea.hbm %s15971_s0, 4096 }
  0x81   : > { %p12598_p2 = scmp.lt.u32.totalorder %s12959_s22, %s15971_s0  ;;  %p12599_p1 = scmp.lt.u32.totalorder %s12597_s20, %s12592_s12 }
  0x82   : > { %p12595_p12 = pnand %p12594_p9, %p12593_p7  ;;  %p12601_p4 = scmp.lt.u32.totalorder %s12592_s12, %s12959_s22 }
  0x83   : > { %p12600_p13 = por %p12599_p1, %p12598_p2 }
  0x84   : > { %p12596_p0 = pneg %p12595_p12 }
  0x85   : > { %p12602_p8 = por %p12601_p4, %p12600_p13 }
  0x87   : > { %p12603_p6 = pnand %p12602_p8, %p12596_p0 }
  0x89   : > { %12606 = shalt.err (!%p12603_p6)
}
  0x8a   : > { %s12607_s17 = scalar_lea.vmem %s12961_s21, 2048  ;;  %s12708_s23 = smov [#allocation2]  }
  0x8b   : > { %p12608_p3 = scmp.ne.s32.totalorder %s12961_s21, %s12607_s17  ;;  %s12612_s18 = sshll.u32 %s12708_s23, 4  ;;  %s12613_s18 = int_to_ptr.vmem [resolvable:$false] %s12612_s18 }
  0x8c   : > { %s12614_s13 = scalar_lea.vmem %s12613_s18, 4096  ;;  %p12615_p12 = scmp.lt.s32.totalorder %s12961_s21, %s12613_s18 }
  0x8d   : > { %p12610_p5 = pnand %p12608_p3, %p12594_p9  ;;  %p12616_p2 = scmp.lt.s32.totalorder %s12614_s13, %s12607_s17 }
  0x8f   : > { %p12611_p7 = pneg %p12610_p5  ;;  %p12617_p1 = por %p12616_p2, %p12615_p12 }
  0x91   : > { %p12618_p13 = pnand %p12617_p1, %p12611_p7 }
  0x93   : > { %12621 = shalt.err (!%p12618_p13)
}
  0x94   : > { %s12709_s12 = smov 128   ;;  %s12710_s19 = smov 8  }
  0x95   : > { %11837 = dma.hbm_to_vmem [thread:$0]  (!%p12963_p11), %s12959_s22, 2048, %s12961_s21, %s12967_s1, %s12709_s12, %s12709_s12, %s12710_s19  }
  0x96   : > { %p16084_p9 = scmp.ne.s32.totalorder %s16077_s16, 0 }
  0x98   : > { %452 = sbr.rel (%p16084_p9) target bundleno = 4421 (0x1145), region = 72 }
  0x9f   : > { %s12998_s20 = sand.u32 1, %s12688_s26   ;;  %p16085_p0 = scmp.ne.s32.totalorder %s16074_s14, 0 }
  0xa0   : > { %s10198_s11 = sshll.u32 %s12998_s20, 7  ;;  %s455_s10 = scalar_lea.sflag [#allocation3], %s12998_s20 }
  0xa1   : > { %s13004_s17 = scalar_lea.vmem [#allocation2], %s10198_s11 }
  0xa2   : > { %12667 = dma.done.wait (%p16085_p0), %s455_s10, 2048  }
  0xa3   : > { %12669 = vsyncadd (%p16085_p0), %s455_s10, 4294965248  ;;  %p16086_p11 = scmp.eq.s32.totalorder %s12811_s29, 0 }
  0xa5   : > { %12671 = dma.done.wait (%p16086_p11), [#allocation6], 4096   ;;  %p16087_p4 = pmov %p16086_p11 }
  0xa7   : > { %12673 = vsyncadd (%p16087_p4), [#allocation6], 4294963200  ;;  %p16088_p8 = pmov %p16087_p4 }
  0xa8   : > { %p16089_p6 = pmov %p16087_p4 }
  0xa9   : > { %12675 = dma.done.wait (%p16088_p8), [#allocation9], 8192  }
  0xaa   : > { %12677 = vsyncadd (%p16089_p6), [#allocation9], 4294959104  ;;  %v15994_v0 = vmov 0   ;;  %v12024_v1 = vld [vmem:[#allocation5 + $0x4] ss:$12 sps:$4 sm:$0xff]   ;;  %v521_v10 = vld [vmem:[%s13004_s17 + $0x8] sm:$0xff]  ;;  %v578_v50 = vlaneseq }
  0xab   : > { %753 = vmatprep.mubr.bf16.mxu0 %v15994_v0  ;;  %v12026_v2 = vld [vmem:[#allocation5] ss:$12 sps:$4 sm:$0xff]   ;;  %721 = vmatprep.subr.bf16.mxu0 %v12024_v1  ;;  %v12027_v3 = vld [vmem:[#allocation5 + $0x1c] ss:$12 sps:$4 sm:$0xff]   ;;  %v12029_v4 = vld [vmem:[#allocation5 + $0x18] ss:$12 sps:$4 sm:$0xff]  }
  0xac   : > { %722 = vmatpush1.bf16.msra.mxu0 %v12026_v2  ;;  %v12030_v5 = vld [vmem:[#allocation5 + $0x34] ss:$12 sps:$4 sm:$0xff]   ;;  %v12032_v6 = vld [vmem:[#allocation5 + $0x30] ss:$12 sps:$4 sm:$0xff]   ;;  %v12033_v7 = vld [vmem:[#allocation5 + $0x4c] ss:$12 sps:$4 sm:$0xff]  }
  0xad   : > { %723 = vmatprep.subr.bf16.mxu0 %v12027_v3  ;;  %v520_v8 = vld [vmem:[%s13004_s17] sm:$0xff]  ;;  %v12035_v9 = vld [vmem:[#allocation5 + $0x48] ss:$12 sps:$4 sm:$0xff]   ;;  %v12044_v20 = vld [vmem:[#allocation5 + $0x90] ss:$12 sps:$4 sm:$0xff]   ;;  %v15996_v49 = vmov 0.0  }
  0xae   : > { %v12036_v11 = vld [vmem:[#allocation5 + $0x64] ss:$12 sps:$4 sm:$0xff]   ;;  %v536_v12 = vpack.c.bf16 %v521_v10, %v520_v8  ;;  %v12038_v13 = vld [vmem:[#allocation5 + $0x60] ss:$12 sps:$4 sm:$0xff]   ;;  %v12039_v14 = vld [vmem:[#allocation5 + $0x7c] ss:$12 sps:$4 sm:$0xff]  }
  0xaf   : > { %v12048_v15 = vld [vmem:[#allocation5 + $0x8] ss:$12 sps:$4 sm:$0xff]   ;;  %v12049_v16 = vld [vmem:[#allocation5 + $0x20] ss:$12 sps:$4 sm:$0xff]   ;;  %v12041_v17 = vld [vmem:[#allocation5 + $0x78] ss:$12 sps:$4 sm:$0xff]  }
  0xb0   : > { %724 = vmatpush1.bf16.msra.mxu0 %v12029_v4  ;;  %10969 = vmatprep.mubr.bf16.mxu1 %v536_v12  ;;  %v12042_v18 = vld [vmem:[#allocation5 + $0x94] ss:$12 sps:$4 sm:$0xff]   ;;  %v12050_v19 = vld [vmem:[#allocation5 + $0x38] ss:$12 sps:$4 sm:$0xff]   ;;  %v12051_v22 = vld [vmem:[#allocation5 + $0x50] ss:$12 sps:$4 sm:$0xff]  }
  0xb1   : > { %725 = vmatprep.subr.bf16.mxu0 %v12030_v5  ;;  %10953 = vmatprep.subr.bf16.mxu1 %v12048_v15  ;;  %v12045_v21 = vld [vmem:[#allocation5 + $0xac] ss:$12 sps:$4 sm:$0xff]   ;;  %v12047_v23 = vld [vmem:[#allocation5 + $0xa8] ss:$12 sps:$4 sm:$0xff]   ;;  %v12055_v30 = vld [vmem:[#allocation5 + $0xb0] ss:$12 sps:$4 sm:$0xff]  }
  0xb2   : > { %10954 = vmatpush3.bf16.msra.mxu1 %v12048_v15  ;;  %v12052_v24 = vld [vmem:[#allocation5 + $0x68] ss:$12 sps:$4 sm:$0xff]   ;;  %v12053_v25 = vld [vmem:[#allocation5 + $0x80] ss:$12 sps:$4 sm:$0xff]   ;;  %v523_v27 = vld [vmem:[%s13004_s17 + $0x18] sm:$0xff]  ;;  %vm12713_vm0 = vmmov 0  }
  0xb3   : > { %10955 = vmatprep.subr.bf16.mxu1 %v12049_v16  ;;  %v522_v26 = vld [vmem:[%s13004_s17 + $0x10] sm:$0xff]  ;;  %v12054_v28 = vld [vmem:[#allocation5 + $0x98] ss:$12 sps:$4 sm:$0xff]   ;;  %v525_v32 = vld [vmem:[%s13004_s17 + $0x28] sm:$0xff]  ;;  %v13048_v51 = vshrl.u32 %v578_v50, 7  ;;  %vm1075_vm1 = vcmask 261120  }
  0xb4   : > { %726 = vmatpush1.bf16.msra.mxu0 %v12032_v6  ;;  %v537_v29 = vpack.c.bf16 %v523_v27, %v522_v26  ;;  %v524_v31 = vld [vmem:[%s13004_s17 + $0x20] sm:$0xff]  ;;  %v526_v34 = vld [vmem:[%s13004_s17 + $0x30] sm:$0xff]  ;;  %v527_v35 = vld [vmem:[%s13004_s17 + $0x38] sm:$0xff]  ;;  %vm2024_vm2 = vcmask 1043456   ;;  %vm1828_vm3 = vcmask 64512   ;;  %s12714_s22 = smov 96  }
  0xb5   : > { %727 = vmatprep.subr.bf16.mxu0 %v12033_v7  ;;  %v538_v33 = vpack.c.bf16 %v525_v32, %v524_v31  ;;  %v528_v36 = vld [vmem:[%s13004_s17 + $0x40] sm:$0xff]  ;;  %v529_v37 = vld [vmem:[%s13004_s17 + $0x48] sm:$0xff]  ;;  %v539_v38 = vpack.c.bf16 %v527_v35, %v526_v34  ;;  %v530_v40 = vld [vmem:[%s13004_s17 + $0x50] sm:$0xff]  ;;  %16090 = vst [vmem:[#allocation18_spill] sm:$0xff] %v13048_v51  ;;  %v15991_v52 = vsub.s32 1, %v13048_v51  ;;  %v15993_v55 = vsub.s32 0, %v13048_v51 }
  0xb6   : > { %10956 = vmatpush3.bf16.msra.mxu1 %v12049_v16  ;;  %v540_v39 = vpack.c.bf16 %v529_v37, %v528_v36  ;;  %v531_v41 = vld [vmem:[%s13004_s17 + $0x58] sm:$0xff]  ;;  %v532_v42 = vld [vmem:[%s13004_s17 + $0x60] sm:$0xff]  ;;  %v533_v43 = vld [vmem:[%s13004_s17 + $0x68] sm:$0xff]  ;;  %v15992_v5 = vsub.s32 2, %v13048_v51  ;;  %s12715_s21 = smov 64   ;;  %s12716_s25 = smov 32  }
  0xb7   : > { %10957 = vmatprep.subr.bf16.mxu1 %v12050_v19  ;;  %v541_v44 = vpack.c.bf16 %v531_v41, %v530_v40  ;;  %v542_v45 = vpack.c.bf16 %v533_v43, %v532_v42  ;;  %v534_v46 = vld [vmem:[%s13004_s17 + $0x70] sm:$0xff]  ;;  %v535_v47 = vld [vmem:[%s13004_s17 + $0x78] sm:$0xff]  ;;  %v576_v53 = vld [vmem:[%s15973_s2] sm:$0x7]  ;;  %vm8294_vm4 = vcmask 523264   ;;  %vm8311_vm5 = vcmask 785408  }
  0xb8   : > { %728 = vmatpush1.bf16.msra.mxu0 %v12035_v9  ;;  %v543_v48 = vpack.c.bf16 %v535_v47, %v534_v46  ;;  %v13056_v54 = vrot.slane %v576_v53, %v15991_v52  ;;  %v13062_v61 = vrot.slane %v576_v53, %v15993_v55  ;;  %s16267_s1 = sld [smem:[#allocation75_spill]]  ;;  %s16268_s13 = sld [smem:[#allocation76_spill]] }
  0xb9   : > { %729 = vmatprep.subr.bf16.mxu0 %v12036_v11  ;;  %v13079_v11 = vrot.slane %v576_v53, %v15992_v5  ;;  %s15843_s12 = scalar_lea.vmem [#allocation11], %s10198_s11  ;;  %s10536_s11 = sshll.u32 %s12811_s29, 11 }
  0xba   : > { %10958 = vmatpush3.bf16.msra.mxu1 %v12050_v19  ;;  %s10076_s19 = sshll.u32 %s15843_s12, 4  ;;  %s16269_s14 = sld [smem:[#allocation77_spill]]  ;;  %s15924_s19 = int_to_ptr.vmem [resolvable:$true] %s10076_s19 }
  0xbb   : > { %10959 = vmatprep.subr.bf16.mxu1 %v12051_v22  ;;  %s10063_s29 = scalar_lea.sflag [#allocation4], %s12998_s20 }
  0xbc   : > { %730 = vmatpush1.bf16.msra.mxu0 %v12038_v13 }
  0xbd   : > { %731 = vmatprep.subr.bf16.mxu0 %v12039_v14 }
  0xbe   : > { %10960 = vmatpush3.bf16.msra.mxu1 %v12051_v22 }
  0xbf   : > { %10961 = vmatprep.subr.bf16.mxu1 %v12052_v24 }
  0xc0   : > { %732 = vmatpush1.bf16.msra.mxu0 %v12041_v17  ;;  %s15922_s16 = scalar_lea.hbm %s16269_s14, %s10536_s11 }
  0xc1   : > { %733 = vmatprep.subr.bf16.mxu0 %v12042_v18 }
  0xc2   : > { %10962 = vmatpush3.bf16.msra.mxu1 %v12052_v24 }
  0xc3   : > { %10963 = vmatprep.subr.bf16.mxu1 %v12053_v25 }
  0xc4   : > { %734 = vmatpush1.bf16.msra.mxu0 %v12044_v20 }
  0xc5   : > { %735 = vmatprep.subr.bf16.mxu0 %v12045_v21 }
  0xc6   : > { %10964 = vmatpush3.bf16.msra.mxu1 %v12053_v25 }
  0xc7   : > { %10965 = vmatprep.subr.bf16.mxu1 %v12054_v28 }
  0xc8   : > { %736 = vmatpush1.bf16.msra.mxu0 %v12047_v23 }
  0xc9   : > { %11009 = vmatprep.subr.bf16.mxu0 %v15996_v49 }
  0xca   : > { %10966 = vmatpush3.bf16.msra.mxu1 %v12054_v28 }
  0xcb   : > { %754 = vmatmul.mubr.bf16.vlgmr.msra.gmra.mrb[0].mxu0 %v536_v12  ;;  %10967 = vmatprep.subr.bf16.mxu1 %v12055_v30 }
  0xcc   : > { %763 = vmatprep.mubr.bf16.mxu0 %v15994_v0 }
  0xce   : > { %10968 = vmatpush3.bf16.msra.mxu1 %v12055_v30 }
  0xcf   : > { %10985 = vmatprep.subr.bf16.mxu1 %v15996_v49 }
  0xd1   : > { %10970 = vmatmul.mubr.bf16.vlgmr.msra.gmra.mrb[0].mxu1 %v537_v29 }
  0xd2   : > { %10973 = vmatprep.mubr.bf16.mxu1 %v538_v33 }
  0xd3   : > { %764 = vmatmul.mubr.bf16.gmra.mrb[4].mxu0 %v537_v29 }
  0xd4   : > { %773 = vmatprep.mubr.bf16.mxu0 %v15994_v0 }
  0xd9   : > { %10974 = vmatmul.mubr.bf16.gmra.mrb[4].mxu1 %v539_v38 }
  0xda   : > { %10977 = vmatprep.mubr.bf16.mxu1 %v540_v39 }
  0xdb   : > { %774 = vmatmul.mubr.bf16.gmra.mrb[8].mxu0 %v538_v33 }
  0xdc   : > { %783 = vmatprep.mubr.bf16.mxu0 %v15994_v0 }
  0xe1   : > { %10978 = vmatmul.mubr.bf16.gmra.mrb[8].mxu1 %v541_v44 }
  0xe2   : > { %10981 = vmatprep.mubr.bf16.mxu1 %v542_v45 }
  0xe3   : > { %784 = vmatmul.mubr.bf16.gmra.mrb[12].mxu0 %v539_v38 }
  0xe4   : > { %793 = vmatprep.mubr.bf16.mxu0 %v15994_v0 }
  0xe9   : > { %10982 = vmatmul.mubr.bf16.gmra.mrb[12].mxu1 %v543_v48 }
  0xea   : > { %10987 = vmatprep.mubr.msk.bf16.mxu1 %vm12713_vm0, %v15996_v49 }
  0xeb   : > { %794 = vmatmul.mubr.bf16.gmra.mrb[16].mxu0 %v540_v39 }
  0xec   : > { %803 = vmatprep.mubr.bf16.mxu0 %v15994_v0 }
  0xf3   : > { %804 = vmatmul.mubr.bf16.gmra.mrb[20].mxu0 %v541_v44 }
  0xf4   : > { %813 = vmatprep.mubr.bf16.mxu0 %v15994_v0 }
  0xfb   : > { %814 = vmatmul.mubr.bf16.gmra.mrb[24].mxu0 %v542_v45 }
  0xfc   : > { %823 = vmatprep.mubr.bf16.mxu0 %v15994_v0 }
 0x103   : > { %824 = vmatmul.mubr.bf16.gmra.mrb[28].mxu0 %v543_v48 }
 0x104   : > { %11011 = vmatprep.mubr.msk.bf16.mxu0 %vm12713_vm0, %v15996_v49 }
 0x19e   : > { %v755_v56 = vpop.f32.mrb[0].mxu0 }
 0x19f   : > { %v757_v57 = vpop.f32.mrb[1].mxu0  ;;  %v756_v2 = vadd.f32 %v755_v56, %v13062_v61 }
 0x1a0   : > { %v758_v58 = vadd.f32 %v757_v57, %v13056_v54  ;;  %v759_v59 = vpop.f32.mrb[2].mxu0 }
 0x1a1   : > { %v761_v60 = vpop.f32.mrb[3].mxu0  ;;  %v13074_v9 = vpack.c.bf16 %v756_v2, %v756_v2  ;;  %v760_v13 = vadd.f32 %v759_v59, %v13062_v61 }
 0x1a2   : > { %v13064_v62 = vpack.c.bf16 %v758_v58, %v758_v58  ;;  %v762_v63 = vadd.f32 %v761_v60, %v13056_v54 }
 0x1a3   : > { %v13104_v26 = vpack.c.bf16 %v760_v13, %v760_v13 }
 0x1a4   : > { %v1080_v1 = vsel %vm1075_vm1, %v13064_v62, 0  ;;  %v13072_v6 = vpack.c.bf16 %v762_v63, %v762_v63  ;;  %v10971_v16 = vpop.f32.mrb[0].mxu1 }
 0x1a5   : > { %10986 = vmatpush3.bf16.xpose.msra.mxu1 %v1080_v1  ;;  %v13092_v18 = vadd.f32 %v10971_v16, %v13079_v11  ;;  %v13094_v19 = vpop.f32.mrb[1].mxu1 }
 0x1a6   : > { %v765_v3 = vpop.f32.mrb[4].mxu0  ;;  %10991 = vmatprep.subr.bf16.mxu1 %v15996_v49  ;;  %v1126_v12 = vsel %vm1075_vm1, %v13072_v6, 0  ;;  %v10972_v22 = vpop.f32.mrb[2].mxu1  ;;  %v869_v52 = vadd.f32 %v13094_v19, %v13079_v11 }
 0x1a7   : > { %v767_v4 = vpop.f32.mrb[5].mxu0  ;;  %v13100_v24 = vadd.f32 %v10972_v22, %v13079_v11  ;;  %v13102_v25 = vpop.f32.mrb[3].mxu1  ;;  %v766_v32 = vadd.f32 %v765_v3, %v13062_v61 }
 0x1a8   : > { %v769_v7 = vpop.f32.mrb[6].mxu0  ;;  %v768_v10 = vadd.f32 %v767_v4, %v13056_v54 }
 0x1a9   : > { %v771_v8 = vpop.f32.mrb[7].mxu0  ;;  %v13137_v47 = vpack.c.bf16 %v766_v32, %v766_v32  ;;  %v770_v59 = vadd.f32 %v769_v7, %v13062_v61 }
 0x1aa   : > { %v13088_v14 = vpack.c.bf16 %v768_v10, %v768_v10  ;;  %v772_v29 = vadd.f32 %v771_v8, %v13056_v54 }
 0x1ac   : > { %10988 = vmatmul.mubr.msk.bf16.vlgmr.msra.gmra.mrb[16].mxu1 %vm1075_vm1, %v13074_v9  ;;  %v1172_v28 = vsel %vm1075_vm1, %v13088_v14, 0  ;;  %v10975_v34 = vpop.f32.mrb[4].mxu1  ;;  %v13124_v38 = vpack.c.bf16 %v772_v29, %v772_v29 }
 0x1ad   : > { %10992 = vmatpush3.bf16.xpose.msra.mxu1 %v1126_v12  ;;  %10993 = vmatprep.mubr.msk.bf16.mxu1 %vm12713_vm0, %v15996_v49  ;;  %v13122_v36 = vadd.f32 %v10975_v34, %v13079_v11  ;;  %v884_v37 = vpop.f32.mrb[5].mxu1 }
 0x1ae   : > { %v775_v15 = vpop.f32.mrb[8].mxu0  ;;  %10997 = vmatprep.subr.bf16.mxu1 %v15996_v49  ;;  %v13132_v42 = vadd.f32 %v884_v37, %v13079_v11  ;;  %v10976_v43 = vpop.f32.mrb[6].mxu1  ;;  %v1218_v57 = vsel %vm1075_vm1, %v13124_v38, 0 }
 0x1af   : > { %v777_v17 = vpop.f32.mrb[9].mxu0  ;;  %v776_v30 = vadd.f32 %v775_v15, %v13062_v61  ;;  %v13135_v45 = vadd.f32 %v10976_v43, %v13079_v11  ;;  %v887_v46 = vpop.f32.mrb[7].mxu1 }
 0x1b0   : > { %v778_v20 = vadd.f32 %v777_v17, %v13056_v54  ;;  %v13097_v21 = vpop.f32.mrb[10].mxu0  ;;  %v13142_v50 = vadd.f32 %v887_v46, %v13079_v11 }
 0x1b1   : > { %v781_v23 = vpop.f32.mrb[11].mxu0  ;;  %v13126_v39 = vpack.c.bf16 %v776_v30, %v776_v30  ;;  %v780_v32 = vadd.f32 %v13097_v21, %v13062_v61 }
 0x1b2   : > { %v13106_v27 = vpack.c.bf16 %v778_v20, %v778_v20  ;;  %v782_v53 = vadd.f32 %v781_v23, %v13056_v54  ;;  %v13177_v20 = vpack.c.bf16 %v770_v59, %v770_v59 }
 0x1b4   : > { %10994 = vmatmul.mubr.msk.bf16.vlgmr.msra.gmra.mrb[20].mxu1 %vm1075_vm1, %v13104_v26  ;;  %v1264_v31 = vsel %vm1075_vm1, %v13106_v27, 0  ;;  %v10979_v63 = vpop.f32.mrb[8].mxu1  ;;  %v13164_v4 = vpack.c.bf16 %v782_v53, %v782_v53 }
 0x1b5   : > { %10998 = vmatpush3.bf16.xpose.msra.mxu1 %v1172_v28  ;;  %11010 = vmatpush3.bf16.xpose.msra.mxu0 %v1264_v31  ;;  %v13162_v2 = vadd.f32 %v10979_v63, %v13079_v11  ;;  %v900_v3 = vpop.f32.mrb[9].mxu1 }
 0x1b6   : > { %v785_v33 = vpop.f32.mrb[12].mxu0  ;;  %10999 = vmatprep.mubr.msk.bf16.mxu1 %vm12713_vm0, %v15996_v49  ;;  %11003 = vmatprep.subr.bf16.mxu1 %v15996_v49  ;;  %v13172_v12 = vadd.f32 %v900_v3, %v13079_v11  ;;  %v10980_v13 = vpop.f32.mrb[10].mxu1  ;;  %v1310_v30 = vsel %vm1075_vm1, %v13164_v4, 0 }
 0x1b7   : > { %v787_v35 = vpop.f32.mrb[13].mxu0  ;;  %11021 = vmatprep.subr.bf16.mxu0 %v15996_v49  ;;  %v786_v56 = vadd.f32 %v785_v33, %v13062_v61  ;;  %v13175_v16 = vadd.f32 %v10980_v13, %v13079_v11  ;;  %v903_v17 = vpop.f32.mrb[11].mxu1 }
 0x1b8   : > { %v788_v40 = vadd.f32 %v787_v35, %v13056_v54  ;;  %v13129_v41 = vpop.f32.mrb[14].mxu0  ;;  %v13182_v23 = vadd.f32 %v903_v17, %v13079_v11 }
 0x1b9   : > { %v791_v44 = vpop.f32.mrb[15].mxu0  ;;  %v13166_v7 = vpack.c.bf16 %v786_v56, %v786_v56 }
 0x1ba   : > { %v13139_v48 = vpack.c.bf16 %v788_v40, %v788_v40  ;;  %v792_v28 = vadd.f32 %v791_v44, %v13056_v54 }
 0x1bc   : > { %11000 = vmatmul.mubr.msk.bf16.vlgmr.msra.gmra.mrb[24].mxu1 %vm1075_vm1, %v13137_v47  ;;  %11012 = vmatmul.mubr.msk.bf16.vlgmr.msra.gmra.mrb[32].mxu0 %vm1075_vm1, %v13126_v39  ;;  %v1356_v58 = vsel %vm1075_vm1, %v13139_v48, 0  ;;  %v10983_v34 = vpop.f32.mrb[12].mxu1  ;;  %v13205_v43 = vpack.c.bf16 %v792_v28, %v792_v28  ;;  %v790_v28 = vadd.f32 %v13129_v41, %v13062_v61 }
 0x1bd   : > { %11004 = vmatpush3.bf16.xpose.msra.mxu1 %v1218_v57  ;;  %11022 = vmatpush3.bf16.xpose.msra.mxu0 %v1356_v58  ;;  %v13203_v37 = vadd.f32 %v10983_v34, %v13079_v11  ;;  %v916_v40 = vpop.f32.mrb[13].mxu1 }
 0x1be   : > { %v795_v60 = vpop.f32.mrb[16].mxu0  ;;  %11005 = vmatprep.mubr.msk.bf16.mxu1 %vm12713_vm0, %v15996_v49  ;;  %11023 = vmatprep.mubr.msk.bf16.mxu0 %vm12713_vm0, %v15996_v49  ;;  %v13213_v53 = vadd.f32 %v916_v40, %v13079_v11  ;;  %v10984_v56 = vpop.f32.mrb[14].mxu1  ;;  %v1402_v13 = vsel %vm1075_vm1, %v13205_v43, 0 }
 0x1bf   : > { %v797_v1 = vpop.f32.mrb[17].mxu0  ;;  %11015 = vmatprep.subr.bf16.mxu1 %v15996_v49  ;;  %11033 = vmatprep.subr.bf16.mxu0 %v15996_v49  ;;  %v796_v29 = vadd.f32 %v795_v60, %v13062_v61  ;;  %16091 = vst [vmem:[#allocation19_spill] sm:$0xff] %v13203_v37  ;;  %v13216_v58 = vadd.f32 %v10984_v56, %v13079_v11  ;;  %v919_v59 = vpop.f32.mrb[15].mxu1 }
 0x1c0   : > { %v798_v8 = vadd.f32 %v797_v1, %v13056_v54  ;;  %v13169_v10 = vpop.f32.mrb[18].mxu0  ;;  %v13218_v60 = vpack.c.bf16 %v780_v32, %v780_v32  ;;  %v13223_v1 = vadd.f32 %v919_v59, %v13079_v11 }
 0x1c1   : > { %v801_v15 = vpop.f32.mrb[19].mxu0  ;;  %v13207_v21 = vpack.c.bf16 %v796_v29, %v796_v29  ;;  %16092 = vst [vmem:[#allocation20_spill] sm:$0xff] %v13216_v58 }
 0x1c2   : > { %v13179_v22 = vpack.c.bf16 %v798_v8, %v798_v8  ;;  %16093 = vst [vmem:[#allocation21_spill] sm:$0xff] %v13223_v1  ;;  %v802_v3 = vadd.f32 %v801_v15, %v13056_v54 }
 0x1c4   : > { %11006 = vmatmul.mubr.msk.bf16.vlgmr.msra.gmra.mrb[28].mxu1 %vm1075_vm1, %v13177_v20  ;;  %11024 = vmatmul.mubr.msk.bf16.vlgmr.msra.gmra.mrb[36].mxu0 %vm1075_vm1, %v13166_v7  ;;  %v1448_v31 = vsel %vm1075_vm1, %v13179_v22, 0 }
 0x1c5   : > { %11016 = vmatpush3.bf16.xpose.msra.mxu1 %v1310_v30  ;;  %11034 = vmatpush3.bf16.xpose.msra.mxu0 %v1448_v31  ;;  %v13243_v30 = vpack.c.bf16 %v802_v3, %v802_v3 }
 0x1c6   : > { %v805_v33 = vpop.f32.mrb[20].mxu0  ;;  %11017 = vmatprep.mubr.msk.bf16.mxu1 %vm12713_vm0, %v15996_v49  ;;  %11035 = vmatprep.mubr.msk.bf16.mxu0 %vm12713_vm0, %v15996_v49 }
 0x1c7   : > { %v807_v35 = vpop.f32.mrb[21].mxu0  ;;  %11027 = vmatprep.subr.bf16.mxu1 %v15996_v49  ;;  %11045 = vmatprep.subr.bf16.mxu0 %v15996_v49  ;;  %v806_v8 = vadd.f32 %v805_v33, %v13062_v61  ;;  %16094 = vst [vmem:[#allocation22_spill] sm:$0xff] %v13243_v30  ;;  %v1494_v3 = vsel %vm1075_vm1, %v13243_v30, 0 }
 0x1c8   : > { %v808_v44 = vadd.f32 %v807_v35, %v13056_v54  ;;  %v13210_v46 = vpop.f32.mrb[22].mxu0  ;;  %v13249_v35 = vpack.c.bf16 %v790_v28, %v790_v28 }
 0x1c9   : > { %v811_v57 = vpop.f32.mrb[23].mxu0  ;;  %v13245_v31 = vpack.c.bf16 %v806_v8, %v806_v8 }
 0x1ca   : > { %v13220_v63 = vpack.c.bf16 %v808_v44, %v808_v44  ;;  %v812_v56 = vadd.f32 %v811_v57, %v13056_v54 }
 0x1cc   : > { %11018 = vmatmul.mubr.msk.bf16.vlgmr.msra.gmra.mrb[32].mxu1 %vm1075_vm1, %v13218_v60  ;;  %11036 = vmatmul.mubr.msk.bf16.vlgmr.msra.gmra.mrb[40].mxu0 %vm1075_vm1, %v13207_v21  ;;  %v1540_v17 = vsel %vm1075_vm1, %v13220_v63, 0  ;;  %v13272_v28 = vpack.c.bf16 %v812_v56, %v812_v56 }
 0x1cd   : > { %11028 = vmatpush3.bf16.xpose.msra.mxu1 %v1402_v13  ;;  %11046 = vmatpush3.bf16.xpose.msra.mxu0 %v1540_v17  ;;  %v800_v13 = vadd.f32 %v13169_v10, %v13062_v61 }
 0x1ce   : > { %v815_v15 = vpop.f32.mrb[24].mxu0  ;;  %11029 = vmatprep.mubr.msk.bf16.mxu1 %vm12713_vm0, %v15996_v49  ;;  %11047 = vmatprep.mubr.msk.bf16.mxu0 %vm12713_vm0, %v15996_v49  ;;  %16096 = vst [vmem:[#allocation24_spill] sm:$0xff] %v13272_v28 }
 0x1cf   : > { %v817_v29 = vpop.f32.mrb[25].mxu0  ;;  %11039 = vmatprep.subr.bf16.mxu1 %v15996_v49  ;;  %11057 = vmatprep.subr.bf16.mxu0 %v15996_v49  ;;  %v816_v59 = vadd.f32 %v815_v15, %v13062_v61 }
 0x1d0   : > { %v818_v32 = vadd.f32 %v817_v29, %v13056_v54  ;;  %v819_v33 = vpop.f32.mrb[26].mxu0 }
 0x1d1   : > { %v820_v41 = vadd.f32 %v819_v33, %v13062_v61  ;;  %v821_v34 = vpop.f32.mrb[27].mxu0  ;;  %v13274_v15 = vpack.c.bf16 %v816_v59, %v816_v59  ;;  %v1586_v59 = vsel %vm1075_vm1, %v13272_v28, 0 }
 0x1d2   : > { %v13251_v40 = vpack.c.bf16 %v818_v32, %v818_v32  ;;  %v822_v44 = vadd.f32 %v821_v34, %v13056_v54  ;;  %v13278_v34 = vpack.c.bf16 %v800_v13, %v800_v13 }
 0x1d3   : > { %16097 = vst [vmem:[#allocation25_spill] sm:$0xff] %v13274_v15 }
 0x1d4   : > { %16095 = vst [vmem:[#allocation23_spill] sm:$0xff] %v13251_v40  ;;  %11030 = vmatmul.mubr.msk.bf16.vlgmr.msra.gmra.mrb[36].mxu1 %vm1075_vm1, %v13249_v35  ;;  %11048 = vmatmul.mubr.msk.bf16.vlgmr.msra.gmra.mrb[44].mxu0 %vm1075_vm1, %v13245_v31  ;;  %v1632_v8 = vsel %vm1075_vm1, %v13251_v40, 0  ;;  %16098 = vst [vmem:[#allocation26_spill] sm:$0xff] %v13278_v34  ;;  %v13296_v19 = vpack.c.bf16 %v822_v44, %v822_v44  ;;  %v13326_v44 = vpack.c.bf16 %v820_v41, %v820_v41 }
 0x1d5   : > { %11040 = vmatpush3.bf16.xpose.msra.mxu1 %v1494_v3  ;;  %11058 = vmatpush3.bf16.xpose.msra.mxu0 %v1632_v8 }
 0x1d6   : > { %v825_v57 = vpop.f32.mrb[28].mxu0  ;;  %11041 = vmatprep.mubr.msk.bf16.mxu1 %vm12713_vm0, %v15996_v49  ;;  %11059 = vmatprep.mubr.msk.bf16.mxu0 %vm12713_vm0, %v15996_v49  ;;  %16100 = vst [vmem:[#allocation28_spill] sm:$0xff] %v13296_v19  ;;  %16105 = vst [vmem:[#allocation33_spill] sm:$0xff] %v13326_v44 }
 0x1d7   : > { %v827_v17 = vpop.f32.mrb[29].mxu0  ;;  %11051 = vmatprep.subr.bf16.mxu1 %v15996_v49  ;;  %11069 = vmatprep.subr.bf16.mxu0 %v15996_v49  ;;  %v826_v56 = vadd.f32 %v825_v57, %v13062_v61  ;;  %v13303_v57 = vpack.c.bf16 %v869_v52, %v869_v52 }
 0x1d8   : > { %v828_v29 = vadd.f32 %v827_v17, %v13056_v54  ;;  %v829_v32 = vpop.f32.mrb[30].mxu0 }
 0x1d9   : > { %v830_v10 = vadd.f32 %v829_v32, %v13062_v61  ;;  %v831_v33 = vpop.f32.mrb[31].mxu0  ;;  %16101 = vst [vmem:[#allocation29_spill] sm:$0xff] %v13303_v57  ;;  %v13306_v17 = vpack.c.bf16 %v826_v56, %v826_v56 }
 0x1da   : > { %v13280_v3 = vpack.c.bf16 %v828_v29, %v828_v29  ;;  %v832_v8 = vadd.f32 %v831_v33, %v13056_v54  ;;  %v810_v54 = vadd.f32 %v13210_v46, %v13062_v61  ;;  %v1678_v61 = vsel %vm1075_vm1, %v13296_v19, 0 }
 0x1db   : > { %16102 = vst [vmem:[#allocation30_spill] sm:$0xff] %v13306_v17  ;;  %v2026_v46 = vsel %vm2024_vm2, %v13303_v57, 0  ;;  %v872_v33 = vadd.f32 %v13102_v25, %v13079_v11  ;;  %v13339_v56 = vpack.c.bf16 %v830_v10, %v830_v10 }
 0x1dc   : > { %16099 = vst [vmem:[#allocation27_spill] sm:$0xff] %v13280_v3  ;;  %11042 = vmatmul.mubr.msk.bf16.vlgmr.msra.gmra.mrb[40].mxu1 %vm1075_vm1, %v13278_v34  ;;  %11060 = vmatmul.mubr.msk.bf16.vlgmr.msra.gmra.mrb[48].mxu0 %vm1075_vm1, %v13274_v15  ;;  %v1724_v13 = vsel %vm1075_vm1, %v13280_v3, 0  ;;  %v13308_v29 = vpack.c.bf16 %v810_v54, %v810_v54  ;;  %v13320_v52 = vpack.c.bf16 %v832_v8, %v832_v8 }
 0x1dd   : > { %11052 = vmatpush3.bf16.xpose.msra.mxu1 %v1586_v59  ;;  %11070 = vmatpush3.bf16.xpose.msra.mxu0 %v1724_v13  ;;  %v13336_v8 = vpack.c.bf16 %v872_v33, %v872_v33  ;;  %16107 = vst [vmem:[#allocation35_spill] sm:$0xff] %v13339_v56 }
 0x1de   : > { %11053 = vmatprep.mubr.msk.bf16.mxu1 %vm12713_vm0, %v15996_v49  ;;  %11071 = vmatprep.mubr.msk.bf16.mxu0 %vm12713_vm0, %v15996_v49  ;;  %16103 = vst [vmem:[#allocation31_spill] sm:$0xff] %v13308_v29  ;;  %16104 = vst [vmem:[#allocation32_spill] sm:$0xff] %v13320_v52  ;;  %v1770_v32 = vsel %vm1075_vm1, %v13320_v52, 0 }
 0x1df   : > { %11063 = vmatprep.subr.bf16.mxu1 %v15996_v49  ;;  %11081 = vmatprep.subr.bf16.mxu0 %v15996_v49  ;;  %16106 = vst [vmem:[#allocation34_spill] sm:$0xff] %v13336_v8  ;;  %v2072_v41 = vsel %vm2024_vm2, %v13336_v8, 0 }
 0x1e4   : > { %11054 = vmatmul.mubr.msk.bf16.vlgmr.msra.gmra.mrb[44].mxu1 %vm1075_vm1, %v13308_v29  ;;  %11072 = vmatmul.mubr.msk.bf16.vlgmr.msra.gmra.mrb[52].mxu0 %vm1075_vm1, %v13306_v17 }
 0x1e5   : > { %11064 = vmatpush3.bf16.xpose.msra.mxu1 %v1678_v61  ;;  %11065 = vmatprep.mubr.msk.bf16.mxu1 %vm12713_vm0, %v15996_v49 }
 0x1e6   : > { %11075 = vmatprep.subr.bf16.mxu1 %v15996_v49  ;;  %11082 = vmatpush3.bf16.msra.mxu0 %v2026_v46 }
 0x1e7   : > { %11083 = vmatprep.mubr.msk.bf16.mxu0 %vm12713_vm0, %v15996_v49  ;;  %11093 = vmatprep.subr.bf16.mxu0 %v15996_v49 }
 0x1ec   : > { %11066 = vmatmul.mubr.msk.bf16.vlgmr.msra.gmra.mrb[48].mxu1 %vm1075_vm1, %v13326_v44 }
 0x1ed   : > { %11076 = vmatpush3.bf16.xpose.msra.mxu1 %v1770_v32  ;;  %11077 = vmatprep.mubr.msk.bf16.mxu1 %vm12713_vm0, %v15996_v49 }
 0x1ee   : > { %11087 = vmatprep.subr.bf16.mxu1 %v15996_v49 }
 0x1f4   : > { %11078 = vmatmul.mubr.msk.bf16.vlgmr.msra.gmra.mrb[52].mxu1 %vm1075_vm1, %v13339_v56 }
 0x1f5   : > { %11088 = vmatpush3.bf16.msra.mxu1 %v2072_v41  ;;  %11089 = vmatprep.mubr.msk.bf16.mxu1 %vm12713_vm0, %v15996_v49 }
 0x1f6   : > { %11099 = vmatprep.subr.bf16.mxu1 %v15996_v49 }
 0x27f   : > { %v1116_v11 = vpop.f32.mrb[16].mxu1 }
 0x280   : > { %v10989_v25 = vpop.f32.mrb[17].mxu1  ;;  %v13348_v59 = vmul.f32 0.17677669, %v1116_v11 }
 0x281   : > { %v1119_v13 = vpop.f32.mrb[18].mxu1 }
 0x282   : > { %v10990_v10 = vpop.f32.mrb[19].mxu1  ;;  %v1829_v54 = vsel %vm1828_vm3, %v13348_v59, -inf }
 0x283   : > { %1830 = vmax.xlane.f32.xlu0 %v1829_v54 }
 0x287   : > { %v1162_v61 = vpop.f32.mrb[20].mxu1 }
 0x288   : > { %v10995_v46 = vpop.f32.mrb[21].mxu1  ;;  %v13352_v32 = vmul.f32 0.17677669, %v1162_v61 }
 0x289   : > { %v1165_v33 = vpop.f32.mrb[22].mxu1 }
 0x28a   : > { %v10996_v41 = vpop.f32.mrb[23].mxu1  ;;  %v1832_v5 = vsel %vm1828_vm3, %v13352_v32, -inf }
 0x28b   : > { %1833 = vmax.xlane.f32.xlu0 %v1832_v5 }
 0x28f   : > { %v1208_v55 = vpop.f32.mrb[24].mxu1  ;;  %v1300_v25 = vpop.f32.mrb[32].mxu0 }
 0x290   : > { %v13356_v11 = vmul.f32 0.17677669, %v1300_v25  ;;  %v13358_v13 = vmul.f32 0.17677669, %v1208_v55  ;;  %v11001_v10 = vpop.f32.mrb[25].mxu1  ;;  %v11013_v0 = vpop.f32.mrb[33].mxu0 }
 0x291   : > { %v1211_v49 = vpop.f32.mrb[26].mxu1  ;;  %v1303_v54 = vpop.f32.mrb[34].mxu0 }
 0x292   : > { %v1841_v61 = vsel %vm1828_vm3, %v13356_v11, -inf  ;;  %v1835_v46 = vsel %vm1828_vm3, %v13358_v13, -inf  ;;  %v11002_v33 = vpop.f32.mrb[27].mxu1  ;;  %v11014_v41 = vpop.f32.mrb[35].mxu0 }
 0x293   : > { %1842 = vmax.xlane.f32.xlu0 %v1841_v61  ;;  %1836 = vmax.xlane.f32.xlu1 %v1835_v46 }
 0x297   : > { %v1254_v5 = vpop.f32.mrb[28].mxu1  ;;  %v1392_v51 = vpop.f32.mrb[36].mxu0 }
 0x298   : > { %v13364_v25 = vmul.f32 0.17677669, %v1392_v51  ;;  %v13366_v55 = vmul.f32 0.17677669, %v1254_v5  ;;  %v11007_v10 = vpop.f32.mrb[29].mxu1  ;;  %v11025_v0 = vpop.f32.mrb[37].mxu0 }
 0x299   : > { %v1257_v49 = vpop.f32.mrb[30].mxu1  ;;  %v1395_v54 = vpop.f32.mrb[38].mxu0 }
 0x29a   : > { %v1847_v58 = vsel %vm1828_vm3, %v13364_v25, -inf  ;;  %v1838_v8 = vsel %vm1828_vm3, %v13366_v55, -inf  ;;  %v11008_v33 = vpop.f32.mrb[31].mxu1  ;;  %v11026_v41 = vpop.f32.mrb[39].mxu0 }
 0x29b   : > { %1848 = vmax.xlane.f32.xlu0 %v1847_v58  ;;  %1839 = vmax.xlane.f32.xlu1 %v1838_v8 }
 0x29f   : > { %v1346_v61 = vpop.f32.mrb[32].mxu1  ;;  %v1484_v46 = vpop.f32.mrb[40].mxu0 }
 0x2a0   : > { %v13372_v51 = vmul.f32 0.17677669, %v1484_v46  ;;  %v13374_v5 = vmul.f32 0.17677669, %v1346_v61  ;;  %v11019_v10 = vpop.f32.mrb[33].mxu1  ;;  %v11037_v0 = vpop.f32.mrb[41].mxu0 }
 0x2a1   : > { %v1349_v49 = vpop.f32.mrb[34].mxu1  ;;  %v1487_v54 = vpop.f32.mrb[42].mxu0 }
 0x2a2   : > { %v1853_v56 = vsel %vm1828_vm3, %v13372_v51, -inf  ;;  %v1844_v52 = vsel %vm1828_vm3, %v13374_v5, -inf  ;;  %v11020_v33 = vpop.f32.mrb[35].mxu1  ;;  %v11038_v41 = vpop.f32.mrb[43].mxu0 }
 0x2a3   : > { %1854 = vmax.xlane.f32.xlu0 %v1853_v56  ;;  %1845 = vmax.xlane.f32.xlu1 %v1844_v52 }
 0x2a7   : > { %v1438_v58 = vpop.f32.mrb[36].mxu1  ;;  %v1576_v8 = vpop.f32.mrb[44].mxu0 }
 0x2a8   : > { %v13380_v46 = vmul.f32 0.17677669, %v1576_v8  ;;  %v13382_v61 = vmul.f32 0.17677669, %v1438_v58  ;;  %v11031_v10 = vpop.f32.mrb[37].mxu1  ;;  %v11049_v0 = vpop.f32.mrb[45].mxu0 }
 0x2a9   : > { %v1441_v49 = vpop.f32.mrb[38].mxu1  ;;  %v1579_v54 = vpop.f32.mrb[46].mxu0 }
 0x2aa   : > { %v1859_v44 = vsel %vm1828_vm3, %v13380_v46, -inf  ;;  %v1850_v19 = vsel %vm1828_vm3, %v13382_v61, -inf  ;;  %v11032_v33 = vpop.f32.mrb[39].mxu1  ;;  %v11050_v41 = vpop.f32.mrb[47].mxu0 }
 0x2ab   : > { %1860 = vmax.xlane.f32.xlu0 %v1859_v44  ;;  %1851 = vmax.xlane.f32.xlu1 %v1850_v19 }
 0x2af   : > { %v1530_v52 = vpop.f32.mrb[40].mxu1  ;;  %v1668_v56 = vpop.f32.mrb[48].mxu0 }
 0x2b0   : > { %v13388_v8 = vmul.f32 0.17677669, %v1668_v56  ;;  %v13390_v58 = vmul.f32 0.17677669, %v1530_v52  ;;  %v11043_v10 = vpop.f32.mrb[41].mxu1  ;;  %v11061_v0 = vpop.f32.mrb[49].mxu0 }
 0x2b1   : > { %v1533_v49 = vpop.f32.mrb[42].mxu1  ;;  %v1671_v54 = vpop.f32.mrb[50].mxu0 }
 0x2b2   : > { %v1865_v29 = vsel %vm1828_vm3, %v13388_v8, -inf  ;;  %v1856_v28 = vsel %vm1828_vm3, %v13390_v58, -inf  ;;  %v11044_v33 = vpop.f32.mrb[43].mxu1  ;;  %v11062_v41 = vpop.f32.mrb[51].mxu0 }
 0x2b3   : > { %1866 = vmax.xlane.f32.xlu0 %v1865_v29  ;;  %1857 = vmax.xlane.f32.xlu1 %v1856_v28 }
 0x2b7   : > { %v1622_v19 = vpop.f32.mrb[44].mxu1  ;;  %v1760_v44 = vpop.f32.mrb[52].mxu0 }
 0x2b8   : > { %v13396_v56 = vmul.f32 0.17677669, %v1760_v44  ;;  %v13398_v52 = vmul.f32 0.17677669, %v1622_v19  ;;  %v11055_v10 = vpop.f32.mrb[45].mxu1  ;;  %v11073_v0 = vpop.f32.mrb[53].mxu0 }
 0x2b9   : > { %v1625_v49 = vpop.f32.mrb[46].mxu1  ;;  %v1763_v54 = vpop.f32.mrb[54].mxu0 }
 0x2ba   : > { %v1871_v34 = vsel %vm1828_vm3, %v13396_v56, -inf  ;;  %v1862_v1 = vsel %vm1828_vm3, %v13398_v52, -inf  ;;  %v11056_v33 = vpop.f32.mrb[47].mxu1  ;;  %v11074_v41 = vpop.f32.mrb[55].mxu0 }
 0x2bb   : > { %1872 = vmax.xlane.f32.xlu0 %v1871_v34  ;;  %1863 = vmax.xlane.f32.xlu1 %v1862_v1 }
 0x2bf   : > { %v1714_v28 = vpop.f32.mrb[48].mxu1 }
 0x2c0   : > { %v13404_v29 = vmul.f32 0.17677669, %v1714_v28  ;;  %v11067_v44 = vpop.f32.mrb[49].mxu1 }
 0x2c1   : > { %v1717_v19 = vpop.f32.mrb[50].mxu1 }
 0x2c2   : > { %v1868_v10 = vsel %vm1828_vm3, %v13404_v29, -inf  ;;  %v11068_v0 = vpop.f32.mrb[51].mxu1 }
 0x2c3   : > { %1869 = vmax.xlane.f32.xlu1 %v1868_v10 }
 0x2c7   : > { %v1806_v49 = vpop.f32.mrb[52].mxu1 }
 0x2c8   : > { %v13408_v54 = vmul.f32 0.17677669, %v1806_v49  ;;  %v11079_v37 = vpop.f32.mrb[53].mxu1 }
 0x2c9   : > { %v1809_v30 = vpop.f32.mrb[54].mxu1 }
 0x2ca   : > { %v1874_v33 = vsel %vm1828_vm3, %v13408_v54, -inf  ;;  %v11080_v34 = vpop.f32.mrb[55].mxu1 }
 0x2cb   : > { %1875 = vmax.xlane.f32.xlu1 %v1874_v33 }
 0x310   : > { %v1831_v1 = vpop.xlane.xlu0 %1830 }
 0x311   : > { %v1877_v41 = vsub.f32 %v13348_v59, %v1831_v1 }
 0x313   : > { %v1893_v28 = vmul.f32 1.442695, %v1877_v41 }
 0x315   : > { %12144 = vpow2.f32 %v1893_v28 }
 0x318   : > { %v1834_v44 = vpop.xlane.xlu0 %1833 }
 0x319   : > { %v1878_v19 = vsub.f32 %v13352_v32, %v1834_v44 }
 0x31b   : > { %v1895_v0 = vmul.f32 1.442695, %v1878_v19 }
 0x31d   : > { %12146 = vpow2.f32 %v1895_v0 }
 0x31f   : > { %v13414_v10 = vpop.eup %12144 }
 0x320   : > { %v1843_v49 = vpop.xlane.xlu0 %1842  ;;  %v1837_v37 = vpop.xlane.xlu1 %1836  ;;  %v1925_v30 = vsel %vm1828_vm3, %v13414_v10, 0.0 }
 0x321   : > { %v1881_v34 = vsub.f32 %v13356_v11, %v1843_v49  ;;  %v1879_v33 = vsub.f32 %v13358_v13, %v1837_v37  ;;  %1926 = vadd.xlane.f32.xlu0 %v1925_v30 }
 0x323   : > { %v1897_v59 = vmul.f32 1.442695, %v1879_v33  ;;  %v1901_v1 = vmul.f32 1.442695, %v1881_v34 }
 0x325   : > { %12148 = vpow2.f32 %v1897_v59 }
 0x326   : > { %12150 = vpow2.f32 %v1901_v1 }
 0x327   : > { %v13420_v41 = vpop.eup %12146 }
 0x328   : > { %v1849_v32 = vpop.xlane.xlu0 %1848  ;;  %v1840_v28 = vpop.xlane.xlu1 %1839  ;;  %v1928_v44 = vsel %vm1828_vm3, %v13420_v41, 0.0 }
 0x329   : > { %v1883_v19 = vsub.f32 %v13364_v25, %v1849_v32  ;;  %v1880_v0 = vsub.f32 %v13366_v55, %v1840_v28  ;;  %1929 = vadd.xlane.f32.xlu1 %v1928_v44 }
 0x32b   : > { %v1905_v11 = vmul.f32 1.442695, %v1883_v19  ;;  %v1899_v49 = vmul.f32 1.442695, %v1880_v0 }
 0x32d   : > { %12152 = vpow2.f32 %v1905_v11 }
 0x32e   : > { %12154 = vpow2.f32 %v1899_v49 }
 0x32f   : > { %v13426_v13 = vpop.eup %12148 }
 0x330   : > { %v1855_v37 = vpop.xlane.xlu0 %1854  ;;  %v1846_v30 = vpop.xlane.xlu1 %1845  ;;  %v1931_v59 = vsel %vm1828_vm3, %v13426_v13, 0.0 }
 0x331   : > { %v1885_v34 = vsub.f32 %v13372_v51, %v1855_v37  ;;  %v1882_v33 = vsub.f32 %v13374_v5, %v1846_v30  ;;  %v13432_v1 = vpop.eup %12150  ;;  %1932 = vadd.xlane.f32.xlu0 %v1931_v59 }
 0x332   : > { %v1937_v32 = vsel %vm1828_vm3, %v13432_v1, 0.0 }
 0x333   : > { %v1909_v25 = vmul.f32 1.442695, %v1885_v34  ;;  %v1903_v55 = vmul.f32 1.442695, %v1882_v33 }
 0x335   : > { %12156 = vpow2.f32 %v1909_v25  ;;  %1938 = vadd.xlane.f32.xlu0 %v1937_v32 }
 0x336   : > { %12158 = vpow2.f32 %v1903_v55 }
 0x337   : > { %v13436_v28 = vpop.eup %12152 }
 0x338   : > { %v13438_v44 = vpop.eup %12154  ;;  %v1861_v51 = vpop.xlane.xlu0 %1860  ;;  %v1943_v19 = vsel %vm1828_vm3, %v13436_v28, 0.0 }
 0x339   : > { %v1852_v5 = vpop.xlane.xlu1 %1851  ;;  %v1887_v0 = vsub.f32 %v13380_v46, %v1861_v51  ;;  %v1934_v49 = vsel %vm1828_vm3, %v13438_v44, 0.0  ;;  %1944 = vadd.xlane.f32.xlu0 %v1943_v19 }
 0x33a   : > { %v1884_v11 = vsub.f32 %v13382_v61, %v1852_v5  ;;  %1935 = vadd.xlane.f32.xlu1 %v1934_v49 }
 0x33b   : > { %v1913_v37 = vmul.f32 1.442695, %v1887_v0 }
 0x33c   : > { %v1907_v30 = vmul.f32 1.442695, %v1884_v11 }
 0x33d   : > { %12160 = vpow2.f32 %v1913_v37 }
 0x33e   : > { %12162 = vpow2.f32 %v1907_v30 }
 0x33f   : > { %v13446_v34 = vpop.eup %12156 }
 0x340   : > { %v13448_v33 = vpop.eup %12158  ;;  %v1867_v59 = vpop.xlane.xlu0 %1866  ;;  %v1949_v46 = vsel %vm1828_vm3, %v13446_v34, 0.0 }
 0x341   : > { %v1858_v25 = vpop.xlane.xlu1 %1857  ;;  %v1889_v61 = vsub.f32 %v13388_v8, %v1867_v59  ;;  %1950 = vadd.xlane.f32.xlu0 %v1949_v46  ;;  %v1940_v32 = vsel %vm1828_vm3, %v13448_v33, 0.0 }
 0x342   : > { %v1886_v55 = vsub.f32 %v13390_v58, %v1858_v25  ;;  %1941 = vadd.xlane.f32.xlu1 %v1940_v32 }
 0x343   : > { %v1917_v51 = vmul.f32 1.442695, %v1889_v61 }
 0x344   : > { %v1911_v5 = vmul.f32 1.442695, %v1886_v55 }
 0x345   : > { %12164 = vpow2.f32 %v1917_v51 }
 0x346   : > { %12166 = vpow2.f32 %v1911_v5 }
 0x347   : > { %v13456_v19 = vpop.eup %12160 }
 0x348   : > { %v13458_v0 = vpop.eup %12162  ;;  %v1873_v11 = vpop.xlane.xlu0 %1872  ;;  %v1955_v8 = vsel %vm1828_vm3, %v13456_v19, 0.0 }
 0x349   : > { %v1864_v49 = vpop.xlane.xlu1 %1863  ;;  %v1891_v58 = vsub.f32 %v13396_v56, %v1873_v11  ;;  %1956 = vadd.xlane.f32.xlu0 %v1955_v8  ;;  %v1946_v30 = vsel %vm1828_vm3, %v13458_v0, 0.0 }
 0x34a   : > { %v1888_v37 = vsub.f32 %v13398_v52, %v1864_v49  ;;  %1947 = vadd.xlane.f32.xlu1 %v1946_v30  ;;  %v13525_v30 = vpack.c.bf16 %v13092_v18, %v13092_v18 }
 0x34b   : > { %v1921_v59 = vmul.f32 1.442695, %v1891_v58 }
 0x34c   : > { %v1915_v25 = vmul.f32 1.442695, %v1888_v37  ;;  %16108 = vst [vmem:[#allocation36_spill] sm:$0xff] %v13525_v30 }
 0x34d   : > { %12168 = vpow2.f32 %v1921_v59 }
 0x34e   : > { %12170 = vpow2.f32 %v1915_v25 }
 0x34f   : > { %v13466_v46 = vpop.eup %12164 }
 0x350   : > { %v13468_v61 = vpop.eup %12166  ;;  %v1961_v55 = vsel %vm1828_vm3, %v13466_v46, 0.0  ;;  %v1870_v11 = vpop.xlane.xlu1 %1869 }
 0x351   : > { %1962 = vadd.xlane.f32.xlu0 %v1961_v55  ;;  %v1952_v56 = vsel %vm1828_vm3, %v13468_v61, 0.0  ;;  %v1890_v49 = vsub.f32 %v13404_v29, %v1870_v11  ;;  %v13532_v55 = vpack.c.bf16 %v13132_v42, %v13132_v42 }
 0x352   : > { %1953 = vadd.xlane.f32.xlu1 %v1952_v56 }
 0x353   : > { %v1919_v8 = vmul.f32 1.442695, %v1890_v49  ;;  %16109 = vst [vmem:[#allocation37_spill] sm:$0xff] %v13532_v55 }
 0x355   : > { %12172 = vpow2.f32 %v1919_v8  ;;  %v16112_v8 = vmov 0.0  }
 0x357   : > { %v13474_v52 = vpop.eup %12168 }
 0x358   : > { %v13476_v32 = vpop.eup %12170  ;;  %v1967_v51 = vsel %vm1828_vm3, %v13474_v52, 0.0  ;;  %v1876_v37 = vpop.xlane.xlu1 %1875 }
 0x359   : > { %1968 = vadd.xlane.f32.xlu0 %v1967_v51  ;;  %v1958_v5 = vsel %vm1828_vm3, %v13476_v32, 0.0  ;;  %v1892_v59 = vsub.f32 %v13408_v54, %v1876_v37  ;;  %v13538_v51 = vpack.c.bf16 %v13122_v36, %v13122_v36  ;;  %v2118_v36 = vsel %vm2024_vm2, %v13525_v30, 0 }
 0x35a   : > { %1959 = vadd.xlane.f32.xlu1 %v1958_v5  ;;  %v13544_v5 = vpack.c.bf16 %v13172_v12, %v13172_v12 }
 0x35b   : > { %v1923_v56 = vmul.f32 1.442695, %v1892_v59  ;;  %16110 = vst [vmem:[#allocation38_spill] sm:$0xff] %v13538_v51 }
 0x35c   : > { %16111 = vst [vmem:[#allocation39_spill] sm:$0xff] %v13544_v5 }
 0x35f   : > { %v13499_v58 = vpop.eup %12172 }
 0x360   : > { %v1964_v29 = vsel %vm1828_vm3, %v13499_v58, 0.0 }
 0x36b   : > { %2810 = vrot.lane.b32.xlu1 %v13072_v6, %s12714_s22 }
 0x36f   : > { %2760 = vrot.lane.b32.xlu0 %v13064_v62, %s12714_s22 }
 0x373   : > { %2860 = vrot.lane.b32.xlu0 %v13088_v14, %s12714_s22 }
 0x377   : > { %2858 = vrot.lane.b32.xlu0 %v13137_v47, %s12714_s22 }
 0x37b   : > { %2960 = vrot.lane.b32.xlu0 %v13106_v27, %s12714_s22 }
 0x37f   : > { %2958 = vrot.lane.b32.xlu0 %v13126_v39, %s12714_s22 }
 0x383   : > { %3060 = vrot.lane.b32.xlu0 %v13139_v48, %s12714_s22 }
 0x387   : > { %3058 = vrot.lane.b32.xlu0 %v13166_v7, %s12714_s22 }
 0x38b   : > { %3160 = vrot.lane.b32.xlu0 %v13179_v22, %s12714_s22 }
 0x38f   : > { %1965 = vadd.xlane.f32.xlu1 %v1964_v29  ;;  %3158 = vrot.lane.b32.xlu0 %v13207_v21, %s12714_s22 }
 0x393   : > { %3260 = vrot.lane.b32.xlu0 %v13220_v63, %s12714_s22 }
 0x397   : > { %3258 = vrot.lane.b32.xlu0 %v13245_v31, %s12714_s22 }
 0x39b   : > { %3360 = vrot.lane.b32.xlu0 %v13251_v40, %s12714_s22 }
 0x39f   : > { %3358 = vrot.lane.b32.xlu0 %v13274_v15, %s12714_s22 }
 0x3a0   : > { %2758 = vrot.lane.b32.xlu1 %v13074_v9, %s12714_s22 }
 0x3a3   : > { %3460 = vrot.lane.b32.xlu0 %v13280_v3, %s12714_s22 }
 0x3a7   : > { %3458 = vrot.lane.b32.xlu0 %v13306_v17, %s12714_s22 }
 0x3ab   : > { %3766 = vrot.lane.b32.xlu0 %v13303_v57, %s12714_s22 }
 0x3ae   : > { %v1927_v25 = vpop.xlane.xlu0 %1926 }
 0x3af   : > { %12174 = vrcp.f32 %v1927_v25  ;;  %3862 = vrot.lane.b32.xlu0 %v13525_v30, %s12714_s22 }
 0x3b0   : > { %12176 = vpow2.f32 %v1923_v56 }
 0x3b3   : > { %3958 = vrot.lane.b32.xlu0 %v13532_v55, %s12714_s22 }
 0x3b6   : > { %v1930_v18 = vpop.xlane.xlu1 %1929 }
 0x3b7   : > { %12178 = vrcp.f32 %v1930_v18  ;;  %4054 = vrot.lane.b32.xlu0 %v13538_v51, %s12714_s22 }
 0x3b9   : > { %v12175_v54 = vpop.eup %12174 }
 0x3ba   : > { %v1974_v42 = vmul.f32 %v12175_v54, %v13414_v10  ;;  %v13554_v29 = vpop.eup %12176  ;;  %v13559_v10 = vpack.c.bf16 %v13100_v24, %v13100_v24 }
 0x3bb   : > { %4150 = vrot.lane.b32.xlu0 %v13544_v5, %s12714_s22  ;;  %v1970_v25 = vsel %vm1828_vm3, %v13554_v29, 0.0 }
 0x3bc   : > { %v2005_v11 = vpack.c.bf16 %v1974_v42, %v1974_v42  ;;  %16113 = vst [vmem:[#allocation40_spill] sm:$0xff] %v13559_v10  ;;  %v2164_v18 = vsel %vm2024_vm2, %v13559_v10, 0 }
 0x3be   : > { %11084 = vmatmul.mubr.msk.bf16.vlgmr.msra.gmra.mrb[56].mxu0 %vm1828_vm3, %v2005_v11  ;;  %v1933_v49 = vpop.xlane.xlu0 %1932 }
 0x3bf   : > { %11094 = vmatpush3.bf16.msra.mxu0 %v2118_v36  ;;  %11095 = vmatprep.mubr.msk.bf16.mxu0 %vm12713_vm0, %v16112_v8  ;;  %12180 = vrcp.f32 %v1933_v49  ;;  %v2210_v49 = vsel %vm2024_vm2, %v13532_v55, 0 }
 0x3c0   : > { %11105 = vmatprep.subr.bf16.mxu0 %v16112_v8 }
 0x3c1   : > { %v12179_v12 = vpop.eup %12178 }
 0x3c2   : > { %v1976_v37 = vmul.f32 %v12179_v12, %v13420_v41  ;;  %v1939_v59 = vpop.xlane.xlu0 %1938 }
 0x3c3   : > { %12182 = vrcp.f32 %v1939_v59 }
 0x3c4   : > { %1971 = vadd.xlane.f32.xlu1 %v1970_v25  ;;  %v2006_v56 = vpack.c.bf16 %v1976_v37, %v1976_v37  ;;  %v13580_v25 = vpack.c.bf16 %v13142_v50, %v13142_v50 }
 0x3c6   : > { %11090 = vmatmul.mubr.msk.bf16.vlgmr.msra.gmra.mrb[56].mxu1 %vm1828_vm3, %v2006_v56  ;;  %v1945_v24 = vpop.xlane.xlu0 %1944  ;;  %16114 = vst [vmem:[#allocation41_spill] sm:$0xff] %v13580_v25  ;;  %v2256_v50 = vsel %vm2024_vm2, %v13580_v25, 0 }
 0x3c7   : > { %11100 = vmatpush3.bf16.msra.mxu1 %v2164_v18  ;;  %v1936_v54 = vpop.xlane.xlu1 %1935  ;;  %11101 = vmatprep.mubr.msk.bf16.mxu1 %vm12713_vm0, %v16112_v8 }
 0x3c8   : > { %11111 = vmatprep.subr.bf16.mxu1 %v16112_v8  ;;  %12184 = vrcp.f32 %v1936_v54 }
 0x3c9   : > { %v12181_v41 = vpop.eup %12180  ;;  %12186 = vrcp.f32 %v1945_v24 }
 0x3ca   : > { %v1978_v42 = vmul.f32 %v12181_v41, %v13426_v13  ;;  %v2302_v41 = vsel %vm2024_vm2, %v13538_v51, 0 }
 0x3cc   : > { %v2007_v11 = vpack.c.bf16 %v1978_v42, %v1978_v42 }
 0x3cd   : > { %v12183_v36 = vpop.eup %12182 }
 0x3ce   : > { %11096 = vmatmul.mubr.msk.bf16.vlgmr.msra.gmra.mrb[60].mxu0 %vm1828_vm3, %v2007_v11  ;;  %v1951_v37 = vpop.xlane.xlu0 %1950  ;;  %v1982_v59 = vmul.f32 %v12183_v36, %v13432_v1 }
 0x3cf   : > { %v1942_v12 = vpop.xlane.xlu1 %1941  ;;  %11106 = vmatpush3.bf16.msra.mxu0 %v2210_v49  ;;  %11107 = vmatprep.mubr.msk.bf16.mxu0 %vm12713_vm0, %v16112_v8  ;;  %v13603_v49 = vpack.c.bf16 %v13135_v45, %v13135_v45 }
 0x3d0   : > { %12188 = vrcp.f32 %v1942_v12  ;;  %11117 = vmatprep.subr.bf16.mxu0 %v16112_v8  ;;  %v2009_v18 = vpack.c.bf16 %v1982_v59, %v1982_v59  ;;  %v2394_v59 = vsel %vm2024_vm2, %v13544_v5, 0 }
 0x3d1   : > { %12190 = vrcp.f32 %v1951_v37  ;;  %16115 = vst [vmem:[#allocation42_spill] sm:$0xff] %v13603_v49  ;;  %v2348_v45 = vsel %vm2024_vm2, %v13603_v49, 0 }
 0x3d2   : > { %v12185_v13 = vpop.eup %12184 }
 0x3d3   : > { %v1980_v56 = vmul.f32 %v12185_v13, %v13438_v44  ;;  %v12187_v54 = vpop.eup %12186 }
 0x3d4   : > { %v1986_v42 = vmul.f32 %v12187_v54, %v13436_v28  ;;  %v13622_v54 = vpack.c.bf16 %v13162_v2, %v13162_v2 }
 0x3d5   : > { %2808 = vrot.lane.b32.xlu1 %v13104_v26, %s12714_s22  ;;  %v2008_v24 = vpack.c.bf16 %v1980_v56, %v1980_v56 }
 0x3d6   : > { %11108 = vmatmul.mubr.msk.bf16.vlgmr.msra.gmra.mrb[64].mxu0 %vm1828_vm3, %v2009_v18  ;;  %v1957_v44 = vpop.xlane.xlu0 %1956  ;;  %v2011_v28 = vpack.c.bf16 %v1986_v42, %v1986_v42  ;;  %16116 = vst [vmem:[#allocation43_spill] sm:$0xff] %v13622_v54  ;;  %v2486_v2 = vsel %vm2024_vm2, %v13622_v54, 0 }
 0x3d7   : > { %v1948_v1 = vpop.xlane.xlu1 %1947  ;;  %11118 = vmatpush3.bf16.msra.mxu0 %v2302_v41  ;;  %11102 = vmatmul.mubr.msk.bf16.vlgmr.msra.gmra.mrb[60].mxu1 %vm1828_vm3, %v2008_v24 }
 0x3d8   : > { %12192 = vrcp.f32 %v1948_v1  ;;  %11112 = vmatpush3.bf16.msra.mxu1 %v2256_v50  ;;  %11113 = vmatprep.mubr.msk.bf16.mxu1 %vm12713_vm0, %v16112_v8 }
 0x3d9   : > { %2910 = vrot.lane.b32.xlu1 %v13124_v38, %s12714_s22  ;;  %11119 = vmatprep.mubr.msk.bf16.mxu0 %vm12713_vm0, %v16112_v8  ;;  %12194 = vrcp.f32 %v1957_v44 }
 0x3da   : > { %v12189_v11 = vpop.eup %12188  ;;  %11123 = vmatprep.subr.bf16.mxu1 %v16112_v8  ;;  %11129 = vmatprep.subr.bf16.mxu0 %v16112_v8 }
 0x3db   : > { %v1984_v36 = vmul.f32 %v12189_v11, %v13448_v33  ;;  %v12191_v37 = vpop.eup %12190 }
 0x3dc   : > { %v1990_v56 = vmul.f32 %v12191_v37, %v13446_v34  ;;  %v13629_v34 = vpack.c.bf16 %v13182_v23, %v13182_v23 }
 0x3dd   : > { %2908 = vrot.lane.b32.xlu1 %v13177_v20, %s12714_s22  ;;  %v2010_v12 = vpack.c.bf16 %v1984_v36, %v1984_v36  ;;  %v13648_v36 = vpack.c.bf16 %v13213_v53, %v13213_v53 }
 0x3de   : > { %11120 = vmatmul.mubr.msk.bf16.vlgmr.msra.gmra.mrb[68].mxu0 %vm1828_vm3, %v2011_v28  ;;  %v1963_v33 = vpop.xlane.xlu0 %1962  ;;  %16117 = vst [vmem:[#allocation44_spill] sm:$0xff] %v13629_v34  ;;  %v2013_v41 = vpack.c.bf16 %v1990_v56, %v1990_v56  ;;  %v2440_v23 = vsel %vm2024_vm2, %v13629_v34, 0 }
 0x3df   : > { %v1954_v13 = vpop.xlane.xlu1 %1953  ;;  %11130 = vmatpush3.bf16.msra.mxu0 %v2394_v59  ;;  %11114 = vmatmul.mubr.msk.bf16.vlgmr.msra.gmra.mrb[64].mxu1 %vm1828_vm3, %v2010_v12  ;;  %16118 = vst [vmem:[#allocation45_spill] sm:$0xff] %v13648_v36  ;;  %v2578_v53 = vsel %vm2024_vm2, %v13648_v36, 0 }
 0x3e0   : > { %12196 = vrcp.f32 %v1954_v13  ;;  %11124 = vmatpush3.bf16.msra.mxu1 %v2348_v45  ;;  %11125 = vmatprep.mubr.msk.bf16.mxu1 %vm12713_vm0, %v16112_v8 }
 0x3e1   : > { %3010 = vrot.lane.b32.xlu1 %v13164_v4, %s12714_s22  ;;  %11131 = vmatprep.mubr.msk.bf16.mxu0 %vm12713_vm0, %v16112_v8  ;;  %12198 = vrcp.f32 %v1963_v33  ;;  %v16121_v33 = vld [vmem:[#allocation19_spill] sm:$0xff] }
 0x3e2   : > { %v12193_v18 = vpop.eup %12192  ;;  %11135 = vmatprep.subr.bf16.mxu1 %v16112_v8  ;;  %11141 = vmatprep.subr.bf16.mxu0 %v16112_v8  ;;  %v13674_v56 = vpack.c.bf16 %v16121_v33, %v16121_v33  ;;  %v16131_v33 = vld [vmem:[#allocation34_spill] sm:$0xff] }
 0x3e3   : > { %v1988_v24 = vmul.f32 %v12193_v18, %v13458_v0  ;;  %v12195_v50 = vpop.eup %12194 }
 0x3e4   : > { %v1994_v42 = vmul.f32 %v12195_v50, %v13456_v19  ;;  %v13655_v19 = vpack.c.bf16 %v13175_v16, %v13175_v16  ;;  %v16120_v16 = vld [vmem:[#allocation22_spill] sm:$0xff] }
 0x3e5   : > { %3008 = vrot.lane.b32.xlu1 %v13218_v60, %s12714_s22  ;;  %v2012_v1 = vpack.c.bf16 %v1988_v24, %v1988_v24  ;;  %v16122_v24 = vld [vmem:[#allocation21_spill] sm:$0xff] }
 0x3e6   : > { %11132 = vmatmul.mubr.msk.bf16.vlgmr.msra.gmra.mrb[72].mxu0 %vm1828_vm3, %v2013_v41  ;;  %v1969_v0 = vpop.xlane.xlu0 %1968  ;;  %16119 = vst [vmem:[#allocation46_spill] sm:$0xff] %v13655_v19  ;;  %v2015_v12 = vpack.c.bf16 %v1994_v42, %v1994_v42  ;;  %v16124_v41 = vld [vmem:[#allocation26_spill] sm:$0xff] }
 0x3e7   : > { %v1960_v44 = vpop.xlane.xlu1 %1959  ;;  %11142 = vmatpush3.bf16.msra.mxu0 %v2486_v2  ;;  %11126 = vmatmul.mubr.msk.bf16.vlgmr.msra.gmra.mrb[68].mxu1 %vm1828_vm3, %v2012_v1 }
 0x3e8   : > { %12200 = vrcp.f32 %v1960_v44  ;;  %11136 = vmatpush3.bf16.msra.mxu1 %v2440_v23  ;;  %11137 = vmatprep.mubr.msk.bf16.mxu1 %vm12713_vm0, %v16112_v8  ;;  %v2670_v44 = vsel %vm2024_vm2, %v13674_v56, 0  ;;  %v16125_v23 = vld [vmem:[#allocation24_spill] sm:$0xff] }
 0x3e9   : > { %3110 = vrot.lane.b32.xlu1 %v13205_v43, %s12714_s22  ;;  %11143 = vmatprep.mubr.msk.bf16.mxu0 %vm12713_vm0, %v16112_v8  ;;  %12202 = vrcp.f32 %v1969_v0 }
 0x3ea   : > { %v12197_v11 = vpop.eup %12196  ;;  %11147 = vmatprep.subr.bf16.mxu1 %v16112_v8  ;;  %11153 = vmatprep.subr.bf16.mxu0 %v16112_v8  ;;  %v2761_v42 = vpop.permute.xlu0 %2760 }
 0x3eb   : > { %v1992_v28 = vmul.f32 %v12197_v11, %v13468_v61  ;;  %v12199_v59 = vpop.eup %12198  ;;  %v2532_v61 = vsel %vm2024_vm2, %v13655_v19, 0  ;;  %v16126_v11 = vld [vmem:[#allocation31_spill] sm:$0xff] }
 0x3ec   : > { %v1998_v13 = vmul.f32 %v12199_v59, %v13466_v46  ;;  %v13681_v46 = vpack.c.bf16 %v16122_v24, %v16122_v24  ;;  %v16128_v59 = vld [vmem:[#allocation33_spill] sm:$0xff]  ;;  %v13719_v24 = vpop.permute.xlu1 %2810 }
 0x3ed   : > { %3108 = vrot.lane.b32.xlu1 %v13249_v35, %s12714_s22  ;;  %v2014_v37 = vpack.c.bf16 %v1992_v28, %v1992_v28 }
 0x3ee   : > { %11144 = vmatmul.mubr.msk.bf16.vlgmr.msra.gmra.mrb[76].mxu0 %vm1828_vm3, %v2015_v12  ;;  %16123 = vst [vmem:[#allocation22_spill] sm:$0xff] %v13681_v46  ;;  %v2017_v1 = vpack.c.bf16 %v1998_v13, %v1998_v13  ;;  %v2766_v12 = vsel %vm1075_vm1, %v2761_v42, 0  ;;  %v16130_v13 = vld [vmem:[#allocation35_spill] sm:$0xff] }
 0x3ef   : > { %11154 = vmatpush3.bf16.msra.mxu0 %v2578_v53  ;;  %11138 = vmatmul.mubr.msk.bf16.vlgmr.msra.gmra.mrb[72].mxu1 %vm1828_vm3, %v2014_v37  ;;  %v2861_v37 = vpop.permute.xlu0 %2860 }
 0x3f0   : > { %11148 = vmatpush3.bf16.msra.mxu1 %v2532_v61  ;;  %11149 = vmatprep.mubr.msk.bf16.mxu1 %vm12713_vm0, %v16112_v8  ;;  %v16129_v61 = vld [vmem:[#allocation32_spill] sm:$0xff] }
 0x3f1   : > { %3210 = vrot.lane.b32.xlu1 %v16120_v16, %s12714_s22  ;;  %11155 = vmatprep.mubr.msk.bf16.mxu0 %vm12713_vm0, %v16112_v8 }
 0x3f2   : > { %v12201_v45 = vpop.eup %12200  ;;  %11159 = vmatprep.subr.bf16.mxu1 %v16112_v8  ;;  %11165 = vmatprep.subr.bf16.mxu0 %v16112_v8 }
 0x3f3   : > { %v1996_v18 = vmul.f32 %v12201_v45, %v13476_v32  ;;  %v12203_v2 = vpop.eup %12202  ;;  %v2624_v32 = vsel %vm2024_vm2, %v13681_v46, 0  ;;  %v2859_v53 = vpop.permute.xlu0 %2858 }
 0x3f4   : > { %v2002_v0 = vmul.f32 %v12203_v2, %v13474_v52  ;;  %v16127_v52 = vld [vmem:[#allocation28_spill] sm:$0xff] }
 0x3f5   : > { %3208 = vrot.lane.b32.xlu1 %v16124_v41, %s12714_s22  ;;  %v2016_v50 = vpack.c.bf16 %v1996_v18, %v1996_v18 }
 0x3f6   : > { %11156 = vmatmul.mubr.msk.bf16.vlgmr.msra.gmra.mrb[80].mxu0 %vm1828_vm3, %v2017_v1  ;;  %v2019_v28 = vpack.c.bf16 %v2002_v0, %v2002_v0 }
 0x3f7   : > { %11166 = vmatpush3.bf16.msra.mxu0 %v2670_v44  ;;  %11150 = vmatmul.mubr.msk.bf16.vlgmr.msra.gmra.mrb[76].mxu1 %vm1828_vm3, %v2016_v50  ;;  %v2961_v45 = vpop.permute.xlu0 %2960 }
 0x3f8   : > { %11160 = vmatpush3.bf16.msra.mxu1 %v2624_v32  ;;  %11167 = vmatprep.mubr.msk.bf16.mxu0 %vm12713_vm0, %v16112_v8  ;;  %v2866_v32 = vsel %vm1075_vm1, %v2861_v37, 0 }
 0x3f9   : > { %3310 = vrot.lane.b32.xlu1 %v16125_v23, %s12714_s22  ;;  %11177 = vmatprep.subr.bf16.mxu0 %v16112_v8 }
 0x3fa   : > { %11161 = vmatprep.mubr.msk.bf16.mxu1 %vm12713_vm0, %v16112_v8  ;;  %11171 = vmatprep.subr.bf16.mxu1 %v16112_v8 }
 0x3fb   : > { %v2959_v18 = vpop.permute.xlu0 %2958 }
 0x3fd   : > { %3308 = vrot.lane.b32.xlu1 %v16126_v11, %s12714_s22 }
 0x3fe   : > { %11168 = vmatmul.mubr.msk.bf16.vlgmr.msra.gmra.mrb[84].mxu0 %vm1828_vm3, %v2019_v28  ;;  %v16132_v28 = vld [vmem:[#allocation20_spill] sm:$0xff] }
 0x3ff   : > { %11179 = vmatprep.mubr.msk.bf16.mxu0 %vm12713_vm0, %v16112_v8  ;;  %v3061_v1 = vpop.permute.xlu0 %3060 }
 0x400   : > { %11178 = vmatpush3.bf16.xpose.msra.mxu0 %v2766_v12  ;;  %v13736_v12 = vpack.c.bf16 %v16132_v28, %v16132_v28 }
 0x401   : > { %3410 = vrot.lane.b32.xlu1 %v16127_v52, %s12714_s22  ;;  %11189 = vmatprep.subr.bf16.mxu0 %v16112_v8 }
 0x403   : > { %v3059_v2 = vpop.permute.xlu0 %3058 }
 0x405   : > { %3408 = vrot.lane.b32.xlu1 %v16128_v59, %s12714_s22 }
 0x407   : > { %v3161_v0 = vpop.permute.xlu0 %3160 }
 0x408   : > { %v3166_v28 = vsel %vm1075_vm1, %v3161_v0, 0 }
 0x409   : > { %3510 = vrot.lane.b32.xlu1 %v16129_v61, %s12714_s22 }
 0x40d   : > { %3508 = vrot.lane.b32.xlu1 %v16130_v13, %s12714_s22 }
 0x411   : > { %3814 = vrot.lane.b32.xlu1 %v16131_v33, %s12714_s22 }
 0x415   : > { %3910 = vrot.lane.b32.xlu1 %v13559_v10, %s12714_s22 }
 0x419   : > { %4006 = vrot.lane.b32.xlu1 %v13580_v25, %s12714_s22 }
 0x41c   : > { %v1966_v50 = vpop.xlane.xlu1 %1965 }
 0x41d   : > { %12204 = vrcp.f32 %v1966_v50  ;;  %4102 = vrot.lane.b32.xlu1 %v13603_v49, %s12714_s22  ;;  %v2966_v50 = vsel %vm1075_vm1, %v2961_v45, 0 }
 0x420   : > { %v2759_v44 = vpop.permute.xlu1 %2758 }
 0x421   : > { %4198 = vrot.lane.b32.xlu1 %v13629_v34, %s12714_s22  ;;  %11180 = vmatmul.mubr.msk.bf16.vlgmr.msra.gmra.mrb[88].mxu0 %vm1075_vm1, %v2759_v44 }
 0x422   : > { %11190 = vmatpush3.bf16.xpose.msra.mxu0 %v2866_v32  ;;  %11191 = vmatprep.mubr.msk.bf16.mxu0 %vm12713_vm0, %v16112_v8  ;;  %v3159_v32 = vpop.permute.xlu0 %3158 }
 0x423   : > { %11201 = vmatprep.subr.bf16.mxu0 %v16112_v8 }
 0x425   : > { %4246 = vrot.lane.b32.xlu1 %v13622_v54, %s12714_s22 }
 0x426   : > { %v3261_v45 = vpop.permute.xlu0 %3260 }
 0x427   : > { %v12205_v42 = vpop.eup %12204 }
 0x428   : > { %v2000_v37 = vmul.f32 %v12205_v42, %v13499_v58  ;;  %v2716_v58 = vsel %vm2024_vm2, %v13736_v12, 0 }
 0x429   : > { %4294 = vrot.lane.b32.xlu1 %v13655_v19, %s12714_s22  ;;  %11192 = vmatmul.mubr.msk.bf16.vlgmr.msra.gmra.mrb[92].mxu0 %vm1075_vm1, %v2859_v53  ;;  %v3066_v53 = vsel %vm1075_vm1, %v3061_v1, 0 }
 0x42a   : > { %11202 = vmatpush3.bf16.xpose.msra.mxu0 %v2966_v50  ;;  %v2018_v44 = vpack.c.bf16 %v2000_v37, %v2000_v37  ;;  %11203 = vmatprep.mubr.msk.bf16.mxu0 %vm12713_vm0, %v16112_v8  ;;  %v3259_v42 = vpop.permute.xlu0 %3258 }
 0x42b   : > { %11213 = vmatprep.subr.bf16.mxu0 %v16112_v8 }
 0x42c   : > { %11162 = vmatmul.mubr.msk.bf16.vlgmr.msra.gmra.mrb[80].mxu1 %vm1828_vm3, %v2018_v44 }
 0x42d   : > { %11172 = vmatpush3.bf16.msra.mxu1 %v2716_v58  ;;  %11173 = vmatprep.mubr.msk.bf16.mxu1 %vm12713_vm0, %v16112_v8 }
 0x42e   : > { %11183 = vmatprep.subr.bf16.mxu1 %v16112_v8  ;;  %v3361_v1 = vpop.permute.xlu0 %3360 }
 0x431   : > { %11204 = vmatmul.mubr.msk.bf16.vlgmr.msra.gmra.mrb[96].mxu0 %vm1075_vm1, %v2959_v18  ;;  %v3266_v18 = vsel %vm1075_vm1, %v3261_v45, 0 }
 0x432   : > { %11214 = vmatpush3.bf16.xpose.msra.mxu0 %v3066_v53  ;;  %11215 = vmatprep.mubr.msk.bf16.mxu0 %vm12713_vm0, %v16112_v8  ;;  %v3359_v0 = vpop.permute.xlu0 %3358 }
 0x433   : > { %11225 = vmatprep.subr.bf16.mxu0 %v16112_v8 }
 0x436   : > { %v3461_v37 = vpop.permute.xlu0 %3460 }
 0x437   : > { %v3466_v44 = vsel %vm1075_vm1, %v3461_v37, 0 }
 0x439   : > { %11216 = vmatmul.mubr.msk.bf16.vlgmr.msra.gmra.mrb[100].mxu0 %vm1075_vm1, %v3059_v2  ;;  %v3366_v2 = vsel %vm1075_vm1, %v3361_v1, 0 }
 0x43a   : > { %11226 = vmatpush3.bf16.xpose.msra.mxu0 %v3166_v28  ;;  %11227 = vmatprep.mubr.msk.bf16.mxu0 %vm12713_vm0, %v16112_v8  ;;  %v3459_v50 = vpop.permute.xlu0 %3458 }
 0x43b   : > { %11237 = vmatprep.subr.bf16.mxu0 %v16112_v8 }
 0x43e   : > { %v3767_v53 = vpop.permute.xlu0 %3766 }
 0x43f   : > { %v3772_v45 = vsel %vm2024_vm2, %v3767_v53, 0 }
 0x441   : > { %11228 = vmatmul.mubr.msk.bf16.vlgmr.msra.gmra.mrb[104].mxu0 %vm1075_vm1, %v3159_v32 }
 0x442   : > { %11238 = vmatpush3.bf16.xpose.msra.mxu0 %v3266_v18  ;;  %11239 = vmatprep.mubr.msk.bf16.mxu0 %vm12713_vm0, %v16112_v8  ;;  %v13919_v3 = vpop.permute.xlu0 %3862 }
 0x443   : > { %11249 = vmatprep.subr.bf16.mxu0 %v16112_v8 }
 0x449   : > { %11240 = vmatmul.mubr.msk.bf16.vlgmr.msra.gmra.mrb[108].mxu0 %vm1075_vm1, %v3259_v42 }
 0x44a   : > { %11250 = vmatpush3.bf16.xpose.msra.mxu0 %v3366_v2  ;;  %11251 = vmatprep.mubr.msk.bf16.mxu0 %vm12713_vm0, %v16112_v8  ;;  %v2816_v2 = vsel %vm1075_vm1, %v13719_v24, 0 }
 0x44b   : > { %11261 = vmatprep.subr.bf16.mxu0 %v16112_v8 }
 0x451   : > { %11252 = vmatmul.mubr.msk.bf16.vlgmr.msra.gmra.mrb[112].mxu0 %vm1075_vm1, %v3359_v0  ;;  %v1972_v32 = vpop.xlane.xlu1 %1971 }
 0x452   : > { %11262 = vmatpush3.bf16.xpose.msra.mxu0 %v3466_v44  ;;  %12206 = vrcp.f32 %v1972_v32  ;;  %11263 = vmatprep.mubr.msk.bf16.mxu0 %vm12713_vm0, %v16112_v8 }
 0x453   : > { %11273 = vmatprep.subr.bf16.mxu0 %v16112_v8 }
 0x455   : > { %v2809_v58 = vpop.permute.xlu1 %2808 }
 0x459   : > { %11264 = vmatmul.mubr.msk.bf16.vlgmr.msra.gmra.mrb[116].mxu0 %vm1075_vm1, %v3459_v50  ;;  %v2911_v42 = vpop.permute.xlu1 %2910 }
 0x45a   : > { %11274 = vmatpush3.bf16.msra.mxu0 %v3772_v45  ;;  %11275 = vmatprep.mubr.msk.bf16.mxu0 %vm12713_vm0, %v16112_v8  ;;  %v2916_v44 = vsel %vm1075_vm1, %v2911_v42, 0 }
 0x45b   : > { %11285 = vmatprep.subr.bf16.mxu0 %v16112_v8 }
 0x45c   : > { %v12207_v28 = vpop.eup %12206 }
 0x45d   : > { %v2909_v1 = vpop.permute.xlu1 %2908  ;;  %v2004_v18 = vmul.f32 %v12207_v28, %v13554_v29 }
 0x45f   : > { %v2020_v0 = vpack.c.bf16 %v2004_v18, %v2004_v18 }
 0x461   : > { %11174 = vmatmul.mubr.msk.bf16.vlgmr.msra.gmra.mrb[84].mxu1 %vm1828_vm3, %v2020_v0  ;;  %v3011_v37 = vpop.permute.xlu1 %3010 }
 0x462   : > { %11184 = vmatpush3.bf16.xpose.msra.mxu1 %v2816_v2  ;;  %11185 = vmatprep.mubr.msk.bf16.mxu1 %vm12713_vm0, %v16112_v8  ;;  %v3016_v24 = vsel %vm1075_vm1, %v3011_v37, 0 }
 0x463   : > { %11195 = vmatprep.subr.bf16.mxu1 %v16112_v8 }
 0x465   : > { %v3009_v50 = vpop.permute.xlu1 %3008 }
 0x469   : > { %11186 = vmatmul.mubr.msk.bf16.vlgmr.msra.gmra.mrb[88].mxu1 %vm1075_vm1, %v2809_v58  ;;  %v3111_v32 = vpop.permute.xlu1 %3110 }
 0x46a   : > { %11196 = vmatpush3.bf16.xpose.msra.mxu1 %v2916_v44  ;;  %11197 = vmatprep.mubr.msk.bf16.mxu1 %vm12713_vm0, %v16112_v8  ;;  %v3116_v45 = vsel %vm1075_vm1, %v3111_v32, 0 }
 0x46b   : > { %11207 = vmatprep.subr.bf16.mxu1 %v16112_v8 }
 0x46d   : > { %v3109_v29 = vpop.permute.xlu1 %3108 }
 0x471   : > { %11198 = vmatmul.mubr.msk.bf16.vlgmr.msra.gmra.mrb[92].mxu1 %vm1075_vm1, %v2909_v1  ;;  %v3211_v53 = vpop.permute.xlu1 %3210 }
 0x472   : > { %11208 = vmatpush3.bf16.xpose.msra.mxu1 %v3016_v24  ;;  %11209 = vmatprep.mubr.msk.bf16.mxu1 %vm12713_vm0, %v16112_v8  ;;  %v3216_v1 = vsel %vm1075_vm1, %v3211_v53, 0 }
 0x473   : > { %11219 = vmatprep.subr.bf16.mxu1 %v16112_v8 }
 0x475   : > { %v3209_v58 = vpop.permute.xlu1 %3208 }
 0x479   : > { %11210 = vmatmul.mubr.msk.bf16.vlgmr.msra.gmra.mrb[96].mxu1 %vm1075_vm1, %v3009_v50  ;;  %v3311_v42 = vpop.permute.xlu1 %3310 }
 0x47a   : > { %11220 = vmatpush3.bf16.xpose.msra.mxu1 %v3116_v45  ;;  %11221 = vmatprep.mubr.msk.bf16.mxu1 %vm12713_vm0, %v16112_v8  ;;  %v3316_v0 = vsel %vm1075_vm1, %v3311_v42, 0 }
 0x47b   : > { %11231 = vmatprep.subr.bf16.mxu1 %v16112_v8 }
 0x47d   : > { %v3309_v28 = vpop.permute.xlu1 %3308 }
 0x481   : > { %11222 = vmatmul.mubr.msk.bf16.vlgmr.msra.gmra.mrb[100].mxu1 %vm1075_vm1, %v3109_v29  ;;  %v3411_v18 = vpop.permute.xlu1 %3410 }
 0x482   : > { %11232 = vmatpush3.bf16.xpose.msra.mxu1 %v3216_v1  ;;  %11233 = vmatprep.mubr.msk.bf16.mxu1 %vm12713_vm0, %v16112_v8  ;;  %v3416_v37 = vsel %vm1075_vm1, %v3411_v18, 0 }
 0x483   : > { %11243 = vmatprep.subr.bf16.mxu1 %v16112_v8 }
 0x485   : > { %v3409_v2 = vpop.permute.xlu1 %3408 }
 0x489   : > { %11234 = vmatmul.mubr.msk.bf16.vlgmr.msra.gmra.mrb[104].mxu1 %vm1075_vm1, %v3209_v58  ;;  %v3511_v44 = vpop.permute.xlu1 %3510 }
 0x48a   : > { %11244 = vmatpush3.bf16.xpose.msra.mxu1 %v3316_v0  ;;  %11245 = vmatprep.mubr.msk.bf16.mxu1 %vm12713_vm0, %v16112_v8  ;;  %v3516_v58 = vsel %vm1075_vm1, %v3511_v44, 0 }
 0x48b   : > { %11255 = vmatprep.subr.bf16.mxu1 %v16112_v8 }
 0x48d   : > { %v3509_v53 = vpop.permute.xlu1 %3508 }
 0x491   : > { %11246 = vmatmul.mubr.msk.bf16.vlgmr.msra.gmra.mrb[108].mxu1 %vm1075_vm1, %v3309_v28  ;;  %v13816_v50 = vpop.f32.mrb[56].mxu0  ;;  %v3815_v18 = vpop.permute.xlu1 %3814 }
 0x492   : > { %16133 = vst [vmem:[#allocation19_spill] sm:$0xff] %v13816_v50  ;;  %11256 = vmatpush3.bf16.xpose.msra.mxu1 %v3416_v37  ;;  %v11085_v32 = vpop.f32.mrb[57].mxu0  ;;  %11257 = vmatprep.mubr.msk.bf16.mxu1 %vm12713_vm0, %v16112_v8  ;;  %v3820_v0 = vsel %vm2024_vm2, %v3815_v18, 0 }
 0x493   : > { %v2065_v29 = vpop.f32.mrb[58].mxu0  ;;  %11267 = vmatprep.subr.bf16.mxu1 %v16112_v8 }
 0x494   : > { %v11086_v24 = vpop.f32.mrb[59].mxu0 }
 0x499   : > { %11258 = vmatmul.mubr.msk.bf16.vlgmr.msra.gmra.mrb[112].mxu1 %vm1075_vm1, %v3409_v2  ;;  %v13823_v45 = vpop.f32.mrb[56].mxu1 }
 0x49a   : > { %16134 = vst [vmem:[#allocation21_spill] sm:$0xff] %v13823_v45  ;;  %11268 = vmatpush3.bf16.xpose.msra.mxu1 %v3516_v58  ;;  %v11091_v42 = vpop.f32.mrb[57].mxu1  ;;  %11269 = vmatprep.mubr.msk.bf16.mxu1 %vm12713_vm0, %v16112_v8 }
 0x49b   : > { %v2111_v28 = vpop.f32.mrb[58].mxu1  ;;  %11279 = vmatprep.subr.bf16.mxu1 %v16112_v8 }
 0x49c   : > { %v11092_v1 = vpop.f32.mrb[59].mxu1 }
 0x4a1   : > { %11270 = vmatmul.mubr.msk.bf16.vlgmr.msra.gmra.mrb[116].mxu1 %vm1075_vm1, %v3509_v53  ;;  %v13830_v37 = vpop.f32.mrb[60].mxu0 }
 0x4a2   : > { %11280 = vmatpush3.bf16.msra.mxu1 %v3820_v0  ;;  %16135 = vst [vmem:[#allocation26_spill] sm:$0xff] %v13830_v37  ;;  %11281 = vmatprep.mubr.msk.bf16.mxu1 %vm12713_vm0, %v16112_v8  ;;  %v11097_v2 = vpop.f32.mrb[61].mxu0 }
 0x4a3   : > { %11291 = vmatprep.subr.bf16.mxu1 %v16112_v8  ;;  %v2157_v44 = vpop.f32.mrb[62].mxu0 }
 0x4a4   : > { %v11098_v32 = vpop.f32.mrb[63].mxu0 }
 0x4a9   : > { %v13835_v29 = vpop.f32.mrb[64].mxu0 }
 0x4aa   : > { %16136 = vst [vmem:[#allocation24_spill] sm:$0xff] %v13835_v29  ;;  %v13837_v24 = vpop.f32.mrb[60].mxu1  ;;  %v11109_v58 = vpop.f32.mrb[65].mxu0 }
 0x4ab   : > { %16137 = vst [vmem:[#allocation31_spill] sm:$0xff] %v13837_v24  ;;  %v11103_v42 = vpop.f32.mrb[61].mxu1  ;;  %v2249_v28 = vpop.f32.mrb[66].mxu0 }
 0x4ac   : > { %v2203_v1 = vpop.f32.mrb[62].mxu1  ;;  %v11110_v53 = vpop.f32.mrb[67].mxu0 }
 0x4ad   : > { %v11104_v18 = vpop.f32.mrb[63].mxu1 }
 0x4b1   : > { %v13839_v0 = vpop.f32.mrb[68].mxu0 }
 0x4b2   : > { %16138 = vst [vmem:[#allocation28_spill] sm:$0xff] %v13839_v0  ;;  %v13841_v37 = vpop.f32.mrb[64].mxu1  ;;  %v11121_v50 = vpop.f32.mrb[69].mxu0 }
 0x4b3   : > { %16139 = vst [vmem:[#allocation33_spill] sm:$0xff] %v13841_v37  ;;  %v11115_v2 = vpop.f32.mrb[65].mxu1  ;;  %v2341_v45 = vpop.f32.mrb[70].mxu0 }
 0x4b4   : > { %v2295_v5 = vpop.f32.mrb[66].mxu1  ;;  %v11122_v44 = vpop.f32.mrb[71].mxu0 }
 0x4b5   : > { %v11116_v32 = vpop.f32.mrb[67].mxu1 }
 0x4b9   : > { %v13843_v51 = vpop.f32.mrb[72].mxu0 }
 0x4ba   : > { %16140 = vst [vmem:[#allocation32_spill] sm:$0xff] %v13843_v51  ;;  %v13845_v29 = vpop.f32.mrb[68].mxu1  ;;  %v11133_v58 = vpop.f32.mrb[73].mxu0 }
 0x4bb   : > { %16141 = vst [vmem:[#allocation35_spill] sm:$0xff] %v13845_v29  ;;  %v11127_v42 = vpop.f32.mrb[69].mxu1  ;;  %v2433_v28 = vpop.f32.mrb[74].mxu0 }
 0x4bc   : > { %v2387_v1 = vpop.f32.mrb[70].mxu1  ;;  %v11134_v53 = vpop.f32.mrb[75].mxu0 }
 0x4bd   : > { %v11128_v18 = vpop.f32.mrb[71].mxu1 }
 0x4c1   : > { %v13847_v24 = vpop.f32.mrb[76].mxu0 }
 0x4c2   : > { %16142 = vst [vmem:[#allocation20_spill] sm:$0xff] %v13847_v24  ;;  %v13849_v0 = vpop.f32.mrb[72].mxu1  ;;  %v11145_v50 = vpop.f32.mrb[77].mxu0 }
 0x4c3   : > { %16143 = vst [vmem:[#allocation47_spill] sm:$0xff] %v13849_v0  ;;  %v11139_v2 = vpop.f32.mrb[73].mxu1  ;;  %v2525_v45 = vpop.f32.mrb[78].mxu0 }
 0x4c4   : > { %v2479_v5 = vpop.f32.mrb[74].mxu1  ;;  %v11146_v44 = vpop.f32.mrb[79].mxu0 }
 0x4c5   : > { %v11140_v32 = vpop.f32.mrb[75].mxu1 }
 0x4c9   : > { %v13851_v37 = vpop.f32.mrb[80].mxu0 }
 0x4ca   : > { %16144 = vst [vmem:[#allocation48_spill] sm:$0xff] %v13851_v37  ;;  %v13853_v51 = vpop.f32.mrb[76].mxu1  ;;  %v11157_v58 = vpop.f32.mrb[81].mxu0 }
 0x4cb   : > { %16145 = vst [vmem:[#allocation49_spill] sm:$0xff] %v13853_v51  ;;  %v11151_v42 = vpop.f32.mrb[77].mxu1  ;;  %v2617_v28 = vpop.f32.mrb[82].mxu0 }
 0x4cc   : > { %v2571_v1 = vpop.f32.mrb[78].mxu1  ;;  %v11158_v53 = vpop.f32.mrb[83].mxu0 }
 0x4cd   : > { %v11152_v18 = vpop.f32.mrb[79].mxu1 }
 0x4d1   : > { %v13855_v29 = vpop.f32.mrb[84].mxu0 }
 0x4d2   : > { %16146 = vst [vmem:[#allocation50_spill] sm:$0xff] %v13855_v29  ;;  %v11169_v24 = vpop.f32.mrb[85].mxu0 }
 0x4d3   : > { %v2709_v0 = vpop.f32.mrb[86].mxu0 }
 0x4d4   : > { %v11170_v50 = vpop.f32.mrb[87].mxu0 }
 0x4f4   : > { %v2802_v2 = vpop.f32.mrb[88].mxu0 }
 0x4f5   : > { %v11181_v45 = vpop.f32.mrb[89].mxu0  ;;  %v13857_v5 = vmul.f32 0.17677669, %v2802_v2 }
 0x4f6   : > { %v2805_v44 = vpop.f32.mrb[90].mxu0 }
 0x4f7   : > { %v11182_v32 = vpop.f32.mrb[91].mxu0  ;;  %v3574_v37 = vsel %vm1828_vm3, %v13857_v5, -inf }
 0x4f8   : > { %3575 = vmax.xlane.f32.xlu0 %v3574_v37 }
 0x4fc   : > { %v2902_v58 = vpop.f32.mrb[92].mxu0 }
 0x4fd   : > { %v11193_v42 = vpop.f32.mrb[93].mxu0  ;;  %v13861_v28 = vmul.f32 0.17677669, %v2902_v58 }
 0x4fe   : > { %v2905_v1 = vpop.f32.mrb[94].mxu0 }
 0x4ff   : > { %v13863_v53 = vpop.f32.mrb[80].mxu1  ;;  %v11194_v24 = vpop.f32.mrb[95].mxu0  ;;  %v3580_v0 = vsel %vm1828_vm3, %v13861_v28, -inf }
 0x500   : > { %16147 = vst [vmem:[#allocation51_spill] sm:$0xff] %v13863_v53  ;;  %3581 = vmax.xlane.f32.xlu0 %v3580_v0  ;;  %v11163_v18 = vpop.f32.mrb[81].mxu1 }
 0x501   : > { %v2663_v50 = vpop.f32.mrb[82].mxu1 }
 0x502   : > { %v11164_v2 = vpop.f32.mrb[83].mxu1 }
 0x504   : > { %v3002_v45 = vpop.f32.mrb[96].mxu0 }
 0x505   : > { %v11205_v44 = vpop.f32.mrb[97].mxu0 }
 0x506   : > { %v3005_v32 = vpop.f32.mrb[98].mxu0 }
 0x507   : > { %v11206_v29 = vpop.f32.mrb[99].mxu0 }
 0x50c   : > { %v3102_v37 = vpop.f32.mrb[100].mxu0 }
 0x50d   : > { %v11217_v51 = vpop.f32.mrb[101].mxu0 }
 0x50e   : > { %v3105_v42 = vpop.f32.mrb[102].mxu0 }
 0x50f   : > { %v11218_v58 = vpop.f32.mrb[103].mxu0 }
 0x514   : > { %v3202_v55 = vpop.f32.mrb[104].mxu0 }
 0x515   : > { %v11229_v1 = vpop.f32.mrb[105].mxu0 }
 0x516   : > { %v3205_v19 = vpop.f32.mrb[106].mxu0 }
 0x517   : > { %v11230_v53 = vpop.f32.mrb[107].mxu0 }
 0x51c   : > { %v3302_v24 = vpop.f32.mrb[108].mxu0 }
 0x51d   : > { %v11241_v30 = vpop.f32.mrb[109].mxu0 }
 0x51e   : > { %v3305_v54 = vpop.f32.mrb[110].mxu0 }
 0x51f   : > { %v11242_v57 = vpop.f32.mrb[111].mxu0 }
 0x524   : > { %v3402_v0 = vpop.f32.mrb[112].mxu0 }
 0x525   : > { %v11253_v18 = vpop.f32.mrb[113].mxu0 }
 0x526   : > { %v3405_v50 = vpop.f32.mrb[114].mxu0 }
 0x527   : > { %v11254_v2 = vpop.f32.mrb[115].mxu0 }
 0x52c   : > { %v3502_v34 = vpop.f32.mrb[116].mxu0 }
 0x52d   : > { %v11265_v44 = vpop.f32.mrb[117].mxu0 }
 0x52e   : > { %v3505_v32 = vpop.f32.mrb[118].mxu0 }
 0x52f   : > { %v11266_v29 = vpop.f32.mrb[119].mxu0  ;;  %v13875_v32 = vmul.f32 0.17677669, %v3002_v45 }
 0x534   : > { %v13867_v17 = vpop.f32.mrb[84].mxu1 }
 0x535   : > { %16148 = vst [vmem:[#allocation52_spill] sm:$0xff] %v13867_v17  ;;  %v11175_v51 = vpop.f32.mrb[85].mxu1 }
 0x536   : > { %v2755_v42 = vpop.f32.mrb[86].mxu1 }
 0x537   : > { %v11176_v58 = vpop.f32.mrb[87].mxu1  ;;  %v13879_v42 = vmul.f32 0.17677669, %v3102_v37  ;;  %v13891_v37 = vmul.f32 0.17677669, %v3302_v24 }
 0x538   : > { %v3586_v58 = vsel %vm1828_vm3, %v13875_v32, -inf  ;;  %v13903_v24 = vmul.f32 0.17677669, %v3502_v34 }
 0x53c   : > { %v2852_v1 = vpop.f32.mrb[88].mxu1 }
 0x53d   : > { %v11187_v19 = vpop.f32.mrb[89].mxu1  ;;  %v13869_v53 = vmul.f32 0.17677669, %v2852_v1 }
 0x53e   : > { %v2855_v30 = vpop.f32.mrb[90].mxu1 }
 0x53f   : > { %v11188_v54 = vpop.f32.mrb[91].mxu1  ;;  %v3577_v57 = vsel %vm1828_vm3, %v13869_v53, -inf }
 0x540   : > { %3578 = vmax.xlane.f32.xlu1 %v3577_v57  ;;  %v13885_v57 = vmul.f32 0.17677669, %v3202_v55 }
 0x544   : > { %v2952_v18 = vpop.f32.mrb[92].mxu1 }
 0x545   : > { %v11199_v50 = vpop.f32.mrb[93].mxu1  ;;  %v13873_v2 = vmul.f32 0.17677669, %v2952_v18  ;;  %v3592_v18 = vsel %vm1828_vm3, %v13879_v42, -inf }
 0x546   : > { %v2955_v44 = vpop.f32.mrb[94].mxu1 }
 0x547   : > { %v11200_v29 = vpop.f32.mrb[95].mxu1  ;;  %v3583_v51 = vsel %vm1828_vm3, %v13873_v2, -inf  ;;  %v3598_v44 = vsel %vm1828_vm3, %v13885_v57, -inf }
 0x548   : > { %3584 = vmax.xlane.f32.xlu0 %v3583_v51 }
 0x54c   : > { %3587 = vmax.xlane.f32.xlu0 %v3586_v58  ;;  %v3052_v1 = vpop.f32.mrb[96].mxu1 }
 0x54d   : > { %v13883_v19 = vmul.f32 0.17677669, %v3052_v1  ;;  %v11211_v30 = vpop.f32.mrb[97].mxu1  ;;  %v13897_v1 = vmul.f32 0.17677669, %v3402_v0 }
 0x54e   : > { %v3055_v54 = vpop.f32.mrb[98].mxu1 }
 0x54f   : > { %v11212_v45 = vpop.f32.mrb[99].mxu1  ;;  %v3589_v50 = vsel %vm1828_vm3, %v13883_v19, -inf  ;;  %v3604_v54 = vsel %vm1828_vm3, %v13891_v37, -inf }
 0x550   : > { %3593 = vmax.xlane.f32.xlu0 %v3592_v18  ;;  %3590 = vmax.xlane.f32.xlu1 %v3589_v50  ;;  %v3610_v18 = vsel %vm1828_vm3, %v13897_v1, -inf }
 0x554   : > { %3599 = vmax.xlane.f32.xlu0 %v3598_v44  ;;  %v3152_v29 = vpop.f32.mrb[100].mxu1 }
 0x555   : > { %v13895_v51 = vmul.f32 0.17677669, %v3152_v29  ;;  %v11223_v55 = vpop.f32.mrb[101].mxu1 }
 0x556   : > { %v3155_v58 = vpop.f32.mrb[102].mxu1 }
 0x557   : > { %v11224_v30 = vpop.f32.mrb[103].mxu1  ;;  %v3595_v45 = vsel %vm1828_vm3, %v13895_v51, -inf  ;;  %v3616_v58 = vsel %vm1828_vm3, %v13903_v24, -inf }
 0x558   : > { %3605 = vmax.xlane.f32.xlu0 %v3604_v54  ;;  %3596 = vmax.xlane.f32.xlu1 %v3595_v45 }
 0x55c   : > { %3611 = vmax.xlane.f32.xlu0 %v3610_v18  ;;  %v3252_v50 = vpop.f32.mrb[104].mxu1 }
 0x55d   : > { %v13907_v44 = vmul.f32 0.17677669, %v3252_v50  ;;  %v11235_v0 = vpop.f32.mrb[105].mxu1 }
 0x55e   : > { %v3255_v29 = vpop.f32.mrb[106].mxu1 }
 0x55f   : > { %v11236_v55 = vpop.f32.mrb[107].mxu1  ;;  %v3601_v30 = vsel %vm1828_vm3, %v13907_v44, -inf }
 0x560   : > { %3617 = vmax.xlane.f32.xlu0 %v3616_v58  ;;  %3602 = vmax.xlane.f32.xlu1 %v3601_v30 }
 0x564   : > { %v3352_v34 = vpop.f32.mrb[108].mxu1 }
 0x565   : > { %v13913_v54 = vmul.f32 0.17677669, %v3352_v34  ;;  %v11247_v45 = vpop.f32.mrb[109].mxu1  ;;  %v13923_v34 = vpop.permute.xlu0 %3958 }
 0x566   : > { %v3355_v17 = vpop.f32.mrb[110].mxu1 }
 0x567   : > { %v11248_v18 = vpop.f32.mrb[111].mxu1  ;;  %v3607_v50 = vsel %vm1828_vm3, %v13913_v54, -inf }
 0x568   : > { %3608 = vmax.xlane.f32.xlu1 %v3607_v50 }
 0x569   : > { %v13927_v50 = vpop.permute.xlu0 %4054 }
 0x56a   : > { %16149 = vst [vmem:[#allocation53_spill] sm:$0xff] %v13927_v50 }
 0x56c   : > { %v3452_v0 = vpop.f32.mrb[112].mxu1 }
 0x56d   : > { %v13917_v29 = vmul.f32 0.17677669, %v3452_v0  ;;  %v11259_v55 = vpop.f32.mrb[113].mxu1  ;;  %v13929_v0 = vpop.permute.xlu0 %4150 }
 0x56e   : > { %v3455_v49 = vpop.f32.mrb[114].mxu1  ;;  %16150 = vst [vmem:[#allocation54_spill] sm:$0xff] %v13929_v0 }
 0x56f   : > { %v11260_v25 = vpop.f32.mrb[115].mxu1  ;;  %v3613_v58 = vsel %vm1828_vm3, %v13917_v29, -inf }
 0x570   : > { %3614 = vmax.xlane.f32.xlu1 %v3613_v58 }
 0x574   : > { %v3552_v30 = vpop.f32.mrb[116].mxu1 }
 0x575   : > { %v11271_v17 = vpop.f32.mrb[117].mxu1 }
 0x576   : > { %4342 = vrot.lane.b32.xlu0 %v13648_v36, %s12714_s22  ;;  %v3555_v45 = vpop.f32.mrb[118].mxu1 }
 0x577   : > { %v11272_v18 = vpop.f32.mrb[119].mxu1 }
 0x581   : > { %4390 = vrot.lane.b32.xlu1 %v13681_v46, %s12714_s22 }
 0x585   : > { %v3576_v25 = vpop.xlane.xlu0 %3575 }
 0x586   : > { %v3622_v49 = vsub.f32 %v13857_v5, %v3576_v25  ;;  %v13943_v5 = vmul.f32 0.17677669, %v3552_v30 }
 0x588   : > { %v3638_v55 = vmul.f32 1.442695, %v3622_v49  ;;  %v3619_v25 = vsel %vm1828_vm3, %v13943_v5, -inf }
 0x58a   : > { %12208 = vpow2.f32 %v3638_v55 }
 0x58d   : > { %v3582_v58 = vpop.xlane.xlu0 %3581 }
 0x58e   : > { %v3624_v17 = vsub.f32 %v13861_v28, %v3582_v58  ;;  %v13947_v28 = vpop.permute.xlu1 %3910 }
 0x590   : > { %v3642_v15 = vmul.f32 1.442695, %v3624_v17 }
 0x592   : > { %12210 = vpow2.f32 %v3642_v15  ;;  %v13949_v15 = vpop.permute.xlu1 %4006 }
 0x594   : > { %v13935_v36 = vpop.eup %12208 }
 0x595   : > { %v3670_v45 = vsel %vm1828_vm3, %v13935_v36, 0.0 }
 0x596   : > { %3671 = vadd.xlane.f32.xlu0 %v3670_v45  ;;  %v13951_v49 = vpop.permute.xlu1 %4102 }
 0x597   : > { %16151 = vst [vmem:[#allocation55_spill] sm:$0xff] %v13951_v49 }
 0x59a   : > { %v13953_v55 = vpop.permute.xlu1 %4198 }
 0x59b   : > { %16152 = vst [vmem:[#allocation56_spill] sm:$0xff] %v13953_v55 }
 0x59c   : > { %v13939_v18 = vpop.eup %12210 }
 0x59d   : > { %v3676_v46 = vsel %vm1828_vm3, %v13939_v18, 0.0 }
 0x59e   : > { %3677 = vadd.xlane.f32.xlu0 %v3676_v46  ;;  %v13955_v58 = vpop.permute.xlu1 %4246 }
 0x59f   : > { %16153 = vst [vmem:[#allocation57_spill] sm:$0xff] %v13955_v58 }
 0x5a2   : > { %v13957_v17 = vpop.permute.xlu1 %4294 }
 0x5a3   : > { %16154 = vst [vmem:[#allocation58_spill] sm:$0xff] %v13957_v17 }
 0x5a5   : > { %3620 = vmax.xlane.f32.xlu1 %v3619_v25 }
 0x5cd   : > { %v3579_v45 = vpop.xlane.xlu1 %3578 }
 0x5ce   : > { %v3623_v46 = vsub.f32 %v13869_v53, %v3579_v45 }
 0x5d0   : > { %v3640_v30 = vmul.f32 1.442695, %v3623_v46 }
 0x5d2   : > { %12212 = vpow2.f32 %v3640_v30 }
 0x5d5   : > { %v3585_v0 = vpop.xlane.xlu0 %3584 }
 0x5d6   : > { %v3625_v25 = vsub.f32 %v13873_v2, %v3585_v0 }
 0x5d8   : > { %v3644_v10 = vmul.f32 1.442695, %v3625_v25 }
 0x5d9   : > { %v3588_v40 = vpop.xlane.xlu0 %3587 }
 0x5da   : > { %12214 = vpow2.f32 %v3644_v10  ;;  %v3626_v33 = vsub.f32 %v13875_v32, %v3588_v40 }
 0x5dc   : > { %v13962_v49 = vpop.eup %12212  ;;  %v3646_v55 = vmul.f32 1.442695, %v3626_v33 }
 0x5dd   : > { %v3594_v50 = vpop.xlane.xlu0 %3593  ;;  %v3591_v58 = vpop.xlane.xlu1 %3590  ;;  %v3673_v17 = vsel %vm1828_vm3, %v13962_v49, 0.0 }
 0x5de   : > { %12216 = vpow2.f32 %v3646_v55  ;;  %v3628_v53 = vsub.f32 %v13879_v42, %v3594_v50  ;;  %v3627_v45 = vsub.f32 %v13883_v19, %v3591_v58  ;;  %3674 = vadd.xlane.f32.xlu1 %v3673_v17 }
 0x5e0   : > { %v3650_v2 = vmul.f32 1.442695, %v3628_v53  ;;  %v3648_v0 = vmul.f32 1.442695, %v3627_v45 }
 0x5e1   : > { %v3600_v46 = vpop.xlane.xlu0 %3599 }
 0x5e2   : > { %12218 = vpow2.f32 %v3650_v2  ;;  %v3630_v10 = vsub.f32 %v13885_v57, %v3600_v46 }
 0x5e3   : > { %12220 = vpow2.f32 %v3648_v0 }
 0x5e4   : > { %v13968_v40 = vpop.eup %12214  ;;  %v3654_v50 = vmul.f32 1.442695, %v3630_v10 }
 0x5e5   : > { %v3606_v33 = vpop.xlane.xlu0 %3605  ;;  %v3597_v32 = vpop.xlane.xlu1 %3596  ;;  %v3679_v30 = vsel %vm1828_vm3, %v13968_v40, 0.0 }
 0x5e6   : > { %v3629_v55 = vsub.f32 %v13895_v51, %v3597_v32  ;;  %3680 = vadd.xlane.f32.xlu1 %v3679_v30  ;;  %v3632_v58 = vsub.f32 %v13891_v37, %v3606_v33 }
 0x5e8   : > { %v13974_v42 = vpop.eup %12216  ;;  %v3652_v19 = vmul.f32 1.442695, %v3629_v55  ;;  %v3658_v45 = vmul.f32 1.442695, %v3632_v58 }
 0x5e9   : > { %v3682_v17 = vsel %vm1828_vm3, %v13974_v42, 0.0  ;;  %v3612_v25 = vpop.xlane.xlu0 %3611 }
 0x5ea   : > { %3683 = vadd.xlane.f32.xlu0 %v3682_v17  ;;  %12222 = vpow2.f32 %v3652_v19  ;;  %v3634_v51 = vsub.f32 %v13897_v1, %v3612_v25 }
 0x5eb   : > { %12224 = vpow2.f32 %v3654_v50 }
 0x5ec   : > { %v13979_v57 = vpop.eup %12218  ;;  %12226 = vpow2.f32 %v3658_v45  ;;  %v3662_v33 = vmul.f32 1.442695, %v3634_v51 }
 0x5ed   : > { %v13981_v53 = vpop.eup %12220  ;;  %v3603_v2 = vpop.xlane.xlu1 %3602  ;;  %v3688_v0 = vsel %vm1828_vm3, %v13979_v57, 0.0 }
 0x5ee   : > { %v3631_v37 = vsub.f32 %v13907_v44, %v3603_v2  ;;  %3689 = vadd.xlane.f32.xlu0 %v3688_v0  ;;  %v3685_v46 = vsel %vm1828_vm3, %v13981_v53, 0.0 }
 0x5ef   : > { %3686 = vadd.xlane.f32.xlu1 %v3685_v46 }
 0x5f0   : > { %v3656_v10 = vmul.f32 1.442695, %v3631_v37 }
 0x5f2   : > { %12228 = vpow2.f32 %v3656_v10 }
 0x5f3   : > { %12230 = vpow2.f32 %v3662_v33 }
 0x5f4   : > { %v13989_v32 = vpop.eup %12222 }
 0x5f5   : > { %v3609_v30 = vpop.xlane.xlu1 %3608  ;;  %v3691_v55 = vsel %vm1828_vm3, %v13989_v32, 0.0  ;;  %v13994_v19 = vpop.eup %12224 }
 0x5f6   : > { %v3633_v1 = vsub.f32 %v13913_v54, %v3609_v30  ;;  %3692 = vadd.xlane.f32.xlu1 %v3691_v55  ;;  %v3694_v50 = vsel %vm1828_vm3, %v13994_v19, 0.0  ;;  %v13998_v58 = vpop.eup %12226  ;;  %v3618_v30 = vpop.xlane.xlu0 %3617 }
 0x5f7   : > { %v3700_v51 = vsel %vm1828_vm3, %v13998_v58, 0.0  ;;  %v3636_v55 = vsub.f32 %v13903_v24, %v3618_v30 }
 0x5f8   : > { %v3660_v44 = vmul.f32 1.442695, %v3633_v1 }
 0x5fa   : > { %12232 = vpow2.f32 %v3660_v44  ;;  %3695 = vadd.xlane.f32.xlu1 %v3694_v50  ;;  %v14021_v1 = vpop.permute.xlu0 %4342  ;;  %v3666_v50 = vmul.f32 1.442695, %v3636_v55 }
 0x5fc   : > { %v14000_v17 = vpop.eup %12228 }
 0x5fd   : > { %v3615_v25 = vpop.xlane.xlu1 %3614  ;;  %v3697_v54 = vsel %vm1828_vm3, %v14000_v17, 0.0  ;;  %v14007_v2 = vpop.eup %12230 }
 0x5fe   : > { %v3635_v45 = vsub.f32 %v13917_v29, %v3615_v25  ;;  %3698 = vadd.xlane.f32.xlu0 %v3697_v54  ;;  %3701 = vadd.xlane.f32.xlu1 %v3700_v51  ;;  %v3706_v37 = vsel %vm1828_vm3, %v14007_v2, 0.0 }
 0x600   : > { %v3664_v0 = vmul.f32 1.442695, %v3635_v45 }
 0x601   : > { %v14026_v54 = vpop.permute.xlu1 %4390 }
 0x602   : > { %12234 = vpow2.f32 %v3664_v0  ;;  %3707 = vadd.xlane.f32.xlu1 %v3706_v37 }
 0x604   : > { %v14011_v46 = vpop.eup %12232 }
 0x605   : > { %v3703_v29 = vsel %vm1828_vm3, %v14011_v46, 0.0 }
 0x606   : > { %3704 = vadd.xlane.f32.xlu0 %v3703_v29  ;;  %v3868_v29 = vsel %vm2024_vm2, %v13919_v3, 0 }
 0x60c   : > { %v14015_v10 = vpop.eup %12234 }
 0x60d   : > { %v3709_v33 = vsel %vm1828_vm3, %v14015_v10, 0.0 }
 0x60e   : > { %3710 = vadd.xlane.f32.xlu0 %v3709_v33 }
 0x613   : > { %4486 = vrot.lane.b32.xlu1 %v13736_v12, %s12714_s22 }
 0x623   : > { %v3672_v44 = vpop.xlane.xlu0 %3671 }
 0x624   : > { %12236 = vrcp.f32 %v3672_v44  ;;  %4438 = vrot.lane.b32.xlu0 %v13674_v56, %s12714_s22  ;;  %v3964_v44 = vsel %vm2024_vm2, %v13923_v34, 0 }
 0x625   : > { %12238 = vpow2.f32 %v3666_v50 }
 0x62b   : > { %v3678_v25 = vpop.xlane.xlu0 %3677 }
 0x62c   : > { %12240 = vrcp.f32 %v3678_v25 }
 0x62e   : > { %v12237_v45 = vpop.eup %12236 }
 0x62f   : > { %v3719_v51 = vmul.f32 %v12237_v45, %v13935_v36  ;;  %v14033_v33 = vpop.eup %12238 }
 0x630   : > { %v3712_v36 = vsel %vm1828_vm3, %v14033_v33, 0.0 }
 0x631   : > { %v3750_v0 = vpack.c.bf16 %v3719_v51, %v3719_v51 }
 0x632   : > { %v3621_v37 = vpop.xlane.xlu1 %3620 }
 0x633   : > { %v3637_v24 = vsub.f32 %v13943_v5, %v3621_v37  ;;  %11276 = vmatmul.mubr.msk.bf16.vlgmr.msra.gmra.mrb[120].mxu0 %vm1828_vm3, %v3750_v0 }
 0x634   : > { %11286 = vmatpush3.bf16.msra.mxu0 %v3868_v29  ;;  %11287 = vmatprep.mubr.msk.bf16.mxu0 %vm12713_vm0, %v16112_v8  ;;  %v3916_v29 = vsel %vm2024_vm2, %v13947_v28, 0 }
 0x635   : > { %v3668_v30 = vmul.f32 1.442695, %v3637_v24  ;;  %11297 = vmatprep.subr.bf16.mxu0 %v16112_v8 }
 0x636   : > { %v12241_v55 = vpop.eup %12240 }
 0x637   : > { %12242 = vpow2.f32 %v3668_v30  ;;  %v3723_v3 = vmul.f32 %v12241_v55, %v13939_v18  ;;  %3713 = vadd.xlane.f32.xlu1 %v3712_v36 }
 0x639   : > { %v3752_v5 = vpack.c.bf16 %v3723_v3, %v3723_v3  ;;  %v4012_v3 = vsel %vm2024_vm2, %v13949_v15, 0 }
 0x63b   : > { %11288 = vmatmul.mubr.msk.bf16.vlgmr.msra.gmra.mrb[124].mxu0 %vm1828_vm3, %v3752_v5 }
 0x63c   : > { %11298 = vmatpush3.bf16.msra.mxu0 %v3964_v44  ;;  %11299 = vmatprep.mubr.msk.bf16.mxu0 %vm12713_vm0, %v16112_v8 }
 0x63d   : > { %11309 = vmatprep.subr.bf16.mxu0 %v16112_v8 }
 0x641   : > { %v14047_v50 = vpop.eup %12242 }
 0x642   : > { %v3715_v25 = vsel %vm1828_vm3, %v14047_v50, 0.0 }
 0x643   : > { %3716 = vadd.xlane.f32.xlu0 %v3715_v25 }
 0x648   : > { %4586 = vrot.lane.b32.xlu1 %v13072_v6, %s12715_s21 }
 0x64c   : > { %4584 = vrot.lane.b32.xlu1 %v13104_v26, %s12715_s21 }
 0x650   : > { %4686 = vrot.lane.b32.xlu1 %v13124_v38, %s12715_s21 }
 0x654   : > { %4684 = vrot.lane.b32.xlu1 %v13177_v20, %s12715_s21 }
 0x658   : > { %4786 = vrot.lane.b32.xlu1 %v13164_v4, %s12715_s21 }
 0x659   : > { %4536 = vrot.lane.b32.xlu0 %v13064_v62, %s12715_s21 }
 0x65c   : > { %4784 = vrot.lane.b32.xlu1 %v13218_v60, %s12715_s21 }
 0x65d   : > { %4534 = vrot.lane.b32.xlu0 %v13074_v9, %s12715_s21 }
 0x660   : > { %4886 = vrot.lane.b32.xlu1 %v13205_v43, %s12715_s21 }
 0x661   : > { %4636 = vrot.lane.b32.xlu0 %v13088_v14, %s12715_s21 }
 0x664   : > { %4884 = vrot.lane.b32.xlu1 %v13249_v35, %s12715_s21 }
 0x665   : > { %4634 = vrot.lane.b32.xlu0 %v13137_v47, %s12715_s21 }
 0x668   : > { %4986 = vrot.lane.b32.xlu1 %v16120_v16, %s12715_s21 }
 0x669   : > { %4736 = vrot.lane.b32.xlu0 %v13106_v27, %s12715_s21 }
 0x66b   : > { %v3675_v34 = vpop.xlane.xlu1 %3674 }
 0x66c   : > { %12244 = vrcp.f32 %v3675_v34  ;;  %4984 = vrot.lane.b32.xlu1 %v16124_v41, %s12715_s21  ;;  %v16155_v34 = vld [vmem:[#allocation53_spill] sm:$0xff] }
 0x66d   : > { %4734 = vrot.lane.b32.xlu0 %v13126_v39, %s12715_s21 }
 0x670   : > { %5086 = vrot.lane.b32.xlu1 %v16125_v23, %s12715_s21 }
 0x671   : > { %4836 = vrot.lane.b32.xlu0 %v13139_v48, %s12715_s21 }
 0x673   : > { %v3681_v18 = vpop.xlane.xlu1 %3680 }
 0x674   : > { %12246 = vrcp.f32 %v3681_v18  ;;  %5084 = vrot.lane.b32.xlu1 %v16126_v11, %s12715_s21 }
 0x675   : > { %4834 = vrot.lane.b32.xlu0 %v13166_v7, %s12715_s21 }
 0x676   : > { %v12245_v45 = vpop.eup %12244 }
 0x677   : > { %v3684_v51 = vpop.xlane.xlu0 %3683  ;;  %v3721_v0 = vmul.f32 %v12245_v45, %v13962_v49 }
 0x678   : > { %12248 = vrcp.f32 %v3684_v51  ;;  %5186 = vrot.lane.b32.xlu1 %v16127_v52, %s12715_s21  ;;  %v16156_v51 = vld [vmem:[#allocation34_spill] sm:$0xff] }
 0x679   : > { %4936 = vrot.lane.b32.xlu0 %v13179_v22, %s12715_s21  ;;  %v3751_v37 = vpack.c.bf16 %v3721_v0, %v3721_v0  ;;  %v16157_v0 = vld [vmem:[#allocation23_spill] sm:$0xff] }
 0x67b   : > { %v3690_v24 = vpop.xlane.xlu0 %3689  ;;  %11282 = vmatmul.mubr.msk.bf16.vlgmr.msra.gmra.mrb[120].mxu1 %vm1828_vm3, %v3751_v37 }
 0x67c   : > { %12250 = vrcp.f32 %v3690_v24  ;;  %11292 = vmatpush3.bf16.msra.mxu1 %v3916_v29  ;;  %v3687_v30 = vpop.xlane.xlu1 %3686  ;;  %11293 = vmatprep.mubr.msk.bf16.mxu1 %vm12713_vm0, %v16112_v8  ;;  %v16158_v24 = vld [vmem:[#allocation55_spill] sm:$0xff] }
 0x67d   : > { %12252 = vrcp.f32 %v3687_v30  ;;  %5184 = vrot.lane.b32.xlu1 %v16128_v59, %s12715_s21  ;;  %4934 = vrot.lane.b32.xlu0 %v13207_v21, %s12715_s21  ;;  %v4108_v30 = vsel %vm2024_vm2, %v16158_v24, 0  ;;  %v16166_v24 = vld [vmem:[#allocation30_spill] sm:$0xff] }
 0x67e   : > { %v12247_v49 = vpop.eup %12246  ;;  %11303 = vmatprep.subr.bf16.mxu1 %v16112_v8 }
 0x67f   : > { %v3725_v28 = vmul.f32 %v12247_v49, %v13968_v40 }
 0x681   : > { %5286 = vrot.lane.b32.xlu1 %v16129_v61, %s12715_s21  ;;  %5036 = vrot.lane.b32.xlu0 %v13220_v63, %s12715_s21  ;;  %v3753_v55 = vpack.c.bf16 %v3725_v28, %v3725_v28  ;;  %v16159_v28 = vld [vmem:[#allocation40_spill] sm:$0xff] }
 0x682   : > { %v12249_v36 = vpop.eup %12248 }
 0x683   : > { %11294 = vmatmul.mubr.msk.bf16.vlgmr.msra.gmra.mrb[124].mxu1 %vm1828_vm3, %v3753_v55  ;;  %v3727_v5 = vmul.f32 %v12249_v36, %v13974_v42  ;;  %v3693_v44 = vpop.xlane.xlu1 %3692  ;;  %v4060_v42 = vsel %vm2024_vm2, %v16155_v34, 0  ;;  %v16160_v36 = vld [vmem:[#allocation25_spill] sm:$0xff] }
 0x684   : > { %11304 = vmatpush3.bf16.msra.mxu1 %v4012_v3  ;;  %11305 = vmatprep.mubr.msk.bf16.mxu1 %vm12713_vm0, %v16112_v8  ;;  %12254 = vrcp.f32 %v3693_v44  ;;  %v16161_v3 = vld [vmem:[#allocation54_spill] sm:$0xff] }
 0x685   : > { %5284 = vrot.lane.b32.xlu1 %v16130_v13, %s12715_s21  ;;  %5034 = vrot.lane.b32.xlu0 %v13245_v31, %s12715_s21  ;;  %v3754_v40 = vpack.c.bf16 %v3727_v5, %v3727_v5  ;;  %v4156_v5 = vsel %vm2024_vm2, %v16161_v3, 0  ;;  %v16168_v3 = vld [vmem:[#allocation44_spill] sm:$0xff] }
 0x686   : > { %v12251_v25 = vpop.eup %12250  ;;  %11315 = vmatprep.subr.bf16.mxu1 %v16112_v8 }
 0x687   : > { %v12253_v15 = vpop.eup %12252  ;;  %11300 = vmatmul.mubr.msk.bf16.vlgmr.msra.gmra.mrb[128].mxu0 %vm1828_vm3, %v3754_v40  ;;  %v3696_v18 = vpop.xlane.xlu1 %3695  ;;  %v3731_v37 = vmul.f32 %v12251_v25, %v13979_v57  ;;  %v16162_v40 = vld [vmem:[#allocation41_spill] sm:$0xff] }
 0x688   : > { %11310 = vmatpush3.bf16.msra.mxu0 %v4060_v42  ;;  %v3729_v45 = vmul.f32 %v12253_v15, %v13981_v53  ;;  %11311 = vmatprep.mubr.msk.bf16.mxu0 %vm12713_vm0, %v16112_v8  ;;  %12256 = vrcp.f32 %v3696_v18  ;;  %v16163_v15 = vld [vmem:[#allocation27_spill] sm:$0xff] }
 0x689   : > { %5590 = vrot.lane.b32.xlu1 %v16156_v51, %s12715_s21  ;;  %5136 = vrot.lane.b32.xlu0 %v16157_v0, %s12715_s21  ;;  %v3756_v55 = vpack.c.bf16 %v3731_v37, %v3731_v37 }
 0x68a   : > { %v3755_v29 = vpack.c.bf16 %v3729_v45, %v3729_v45  ;;  %11321 = vmatprep.subr.bf16.mxu0 %v16112_v8  ;;  %v16164_v45 = vld [vmem:[#allocation56_spill] sm:$0xff] }
 0x68b   : > { %v3699_v49 = vpop.xlane.xlu0 %3698  ;;  %v3702_v53 = vpop.xlane.xlu1 %3701  ;;  %v4204_v37 = vsel %vm2024_vm2, %v16164_v45, 0 }
 0x68c   : > { %11306 = vmatmul.mubr.msk.bf16.vlgmr.msra.gmra.mrb[128].mxu1 %vm1828_vm3, %v3755_v29  ;;  %12258 = vrcp.f32 %v3699_v49  ;;  %v16165_v29 = vld [vmem:[#allocation42_spill] sm:$0xff] }
 0x68d   : > { %11316 = vmatpush3.bf16.msra.mxu1 %v4108_v30  ;;  %5686 = vrot.lane.b32.xlu1 %v16159_v28, %s12715_s21  ;;  %12260 = vrcp.f32 %v3702_v53 }
 0x68e   : > { %5134 = vrot.lane.b32.xlu0 %v16160_v36, %s12715_s21  ;;  %11317 = vmatprep.mubr.msk.bf16.mxu1 %vm12713_vm0, %v16112_v8  ;;  %v12255_v57 = vpop.eup %12254 }
 0x68f   : > { %11312 = vmatmul.mubr.msk.bf16.vlgmr.msra.gmra.mrb[132].mxu0 %vm1828_vm3, %v3756_v55  ;;  %11327 = vmatprep.subr.bf16.mxu1 %v16112_v8  ;;  %v3733_v44 = vmul.f32 %v12255_v57, %v13989_v32  ;;  %v3708_v25 = vpop.xlane.xlu1 %3707  ;;  %v16167_v55 = vld [vmem:[#allocation57_spill] sm:$0xff] }
 0x690   : > { %11322 = vmatpush3.bf16.msra.mxu0 %v4156_v5  ;;  %11323 = vmatprep.mubr.msk.bf16.mxu0 %vm12713_vm0, %v16112_v8  ;;  %v4252_v57 = vsel %vm2024_vm2, %v16167_v55, 0  ;;  %v16169_v5 = vld [vmem:[#allocation29_spill] sm:$0xff] }
 0x691   : > { %5782 = vrot.lane.b32.xlu1 %v16162_v40, %s12715_s21  ;;  %11333 = vmatprep.subr.bf16.mxu0 %v16112_v8  ;;  %v3757_v34 = vpack.c.bf16 %v3733_v44, %v3733_v44 }
 0x692   : > { %5236 = vrot.lane.b32.xlu0 %v16163_v15, %s12715_s21  ;;  %v12257_v42 = vpop.eup %12256 }
 0x693   : > { %v3705_v18 = vpop.xlane.xlu0 %3704  ;;  %v3735_v32 = vmul.f32 %v12257_v42, %v13994_v19  ;;  %v16170_v42 = vld [vmem:[#allocation58_spill] sm:$0xff] }
 0x694   : > { %12262 = vrcp.f32 %v3705_v18  ;;  %11318 = vmatmul.mubr.msk.bf16.vlgmr.msra.gmra.mrb[132].mxu1 %vm1828_vm3, %v3757_v34  ;;  %v4300_v18 = vsel %vm2024_vm2, %v16170_v42, 0 }
 0x695   : > { %12264 = vrcp.f32 %v3708_v25  ;;  %11328 = vmatpush3.bf16.msra.mxu1 %v4204_v37  ;;  %5878 = vrot.lane.b32.xlu1 %v16165_v29, %s12715_s21  ;;  %v3758_v30 = vpack.c.bf16 %v3735_v32, %v3735_v32  ;;  %v16172_v37 = vld [vmem:[#allocation36_spill] sm:$0xff] }
 0x696   : > { %5234 = vrot.lane.b32.xlu0 %v16166_v24, %s12715_s21  ;;  %11329 = vmatprep.mubr.msk.bf16.mxu1 %vm12713_vm0, %v16112_v8  ;;  %v12259_v49 = vpop.eup %12258 }
 0x697   : > { %11339 = vmatprep.subr.bf16.mxu1 %v16112_v8  ;;  %v12261_v53 = vpop.eup %12260  ;;  %11324 = vmatmul.mubr.msk.bf16.vlgmr.msra.gmra.mrb[136].mxu0 %vm1828_vm3, %v3758_v30  ;;  %v3737_v19 = vmul.f32 %v12259_v49, %v14000_v17  ;;  %v16171_v17 = vld [vmem:[#allocation43_spill] sm:$0xff]  ;;  %v4348_v49 = vsel %vm2024_vm2, %v14021_v1, 0 }
 0x698   : > { %11334 = vmatpush3.bf16.msra.mxu0 %v4252_v57  ;;  %11335 = vmatprep.mubr.msk.bf16.mxu0 %vm12713_vm0, %v16112_v8  ;;  %v3739_v25 = vmul.f32 %v12261_v53, %v13998_v58  ;;  %v16173_v53 = vld [vmem:[#allocation46_spill] sm:$0xff]  ;;  %v16174_v57 = vld [vmem:[#allocation37_spill] sm:$0xff] }
 0x699   : > { %5974 = vrot.lane.b32.xlu1 %v16168_v3, %s12715_s21  ;;  %v3759_v44 = vpack.c.bf16 %v3737_v19, %v3737_v19  ;;  %11345 = vmatprep.subr.bf16.mxu0 %v16112_v8 }
 0x69a   : > { %5542 = vrot.lane.b32.xlu0 %v16169_v5, %s12715_s21  ;;  %v3760_v32 = vpack.c.bf16 %v3739_v25, %v3739_v25  ;;  %v16175_v25 = vld [vmem:[#allocation38_spill] sm:$0xff] }
 0x69b   : > { %v3711_v34 = vpop.xlane.xlu0 %3710 }
 0x69c   : > { %12266 = vrcp.f32 %v3711_v34  ;;  %11330 = vmatmul.mubr.msk.bf16.vlgmr.msra.gmra.mrb[136].mxu1 %vm1828_vm3, %v3759_v44 }
 0x69d   : > { %11340 = vmatpush3.bf16.msra.mxu1 %v4300_v18  ;;  %6022 = vrot.lane.b32.xlu1 %v16171_v17, %s12715_s21 }
 0x69e   : > { %v12263_v45 = vpop.eup %12262  ;;  %5638 = vrot.lane.b32.xlu0 %v16172_v37, %s12715_s21  ;;  %11341 = vmatprep.mubr.msk.bf16.mxu1 %vm12713_vm0, %v16112_v8 }
 0x69f   : > { %v12265_v58 = vpop.eup %12264  ;;  %11351 = vmatprep.subr.bf16.mxu1 %v16112_v8  ;;  %v3741_v30 = vmul.f32 %v12263_v45, %v14011_v46  ;;  %11336 = vmatmul.mubr.msk.bf16.vlgmr.msra.gmra.mrb[140].mxu0 %vm1828_vm3, %v3760_v32  ;;  %v4396_v46 = vsel %vm2024_vm2, %v14026_v54, 0  ;;  %v4439_v1 = vpop.permute.xlu0 %4438  ;;  %v16176_v45 = vld [vmem:[#allocation39_spill] sm:$0xff] }
 0x6a0   : > { %11346 = vmatpush3.bf16.msra.mxu0 %v4348_v49  ;;  %11347 = vmatprep.mubr.msk.bf16.mxu0 %vm12713_vm0, %v16112_v8  ;;  %v3743_v19 = vmul.f32 %v12265_v58, %v14007_v2  ;;  %v4444_v42 = vsel %vm2024_vm2, %v4439_v1, 0  ;;  %v4487_v54 = vpop.permute.xlu1 %4486 }
 0x6a1   : > { %6070 = vrot.lane.b32.xlu1 %v16173_v53, %s12715_s21  ;;  %v3761_v55 = vpack.c.bf16 %v3741_v30, %v3741_v30  ;;  %11357 = vmatprep.subr.bf16.mxu0 %v16112_v8  ;;  %v4492_v32 = vsel %vm2024_vm2, %v4487_v54, 0 }
 0x6a2   : > { %5734 = vrot.lane.b32.xlu0 %v16174_v57, %s12715_s21  ;;  %v3762_v34 = vpack.c.bf16 %v3743_v19, %v3743_v19 }
 0x6a4   : > { %11342 = vmatmul.mubr.msk.bf16.vlgmr.msra.gmra.mrb[140].mxu1 %vm1828_vm3, %v3761_v55 }
 0x6a5   : > { %11352 = vmatpush3.bf16.msra.mxu1 %v4396_v46  ;;  %11353 = vmatprep.mubr.msk.bf16.mxu1 %vm12713_vm0, %v16112_v8 }
 0x6a6   : > { %v12267_v44 = vpop.eup %12266  ;;  %5830 = vrot.lane.b32.xlu0 %v16175_v25, %s12715_s21  ;;  %11363 = vmatprep.subr.bf16.mxu1 %v16112_v8 }
 0x6a7   : > { %v3745_v2 = vmul.f32 %v12267_v44, %v14015_v10  ;;  %11348 = vmatmul.mubr.msk.bf16.vlgmr.msra.gmra.mrb[144].mxu0 %vm1828_vm3, %v3762_v34 }
 0x6a8   : > { %11358 = vmatpush3.bf16.msra.mxu0 %v4444_v42  ;;  %11359 = vmatprep.mubr.msk.bf16.mxu0 %vm12713_vm0, %v16112_v8 }
 0x6a9   : > { %v3763_v18 = vpack.c.bf16 %v3745_v2, %v3745_v2  ;;  %11369 = vmatprep.subr.bf16.mxu0 %v16112_v8 }
 0x6aa   : > { %5926 = vrot.lane.b32.xlu0 %v16176_v45, %s12715_s21 }
 0x6ac   : > { %11354 = vmatmul.mubr.msk.bf16.vlgmr.msra.gmra.mrb[144].mxu1 %vm1828_vm3, %v3763_v18 }
 0x6ad   : > { %11364 = vmatpush3.bf16.msra.mxu1 %v4492_v32  ;;  %11365 = vmatprep.mubr.msk.bf16.mxu1 %vm12713_vm0, %v16112_v8 }
 0x6ae   : > { %11375 = vmatprep.subr.bf16.mxu1 %v16112_v8 }
 0x6c4   : > { %v3714_v10 = vpop.xlane.xlu1 %3713 }
 0x6c5   : > { %12268 = vrcp.f32 %v3714_v10 }
 0x6c8   : > { %v4587_v58 = vpop.permute.xlu1 %4586 }
 0x6cc   : > { %v4585_v30 = vpop.permute.xlu1 %4584 }
 0x6cf   : > { %v12269_v49 = vpop.eup %12268 }
 0x6d0   : > { %v3717_v55 = vpop.xlane.xlu0 %3716  ;;  %v4687_v19 = vpop.permute.xlu1 %4686  ;;  %v3747_v46 = vmul.f32 %v12269_v49, %v14033_v33 }
 0x6d1   : > { %12270 = vrcp.f32 %v3717_v55 }
 0x6d2   : > { %v3764_v1 = vpack.c.bf16 %v3747_v46, %v3747_v46  ;;  %v4592_v46 = vsel %vm1075_vm1, %v4587_v58, 0 }
 0x6d4   : > { %v4537_v44 = vpop.permute.xlu0 %4536  ;;  %11360 = vmatmul.mubr.msk.bf16.vlgmr.msra.gmra.mrb[148].mxu0 %vm1828_vm3, %v3764_v1  ;;  %v4685_v2 = vpop.permute.xlu1 %4684 }
 0x6d5   : > { %v4542_v34 = vsel %vm1075_vm1, %v4537_v44, 0  ;;  %11371 = vmatprep.mubr.msk.bf16.mxu0 %vm12713_vm0, %v16112_v8 }
 0x6d6   : > { %11370 = vmatpush3.bf16.xpose.msra.mxu0 %v4542_v34 }
 0x6d7   : > { %11381 = vmatprep.subr.bf16.mxu0 %v16112_v8 }
 0x6d8   : > { %v4535_v42 = vpop.permute.xlu0 %4534  ;;  %v4787_v54 = vpop.permute.xlu1 %4786 }
 0x6db   : > { %v12271_v18 = vpop.eup %12270 }
 0x6dc   : > { %v4637_v32 = vpop.permute.xlu0 %4636  ;;  %v3749_v10 = vmul.f32 %v12271_v18, %v14047_v50  ;;  %v4785_v49 = vpop.permute.xlu1 %4784 }
 0x6dd   : > { %v4642_v33 = vsel %vm1075_vm1, %v4637_v32, 0  ;;  %11372 = vmatmul.mubr.msk.bf16.vlgmr.msra.gmra.mrb[152].mxu0 %vm1075_vm1, %v4535_v42  ;;  %v4692_v42 = vsel %vm1075_vm1, %v4687_v19, 0 }
 0x6de   : > { %11382 = vmatpush3.bf16.xpose.msra.mxu0 %v4642_v33  ;;  %v3765_v55 = vpack.c.bf16 %v3749_v10, %v3749_v10  ;;  %11383 = vmatprep.mubr.msk.bf16.mxu0 %vm12713_vm0, %v16112_v8 }
 0x6df   : > { %11393 = vmatprep.subr.bf16.mxu0 %v16112_v8 }
 0x6e0   : > { %v4635_v1 = vpop.permute.xlu0 %4634  ;;  %11366 = vmatmul.mubr.msk.bf16.vlgmr.msra.gmra.mrb[148].mxu1 %vm1828_vm3, %v3765_v55  ;;  %v4887_v44 = vpop.permute.xlu1 %4886 }
 0x6e1   : > { %11376 = vmatpush3.bf16.xpose.msra.mxu1 %v4592_v46  ;;  %11377 = vmatprep.mubr.msk.bf16.mxu1 %vm12713_vm0, %v16112_v8 }
 0x6e2   : > { %11387 = vmatprep.subr.bf16.mxu1 %v16112_v8 }
 0x6e4   : > { %v4737_v50 = vpop.permute.xlu0 %4736  ;;  %v4885_v58 = vpop.permute.xlu1 %4884 }
 0x6e5   : > { %v4742_v34 = vsel %vm1075_vm1, %v4737_v50, 0  ;;  %11384 = vmatmul.mubr.msk.bf16.vlgmr.msra.gmra.mrb[156].mxu0 %vm1075_vm1, %v4635_v1 }
 0x6e6   : > { %11394 = vmatpush3.bf16.xpose.msra.mxu0 %v4742_v34  ;;  %11395 = vmatprep.mubr.msk.bf16.mxu0 %vm12713_vm0, %v16112_v8 }
 0x6e7   : > { %11405 = vmatprep.subr.bf16.mxu0 %v16112_v8 }
 0x6e8   : > { %v4735_v18 = vpop.permute.xlu0 %4734  ;;  %11378 = vmatmul.mubr.msk.bf16.vlgmr.msra.gmra.mrb[152].mxu1 %vm1075_vm1, %v4585_v30  ;;  %v4987_v10 = vpop.permute.xlu1 %4986  ;;  %v4792_v30 = vsel %vm1075_vm1, %v4787_v54, 0 }
 0x6e9   : > { %11388 = vmatpush3.bf16.xpose.msra.mxu1 %v4692_v42  ;;  %11389 = vmatprep.mubr.msk.bf16.mxu1 %vm12713_vm0, %v16112_v8 }
 0x6ea   : > { %11399 = vmatprep.subr.bf16.mxu1 %v16112_v8 }
 0x6ec   : > { %v4837_v32 = vpop.permute.xlu0 %4836  ;;  %v4985_v55 = vpop.permute.xlu1 %4984 }
 0x6ed   : > { %v4842_v33 = vsel %vm1075_vm1, %v4837_v32, 0  ;;  %11396 = vmatmul.mubr.msk.bf16.vlgmr.msra.gmra.mrb[160].mxu0 %vm1075_vm1, %v4735_v18 }
 0x6ee   : > { %11406 = vmatpush3.bf16.xpose.msra.mxu0 %v4842_v33  ;;  %11407 = vmatprep.mubr.msk.bf16.mxu0 %vm12713_vm0, %v16112_v8 }
 0x6ef   : > { %11417 = vmatprep.subr.bf16.mxu0 %v16112_v8 }
 0x6f0   : > { %v4835_v19 = vpop.permute.xlu0 %4834  ;;  %11390 = vmatmul.mubr.msk.bf16.vlgmr.msra.gmra.mrb[156].mxu1 %vm1075_vm1, %v4685_v2  ;;  %v4892_v2 = vsel %vm1075_vm1, %v4887_v44, 0  ;;  %v5087_v50 = vpop.permute.xlu1 %5086 }
 0x6f1   : > { %11400 = vmatpush3.bf16.xpose.msra.mxu1 %v4792_v30  ;;  %11401 = vmatprep.mubr.msk.bf16.mxu1 %vm12713_vm0, %v16112_v8 }
 0x6f2   : > { %11411 = vmatprep.subr.bf16.mxu1 %v16112_v8 }
 0x6f4   : > { %v4937_v46 = vpop.permute.xlu0 %4936  ;;  %v5085_v44 = vpop.permute.xlu1 %5084 }
 0x6f5   : > { %v4942_v1 = vsel %vm1075_vm1, %v4937_v46, 0  ;;  %11408 = vmatmul.mubr.msk.bf16.vlgmr.msra.gmra.mrb[164].mxu0 %vm1075_vm1, %v4835_v19 }
 0x6f6   : > { %11418 = vmatpush3.bf16.xpose.msra.mxu0 %v4942_v1  ;;  %11419 = vmatprep.mubr.msk.bf16.mxu0 %vm12713_vm0, %v16112_v8 }
 0x6f7   : > { %11429 = vmatprep.subr.bf16.mxu0 %v16112_v8 }
 0x6f8   : > { %v4935_v54 = vpop.permute.xlu0 %4934  ;;  %11402 = vmatmul.mubr.msk.bf16.vlgmr.msra.gmra.mrb[160].mxu1 %vm1075_vm1, %v4785_v49  ;;  %v4992_v49 = vsel %vm1075_vm1, %v4987_v10, 0  ;;  %v5187_v33 = vpop.permute.xlu1 %5186 }
 0x6f9   : > { %11412 = vmatpush3.bf16.xpose.msra.mxu1 %v4892_v2  ;;  %11413 = vmatprep.mubr.msk.bf16.mxu1 %vm12713_vm0, %v16112_v8 }
 0x6fa   : > { %11423 = vmatprep.subr.bf16.mxu1 %v16112_v8 }
 0x6fc   : > { %v5037_v34 = vpop.permute.xlu0 %5036 }
 0x6fd   : > { %v5042_v42 = vsel %vm1075_vm1, %v5037_v34, 0  ;;  %11420 = vmatmul.mubr.msk.bf16.vlgmr.msra.gmra.mrb[168].mxu0 %vm1075_vm1, %v4935_v54  ;;  %v5185_v54 = vpop.permute.xlu1 %5184 }
 0x6fe   : > { %11430 = vmatpush3.bf16.xpose.msra.mxu0 %v5042_v42  ;;  %11431 = vmatprep.mubr.msk.bf16.mxu0 %vm12713_vm0, %v16112_v8 }
 0x6ff   : > { %11441 = vmatprep.subr.bf16.mxu0 %v16112_v8 }
 0x700   : > { %v5035_v18 = vpop.permute.xlu0 %5034  ;;  %11414 = vmatmul.mubr.msk.bf16.vlgmr.msra.gmra.mrb[164].mxu1 %vm1075_vm1, %v4885_v58  ;;  %v5092_v58 = vsel %vm1075_vm1, %v5087_v50, 0  ;;  %v5192_v50 = vsel %vm1075_vm1, %v5187_v33, 0 }
 0x701   : > { %11424 = vmatpush3.bf16.xpose.msra.mxu1 %v4992_v49  ;;  %11425 = vmatprep.mubr.msk.bf16.mxu1 %vm12713_vm0, %v16112_v8 }
 0x702   : > { %11435 = vmatprep.subr.bf16.mxu1 %v16112_v8 }
 0x704   : > { %v5137_v32 = vpop.permute.xlu0 %5136 }
 0x705   : > { %v5142_v30 = vsel %vm1075_vm1, %v5137_v32, 0  ;;  %11432 = vmatmul.mubr.msk.bf16.vlgmr.msra.gmra.mrb[172].mxu0 %vm1075_vm1, %v5035_v18 }
 0x706   : > { %v14280_v19 = vpop.f32.mrb[120].mxu0  ;;  %11442 = vmatpush3.bf16.xpose.msra.mxu0 %v5142_v30  ;;  %11443 = vmatprep.mubr.msk.bf16.mxu0 %vm12713_vm0, %v16112_v8  ;;  %v5287_v30 = vpop.permute.xlu1 %5286 }
 0x707   : > { %16177 = vst [vmem:[#allocation53_spill] sm:$0xff] %v14280_v19  ;;  %v11277_v10 = vpop.f32.mrb[121].mxu0  ;;  %11453 = vmatprep.subr.bf16.mxu0 %v16112_v8 }
 0x708   : > { %v3811_v46 = vpop.f32.mrb[122].mxu0  ;;  %v5135_v1 = vpop.permute.xlu0 %5134  ;;  %11426 = vmatmul.mubr.msk.bf16.vlgmr.msra.gmra.mrb[168].mxu1 %vm1075_vm1, %v4985_v55 }
 0x709   : > { %11436 = vmatpush3.bf16.xpose.msra.mxu1 %v5092_v58  ;;  %v11278_v2 = vpop.f32.mrb[123].mxu0  ;;  %11437 = vmatprep.mubr.msk.bf16.mxu1 %vm12713_vm0, %v16112_v8 }
 0x70a   : > { %11447 = vmatprep.subr.bf16.mxu1 %v16112_v8  ;;  %v5285_v33 = vpop.permute.xlu1 %5284 }
 0x70c   : > { %v5237_v34 = vpop.permute.xlu0 %5236 }
 0x70d   : > { %v5242_v42 = vsel %vm1075_vm1, %v5237_v34, 0  ;;  %11444 = vmatmul.mubr.msk.bf16.vlgmr.msra.gmra.mrb[176].mxu0 %vm1075_vm1, %v5135_v1 }
 0x70e   : > { %v14292_v49 = vpop.f32.mrb[124].mxu0  ;;  %11454 = vmatpush3.bf16.xpose.msra.mxu0 %v5242_v42  ;;  %11455 = vmatprep.mubr.msk.bf16.mxu0 %vm12713_vm0, %v16112_v8  ;;  %v5591_v1 = vpop.permute.xlu1 %5590 }
 0x70f   : > { %16178 = vst [vmem:[#allocation55_spill] sm:$0xff] %v14292_v49  ;;  %v11289_v55 = vpop.f32.mrb[125].mxu0  ;;  %11465 = vmatprep.subr.bf16.mxu0 %v16112_v8  ;;  %v5596_v2 = vsel %vm2024_vm2, %v5591_v1, 0 }
 0x710   : > { %v3907_v18 = vpop.f32.mrb[126].mxu0  ;;  %v5235_v32 = vpop.permute.xlu0 %5234  ;;  %11438 = vmatmul.mubr.msk.bf16.vlgmr.msra.gmra.mrb[172].mxu1 %vm1075_vm1, %v5085_v44  ;;  %v5292_v44 = vsel %vm1075_vm1, %v5287_v30, 0 }
 0x711   : > { %11448 = vmatpush3.bf16.xpose.msra.mxu1 %v5192_v50  ;;  %v11290_v10 = vpop.f32.mrb[127].mxu0  ;;  %11449 = vmatprep.mubr.msk.bf16.mxu1 %vm12713_vm0, %v16112_v8 }
 0x712   : > { %11459 = vmatprep.subr.bf16.mxu1 %v16112_v8 }
 0x714   : > { %v5543_v58 = vpop.permute.xlu0 %5542 }
 0x715   : > { %v5548_v46 = vsel %vm2024_vm2, %v5543_v58, 0  ;;  %11456 = vmatmul.mubr.msk.bf16.vlgmr.msra.gmra.mrb[180].mxu0 %vm1075_vm1, %v5235_v32 }
 0x716   : > { %11466 = vmatpush3.bf16.msra.mxu0 %v5548_v46  ;;  %11467 = vmatprep.mubr.msk.bf16.mxu0 %vm12713_vm0, %v16112_v8 }
 0x717   : > { %11477 = vmatprep.subr.bf16.mxu0 %v16112_v8 }
 0x718   : > { %11450 = vmatmul.mubr.msk.bf16.vlgmr.msra.gmra.mrb[176].mxu1 %vm1075_vm1, %v5185_v54 }
 0x719   : > { %11460 = vmatpush3.bf16.xpose.msra.mxu1 %v5292_v44  ;;  %11461 = vmatprep.mubr.msk.bf16.mxu1 %vm12713_vm0, %v16112_v8 }
 0x71a   : > { %11471 = vmatprep.subr.bf16.mxu1 %v16112_v8 }
 0x720   : > { %11462 = vmatmul.mubr.msk.bf16.vlgmr.msra.gmra.mrb[180].mxu1 %vm1075_vm1, %v5285_v33 }
 0x721   : > { %11472 = vmatpush3.bf16.msra.mxu1 %v5596_v2  ;;  %11473 = vmatprep.mubr.msk.bf16.mxu1 %vm12713_vm0, %v16112_v8 }
 0x722   : > { %11483 = vmatprep.subr.bf16.mxu1 %v16112_v8 }
 0x74e   : > { %v14317_v34 = vpop.f32.mrb[120].mxu1 }
 0x74f   : > { %16179 = vst [vmem:[#allocation54_spill] sm:$0xff] %v14317_v34  ;;  %v11283_v42 = vpop.f32.mrb[121].mxu1 }
 0x750   : > { %v3859_v55 = vpop.f32.mrb[122].mxu1 }
 0x751   : > { %v11284_v50 = vpop.f32.mrb[123].mxu1 }
 0x756   : > { %v14321_v18 = vpop.f32.mrb[124].mxu1 }
 0x757   : > { %16180 = vst [vmem:[#allocation56_spill] sm:$0xff] %v14321_v18  ;;  %v11295_v30 = vpop.f32.mrb[125].mxu1 }
 0x758   : > { %v3955_v10 = vpop.f32.mrb[126].mxu1 }
 0x759   : > { %v11296_v58 = vpop.f32.mrb[127].mxu1 }
 0x75a   : > { %v14325_v46 = vpop.f32.mrb[128].mxu0 }
 0x75b   : > { %16181 = vst [vmem:[#allocation57_spill] sm:$0xff] %v14325_v46  ;;  %v11301_v33 = vpop.f32.mrb[129].mxu0 }
 0x75c   : > { %v4003_v44 = vpop.f32.mrb[130].mxu0 }
 0x75d   : > { %v11302_v1 = vpop.f32.mrb[131].mxu0 }
 0x75f   : > { %v14327_v2 = vpop.f32.mrb[128].mxu1 }
 0x760   : > { %16182 = vst [vmem:[#allocation58_spill] sm:$0xff] %v14327_v2  ;;  %v11307_v55 = vpop.f32.mrb[129].mxu1 }
 0x761   : > { %v4051_v50 = vpop.f32.mrb[130].mxu1 }
 0x762   : > { %v11308_v54 = vpop.f32.mrb[131].mxu1  ;;  %v14331_v19 = vpop.f32.mrb[132].mxu0 }
 0x763   : > { %16183 = vst [vmem:[#allocation59_spill] sm:$0xff] %v14331_v19  ;;  %v11313_v34 = vpop.f32.mrb[133].mxu0 }
 0x764   : > { %v4099_v32 = vpop.f32.mrb[134].mxu0 }
 0x765   : > { %v11314_v30 = vpop.f32.mrb[135].mxu0 }
 0x767   : > { %v14333_v10 = vpop.f32.mrb[132].mxu1 }
 0x768   : > { %16184 = vst [vmem:[#allocation60_spill] sm:$0xff] %v14333_v10  ;;  %v11319_v33 = vpop.f32.mrb[133].mxu1 }
 0x769   : > { %v4147_v44 = vpop.f32.mrb[134].mxu1 }
 0x76a   : > { %v11320_v1 = vpop.f32.mrb[135].mxu1  ;;  %v14337_v49 = vpop.f32.mrb[136].mxu0 }
 0x76b   : > { %16185 = vst [vmem:[#allocation61_spill] sm:$0xff] %v14337_v49  ;;  %v11325_v18 = vpop.f32.mrb[137].mxu0 }
 0x76c   : > { %v4195_v42 = vpop.f32.mrb[138].mxu0 }
 0x76d   : > { %v11326_v55 = vpop.f32.mrb[139].mxu0 }
 0x76f   : > { %v14339_v50 = vpop.f32.mrb[136].mxu1 }
 0x770   : > { %16186 = vst [vmem:[#allocation62_spill] sm:$0xff] %v14339_v50  ;;  %v11331_v54 = vpop.f32.mrb[137].mxu1 }
 0x771   : > { %v4243_v32 = vpop.f32.mrb[138].mxu1 }
 0x772   : > { %v11332_v30 = vpop.f32.mrb[139].mxu1  ;;  %v14343_v46 = vpop.f32.mrb[140].mxu0 }
 0x773   : > { %16187 = vst [vmem:[#allocation63_spill] sm:$0xff] %v14343_v46  ;;  %v11337_v2 = vpop.f32.mrb[141].mxu0 }
 0x774   : > { %v4291_v58 = vpop.f32.mrb[142].mxu0 }
 0x775   : > { %v11338_v33 = vpop.f32.mrb[143].mxu0 }
 0x777   : > { %v14345_v44 = vpop.f32.mrb[140].mxu1 }
 0x778   : > { %16188 = vst [vmem:[#allocation64_spill] sm:$0xff] %v14345_v44  ;;  %v11343_v42 = vpop.f32.mrb[141].mxu1 }
 0x779   : > { %v4339_v1 = vpop.f32.mrb[142].mxu1 }
 0x77a   : > { %v11344_v55 = vpop.f32.mrb[143].mxu1  ;;  %v14349_v19 = vpop.f32.mrb[144].mxu0 }
 0x77b   : > { %16189 = vst [vmem:[#allocation65_spill] sm:$0xff] %v14349_v19  ;;  %v11349_v10 = vpop.f32.mrb[145].mxu0 }
 0x77c   : > { %v4387_v34 = vpop.f32.mrb[146].mxu0 }
 0x77d   : > { %v11350_v54 = vpop.f32.mrb[147].mxu0 }
 0x77f   : > { %v14351_v32 = vpop.f32.mrb[144].mxu1 }
 0x780   : > { %16190 = vst [vmem:[#allocation66_spill] sm:$0xff] %v14351_v32  ;;  %v11355_v58 = vpop.f32.mrb[145].mxu1 }
 0x781   : > { %v4435_v30 = vpop.f32.mrb[146].mxu1 }
 0x782   : > { %v11356_v33 = vpop.f32.mrb[147].mxu1 }
 0x7a7   : > { %v14355_v49 = vpop.f32.mrb[148].mxu0 }
 0x7a8   : > { %16191 = vst [vmem:[#allocation67_spill] sm:$0xff] %v14355_v49  ;;  %v11361_v50 = vpop.f32.mrb[149].mxu0 }
 0x7a9   : > { %v4483_v18 = vpop.f32.mrb[150].mxu0 }
 0x7aa   : > { %v11362_v42 = vpop.f32.mrb[151].mxu0 }
 0x7b0   : > { %v4578_v1 = vpop.f32.mrb[152].mxu0 }
 0x7b1   : > { %v14357_v55 = vmul.f32 0.17677669, %v4578_v1  ;;  %v11373_v46 = vpop.f32.mrb[153].mxu0 }
 0x7b2   : > { %v4581_v10 = vpop.f32.mrb[154].mxu0 }
 0x7b3   : > { %v14359_v34 = vpop.f32.mrb[148].mxu1  ;;  %v11374_v54 = vpop.f32.mrb[155].mxu0  ;;  %v5350_v44 = vsel %vm1828_vm3, %v14357_v55, -inf }
 0x7b4   : > { %16192 = vst [vmem:[#allocation68_spill] sm:$0xff] %v14359_v34  ;;  %5351 = vmax.xlane.f32.xlu0 %v5350_v44  ;;  %v11367_v30 = vpop.f32.mrb[149].mxu1 }
 0x7b5   : > { %v4531_v33 = vpop.f32.mrb[150].mxu1 }
 0x7b6   : > { %v11368_v50 = vpop.f32.mrb[151].mxu1 }
 0x7b8   : > { %v4678_v18 = vpop.f32.mrb[156].mxu0 }
 0x7b9   : > { %v14365_v42 = vmul.f32 0.17677669, %v4678_v18  ;;  %v11385_v1 = vpop.f32.mrb[157].mxu0 }
 0x7ba   : > { %v4681_v2 = vpop.f32.mrb[158].mxu0 }
 0x7bb   : > { %v4628_v46 = vpop.f32.mrb[152].mxu1  ;;  %v11386_v10 = vpop.f32.mrb[159].mxu0  ;;  %v5356_v54 = vsel %vm1828_vm3, %v14365_v42, -inf }
 0x7bc   : > { %v14369_v19 = vmul.f32 0.17677669, %v4628_v46  ;;  %5357 = vmax.xlane.f32.xlu0 %v5356_v54  ;;  %v11379_v32 = vpop.f32.mrb[153].mxu1 }
 0x7bd   : > { %v4631_v53 = vpop.f32.mrb[154].mxu1 }
 0x7be   : > { %v11380_v58 = vpop.f32.mrb[155].mxu1  ;;  %v5353_v44 = vsel %vm1828_vm3, %v14369_v19, -inf }
 0x7bf   : > { %5354 = vmax.xlane.f32.xlu1 %v5353_v44 }
 0x7c0   : > { %v4778_v30 = vpop.f32.mrb[160].mxu0 }
 0x7c1   : > { %v11397_v33 = vpop.f32.mrb[161].mxu0  ;;  %v14375_v34 = vmul.f32 0.17677669, %v4778_v30 }
 0x7c2   : > { %v4781_v50 = vpop.f32.mrb[162].mxu0 }
 0x7c3   : > { %v4728_v18 = vpop.f32.mrb[156].mxu1  ;;  %v11398_v2 = vpop.f32.mrb[163].mxu0  ;;  %v5362_v33 = vsel %vm1828_vm3, %v14375_v34, -inf }
 0x7c4   : > { %v14373_v1 = vmul.f32 0.17677669, %v4728_v18  ;;  %v11391_v10 = vpop.f32.mrb[157].mxu1 }
 0x7c5   : > { %v4731_v49 = vpop.f32.mrb[158].mxu1 }
 0x7c6   : > { %v11392_v46 = vpop.f32.mrb[159].mxu1  ;;  %v5359_v53 = vsel %vm1828_vm3, %v14373_v1, -inf }
 0x7c7   : > { %5360 = vmax.xlane.f32.xlu0 %v5359_v53 }
 0x7c8   : > { %v4878_v32 = vpop.f32.mrb[164].mxu0 }
 0x7c9   : > { %v11409_v58 = vpop.f32.mrb[165].mxu0  ;;  %v14379_v54 = vmul.f32 0.17677669, %v4878_v32 }
 0x7ca   : > { %v4881_v44 = vpop.f32.mrb[166].mxu0 }
 0x7cb   : > { %v11410_v50 = vpop.f32.mrb[167].mxu0  ;;  %5363 = vmax.xlane.f32.xlu0 %v5362_v33  ;;  %v4828_v18 = vpop.f32.mrb[160].mxu1  ;;  %v5368_v46 = vsel %vm1828_vm3, %v14379_v54, -inf }
 0x7cc   : > { %v14383_v2 = vmul.f32 0.17677669, %v4828_v18  ;;  %v11403_v49 = vpop.f32.mrb[161].mxu1 }
 0x7cd   : > { %v4831_v30 = vpop.f32.mrb[162].mxu1 }
 0x7ce   : > { %v11404_v10 = vpop.f32.mrb[163].mxu1  ;;  %v5365_v53 = vsel %vm1828_vm3, %v14383_v2, -inf }
 0x7cf   : > { %5369 = vmax.xlane.f32.xlu0 %v5368_v46  ;;  %5366 = vmax.xlane.f32.xlu1 %v5365_v53 }
 0x7d0   : > { %v4978_v32 = vpop.f32.mrb[168].mxu0 }
 0x7d1   : > { %v14389_v58 = vmul.f32 0.17677669, %v4978_v32  ;;  %v11421_v44 = vpop.f32.mrb[169].mxu0 }
 0x7d2   : > { %v4981_v50 = vpop.f32.mrb[170].mxu0 }
 0x7d3   : > { %v4928_v33 = vpop.f32.mrb[164].mxu1  ;;  %v11422_v17 = vpop.f32.mrb[171].mxu0  ;;  %v5374_v18 = vsel %vm1828_vm3, %v14389_v58, -inf }
 0x7d4   : > { %v14393_v49 = vmul.f32 0.17677669, %v4928_v33  ;;  %5375 = vmax.xlane.f32.xlu0 %v5374_v18  ;;  %v11415_v30 = vpop.f32.mrb[165].mxu1 }
 0x7d5   : > { %v4931_v10 = vpop.f32.mrb[166].mxu1 }
 0x7d6   : > { %v11416_v45 = vpop.f32.mrb[167].mxu1  ;;  %v5371_v46 = vsel %vm1828_vm3, %v14393_v49, -inf }
 0x7d7   : > { %5372 = vmax.xlane.f32.xlu1 %v5371_v46 }
 0x7d8   : > { %v5078_v53 = vpop.f32.mrb[172].mxu0 }
 0x7d9   : > { %v14397_v32 = vmul.f32 0.17677669, %v5078_v53  ;;  %v11433_v44 = vpop.f32.mrb[173].mxu0 }
 0x7da   : > { %v5081_v50 = vpop.f32.mrb[174].mxu0 }
 0x7db   : > { %v5028_v3 = vpop.f32.mrb[168].mxu1  ;;  %v11434_v17 = vpop.f32.mrb[175].mxu0  ;;  %v5380_v25 = vsel %vm1828_vm3, %v14397_v32, -inf }
 0x7dc   : > { %v14401_v33 = vmul.f32 0.17677669, %v5028_v3  ;;  %5381 = vmax.xlane.f32.xlu0 %v5380_v25  ;;  %v11427_v18 = vpop.f32.mrb[169].mxu1 }
 0x7dd   : > { %v5031_v30 = vpop.f32.mrb[170].mxu1 }
 0x7de   : > { %v11428_v45 = vpop.f32.mrb[171].mxu1  ;;  %v5377_v10 = vsel %vm1828_vm3, %v14401_v33, -inf }
 0x7df   : > { %5378 = vmax.xlane.f32.xlu1 %v5377_v10 }
 0x7e0   : > { %v5178_v46 = vpop.f32.mrb[176].mxu0 }
 0x7e1   : > { %v14405_v53 = vmul.f32 0.17677669, %v5178_v46  ;;  %v11445_v44 = vpop.f32.mrb[177].mxu0 }
 0x7e2   : > { %v5181_v50 = vpop.f32.mrb[178].mxu0 }
 0x7e3   : > { %v5128_v57 = vpop.f32.mrb[172].mxu1  ;;  %v11446_v17 = vpop.f32.mrb[179].mxu0  ;;  %v5386_v37 = vsel %vm1828_vm3, %v14405_v53, -inf }
 0x7e4   : > { %v14409_v3 = vmul.f32 0.17677669, %v5128_v57  ;;  %5387 = vmax.xlane.f32.xlu0 %v5386_v37  ;;  %v11439_v25 = vpop.f32.mrb[173].mxu1 }
 0x7e5   : > { %v5131_v18 = vpop.f32.mrb[174].mxu1 }
 0x7e6   : > { %v11440_v30 = vpop.f32.mrb[175].mxu1  ;;  %v5383_v45 = vsel %vm1828_vm3, %v14409_v3, -inf }
 0x7e7   : > { %5384 = vmax.xlane.f32.xlu1 %v5383_v45 }
 0x7e8   : > { %v5278_v10 = vpop.f32.mrb[180].mxu0 }
 0x7e9   : > { %v14413_v46 = vmul.f32 0.17677669, %v5278_v10  ;;  %v11457_v44 = vpop.f32.mrb[181].mxu0 }
 0x7ea   : > { %v5281_v50 = vpop.f32.mrb[182].mxu0 }
 0x7eb   : > { %v5228_v5 = vpop.f32.mrb[176].mxu1  ;;  %v11458_v17 = vpop.f32.mrb[183].mxu0  ;;  %v5392_v24 = vsel %vm1828_vm3, %v14413_v46, -inf  ;;  %v16193_v50 = vld [vmem:[#allocation22_spill] sm:$0xff] }
 0x7ec   : > { %v14417_v57 = vmul.f32 0.17677669, %v5228_v5  ;;  %5393 = vmax.xlane.f32.xlu0 %v5392_v24  ;;  %v11451_v37 = vpop.f32.mrb[177].mxu1  ;;  %v16194_v17 = vld [vmem:[#allocation45_spill] sm:$0xff] }
 0x7ed   : > { %v5231_v25 = vpop.f32.mrb[178].mxu1  ;;  %v14429_v37 = vpop.permute.xlu1 %5686 }
 0x7ee   : > { %v11452_v18 = vpop.f32.mrb[179].mxu1  ;;  %v5389_v30 = vsel %vm1828_vm3, %v14417_v57, -inf  ;;  %v14431_v25 = vpop.permute.xlu0 %5638 }
 0x7ef   : > { %5390 = vmax.xlane.f32.xlu1 %v5389_v30 }
 0x7f1   : > { %v14433_v18 = vpop.permute.xlu1 %5782 }
 0x7f3   : > { %v5328_v45 = vpop.f32.mrb[180].mxu1 }
 0x7f4   : > { %v11463_v10 = vpop.f32.mrb[181].mxu1  ;;  %v14425_v5 = vmul.f32 0.17677669, %v5328_v45 }
 0x7f5   : > { %v5331_v29 = vpop.f32.mrb[182].mxu1  ;;  %v14437_v30 = vpop.permute.xlu1 %5878 }
 0x7f6   : > { %v11464_v44 = vpop.f32.mrb[183].mxu1  ;;  %v5395_v24 = vsel %vm1828_vm3, %v14425_v5, -inf  ;;  %v14435_v29 = vpop.permute.xlu0 %5734  ;;  %16195 = vst [vmem:[#allocation69_spill] sm:$0xff] %v14437_v30 }
 0x7f9   : > { %v14441_v44 = vpop.permute.xlu1 %5974 }
 0x7fa   : > { %v14439_v10 = vpop.permute.xlu0 %5830  ;;  %16197 = vst [vmem:[#allocation71_spill] sm:$0xff] %v14441_v44 }
 0x7fb   : > { %16196 = vst [vmem:[#allocation70_spill] sm:$0xff] %v14439_v10 }
 0x7fe   : > { %v14443_v45 = vpop.permute.xlu0 %5926 }
 0x800   : > { %6166 = vrot.lane.b32.xlu1 %v16193_v50, %s12715_s21  ;;  %v14445_v50 = vpop.permute.xlu1 %6022 }
 0x801   : > { %16198 = vst [vmem:[#allocation72_spill] sm:$0xff] %v14445_v50 }
 0x802   : > { %6118 = vrot.lane.b32.xlu0 %v16194_v17, %s12715_s21 }
 0x804   : > { %v14448_v40 = vpop.permute.xlu1 %6070 }
 0x824   : > { %5396 = vmax.xlane.f32.xlu1 %v5395_v24 }
 0x841   : > { %v5352_v17 = vpop.xlane.xlu0 %5351 }
 0x842   : > { %v5398_v24 = vsub.f32 %v14357_v55, %v5352_v17 }
 0x844   : > { %v5414_v15 = vmul.f32 1.442695, %v5398_v24 }
 0x846   : > { %12272 = vpow2.f32 %v5414_v15 }
 0x849   : > { %v5358_v36 = vpop.xlane.xlu0 %5357 }
 0x84a   : > { %v5400_v28 = vsub.f32 %v14365_v42, %v5358_v36 }
 0x84c   : > { %v5418_v0 = vmul.f32 1.442695, %v5400_v28  ;;  %v5355_v30 = vpop.xlane.xlu1 %5354 }
 0x84d   : > { %v5399_v51 = vsub.f32 %v14369_v19, %v5355_v30 }
 0x84e   : > { %12274 = vpow2.f32 %v5418_v0 }
 0x84f   : > { %v5416_v44 = vmul.f32 1.442695, %v5399_v51 }
 0x850   : > { %v14452_v10 = vpop.eup %12272 }
 0x851   : > { %12276 = vpow2.f32 %v5416_v44  ;;  %v5446_v50 = vsel %vm1828_vm3, %v14452_v10, 0.0 }
 0x852   : > { %5447 = vadd.xlane.f32.xlu0 %v5446_v50 }
 0x854   : > { %v5361_v55 = vpop.xlane.xlu0 %5360 }
 0x855   : > { %v5401_v15 = vsub.f32 %v14373_v1, %v5361_v55 }
 0x857   : > { %v5420_v17 = vmul.f32 1.442695, %v5401_v15 }
 0x858   : > { %v14457_v24 = vpop.eup %12274  ;;  %v5364_v36 = vpop.xlane.xlu0 %5363 }
 0x859   : > { %12278 = vpow2.f32 %v5420_v17  ;;  %v5402_v28 = vsub.f32 %v14375_v34, %v5364_v36  ;;  %v5452_v51 = vsel %vm1828_vm3, %v14457_v24, 0.0 }
 0x85a   : > { %5453 = vadd.xlane.f32.xlu0 %v5452_v51 }
 0x85b   : > { %v14462_v0 = vpop.eup %12276  ;;  %v5422_v19 = vmul.f32 1.442695, %v5402_v28 }
 0x85c   : > { %v5370_v42 = vpop.xlane.xlu0 %5369  ;;  %v5367_v30 = vpop.xlane.xlu1 %5366  ;;  %v5449_v50 = vsel %vm1828_vm3, %v14462_v0, 0.0 }
 0x85d   : > { %12280 = vpow2.f32 %v5422_v19  ;;  %v5404_v1 = vsub.f32 %v14379_v54, %v5370_v42  ;;  %v5403_v44 = vsub.f32 %v14383_v2, %v5367_v30  ;;  %5450 = vadd.xlane.f32.xlu1 %v5449_v50 }
 0x85f   : > { %v5426_v55 = vmul.f32 1.442695, %v5404_v1  ;;  %v5424_v34 = vmul.f32 1.442695, %v5403_v44 }
 0x861   : > { %12282 = vpow2.f32 %v5426_v55  ;;  %v5376_v15 = vpop.xlane.xlu0 %5375 }
 0x862   : > { %12284 = vpow2.f32 %v5424_v34  ;;  %v5406_v36 = vsub.f32 %v14389_v58, %v5376_v15 }
 0x863   : > { %v14468_v17 = vpop.eup %12278 }
 0x864   : > { %v5373_v28 = vpop.xlane.xlu1 %5372  ;;  %v5455_v51 = vsel %vm1828_vm3, %v14468_v17, 0.0  ;;  %v5430_v2 = vmul.f32 1.442695, %v5406_v36 }
 0x865   : > { %v5405_v19 = vsub.f32 %v14393_v49, %v5373_v28  ;;  %5456 = vadd.xlane.f32.xlu1 %v5455_v51 }
 0x867   : > { %v14474_v54 = vpop.eup %12280  ;;  %v5428_v42 = vmul.f32 1.442695, %v5405_v19 }
 0x868   : > { %v5458_v30 = vsel %vm1828_vm3, %v14474_v54, 0.0 }
 0x869   : > { %12286 = vpow2.f32 %v5428_v42  ;;  %5459 = vadd.xlane.f32.xlu0 %v5458_v30  ;;  %v5382_v50 = vpop.xlane.xlu0 %5381 }
 0x86a   : > { %v5408_v1 = vsub.f32 %v14397_v32, %v5382_v50  ;;  %12288 = vpow2.f32 %v5430_v2 }
 0x86b   : > { %v14479_v58 = vpop.eup %12282 }
 0x86c   : > { %v14481_v44 = vpop.eup %12284  ;;  %v5434_v55 = vmul.f32 1.442695, %v5408_v1  ;;  %v5379_v49 = vpop.xlane.xlu1 %5378  ;;  %v5464_v34 = vsel %vm1828_vm3, %v14479_v58, 0.0 }
 0x86d   : > { %v5407_v15 = vsub.f32 %v14401_v33, %v5379_v49  ;;  %5465 = vadd.xlane.f32.xlu0 %v5464_v34  ;;  %v5461_v36 = vsel %vm1828_vm3, %v14481_v44, 0.0 }
 0x86e   : > { %5462 = vadd.xlane.f32.xlu1 %v5461_v36  ;;  %12290 = vpow2.f32 %v5434_v55 }
 0x86f   : > { %v5432_v28 = vmul.f32 1.442695, %v5407_v15 }
 0x871   : > { %12292 = vpow2.f32 %v5432_v28  ;;  %v5388_v32 = vpop.xlane.xlu0 %5387 }
 0x872   : > { %v5410_v51 = vsub.f32 %v14405_v53, %v5388_v32 }
 0x873   : > { %v14489_v19 = vpop.eup %12286 }
 0x874   : > { %v5438_v2 = vmul.f32 1.442695, %v5410_v51  ;;  %v5385_v42 = vpop.xlane.xlu1 %5384  ;;  %v5467_v30 = vsel %vm1828_vm3, %v14489_v19, 0.0  ;;  %v14493_v50 = vpop.eup %12288 }
 0x875   : > { %v5409_v33 = vsub.f32 %v14409_v3, %v5385_v42  ;;  %5468 = vadd.xlane.f32.xlu1 %v5467_v30  ;;  %v5470_v55 = vsel %vm1828_vm3, %v14493_v50, 0.0 }
 0x876   : > { %12294 = vpow2.f32 %v5438_v2 }
 0x877   : > { %v5436_v1 = vmul.f32 1.442695, %v5409_v33 }
 0x878   : > { %v14498_v49 = vpop.eup %12290 }
 0x879   : > { %12296 = vpow2.f32 %v5436_v1  ;;  %5471 = vadd.xlane.f32.xlu1 %v5470_v55  ;;  %v5476_v36 = vsel %vm1828_vm3, %v14498_v49, 0.0  ;;  %v5394_v33 = vpop.xlane.xlu0 %5393 }
 0x87a   : > { %v5412_v1 = vsub.f32 %v14413_v46, %v5394_v33 }
 0x87b   : > { %v14500_v53 = vpop.eup %12292 }
 0x87c   : > { %v5391_v34 = vpop.xlane.xlu1 %5390  ;;  %v5473_v15 = vsel %vm1828_vm3, %v14500_v53, 0.0  ;;  %v5442_v55 = vmul.f32 1.442695, %v5412_v1  ;;  %v16202_v1 = vld [vmem:[#allocation69_spill] sm:$0xff] }
 0x87d   : > { %v5411_v3 = vsub.f32 %v14417_v57, %v5391_v34  ;;  %5474 = vadd.xlane.f32.xlu0 %v5473_v15  ;;  %5477 = vadd.xlane.f32.xlu1 %v5476_v36 }
 0x87f   : > { %v5440_v28 = vmul.f32 1.442695, %v5411_v3 }
 0x880   : > { %v14507_v32 = vpop.eup %12294  ;;  %v14524_v34 = vpop.permute.xlu1 %6166 }
 0x881   : > { %12298 = vpow2.f32 %v5440_v28  ;;  %v5482_v51 = vsel %vm1828_vm3, %v14507_v32, 0.0 }
 0x882   : > { %5483 = vadd.xlane.f32.xlu1 %v5482_v51  ;;  %12300 = vpow2.f32 %v5442_v55  ;;  %v5884_v55 = vsel %vm2024_vm2, %v16202_v1, 0 }
 0x883   : > { %v14511_v2 = vpop.eup %12296 }
 0x884   : > { %v5479_v42 = vsel %vm1828_vm3, %v14511_v2, 0.0 }
 0x885   : > { %5480 = vadd.xlane.f32.xlu0 %v5479_v42 }
 0x88b   : > { %v14515_v30 = vpop.eup %12298 }
 0x88c   : > { %v5485_v57 = vsel %vm1828_vm3, %v14515_v30, 0.0  ;;  %v14527_v3 = vpop.eup %12300 }
 0x88d   : > { %5486 = vadd.xlane.f32.xlu0 %v5485_v57  ;;  %v5488_v51 = vsel %vm1828_vm3, %v14527_v3, 0.0 }
 0x893   : > { %6262 = vrot.lane.b32.xlu1 %v13736_v12, %s12715_s21 }
 0x8a3   : > { %6214 = vrot.lane.b32.xlu0 %v13674_v56, %s12715_s21 }
 0x8b1   : > { %v5397_v15 = vpop.xlane.xlu1 %5396 }
 0x8b2   : > { %v5413_v36 = vsub.f32 %v14425_v5, %v5397_v15  ;;  %v14547_v5 = vpop.permute.xlu0 %6118 }
 0x8b4   : > { %v5444_v28 = vmul.f32 1.442695, %v5413_v36 }
 0x8b6   : > { %12302 = vpow2.f32 %v5444_v28  ;;  %v5932_v28 = vsel %vm2024_vm2, %v14443_v45, 0  ;;  %v16206_v45 = vld [vmem:[#allocation27_spill] sm:$0xff] }
 0x8b7   : > { %5489 = vadd.xlane.f32.xlu1 %v5488_v51 }
 0x8c0   : > { %v14531_v42 = vpop.eup %12302 }
 0x8c1   : > { %v5491_v46 = vsel %vm1828_vm3, %v14531_v42, 0.0 }
 0x8c2   : > { %5492 = vadd.xlane.f32.xlu0 %v5491_v46 }
 0x8c8   : > { %6362 = vrot.lane.b32.xlu1 %v13072_v6, %s12716_s25 }
 0x8cc   : > { %6360 = vrot.lane.b32.xlu1 %v13104_v26, %s12716_s25 }
 0x8d0   : > { %6462 = vrot.lane.b32.xlu1 %v13124_v38, %s12716_s25 }
 0x8d4   : > { %6460 = vrot.lane.b32.xlu1 %v13177_v20, %s12716_s25 }
 0x8d8   : > { %6562 = vrot.lane.b32.xlu1 %v13164_v4, %s12716_s25  ;;  %6312 = vrot.lane.b32.xlu0 %v13064_v62, %s12716_s25 }
 0x8dc   : > { %6560 = vrot.lane.b32.xlu1 %v13218_v60, %s12716_s25  ;;  %6310 = vrot.lane.b32.xlu0 %v13074_v9, %s12716_s25 }
 0x8df   : > { %v5448_v6 = vpop.xlane.xlu0 %5447 }
 0x8e0   : > { %12304 = vrcp.f32 %v5448_v6  ;;  %6662 = vrot.lane.b32.xlu1 %v13205_v43, %s12716_s25  ;;  %6412 = vrot.lane.b32.xlu0 %v13088_v14, %s12716_s25  ;;  %v16205_v6 = vld [vmem:[#allocation41_spill] sm:$0xff] }
 0x8e4   : > { %6660 = vrot.lane.b32.xlu1 %v13249_v35, %s12716_s25  ;;  %6410 = vrot.lane.b32.xlu0 %v13137_v47, %s12716_s25  ;;  %v5644_v47 = vsel %vm2024_vm2, %v14431_v25, 0  ;;  %v5740_v35 = vsel %vm2024_vm2, %v14435_v29, 0  ;;  %v5788_v25 = vsel %vm2024_vm2, %v14433_v18, 0  ;;  %v16199_v18 = vld [vmem:[#allocation70_spill] sm:$0xff] }
 0x8e7   : > { %v5454_v62 = vpop.xlane.xlu0 %5453 }
 0x8e8   : > { %12306 = vrcp.f32 %v5454_v62  ;;  %6762 = vrot.lane.b32.xlu1 %v16120_v16, %s12716_s25  ;;  %6512 = vrot.lane.b32.xlu0 %v13106_v27, %s12716_s25 }
 0x8ea   : > { %v12305_v9 = vpop.eup %12304  ;;  %v5451_v26 = vpop.xlane.xlu1 %5450 }
 0x8eb   : > { %12308 = vrcp.f32 %v5451_v26  ;;  %v5495_v38 = vmul.f32 %v12305_v9, %v14452_v10  ;;  %v5836_v10 = vsel %vm2024_vm2, %v16199_v18, 0 }
 0x8ec   : > { %6760 = vrot.lane.b32.xlu1 %v16124_v41, %s12716_s25  ;;  %6510 = vrot.lane.b32.xlu0 %v13126_v39, %s12716_s25 }
 0x8ed   : > { %v5526_v14 = vpack.c.bf16 %v5495_v38, %v5495_v38 }
 0x8ef   : > { %11468 = vmatmul.mubr.msk.bf16.vlgmr.msra.gmra.mrb[184].mxu0 %vm1828_vm3, %v5526_v14 }
 0x8f0   : > { %11478 = vmatpush3.bf16.msra.mxu0 %v5644_v47  ;;  %6862 = vrot.lane.b32.xlu1 %v16125_v23, %s12716_s25  ;;  %v16208_v47 = vld [vmem:[#allocation42_spill] sm:$0xff] }
 0x8f1   : > { %6612 = vrot.lane.b32.xlu0 %v13139_v48, %s12716_s25  ;;  %11479 = vmatprep.mubr.msk.bf16.mxu0 %vm12713_vm0, %v16112_v8 }
 0x8f2   : > { %v12307_v27 = vpop.eup %12306  ;;  %v5457_v4 = vpop.xlane.xlu1 %5456  ;;  %11489 = vmatprep.subr.bf16.mxu0 %v16112_v8 }
 0x8f3   : > { %12310 = vrcp.f32 %v5457_v4  ;;  %v5499_v39 = vmul.f32 %v12307_v27, %v14457_v24 }
 0x8f4   : > { %6860 = vrot.lane.b32.xlu1 %v16126_v11, %s12716_s25 }
 0x8f5   : > { %v12309_v20 = vpop.eup %12308  ;;  %6610 = vrot.lane.b32.xlu0 %v13166_v7, %s12716_s25  ;;  %v5528_v43 = vpack.c.bf16 %v5499_v39, %v5499_v39  ;;  %v5692_v7 = vsel %vm2024_vm2, %v14429_v37, 0  ;;  %v16209_v39 = vld [vmem:[#allocation30_spill] sm:$0xff] }
 0x8f6   : > { %v5460_v60 = vpop.xlane.xlu0 %5459  ;;  %v5497_v48 = vmul.f32 %v12309_v20, %v14462_v0 }
 0x8f7   : > { %12312 = vrcp.f32 %v5460_v60  ;;  %11480 = vmatmul.mubr.msk.bf16.vlgmr.msra.gmra.mrb[188].mxu0 %vm1828_vm3, %v5528_v43 }
 0x8f8   : > { %11490 = vmatpush3.bf16.msra.mxu0 %v5740_v35  ;;  %6962 = vrot.lane.b32.xlu1 %v16127_v52, %s12716_s25  ;;  %v5527_v16 = vpack.c.bf16 %v5497_v48, %v5497_v48 }
 0x8f9   : > { %6712 = vrot.lane.b32.xlu0 %v13179_v22, %s12716_s25  ;;  %11491 = vmatprep.mubr.msk.bf16.mxu0 %vm12713_vm0, %v16112_v8 }
 0x8fa   : > { %v5466_v41 = vpop.xlane.xlu0 %5465  ;;  %11474 = vmatmul.mubr.msk.bf16.vlgmr.msra.gmra.mrb[184].mxu1 %vm1828_vm3, %v5527_v16  ;;  %11501 = vmatprep.subr.bf16.mxu0 %v16112_v8  ;;  %v16211_v16 = vld [vmem:[#allocation29_spill] sm:$0xff] }
 0x8fb   : > { %12314 = vrcp.f32 %v5466_v41  ;;  %11484 = vmatpush3.bf16.msra.mxu1 %v5692_v7  ;;  %v5463_v23 = vpop.xlane.xlu1 %5462  ;;  %11485 = vmatprep.mubr.msk.bf16.mxu1 %vm12713_vm0, %v16112_v8  ;;  %v6076_v41 = vsel %vm2024_vm2, %v14448_v40, 0 }
 0x8fc   : > { %12316 = vrcp.f32 %v5463_v23  ;;  %6960 = vrot.lane.b32.xlu1 %v16128_v59, %s12716_s25  ;;  %11495 = vmatprep.subr.bf16.mxu1 %v16112_v8 }
 0x8fd   : > { %v12311_v22 = vpop.eup %12310  ;;  %6710 = vrot.lane.b32.xlu0 %v13207_v21, %s12716_s25 }
 0x8fe   : > { %v5501_v11 = vmul.f32 %v12311_v22, %v14468_v17  ;;  %v16201_v17 = vld [vmem:[#allocation23_spill] sm:$0xff] }
 0x900   : > { %7062 = vrot.lane.b32.xlu1 %v16129_v61, %s12716_s25  ;;  %v5529_v52 = vpack.c.bf16 %v5501_v11, %v5501_v11  ;;  %v16212_v11 = vld [vmem:[#allocation36_spill] sm:$0xff] }
 0x901   : > { %v12313_v37 = vpop.eup %12312  ;;  %6812 = vrot.lane.b32.xlu0 %v13220_v63, %s12716_s25 }
 0x902   : > { %11486 = vmatmul.mubr.msk.bf16.vlgmr.msra.gmra.mrb[188].mxu1 %vm1828_vm3, %v5529_v52  ;;  %v5469_v59 = vpop.xlane.xlu1 %5468  ;;  %v5503_v29 = vmul.f32 %v12313_v37, %v14474_v54 }
 0x903   : > { %11496 = vmatpush3.bf16.msra.mxu1 %v5788_v25  ;;  %12318 = vrcp.f32 %v5469_v59  ;;  %11497 = vmatprep.mubr.msk.bf16.mxu1 %vm12713_vm0, %v16112_v8  ;;  %v16213_v25 = vld [vmem:[#allocation37_spill] sm:$0xff]  ;;  %v6172_v59 = vsel %vm2024_vm2, %v14524_v34, 0 }
 0x904   : > { %7060 = vrot.lane.b32.xlu1 %v16130_v13, %s12716_s25  ;;  %v5530_v21 = vpack.c.bf16 %v5503_v29, %v5503_v29  ;;  %11507 = vmatprep.subr.bf16.mxu1 %v16112_v8  ;;  %v16200_v13 = vld [vmem:[#allocation34_spill] sm:$0xff] }
 0x905   : > { %v12315_v63 = vpop.eup %12314  ;;  %6810 = vrot.lane.b32.xlu0 %v13245_v31, %s12716_s25 }
 0x906   : > { %v12317_v61 = vpop.eup %12316  ;;  %11492 = vmatmul.mubr.msk.bf16.vlgmr.msra.gmra.mrb[192].mxu0 %vm1828_vm3, %v5530_v21  ;;  %v5472_v24 = vpop.xlane.xlu1 %5471  ;;  %v5507_v31 = vmul.f32 %v12315_v63, %v14479_v58  ;;  %v16204_v58 = vld [vmem:[#allocation25_spill] sm:$0xff]  ;;  %v16214_v21 = vld [vmem:[#allocation38_spill] sm:$0xff] }
 0x907   : > { %11502 = vmatpush3.bf16.msra.mxu0 %v5836_v10  ;;  %12320 = vrcp.f32 %v5472_v24  ;;  %v5505_v0 = vmul.f32 %v12317_v61, %v14481_v44  ;;  %11503 = vmatprep.mubr.msk.bf16.mxu0 %vm12713_vm0, %v16112_v8  ;;  %v16203_v44 = vld [vmem:[#allocation40_spill] sm:$0xff] }
 0x908   : > { %7366 = vrot.lane.b32.xlu1 %v16200_v13, %s12716_s25  ;;  %11513 = vmatprep.subr.bf16.mxu0 %v16112_v8  ;;  %v5532_v15 = vpack.c.bf16 %v5507_v31, %v5507_v31 }
 0x909   : > { %6912 = vrot.lane.b32.xlu0 %v16201_v17, %s12716_s25  ;;  %v5531_v54 = vpack.c.bf16 %v5505_v0, %v5505_v0 }
 0x90a   : > { %v5475_v57 = vpop.xlane.xlu0 %5474  ;;  %v5478_v33 = vpop.xlane.xlu1 %5477 }
 0x90b   : > { %12322 = vrcp.f32 %v5475_v57  ;;  %11498 = vmatmul.mubr.msk.bf16.vlgmr.msra.gmra.mrb[192].mxu1 %vm1828_vm3, %v5531_v54 }
 0x90c   : > { %11508 = vmatpush3.bf16.msra.mxu1 %v5884_v55  ;;  %12324 = vrcp.f32 %v5478_v33  ;;  %7462 = vrot.lane.b32.xlu1 %v16203_v44, %s12716_s25 }
 0x90d   : > { %v12319_v36 = vpop.eup %12318  ;;  %6910 = vrot.lane.b32.xlu0 %v16204_v58, %s12716_s25  ;;  %11509 = vmatprep.mubr.msk.bf16.mxu1 %vm12713_vm0, %v16112_v8 }
 0x90e   : > { %11504 = vmatmul.mubr.msk.bf16.vlgmr.msra.gmra.mrb[196].mxu0 %vm1828_vm3, %v5532_v15  ;;  %11519 = vmatprep.subr.bf16.mxu1 %v16112_v8  ;;  %v5509_v51 = vmul.f32 %v12319_v36, %v14489_v19  ;;  %v16207_v19 = vld [vmem:[#allocation71_spill] sm:$0xff] }
 0x90f   : > { %11514 = vmatpush3.bf16.msra.mxu0 %v5932_v28  ;;  %v5484_v46 = vpop.xlane.xlu1 %5483  ;;  %11515 = vmatprep.mubr.msk.bf16.mxu0 %vm12713_vm0, %v16112_v8  ;;  %v5980_v14 = vsel %vm2024_vm2, %v16207_v19, 0 }
 0x910   : > { %7558 = vrot.lane.b32.xlu1 %v16205_v6, %s12716_s25  ;;  %v5533_v62 = vpack.c.bf16 %v5509_v51, %v5509_v51  ;;  %11525 = vmatprep.subr.bf16.mxu0 %v16112_v8  ;;  %12326 = vrcp.f32 %v5484_v46 }
 0x911   : > { %v12321_v9 = vpop.eup %12320  ;;  %7012 = vrot.lane.b32.xlu0 %v16206_v45, %s12716_s25 }
 0x912   : > { %v5481_v26 = vpop.xlane.xlu0 %5480  ;;  %v5511_v38 = vmul.f32 %v12321_v9, %v14493_v50  ;;  %v16210_v50 = vld [vmem:[#allocation72_spill] sm:$0xff] }
 0x913   : > { %12328 = vrcp.f32 %v5481_v26  ;;  %11510 = vmatmul.mubr.msk.bf16.vlgmr.msra.gmra.mrb[196].mxu1 %vm1828_vm3, %v5533_v62  ;;  %v6028_v43 = vsel %vm2024_vm2, %v16210_v50, 0  ;;  %v6263_v63 = vpop.permute.xlu1 %6262 }
 0x914   : > { %11520 = vmatpush3.bf16.msra.mxu1 %v5980_v14  ;;  %7654 = vrot.lane.b32.xlu1 %v16208_v47, %s12716_s25  ;;  %v5534_v27 = vpack.c.bf16 %v5511_v38, %v5511_v38  ;;  %v6268_v18 = vsel %vm2024_vm2, %v6263_v63, 0 }
 0x915   : > { %v12323_v4 = vpop.eup %12322  ;;  %7010 = vrot.lane.b32.xlu0 %v16209_v39, %s12716_s25  ;;  %11521 = vmatprep.mubr.msk.bf16.mxu1 %vm12713_vm0, %v16112_v8 }
 0x916   : > { %v12325_v20 = vpop.eup %12324  ;;  %11516 = vmatmul.mubr.msk.bf16.vlgmr.msra.gmra.mrb[200].mxu0 %vm1828_vm3, %v5534_v27  ;;  %11531 = vmatprep.subr.bf16.mxu1 %v16112_v8  ;;  %v5513_v60 = vmul.f32 %v12323_v4, %v14500_v53 }
 0x917   : > { %11526 = vmatpush3.bf16.msra.mxu0 %v6028_v43  ;;  %11527 = vmatprep.mubr.msk.bf16.mxu0 %vm12713_vm0, %v16112_v8  ;;  %v5515_v35 = vmul.f32 %v12325_v20, %v14498_v49  ;;  %v6124_v49 = vsel %vm2024_vm2, %v14547_v5, 0 }
 0x918   : > { %v5535_v48 = vpack.c.bf16 %v5513_v60, %v5513_v60  ;;  %11537 = vmatprep.subr.bf16.mxu0 %v16112_v8 }
 0x919   : > { %7318 = vrot.lane.b32.xlu0 %v16211_v16, %s12716_s25  ;;  %v5536_v23 = vpack.c.bf16 %v5515_v35, %v5515_v35 }
 0x91a   : > { %v5487_v7 = vpop.xlane.xlu0 %5486  ;;  %v12327_v53 = vpop.eup %12326 }
 0x91b   : > { %12330 = vrcp.f32 %v5487_v7  ;;  %11522 = vmatmul.mubr.msk.bf16.vlgmr.msra.gmra.mrb[200].mxu1 %vm1828_vm3, %v5535_v48  ;;  %v5519_v37 = vmul.f32 %v12327_v53, %v14507_v32 }
 0x91c   : > { %11532 = vmatpush3.bf16.msra.mxu1 %v6076_v41  ;;  %11533 = vmatprep.mubr.msk.bf16.mxu1 %vm12713_vm0, %v16112_v8 }
 0x91d   : > { %v12329_v22 = vpop.eup %12328  ;;  %7414 = vrot.lane.b32.xlu0 %v16212_v11, %s12716_s25  ;;  %11543 = vmatprep.subr.bf16.mxu1 %v16112_v8 }
 0x91e   : > { %11528 = vmatmul.mubr.msk.bf16.vlgmr.msra.gmra.mrb[204].mxu0 %vm1828_vm3, %v5536_v23  ;;  %v5517_v40 = vmul.f32 %v12329_v22, %v14511_v2  ;;  %v6215_v5 = vpop.permute.xlu0 %6214  ;;  %v5538_v2 = vpack.c.bf16 %v5519_v37, %v5519_v37 }
 0x91f   : > { %11538 = vmatpush3.bf16.msra.mxu0 %v6124_v49  ;;  %11539 = vmatprep.mubr.msk.bf16.mxu0 %vm12713_vm0, %v16112_v8  ;;  %v6220_v32 = vsel %vm2024_vm2, %v6215_v5, 0 }
 0x920   : > { %v5537_v52 = vpack.c.bf16 %v5517_v40, %v5517_v40  ;;  %11549 = vmatprep.subr.bf16.mxu0 %v16112_v8 }
 0x921   : > { %7510 = vrot.lane.b32.xlu0 %v16213_v25, %s12716_s25 }
 0x923   : > { %11534 = vmatmul.mubr.msk.bf16.vlgmr.msra.gmra.mrb[204].mxu1 %vm1828_vm3, %v5537_v52 }
 0x924   : > { %11544 = vmatpush3.bf16.msra.mxu1 %v6172_v59  ;;  %11545 = vmatprep.mubr.msk.bf16.mxu1 %vm12713_vm0, %v16112_v8 }
 0x925   : > { %v12331_v29 = vpop.eup %12330  ;;  %7606 = vrot.lane.b32.xlu0 %v16214_v21, %s12716_s25  ;;  %11555 = vmatprep.subr.bf16.mxu1 %v16112_v8 }
 0x926   : > { %11540 = vmatmul.mubr.msk.bf16.vlgmr.msra.gmra.mrb[208].mxu0 %vm1828_vm3, %v5538_v2  ;;  %v5521_v34 = vmul.f32 %v12331_v29, %v14515_v30 }
 0x927   : > { %11550 = vmatpush3.bf16.msra.mxu0 %v6220_v32  ;;  %11551 = vmatprep.mubr.msk.bf16.mxu0 %vm12713_vm0, %v16112_v8 }
 0x928   : > { %v5539_v61 = vpack.c.bf16 %v5521_v34, %v5521_v34  ;;  %11561 = vmatprep.subr.bf16.mxu0 %v16112_v8 }
 0x92b   : > { %11546 = vmatmul.mubr.msk.bf16.vlgmr.msra.gmra.mrb[208].mxu1 %vm1828_vm3, %v5539_v61 }
 0x92c   : > { %11556 = vmatpush3.bf16.msra.mxu1 %v6268_v18  ;;  %11557 = vmatprep.mubr.msk.bf16.mxu1 %vm12713_vm0, %v16112_v8 }
 0x92d   : > { %11567 = vmatprep.subr.bf16.mxu1 %v16112_v8 }
 0x944   : > { %v5490_v10 = vpop.xlane.xlu1 %5489 }
 0x945   : > { %12332 = vrcp.f32 %v5490_v10 }
 0x948   : > { %v6363_v30 = vpop.permute.xlu1 %6362 }
 0x949   : > { %v6368_v46 = vsel %vm1075_vm1, %v6363_v30, 0 }
 0x94c   : > { %v6361_v24 = vpop.permute.xlu1 %6360 }
 0x94f   : > { %v12333_v0 = vpop.eup %12332  ;;  %v5493_v13 = vpop.xlane.xlu0 %5492 }
 0x950   : > { %12334 = vrcp.f32 %v5493_v13  ;;  %v6463_v31 = vpop.permute.xlu1 %6462  ;;  %v5523_v17 = vmul.f32 %v12333_v0, %v14527_v3 }
 0x951   : > { %v6468_v26 = vsel %vm1075_vm1, %v6463_v31, 0 }
 0x952   : > { %v5540_v54 = vpack.c.bf16 %v5523_v17, %v5523_v17 }
 0x953   : > { %v6313_v57 = vpop.permute.xlu0 %6312 }
 0x954   : > { %v6318_v33 = vsel %vm1075_vm1, %v6313_v57, 0  ;;  %11552 = vmatmul.mubr.msk.bf16.vlgmr.msra.gmra.mrb[212].mxu0 %vm1828_vm3, %v5540_v54  ;;  %v6461_v1 = vpop.permute.xlu1 %6460 }
 0x955   : > { %11562 = vmatpush3.bf16.xpose.msra.mxu0 %v6318_v33  ;;  %11563 = vmatprep.mubr.msk.bf16.mxu0 %vm12713_vm0, %v16112_v8 }
 0x956   : > { %11573 = vmatprep.subr.bf16.mxu0 %v16112_v8 }
 0x957   : > { %v6311_v55 = vpop.permute.xlu0 %6310 }
 0x958   : > { %v6563_v44 = vpop.permute.xlu1 %6562 }
 0x959   : > { %v6568_v27 = vsel %vm1075_vm1, %v6563_v44, 0 }
 0x95a   : > { %v12335_v15 = vpop.eup %12334 }
 0x95b   : > { %v6413_v36 = vpop.permute.xlu0 %6412  ;;  %v5525_v58 = vmul.f32 %v12335_v15, %v14531_v42 }
 0x95c   : > { %v6418_v3 = vsel %vm1075_vm1, %v6413_v36, 0  ;;  %11564 = vmatmul.mubr.msk.bf16.vlgmr.msra.gmra.mrb[216].mxu0 %vm1075_vm1, %v6311_v55  ;;  %v6561_v28 = vpop.permute.xlu1 %6560 }
 0x95d   : > { %11574 = vmatpush3.bf16.xpose.msra.mxu0 %v6418_v3  ;;  %v5541_v51 = vpack.c.bf16 %v5525_v58, %v5525_v58  ;;  %11575 = vmatprep.mubr.msk.bf16.mxu0 %vm12713_vm0, %v16112_v8 }
 0x95e   : > { %11585 = vmatprep.subr.bf16.mxu0 %v16112_v8 }
 0x95f   : > { %v6411_v6 = vpop.permute.xlu0 %6410  ;;  %11558 = vmatmul.mubr.msk.bf16.vlgmr.msra.gmra.mrb[212].mxu1 %vm1828_vm3, %v5541_v51 }
 0x960   : > { %11568 = vmatpush3.bf16.xpose.msra.mxu1 %v6368_v46  ;;  %v6663_v62 = vpop.permute.xlu1 %6662  ;;  %11569 = vmatprep.mubr.msk.bf16.mxu1 %vm12713_vm0, %v16112_v8 }
 0x961   : > { %11579 = vmatprep.subr.bf16.mxu1 %v16112_v8  ;;  %v6668_v43 = vsel %vm1075_vm1, %v6663_v62, 0 }
 0x963   : > { %v6513_v42 = vpop.permute.xlu0 %6512 }
 0x964   : > { %v6518_v9 = vsel %vm1075_vm1, %v6513_v42, 0  ;;  %11576 = vmatmul.mubr.msk.bf16.vlgmr.msra.gmra.mrb[220].mxu0 %vm1075_vm1, %v6411_v6  ;;  %v6661_v45 = vpop.permute.xlu1 %6660 }
 0x965   : > { %11586 = vmatpush3.bf16.xpose.msra.mxu0 %v6518_v9  ;;  %11587 = vmatprep.mubr.msk.bf16.mxu0 %vm12713_vm0, %v16112_v8 }
 0x966   : > { %11597 = vmatprep.subr.bf16.mxu0 %v16112_v8 }
 0x967   : > { %v6511_v38 = vpop.permute.xlu0 %6510  ;;  %11570 = vmatmul.mubr.msk.bf16.vlgmr.msra.gmra.mrb[216].mxu1 %vm1075_vm1, %v6361_v24 }
 0x968   : > { %11580 = vmatpush3.bf16.xpose.msra.mxu1 %v6468_v26  ;;  %11581 = vmatprep.mubr.msk.bf16.mxu1 %vm12713_vm0, %v16112_v8  ;;  %v6763_v14 = vpop.permute.xlu1 %6762 }
 0x969   : > { %11591 = vmatprep.subr.bf16.mxu1 %v16112_v8  ;;  %v6768_v41 = vsel %vm1075_vm1, %v6763_v14, 0 }
 0x96b   : > { %v6613_v19 = vpop.permute.xlu0 %6612 }
 0x96c   : > { %v6618_v47 = vsel %vm1075_vm1, %v6613_v19, 0  ;;  %11588 = vmatmul.mubr.msk.bf16.vlgmr.msra.gmra.mrb[224].mxu0 %vm1075_vm1, %v6511_v38  ;;  %v6761_v39 = vpop.permute.xlu1 %6760 }
 0x96d   : > { %11598 = vmatpush3.bf16.xpose.msra.mxu0 %v6618_v47  ;;  %11599 = vmatprep.mubr.msk.bf16.mxu0 %vm12713_vm0, %v16112_v8 }
 0x96e   : > { %11609 = vmatprep.subr.bf16.mxu0 %v16112_v8 }
 0x96f   : > { %v6611_v4 = vpop.permute.xlu0 %6610  ;;  %11582 = vmatmul.mubr.msk.bf16.vlgmr.msra.gmra.mrb[220].mxu1 %vm1075_vm1, %v6461_v1 }
 0x970   : > { %11592 = vmatpush3.bf16.xpose.msra.mxu1 %v6568_v27  ;;  %11593 = vmatprep.mubr.msk.bf16.mxu1 %vm12713_vm0, %v16112_v8  ;;  %v6863_v48 = vpop.permute.xlu1 %6862 }
 0x971   : > { %11603 = vmatprep.subr.bf16.mxu1 %v16112_v8  ;;  %v6868_v49 = vsel %vm1075_vm1, %v6863_v48, 0 }
 0x973   : > { %v6713_v20 = vpop.permute.xlu0 %6712 }
 0x974   : > { %v6718_v50 = vsel %vm1075_vm1, %v6713_v20, 0  ;;  %11600 = vmatmul.mubr.msk.bf16.vlgmr.msra.gmra.mrb[228].mxu0 %vm1075_vm1, %v6611_v4  ;;  %v6861_v7 = vpop.permute.xlu1 %6860 }
 0x975   : > { %11610 = vmatpush3.bf16.xpose.msra.mxu0 %v6718_v50  ;;  %11611 = vmatprep.mubr.msk.bf16.mxu0 %vm12713_vm0, %v16112_v8 }
 0x976   : > { %11621 = vmatprep.subr.bf16.mxu0 %v16112_v8 }
 0x977   : > { %v6711_v60 = vpop.permute.xlu0 %6710  ;;  %11594 = vmatmul.mubr.msk.bf16.vlgmr.msra.gmra.mrb[224].mxu1 %vm1075_vm1, %v6561_v28 }
 0x978   : > { %11604 = vmatpush3.bf16.xpose.msra.mxu1 %v6668_v43  ;;  %11605 = vmatprep.mubr.msk.bf16.mxu1 %vm12713_vm0, %v16112_v8  ;;  %v6963_v22 = vpop.permute.xlu1 %6962 }
 0x979   : > { %11615 = vmatprep.subr.bf16.mxu1 %v16112_v8  ;;  %v6968_v59 = vsel %vm1075_vm1, %v6963_v22, 0 }
 0x97b   : > { %v6813_v35 = vpop.permute.xlu0 %6812 }
 0x97c   : > { %v6818_v16 = vsel %vm1075_vm1, %v6813_v35, 0  ;;  %11612 = vmatmul.mubr.msk.bf16.vlgmr.msra.gmra.mrb[232].mxu0 %vm1075_vm1, %v6711_v60  ;;  %v6961_v52 = vpop.permute.xlu1 %6960 }
 0x97d   : > { %11622 = vmatpush3.bf16.xpose.msra.mxu0 %v6818_v16  ;;  %11623 = vmatprep.mubr.msk.bf16.mxu0 %vm12713_vm0, %v16112_v8 }
 0x97e   : > { %11633 = vmatprep.subr.bf16.mxu0 %v16112_v8 }
 0x97f   : > { %v6811_v53 = vpop.permute.xlu0 %6810  ;;  %11606 = vmatmul.mubr.msk.bf16.vlgmr.msra.gmra.mrb[228].mxu1 %vm1075_vm1, %v6661_v45 }
 0x980   : > { %11616 = vmatpush3.bf16.xpose.msra.mxu1 %v6768_v41  ;;  %11617 = vmatprep.mubr.msk.bf16.mxu1 %vm12713_vm0, %v16112_v8  ;;  %v7063_v2 = vpop.permute.xlu1 %7062 }
 0x981   : > { %11627 = vmatprep.subr.bf16.mxu1 %v16112_v8  ;;  %v7068_v34 = vsel %vm1075_vm1, %v7063_v2, 0 }
 0x983   : > { %v6913_v23 = vpop.permute.xlu0 %6912 }
 0x984   : > { %v6918_v11 = vsel %vm1075_vm1, %v6913_v23, 0  ;;  %11624 = vmatmul.mubr.msk.bf16.vlgmr.msra.gmra.mrb[236].mxu0 %vm1075_vm1, %v6811_v53  ;;  %v7061_v32 = vpop.permute.xlu1 %7060 }
 0x985   : > { %11634 = vmatpush3.bf16.xpose.msra.mxu0 %v6918_v11  ;;  %11635 = vmatprep.mubr.msk.bf16.mxu0 %vm12713_vm0, %v16112_v8 }
 0x986   : > { %11645 = vmatprep.subr.bf16.mxu0 %v16112_v8 }
 0x987   : > { %v6911_v40 = vpop.permute.xlu0 %6910  ;;  %11618 = vmatmul.mubr.msk.bf16.vlgmr.msra.gmra.mrb[232].mxu1 %vm1075_vm1, %v6761_v39 }
 0x988   : > { %11628 = vmatpush3.bf16.xpose.msra.mxu1 %v6868_v49  ;;  %11629 = vmatprep.mubr.msk.bf16.mxu1 %vm12713_vm0, %v16112_v8  ;;  %v7367_v63 = vpop.permute.xlu1 %7366 }
 0x989   : > { %11639 = vmatprep.subr.bf16.mxu1 %v16112_v8  ;;  %v7372_v61 = vsel %vm2024_vm2, %v7367_v63, 0 }
 0x98b   : > { %v7013_v37 = vpop.permute.xlu0 %7012 }
 0x98c   : > { %v7018_v25 = vsel %vm1075_vm1, %v7013_v37, 0  ;;  %11636 = vmatmul.mubr.msk.bf16.vlgmr.msra.gmra.mrb[240].mxu0 %vm1075_vm1, %v6911_v40 }
 0x98d   : > { %11646 = vmatpush3.bf16.xpose.msra.mxu0 %v7018_v25  ;;  %11647 = vmatprep.mubr.msk.bf16.mxu0 %vm12713_vm0, %v16112_v8 }
 0x98e   : > { %11657 = vmatprep.subr.bf16.mxu0 %v16112_v8 }
 0x98f   : > { %v7011_v5 = vpop.permute.xlu0 %7010  ;;  %11630 = vmatmul.mubr.msk.bf16.vlgmr.msra.gmra.mrb[236].mxu1 %vm1075_vm1, %v6861_v7 }
 0x990   : > { %11640 = vmatpush3.bf16.xpose.msra.mxu1 %v6968_v59  ;;  %11641 = vmatprep.mubr.msk.bf16.mxu1 %vm12713_vm0, %v16112_v8 }
 0x991   : > { %11651 = vmatprep.subr.bf16.mxu1 %v16112_v8 }
 0x993   : > { %v7319_v29 = vpop.permute.xlu0 %7318 }
 0x994   : > { %v7324_v21 = vsel %vm2024_vm2, %v7319_v29, 0  ;;  %11648 = vmatmul.mubr.msk.bf16.vlgmr.msra.gmra.mrb[244].mxu0 %vm1075_vm1, %v7011_v5 }
 0x995   : > { %11658 = vmatpush3.bf16.msra.mxu0 %v7324_v21  ;;  %11659 = vmatprep.mubr.msk.bf16.mxu0 %vm12713_vm0, %v16112_v8 }
 0x996   : > { %11669 = vmatprep.subr.bf16.mxu0 %v16112_v8 }
 0x997   : > { %11642 = vmatmul.mubr.msk.bf16.vlgmr.msra.gmra.mrb[240].mxu1 %vm1075_vm1, %v6961_v52 }
 0x998   : > { %11652 = vmatpush3.bf16.xpose.msra.mxu1 %v7068_v34  ;;  %11653 = vmatprep.mubr.msk.bf16.mxu1 %vm12713_vm0, %v16112_v8 }
 0x999   : > { %11663 = vmatprep.subr.bf16.mxu1 %v16112_v8 }
 0x99f   : > { %11654 = vmatmul.mubr.msk.bf16.vlgmr.msra.gmra.mrb[244].mxu1 %vm1075_vm1, %v7061_v32 }
 0x9a0   : > { %11664 = vmatpush3.bf16.msra.mxu1 %v7372_v61  ;;  %11665 = vmatprep.mubr.msk.bf16.mxu1 %vm12713_vm0, %v16112_v8 }
 0x9a1   : > { %11675 = vmatprep.subr.bf16.mxu1 %v16112_v8 }
 0x9c2   : > { %v14805_v18 = vpop.f32.mrb[184].mxu0 }
 0x9c3   : > { %v11469_v10 = vpop.f32.mrb[185].mxu0 }
 0x9c4   : > { %v5587_v30 = vpop.f32.mrb[186].mxu0 }
 0x9c5   : > { %v11470_v24 = vpop.f32.mrb[187].mxu0 }
 0x9ca   : > { %v14807_v0 = vpop.f32.mrb[188].mxu0 }
 0x9cb   : > { %v11481_v13 = vpop.f32.mrb[189].mxu0 }
 0x9cc   : > { %v5683_v31 = vpop.f32.mrb[190].mxu0 }
 0x9cd   : > { %v14809_v17 = vpop.f32.mrb[184].mxu1  ;;  %v11482_v54 = vpop.f32.mrb[191].mxu0 }
 0x9ce   : > { %v11914_v57 = vpack.i.bf16 %v14809_v17, %v14805_v18  ;;  %v11475_v33 = vpop.f32.mrb[185].mxu1 }
 0x9cf   : > { %v5635_v1 = vpop.f32.mrb[186].mxu1 }
 0x9d0   : > { %v11476_v55 = vpop.f32.mrb[187].mxu1 }
 0x9d5   : > { %v14813_v44 = vpop.f32.mrb[188].mxu1 }
 0x9d6   : > { %v11919_v15 = vpack.i.bf16 %v14813_v44, %v14807_v0  ;;  %v11487_v36 = vpop.f32.mrb[189].mxu1 }
 0x9d7   : > { %v5731_v58 = vpop.f32.mrb[190].mxu1 }
 0x9d8   : > { %v11488_v3 = vpop.f32.mrb[191].mxu1 }
 0x9d9   : > { %v14817_v28 = vpop.f32.mrb[192].mxu0 }
 0x9da   : > { %v11493_v51 = vpop.f32.mrb[193].mxu0 }
 0x9db   : > { %v5779_v46 = vpop.f32.mrb[194].mxu0 }
 0x9dc   : > { %v11494_v6 = vpop.f32.mrb[195].mxu0 }
 0x9de   : > { %v14819_v62 = vpop.f32.mrb[192].mxu1 }
 0x9df   : > { %v11944_v42 = vpack.i.bf16 %v14819_v62, %v14817_v28  ;;  %v11499_v9 = vpop.f32.mrb[193].mxu1 }
 0x9e0   : > { %v5827_v45 = vpop.f32.mrb[194].mxu1 }
 0x9e1   : > { %v11500_v26 = vpop.f32.mrb[195].mxu1  ;;  %v14823_v38 = vpop.f32.mrb[196].mxu0 }
 0x9e2   : > { %v11505_v19 = vpop.f32.mrb[197].mxu0 }
 0x9e3   : > { %v5875_v14 = vpop.f32.mrb[198].mxu0 }
 0x9e4   : > { %v11506_v47 = vpop.f32.mrb[199].mxu0 }
 0x9e6   : > { %v14825_v27 = vpop.f32.mrb[196].mxu1 }
 0x9e7   : > { %v11949_v4 = vpack.i.bf16 %v14825_v27, %v14823_v38  ;;  %v11511_v39 = vpop.f32.mrb[197].mxu1 }
 0x9e8   : > { %v5923_v20 = vpop.f32.mrb[198].mxu1 }
 0x9e9   : > { %v11512_v50 = vpop.f32.mrb[199].mxu1  ;;  %v14829_v43 = vpop.f32.mrb[200].mxu0 }
 0x9ea   : > { %v11517_v60 = vpop.f32.mrb[201].mxu0 }
 0x9eb   : > { %v5971_v48 = vpop.f32.mrb[202].mxu0 }
 0x9ec   : > { %v11518_v35 = vpop.f32.mrb[203].mxu0 }
 0x9ee   : > { %v14831_v16 = vpop.f32.mrb[200].mxu1 }
 0x9ef   : > { %v11974_v7 = vpack.i.bf16 %v14831_v16, %v14829_v43  ;;  %v11523_v41 = vpop.f32.mrb[201].mxu1 }
 0x9f0   : > { %v6019_v53 = vpop.f32.mrb[202].mxu1 }
 0x9f1   : > { %v11524_v23 = vpop.f32.mrb[203].mxu1  ;;  %v14835_v22 = vpop.f32.mrb[204].mxu0 }
 0x9f2   : > { %v11529_v11 = vpop.f32.mrb[205].mxu0 }
 0x9f3   : > { %v6067_v49 = vpop.f32.mrb[206].mxu0 }
 0x9f4   : > { %v11530_v40 = vpop.f32.mrb[207].mxu0 }
 0x9f6   : > { %v14837_v52 = vpop.f32.mrb[204].mxu1 }
 0x9f7   : > { %v11979_v37 = vpack.i.bf16 %v14837_v52, %v14835_v22  ;;  %v11535_v25 = vpop.f32.mrb[205].mxu1  ;;  %v16243_v52 = vld [vmem:[#allocation68_spill] sm:$0xff] }
 0x9f8   : > { %v6115_v59 = vpop.f32.mrb[206].mxu1 }
 0x9f9   : > { %v11536_v5 = vpop.f32.mrb[207].mxu1  ;;  %v14841_v2 = vpop.f32.mrb[208].mxu0 }
 0x9fa   : > { %v11541_v29 = vpop.f32.mrb[209].mxu0 }
 0x9fb   : > { %v6163_v21 = vpop.f32.mrb[210].mxu0 }
 0x9fc   : > { %v11542_v32 = vpop.f32.mrb[211].mxu0 }
 0x9fe   : > { %v14843_v34 = vpop.f32.mrb[208].mxu1 }
 0x9ff   : > { %v12004_v63 = vpack.i.bf16 %v14843_v34, %v14841_v2  ;;  %v11547_v61 = vpop.f32.mrb[209].mxu1 }
 0xa00   : > { %v6211_v10 = vpop.f32.mrb[210].mxu1 }
 0xa01   : > { %v11548_v30 = vpop.f32.mrb[211].mxu1 }
 0xa27   : > { %v14847_v24 = vpop.f32.mrb[212].mxu0 }
 0xa28   : > { %v11553_v13 = vpop.f32.mrb[213].mxu0 }
 0xa29   : > { %v6259_v31 = vpop.f32.mrb[214].mxu0 }
 0xa2a   : > { %v11554_v54 = vpop.f32.mrb[215].mxu0 }
 0xa2f   : > { %v6354_v33 = vpop.f32.mrb[216].mxu0 }
 0xa30   : > { %v14849_v1 = vmul.f32 0.17677669, %v6354_v33  ;;  %v11565_v55 = vpop.f32.mrb[217].mxu0 }
 0xa31   : > { %v6357_v36 = vpop.f32.mrb[218].mxu0 }
 0xa32   : > { %v14851_v58 = vpop.f32.mrb[212].mxu1  ;;  %v11566_v3 = vpop.f32.mrb[219].mxu0  ;;  %v7126_v51 = vsel %vm1828_vm3, %v14849_v1, -inf }
 0xa33   : > { %v12009_v46 = vpack.i.bf16 %v14851_v58, %v14847_v24  ;;  %7127 = vmax.xlane.f32.xlu0 %v7126_v51  ;;  %v11559_v6 = vpop.f32.mrb[213].mxu1 }
 0xa34   : > { %v6307_v9 = vpop.f32.mrb[214].mxu1 }
 0xa35   : > { %v11560_v45 = vpop.f32.mrb[215].mxu1 }
 0xa37   : > { %v6454_v26 = vpop.f32.mrb[220].mxu0 }
 0xa38   : > { %v14857_v19 = vmul.f32 0.17677669, %v6454_v26  ;;  %v11577_v14 = vpop.f32.mrb[221].mxu0 }
 0xa39   : > { %v6457_v47 = vpop.f32.mrb[222].mxu0 }
 0xa3a   : > { %v6404_v39 = vpop.f32.mrb[216].mxu1  ;;  %v11578_v20 = vpop.f32.mrb[223].mxu0  ;;  %v7132_v50 = vsel %vm1828_vm3, %v14857_v19, -inf }
 0xa3b   : > { %v14861_v60 = vmul.f32 0.17677669, %v6404_v39  ;;  %7133 = vmax.xlane.f32.xlu0 %v7132_v50  ;;  %v11571_v48 = vpop.f32.mrb[217].mxu1 }
 0xa3c   : > { %v6407_v35 = vpop.f32.mrb[218].mxu1 }
 0xa3d   : > { %v11572_v41 = vpop.f32.mrb[219].mxu1  ;;  %v7129_v53 = vsel %vm1828_vm3, %v14861_v60, -inf }
 0xa3e   : > { %7130 = vmax.xlane.f32.xlu1 %v7129_v53 }
 0xa3f   : > { %v6554_v23 = vpop.f32.mrb[224].mxu0 }
 0xa40   : > { %v11589_v11 = vpop.f32.mrb[225].mxu0  ;;  %v14867_v21 = vmul.f32 0.17677669, %v6554_v23 }
 0xa41   : > { %v6557_v49 = vpop.f32.mrb[226].mxu0 }
 0xa42   : > { %v6504_v40 = vpop.f32.mrb[220].mxu1  ;;  %v11590_v25 = vpop.f32.mrb[227].mxu0  ;;  %v7138_v54 = vsel %vm1828_vm3, %v14867_v21, -inf }
 0xa43   : > { %v14865_v59 = vmul.f32 0.17677669, %v6504_v40  ;;  %v11583_v5 = vpop.f32.mrb[221].mxu1 }
 0xa44   : > { %v6507_v29 = vpop.f32.mrb[222].mxu1 }
 0xa45   : > { %v11584_v32 = vpop.f32.mrb[223].mxu1  ;;  %v7135_v61 = vsel %vm1828_vm3, %v14865_v59, -inf }
 0xa46   : > { %7136 = vmax.xlane.f32.xlu0 %v7135_v61 }
 0xa47   : > { %v6654_v10 = vpop.f32.mrb[228].mxu0 }
 0xa48   : > { %v11601_v30 = vpop.f32.mrb[229].mxu0  ;;  %v14871_v13 = vmul.f32 0.17677669, %v6654_v10 }
 0xa49   : > { %v6657_v31 = vpop.f32.mrb[230].mxu0 }
 0xa4a   : > { %v11602_v33 = vpop.f32.mrb[231].mxu0  ;;  %7139 = vmax.xlane.f32.xlu0 %v7138_v54  ;;  %v6604_v55 = vpop.f32.mrb[224].mxu1  ;;  %v7144_v9 = vsel %vm1828_vm3, %v14871_v13, -inf }
 0xa4b   : > { %v14875_v36 = vmul.f32 0.17677669, %v6604_v55  ;;  %v11595_v3 = vpop.f32.mrb[225].mxu1 }
 0xa4c   : > { %v6607_v51 = vpop.f32.mrb[226].mxu1 }
 0xa4d   : > { %v11596_v6 = vpop.f32.mrb[227].mxu1  ;;  %v7141_v45 = vsel %vm1828_vm3, %v14875_v36, -inf }
 0xa4e   : > { %7145 = vmax.xlane.f32.xlu0 %v7144_v9  ;;  %7142 = vmax.xlane.f32.xlu1 %v7141_v45 }
 0xa4f   : > { %v6754_v26 = vpop.f32.mrb[232].mxu0 }
 0xa50   : > { %v14881_v14 = vmul.f32 0.17677669, %v6754_v26  ;;  %v11613_v47 = vpop.f32.mrb[233].mxu0 }
 0xa51   : > { %v6757_v39 = vpop.f32.mrb[234].mxu0 }
 0xa52   : > { %v6704_v20 = vpop.f32.mrb[228].mxu1  ;;  %v11614_v50 = vpop.f32.mrb[235].mxu0  ;;  %v7150_v48 = vsel %vm1828_vm3, %v14881_v14, -inf }
 0xa53   : > { %v14885_v35 = vmul.f32 0.17677669, %v6704_v20  ;;  %7151 = vmax.xlane.f32.xlu0 %v7150_v48  ;;  %v11607_v41 = vpop.f32.mrb[229].mxu1 }
 0xa54   : > { %v6707_v53 = vpop.f32.mrb[230].mxu1 }
 0xa55   : > { %v11608_v23 = vpop.f32.mrb[231].mxu1  ;;  %v7147_v11 = vsel %vm1828_vm3, %v14885_v35, -inf }
 0xa56   : > { %7148 = vmax.xlane.f32.xlu1 %v7147_v11 }
 0xa57   : > { %v6854_v49 = vpop.f32.mrb[236].mxu0 }
 0xa58   : > { %v14889_v40 = vmul.f32 0.17677669, %v6854_v49  ;;  %v11625_v25 = vpop.f32.mrb[237].mxu0 }
 0xa59   : > { %v6857_v5 = vpop.f32.mrb[238].mxu0 }
 0xa5a   : > { %v6804_v29 = vpop.f32.mrb[232].mxu1  ;;  %v11626_v32 = vpop.f32.mrb[239].mxu0  ;;  %v7156_v61 = vsel %vm1828_vm3, %v14889_v40, -inf }
 0xa5b   : > { %v14893_v10 = vmul.f32 0.17677669, %v6804_v29  ;;  %7157 = vmax.xlane.f32.xlu0 %v7156_v61  ;;  %v11619_v30 = vpop.f32.mrb[233].mxu1 }
 0xa5c   : > { %v6807_v31 = vpop.f32.mrb[234].mxu1 }
 0xa5d   : > { %v11620_v54 = vpop.f32.mrb[235].mxu1  ;;  %v7153_v33 = vsel %vm1828_vm3, %v14893_v10, -inf }
 0xa5e   : > { %7154 = vmax.xlane.f32.xlu1 %v7153_v33 }
 0xa5f   : > { %v6954_v55 = vpop.f32.mrb[240].mxu0 }
 0xa60   : > { %v14897_v3 = vmul.f32 0.17677669, %v6954_v55  ;;  %v11637_v51 = vpop.f32.mrb[241].mxu0 }
 0xa61   : > { %v6957_v6 = vpop.f32.mrb[242].mxu0 }
 0xa62   : > { %v6904_v9 = vpop.f32.mrb[236].mxu1  ;;  %v11638_v45 = vpop.f32.mrb[243].mxu0  ;;  %v7162_v26 = vsel %vm1828_vm3, %v14897_v3, -inf  ;;  %v16215_v6 = vld [vmem:[#allocation44_spill] sm:$0xff] }
 0xa63   : > { %v14901_v47 = vmul.f32 0.17677669, %v6904_v9  ;;  %7163 = vmax.xlane.f32.xlu0 %v7162_v26  ;;  %v11631_v39 = vpop.f32.mrb[237].mxu1  ;;  %v16216_v9 = vld [vmem:[#allocation39_spill] sm:$0xff]  ;;  %v16218_v26 = vld [vmem:[#allocation46_spill] sm:$0xff] }
 0xa64   : > { %v6907_v20 = vpop.f32.mrb[238].mxu1  ;;  %v16217_v45 = vld [vmem:[#allocation43_spill] sm:$0xff] }
 0xa65   : > { %v11632_v50 = vpop.f32.mrb[239].mxu1  ;;  %v7159_v48 = vsel %vm1828_vm3, %v14901_v47, -inf }
 0xa66   : > { %7160 = vmax.xlane.f32.xlu1 %v7159_v48  ;;  %v14925_v50 = vpop.permute.xlu0 %7414 }
 0xa67   : > { %v7054_v41 = vpop.f32.mrb[244].mxu0 }
 0xa68   : > { %v14905_v53 = vmul.f32 0.17677669, %v7054_v41  ;;  %v11649_v23 = vpop.f32.mrb[245].mxu0  ;;  %v14929_v41 = vpop.permute.xlu1 %7462 }
 0xa69   : > { %v7057_v11 = vpop.f32.mrb[246].mxu0 }
 0xa6a   : > { %v7004_v49 = vpop.f32.mrb[240].mxu1  ;;  %v11650_v25 = vpop.f32.mrb[247].mxu0  ;;  %v7168_v5 = vsel %vm1828_vm3, %v14905_v53, -inf }
 0xa6b   : > { %v14909_v29 = vmul.f32 0.17677669, %v7004_v49  ;;  %7169 = vmax.xlane.f32.xlu0 %v7168_v5  ;;  %v11643_v32 = vpop.f32.mrb[241].mxu1  ;;  %v14927_v48 = vpop.permute.xlu0 %7510 }
 0xa6c   : > { %v7007_v61 = vpop.f32.mrb[242].mxu1  ;;  %v14933_v49 = vpop.permute.xlu1 %7558 }
 0xa6d   : > { %v11644_v30 = vpop.f32.mrb[243].mxu1  ;;  %v7165_v31 = vsel %vm1828_vm3, %v14909_v29, -inf }
 0xa6e   : > { %7166 = vmax.xlane.f32.xlu1 %v7165_v31 }
 0xa6f   : > { %v14931_v23 = vpop.permute.xlu0 %7606 }
 0xa70   : > { %v14936_v32 = vpop.permute.xlu1 %7654 }
 0xa72   : > { %v7104_v54 = vpop.f32.mrb[244].mxu1 }
 0xa73   : > { %v11655_v33 = vpop.f32.mrb[245].mxu1  ;;  %v14921_v39 = vmul.f32 0.17677669, %v7104_v54 }
 0xa74   : > { %v7107_v55 = vpop.f32.mrb[246].mxu1 }
 0xa75   : > { %v11656_v51 = vpop.f32.mrb[247].mxu1  ;;  %v7171_v20 = vsel %vm1828_vm3, %v14921_v39, -inf }
 0xa7f   : > { %7750 = vrot.lane.b32.xlu1 %v16215_v6, %s12716_s25 }
 0xa81   : > { %7702 = vrot.lane.b32.xlu0 %v16216_v9, %s12716_s25 }
 0xa83   : > { %7798 = vrot.lane.b32.xlu1 %v16217_v45, %s12716_s25 }
 0xa87   : > { %7846 = vrot.lane.b32.xlu1 %v16218_v26, %s12716_s25 }
 0xaab   : > { %7172 = vmax.xlane.f32.xlu1 %v7171_v20 }
 0xac0   : > { %v7128_v11 = vpop.xlane.xlu0 %7127 }
 0xac1   : > { %v7174_v25 = vsub.f32 %v14849_v1, %v7128_v11 }
 0xac3   : > { %v7190_v5 = vmul.f32 1.442695, %v7174_v25 }
 0xac5   : > { %12336 = vpow2.f32 %v7190_v5 }
 0xac8   : > { %v7134_v61 = vpop.xlane.xlu0 %7133 }
 0xac9   : > { %v7176_v30 = vsub.f32 %v14857_v19, %v7134_v61 }
 0xacb   : > { %v7194_v31 = vmul.f32 1.442695, %v7176_v30  ;;  %v7131_v54 = vpop.xlane.xlu1 %7130 }
 0xacc   : > { %v7175_v33 = vsub.f32 %v14861_v60, %v7131_v54 }
 0xacd   : > { %12338 = vpow2.f32 %v7194_v31 }
 0xace   : > { %v7192_v55 = vmul.f32 1.442695, %v7175_v33 }
 0xacf   : > { %v14940_v51 = vpop.eup %12336 }
 0xad0   : > { %12340 = vpow2.f32 %v7192_v55  ;;  %v7222_v6 = vsel %vm1828_vm3, %v14940_v51, 0.0 }
 0xad1   : > { %7223 = vadd.xlane.f32.xlu0 %v7222_v6 }
 0xad3   : > { %v7137_v1 = vpop.xlane.xlu0 %7136 }
 0xad4   : > { %v7177_v9 = vsub.f32 %v14865_v59, %v7137_v1 }
 0xad6   : > { %v7196_v45 = vmul.f32 1.442695, %v7177_v9 }
 0xad7   : > { %v14945_v26 = vpop.eup %12338  ;;  %v7140_v19 = vpop.xlane.xlu0 %7139 }
 0xad8   : > { %12342 = vpow2.f32 %v7196_v45  ;;  %v7178_v20 = vsub.f32 %v14867_v21, %v7140_v19  ;;  %v7228_v60 = vsel %vm1828_vm3, %v14945_v26, 0.0 }
 0xad9   : > { %7229 = vadd.xlane.f32.xlu0 %v7228_v60 }
 0xada   : > { %v14950_v11 = vpop.eup %12340  ;;  %v7198_v25 = vmul.f32 1.442695, %v7178_v20 }
 0xadb   : > { %v7146_v5 = vpop.xlane.xlu0 %7145  ;;  %v7143_v61 = vpop.xlane.xlu1 %7142  ;;  %v7225_v30 = vsel %vm1828_vm3, %v14950_v11, 0.0 }
 0xadc   : > { %12344 = vpow2.f32 %v7198_v25  ;;  %v7180_v59 = vsub.f32 %v14871_v13, %v7146_v5  ;;  %v7179_v31 = vsub.f32 %v14875_v36, %v7143_v61  ;;  %7226 = vadd.xlane.f32.xlu1 %v7225_v30 }
 0xade   : > { %v7202_v54 = vmul.f32 1.442695, %v7180_v59  ;;  %v7200_v21 = vmul.f32 1.442695, %v7179_v31 }
 0xae0   : > { %12346 = vpow2.f32 %v7202_v54  ;;  %v7152_v33 = vpop.xlane.xlu0 %7151 }
 0xae1   : > { %12348 = vpow2.f32 %v7200_v21  ;;  %v7182_v6 = vsub.f32 %v14881_v14, %v7152_v33 }
 0xae2   : > { %v14956_v55 = vpop.eup %12342 }
 0xae3   : > { %v7149_v1 = vpop.xlane.xlu1 %7148  ;;  %v7231_v9 = vsel %vm1828_vm3, %v14956_v55, 0.0  ;;  %v7206_v36 = vmul.f32 1.442695, %v7182_v6 }
 0xae4   : > { %v7181_v45 = vsub.f32 %v14885_v35, %v7149_v1  ;;  %7232 = vadd.xlane.f32.xlu1 %v7231_v9 }
 0xae6   : > { %v14962_v13 = vpop.eup %12344  ;;  %v7204_v19 = vmul.f32 1.442695, %v7181_v45 }
 0xae7   : > { %v7234_v20 = vsel %vm1828_vm3, %v14962_v13, 0.0 }
 0xae8   : > { %12350 = vpow2.f32 %v7204_v19  ;;  %7235 = vadd.xlane.f32.xlu0 %v7234_v20  ;;  %v7158_v60 = vpop.xlane.xlu0 %7157 }
 0xae9   : > { %v7184_v25 = vsub.f32 %v14889_v40, %v7158_v60  ;;  %12352 = vpow2.f32 %v7206_v36 }
 0xaea   : > { %v14967_v14 = vpop.eup %12346 }
 0xaeb   : > { %v14969_v5 = vpop.eup %12348  ;;  %v7210_v61 = vmul.f32 1.442695, %v7184_v25  ;;  %v7155_v35 = vpop.xlane.xlu1 %7154  ;;  %v7240_v30 = vsel %vm1828_vm3, %v14967_v14, 0.0  ;;  %v16219_v25 = vld [vmem:[#allocation22_spill] sm:$0xff] }
 0xaec   : > { %v7183_v59 = vsub.f32 %v14893_v10, %v7155_v35  ;;  %7241 = vadd.xlane.f32.xlu0 %v7240_v30  ;;  %v7237_v31 = vsel %vm1828_vm3, %v14969_v5, 0.0  ;;  %v16220_v35 = vld [vmem:[#allocation45_spill] sm:$0xff] }
 0xaed   : > { %7238 = vadd.xlane.f32.xlu1 %v7237_v31  ;;  %12354 = vpow2.f32 %v7210_v61 }
 0xaee   : > { %v7208_v54 = vmul.f32 1.442695, %v7183_v59 }
 0xaf0   : > { %12356 = vpow2.f32 %v7208_v54  ;;  %v7164_v61 = vpop.xlane.xlu0 %7163 }
 0xaf1   : > { %v7186_v30 = vsub.f32 %v14897_v3, %v7164_v61 }
 0xaf2   : > { %v14976_v40 = vpop.eup %12350 }
 0xaf3   : > { %v7161_v21 = vpop.xlane.xlu1 %7160  ;;  %v7243_v33 = vsel %vm1828_vm3, %v14976_v40, 0.0  ;;  %v14980_v6 = vpop.eup %12352  ;;  %v7214_v31 = vmul.f32 1.442695, %v7186_v30 }
 0xaf4   : > { %v7185_v1 = vsub.f32 %v14901_v47, %v7161_v21  ;;  %7244 = vadd.xlane.f32.xlu1 %v7243_v33  ;;  %v7246_v9 = vsel %vm1828_vm3, %v14980_v6, 0.0 }
 0xaf6   : > { %v7212_v10 = vmul.f32 1.442695, %v7185_v1 }
 0xaf7   : > { %v14985_v45 = vpop.eup %12354 }
 0xaf8   : > { %12358 = vpow2.f32 %v7212_v10  ;;  %7247 = vadd.xlane.f32.xlu1 %v7246_v9  ;;  %v7252_v20 = vsel %vm1828_vm3, %v14985_v45, 0.0  ;;  %v7170_v59 = vpop.xlane.xlu0 %7169 }
 0xaf9   : > { %v7188_v54 = vsub.f32 %v14905_v53, %v7170_v59  ;;  %12360 = vpow2.f32 %v7214_v31 }
 0xafa   : > { %v14987_v36 = vpop.eup %12356 }
 0xafb   : > { %v7249_v19 = vsel %vm1828_vm3, %v14987_v36, 0.0  ;;  %v7167_v21 = vpop.xlane.xlu1 %7166  ;;  %v7218_v33 = vmul.f32 1.442695, %v7188_v54 }
 0xafc   : > { %7250 = vadd.xlane.f32.xlu0 %v7249_v19  ;;  %7253 = vadd.xlane.f32.xlu1 %v7252_v20  ;;  %v7187_v1 = vsub.f32 %v14909_v29, %v7167_v21  ;;  %v16221_v21 = vld [vmem:[#allocation56_spill] sm:$0xff] }
 0xafd   : > { %12362 = vpow2.f32 %v7218_v33  ;;  %v16222_v33 = vld [vmem:[#allocation55_spill] sm:$0xff] }
 0xafe   : > { %v7216_v10 = vmul.f32 1.442695, %v7187_v1  ;;  %v16223_v1 = vpack.i.bf16 %v16221_v21, %v16222_v33 }
 0xaff   : > { %v15004_v9 = vpop.permute.xlu1 %7750 }
 0xb00   : > { %12364 = vpow2.f32 %v7216_v10 }
 0xb02   : > { %v14993_v47 = vpop.eup %12358 }
 0xb03   : > { %v7255_v60 = vsel %vm1828_vm3, %v14993_v47, 0.0  ;;  %v15006_v19 = vpop.eup %12360  ;;  %v15008_v20 = vpop.permute.xlu1 %7798 }
 0xb04   : > { %7256 = vadd.xlane.f32.xlu0 %v7255_v60  ;;  %v7258_v3 = vsel %vm1828_vm3, %v15006_v19, 0.0 }
 0xb07   : > { %v15012_v60 = vpop.eup %12362  ;;  %v15014_v53 = vpop.permute.xlu1 %7846 }
 0xb08   : > { %v7264_v29 = vsel %vm1828_vm3, %v15012_v60, 0.0 }
 0xb0d   : > { %7942 = vrot.lane.b32.xlu1 %v16219_v25, %s12716_s25  ;;  %v15018_v25 = vpop.eup %12364 }
 0xb1a   : > { %7894 = vrot.lane.b32.xlu0 %v16220_v35, %s12716_s25  ;;  %v7261_v35 = vsel %vm1828_vm3, %v15018_v25, 0.0 }
 0xb31   : > { %7259 = vadd.xlane.f32.xlu1 %v7258_v3  ;;  %v16225_v3 = vld [vmem:[#allocation53_spill] sm:$0xff] }
 0xb35   : > { %7265 = vadd.xlane.f32.xlu1 %v7264_v29 }
 0xb38   : > { %v7173_v61 = vpop.xlane.xlu1 %7172 }
 0xb39   : > { %v7189_v30 = vsub.f32 %v14921_v39, %v7173_v61  ;;  %7262 = vadd.xlane.f32.xlu0 %v7261_v35  ;;  %v15037_v39 = vpop.permute.xlu0 %7702 }
 0xb3b   : > { %v7220_v59 = vmul.f32 1.442695, %v7189_v30 }
 0xb3d   : > { %12366 = vpow2.f32 %v7220_v59 }
 0xb46   : > { %8038 = vrot.lane.b32.xlu1 %v13736_v12, %s12716_s25  ;;  %v16224_v12 = vld [vmem:[#allocation54_spill] sm:$0xff] }
 0xb47   : > { %v15025_v31 = vpop.eup %12366  ;;  %v16226_v29 = vpack.i.bf16 %v16224_v12, %v16225_v3 }
 0xb48   : > { %v7267_v54 = vsel %vm1828_vm3, %v15025_v31, 0.0 }
 0xb49   : > { %7268 = vadd.xlane.f32.xlu0 %v7267_v54 }
 0xb4a   : > { %11910 = vrot.lane.b32.xlu1 %v16223_v1, %s12716_s25 }
 0xb4e   : > { %11920 = vrot.lane.b32.xlu1 %v11919_v15, %s12715_s21 }
 0xb5e   : > { %v7224_v10 = vpop.xlane.xlu0 %7223 }
 0xb5f   : > { %12368 = vrcp.f32 %v7224_v10  ;;  %7990 = vrot.lane.b32.xlu0 %v13674_v56, %s12716_s25  ;;  %v7420_v56 = vsel %vm2024_vm2, %v14925_v50, 0  ;;  %v7516_v50 = vsel %vm2024_vm2, %v14927_v48, 0 }
 0xb63   : > { %11905 = vrot.lane.b32.xlu0 %v16226_v29, %s12716_s25 }
 0xb66   : > { %v7230_v61 = vpop.xlane.xlu0 %7229 }
 0xb67   : > { %12370 = vrcp.f32 %v7230_v61  ;;  %11915 = vrot.lane.b32.xlu0 %v11914_v57, %s12715_s21 }
 0xb69   : > { %v12369_v0 = vpop.eup %12368  ;;  %v7227_v44 = vpop.xlane.xlu1 %7226 }
 0xb6a   : > { %12372 = vrcp.f32 %v7227_v44  ;;  %v7271_v15 = vmul.f32 %v12369_v0, %v14940_v51  ;;  %v7612_v44 = vsel %vm2024_vm2, %v14931_v23, 0  ;;  %v7660_v23 = vsel %vm2024_vm2, %v14936_v32, 0 }
 0xb6c   : > { %v7302_v35 = vpack.c.bf16 %v7271_v15, %v7271_v15 }
 0xb6e   : > { %11660 = vmatmul.mubr.msk.bf16.vlgmr.msra.gmra.mrb[248].mxu0 %vm1828_vm3, %v7302_v35 }
 0xb6f   : > { %11670 = vmatpush3.bf16.msra.mxu0 %v7420_v56  ;;  %11671 = vmatprep.mubr.msk.bf16.mxu0 %vm12713_vm0, %v16112_v8 }
 0xb70   : > { %11681 = vmatprep.subr.bf16.mxu0 %v16112_v8 }
 0xb71   : > { %v12371_v30 = vpop.eup %12370  ;;  %v7233_v18 = vpop.xlane.xlu1 %7232 }
 0xb72   : > { %12374 = vrcp.f32 %v7233_v18  ;;  %v7275_v17 = vmul.f32 %v12371_v30, %v14945_v26  ;;  %v7468_v26 = vsel %vm2024_vm2, %v14929_v41, 0  ;;  %v7564_v41 = vsel %vm2024_vm2, %v14933_v49, 0 }
 0xb74   : > { %v12373_v57 = vpop.eup %12372  ;;  %v7304_v59 = vpack.c.bf16 %v7275_v17, %v7275_v17 }
 0xb75   : > { %v7236_v51 = vpop.xlane.xlu0 %7235  ;;  %v7273_v54 = vmul.f32 %v12373_v57, %v14950_v11 }
 0xb76   : > { %12376 = vrcp.f32 %v7236_v51  ;;  %11672 = vmatmul.mubr.msk.bf16.vlgmr.msra.gmra.mrb[252].mxu0 %vm1828_vm3, %v7304_v59 }
 0xb77   : > { %11682 = vmatpush3.bf16.msra.mxu0 %v7516_v50  ;;  %v7303_v21 = vpack.c.bf16 %v7273_v54, %v7273_v54  ;;  %11683 = vmatprep.mubr.msk.bf16.mxu0 %vm12713_vm0, %v16112_v8  ;;  %v7756_v54 = vsel %vm2024_vm2, %v15004_v9, 0 }
 0xb78   : > { %11693 = vmatprep.subr.bf16.mxu0 %v16112_v8 }
 0xb79   : > { %v7242_v33 = vpop.xlane.xlu0 %7241  ;;  %11666 = vmatmul.mubr.msk.bf16.vlgmr.msra.gmra.mrb[248].mxu1 %vm1828_vm3, %v7303_v21  ;;  %v7804_v21 = vsel %vm2024_vm2, %v15008_v20, 0 }
 0xb7a   : > { %12378 = vrcp.f32 %v7242_v33  ;;  %11676 = vmatpush3.bf16.msra.mxu1 %v7468_v26  ;;  %v7239_v11 = vpop.xlane.xlu1 %7238  ;;  %11677 = vmatprep.mubr.msk.bf16.mxu1 %vm12713_vm0, %v16112_v8  ;;  %v7852_v33 = vsel %vm2024_vm2, %v15014_v53, 0 }
 0xb7b   : > { %12380 = vrcp.f32 %v7239_v11  ;;  %11687 = vmatprep.subr.bf16.mxu1 %v16112_v8 }
 0xb7c   : > { %v12375_v48 = vpop.eup %12374 }
 0xb7d   : > { %v7277_v1 = vmul.f32 %v12375_v48, %v14956_v55 }
 0xb7f   : > { %v7305_v10 = vpack.c.bf16 %v7277_v1, %v7277_v1 }
 0xb80   : > { %v12377_v12 = vpop.eup %12376 }
 0xb81   : > { %v7279_v3 = vmul.f32 %v12377_v12, %v14962_v13  ;;  %11678 = vmatmul.mubr.msk.bf16.vlgmr.msra.gmra.mrb[252].mxu1 %vm1828_vm3, %v7305_v10  ;;  %v7245_v29 = vpop.xlane.xlu1 %7244 }
 0xb82   : > { %11688 = vmatpush3.bf16.msra.mxu1 %v7564_v41  ;;  %12382 = vrcp.f32 %v7245_v29  ;;  %11689 = vmatprep.mubr.msk.bf16.mxu1 %vm12713_vm0, %v16112_v8 }
 0xb83   : > { %v7306_v61 = vpack.c.bf16 %v7279_v3, %v7279_v3  ;;  %11699 = vmatprep.subr.bf16.mxu1 %v16112_v8 }
 0xb84   : > { %v12379_v0 = vpop.eup %12378 }
 0xb85   : > { %v12381_v55 = vpop.eup %12380  ;;  %11684 = vmatmul.mubr.msk.bf16.vlgmr.msra.gmra.mrb[0].mxu0 %vm1828_vm3, %v7306_v61  ;;  %v7248_v49 = vpop.xlane.xlu1 %7247  ;;  %v7283_v15 = vmul.f32 %v12379_v0, %v14967_v14  ;;  %v7708_v14 = vsel %vm2024_vm2, %v15037_v39, 0 }
 0xb86   : > { %v7281_v13 = vmul.f32 %v12381_v55, %v14969_v5  ;;  %11694 = vmatpush3.bf16.msra.mxu0 %v7612_v44  ;;  %12384 = vrcp.f32 %v7248_v49  ;;  %11695 = vmatprep.mubr.msk.bf16.mxu0 %vm12713_vm0, %v16112_v8 }
 0xb87   : > { %11705 = vmatprep.subr.bf16.mxu0 %v16112_v8  ;;  %v7308_v18 = vpack.c.bf16 %v7283_v15, %v7283_v15 }
 0xb88   : > { %v7307_v35 = vpack.c.bf16 %v7281_v13, %v7281_v13 }
 0xb89   : > { %v7251_v56 = vpop.xlane.xlu0 %7250  ;;  %v7254_v30 = vpop.xlane.xlu1 %7253 }
 0xb8a   : > { %12386 = vrcp.f32 %v7251_v56  ;;  %11690 = vmatmul.mubr.msk.bf16.vlgmr.msra.gmra.mrb[0].mxu1 %vm1828_vm3, %v7307_v35 }
 0xb8b   : > { %11700 = vmatpush3.bf16.msra.mxu1 %v7660_v23  ;;  %12388 = vrcp.f32 %v7254_v30  ;;  %11701 = vmatprep.mubr.msk.bf16.mxu1 %vm12713_vm0, %v16112_v8 }
 0xb8c   : > { %v12383_v5 = vpop.eup %12382  ;;  %11711 = vmatprep.subr.bf16.mxu1 %v16112_v8 }
 0xb8d   : > { %v7285_v17 = vmul.f32 %v12383_v5, %v14976_v40  ;;  %11696 = vmatmul.mubr.msk.bf16.vlgmr.msra.gmra.mrb[4].mxu0 %vm1828_vm3, %v7308_v18  ;;  %v7943_v53 = vpop.permute.xlu1 %7942 }
 0xb8e   : > { %11706 = vmatpush3.bf16.msra.mxu0 %v7708_v14  ;;  %11707 = vmatprep.mubr.msk.bf16.mxu0 %vm12713_vm0, %v16112_v8  ;;  %v7948_v10 = vsel %vm2024_vm2, %v7943_v53, 0  ;;  %v16227_v14 = vmov 0   ;;  %v16229_v53 = vld [vmem:[#allocation57_spill] sm:$0xff] }
 0xb8f   : > { %v7309_v32 = vpack.c.bf16 %v7285_v17, %v7285_v17  ;;  %11717 = vmatprep.subr.bf16.mxu0 %v16112_v8  ;;  %v12056_v17 = vld [vmem:[#allocation7] sm:$0xff]  }
 0xb90   : > { %v12385_v57 = vpop.eup %12384 }
 0xb91   : > { %v7287_v59 = vmul.f32 %v12385_v57, %v14980_v6  ;;  %v7257_v51 = vpop.xlane.xlu0 %7256  ;;  %v12060_v57 = vld [vmem:[#allocation7 + $0x20] sm:$0xff]  }
 0xb92   : > { %12390 = vrcp.f32 %v7257_v51  ;;  %11702 = vmatmul.mubr.msk.bf16.vlgmr.msra.gmra.mrb[4].mxu1 %vm1828_vm3, %v7309_v32  ;;  %v12059_v32 = vld [vmem:[#allocation7 + $0x18] sm:$0xff]   ;;  %v12061_v51 = vld [vmem:[#allocation7 + $0x28] sm:$0xff]  }
 0xb93   : > { %v7310_v40 = vpack.c.bf16 %v7287_v59, %v7287_v59  ;;  %11712 = vmatpush3.bf16.msra.mxu1 %v7756_v54  ;;  %11713 = vmatprep.mubr.msk.bf16.mxu1 %vm12713_vm0, %v16112_v8 }
 0xb94   : > { %v12387_v39 = vpop.eup %12386  ;;  %11723 = vmatprep.subr.bf16.mxu1 %v16112_v8 }
 0xb95   : > { %v12389_v50 = vpop.eup %12388  ;;  %v7289_v6 = vmul.f32 %v12387_v39, %v14987_v36  ;;  %11708 = vmatmul.mubr.msk.bf16.vlgmr.msra.gmra.mrb[8].mxu0 %vm1828_vm3, %v7310_v40  ;;  %v7895_v11 = vpop.permute.xlu0 %7894  ;;  %v12062_v39 = vld [vmem:[#allocation7 + $0x30] sm:$0xff]  }
 0xb96   : > { %11718 = vmatpush3.bf16.msra.mxu0 %v7804_v21  ;;  %11719 = vmatprep.mubr.msk.bf16.mxu0 %vm12713_vm0, %v16112_v8  ;;  %v7291_v26 = vmul.f32 %v12389_v50, %v14985_v45  ;;  %v7900_v45 = vsel %vm2024_vm2, %v7895_v11, 0 }
 0xb97   : > { %v7311_v9 = vpack.c.bf16 %v7289_v6, %v7289_v6  ;;  %11729 = vmatprep.subr.bf16.mxu0 %v16112_v8 }
 0xb98   : > { %v7312_v20 = vpack.c.bf16 %v7291_v26, %v7291_v26 }
 0xb9a   : > { %11714 = vmatmul.mubr.msk.bf16.vlgmr.msra.gmra.mrb[8].mxu1 %vm1828_vm3, %v7311_v9  ;;  %v12063_v9 = vld [vmem:[#allocation7 + $0x38] sm:$0xff]  }
 0xb9b   : > { %11724 = vmatpush3.bf16.msra.mxu1 %v7852_v33  ;;  %11725 = vmatprep.mubr.msk.bf16.mxu1 %vm12713_vm0, %v16112_v8 }
 0xb9c   : > { %v12391_v36 = vpop.eup %12390  ;;  %11735 = vmatprep.subr.bf16.mxu1 %v16112_v8 }
 0xb9d   : > { %v7293_v48 = vmul.f32 %v12391_v36, %v14993_v47  ;;  %11720 = vmatmul.mubr.msk.bf16.vlgmr.msra.gmra.mrb[12].mxu0 %vm1828_vm3, %v7312_v20 }
 0xb9e   : > { %11730 = vmatpush3.bf16.msra.mxu0 %v7900_v45  ;;  %11731 = vmatprep.mubr.msk.bf16.mxu0 %vm12713_vm0, %v16112_v8  ;;  %v16228_v45 = vld [vmem:[#allocation58_spill] sm:$0xff] }
 0xb9f   : > { %v7313_v1 = vpack.c.bf16 %v7293_v48, %v7293_v48  ;;  %11741 = vmatprep.subr.bf16.mxu0 %v16112_v8 }
 0xba2   : > { %11726 = vmatmul.mubr.msk.bf16.vlgmr.msra.gmra.mrb[12].mxu1 %vm1828_vm3, %v7313_v1  ;;  %v16230_v1 = vpack.i.bf16 %v16228_v45, %v16229_v53 }
 0xba3   : > { %11736 = vmatpush3.bf16.msra.mxu1 %v7948_v10  ;;  %11737 = vmatprep.mubr.msk.bf16.mxu1 %vm12713_vm0, %v16112_v8 }
 0xba4   : > { %11747 = vmatprep.subr.bf16.mxu1 %v16112_v8 }
 0xbbe   : > { %v7260_v47 = vpop.xlane.xlu1 %7259 }
 0xbbf   : > { %12392 = vrcp.f32 %v7260_v47 }
 0xbc2   : > { %v7266_v3 = vpop.xlane.xlu1 %7265 }
 0xbc6   : > { %v7263_v12 = vpop.xlane.xlu0 %7262  ;;  %v8039_v44 = vpop.permute.xlu1 %8038 }
 0xbc7   : > { %12394 = vrcp.f32 %v7263_v12  ;;  %v8044_v15 = vsel %vm2024_vm2, %v8039_v44, 0  ;;  %v16231_v44 = vld [vmem:[#allocation60_spill] sm:$0xff] }
 0xbc8   : > { %12396 = vrcp.f32 %v7266_v3 }
 0xbc9   : > { %v12393_v41 = vpop.eup %12392 }
 0xbca   : > { %v7295_v29 = vmul.f32 %v12393_v41, %v15006_v19 }
 0xbcc   : > { %v7314_v61 = vpack.c.bf16 %v7295_v29, %v7295_v29 }
 0xbce   : > { %11732 = vmatmul.mubr.msk.bf16.vlgmr.msra.gmra.mrb[16].mxu0 %vm1828_vm3, %v7314_v61 }
 0xbcf   : > { %11743 = vmatprep.mubr.msk.bf16.mxu0 %vm12713_vm0, %v16112_v8 }
 0xbd1   : > { %v12395_v0 = vpop.eup %12394 }
 0xbd2   : > { %v7297_v55 = vmul.f32 %v12395_v0, %v15018_v25  ;;  %v12397_v13 = vpop.eup %12396 }
 0xbd3   : > { %v7299_v19 = vmul.f32 %v12397_v13, %v15012_v60  ;;  %v12058_v60 = vld [vmem:[#allocation7 + $0x10] sm:$0xff]  }
 0xbd4   : > { %v7315_v49 = vpack.c.bf16 %v7297_v55, %v7297_v55 }
 0xbd5   : > { %v7316_v25 = vpack.c.bf16 %v7299_v19, %v7299_v19 }
 0xbd6   : > { %v7269_v35 = vpop.xlane.xlu0 %7268  ;;  %11738 = vmatmul.mubr.msk.bf16.vlgmr.msra.gmra.mrb[16].mxu1 %vm1828_vm3, %v7315_v49  ;;  %v16232_v49 = vld [vmem:[#allocation59_spill] sm:$0xff] }
 0xbd7   : > { %12398 = vrcp.f32 %v7269_v35  ;;  %11748 = vmatpush3.bf16.msra.mxu1 %v8044_v15  ;;  %11749 = vmatprep.mubr.msk.bf16.mxu1 %vm12713_vm0, %v16112_v8  ;;  %v12057_v8 = vld [vmem:[#allocation7 + $0x8] sm:$0xff]   ;;  %v16233_v13 = vpack.i.bf16 %v16231_v44, %v16232_v49 }
 0xbda   : > { %v7991_v56 = vpop.permute.xlu0 %7990 }
 0xbdb   : > { %v7996_v30 = vsel %vm2024_vm2, %v7991_v56, 0 }
 0xbdc   : > { %11742 = vmatpush3.bf16.msra.mxu0 %v7996_v30 }
 0xbdd   : > { %11753 = vmatprep.subr.bf16.mxu0 %v12056_v17 }
 0xbde   : > { %v11906_v44 = vpop.permute.xlu0 %11905 }
 0xbdf   : > { %11744 = vmatmul.mubr.msk.bf16.vlgmr.msra.gmra.mrb[20].mxu0 %vm1828_vm3, %v7316_v25 }
 0xbe0   : > { %11754 = vmatpush3.bf16.msra.mxu0 %v12056_v17 }
 0xbe1   : > { %v12399_v23 = vpop.eup %12398  ;;  %11755 = vmatprep.subr.bf16.mxu0 %v12057_v8 }
 0xbe2   : > { %v7301_v18 = vmul.f32 %v12399_v23, %v15025_v31  ;;  %v16234_v23 = vld [vmem:[#allocation62_spill] sm:$0xff] }
 0xbe4   : > { %v7317_v5 = vpack.c.bf16 %v7301_v18, %v7301_v18  ;;  %11756 = vmatpush3.bf16.msra.mxu0 %v12057_v8  ;;  %v16235_v18 = vld [vmem:[#allocation61_spill] sm:$0xff] }
 0xbe5   : > { %11757 = vmatprep.subr.bf16.mxu0 %v12058_v60 }
 0xbe6   : > { %11750 = vmatmul.mubr.msk.bf16.vlgmr.msra.gmra.mrb[20].mxu1 %vm1828_vm3, %v7317_v5  ;;  %v16236_v5 = vpack.i.bf16 %v16234_v23, %v16235_v18  ;;  %v16247_v23 = vld [vmem:[#allocation19_spill] sm:$0xff] }
 0xbe7   : > { %9029 = vmatprep.mubr.bf16.mxu1 %v16227_v14 }
 0xbe8   : > { %11758 = vmatpush3.bf16.msra.mxu0 %v12058_v60 }
 0xbe9   : > { %11759 = vmatprep.subr.bf16.mxu0 %v12059_v32 }
 0xbec   : > { %11760 = vmatpush3.bf16.msra.mxu0 %v12059_v32 }
 0xbed   : > { %11761 = vmatprep.subr.bf16.mxu0 %v12060_v57 }
 0xbf0   : > { %11762 = vmatpush3.bf16.msra.mxu0 %v12060_v57 }
 0xbf1   : > { %11763 = vmatprep.subr.bf16.mxu0 %v12061_v51 }
 0xbf4   : > { %11764 = vmatpush3.bf16.msra.mxu0 %v12061_v51  ;;  %v16238_v51 = vld [vmem:[#allocation63_spill] sm:$0xff] }
 0xbf5   : > { %11765 = vmatprep.subr.bf16.mxu0 %v12062_v39 }
 0xbf8   : > { %11766 = vmatpush3.bf16.msra.mxu0 %v12062_v39 }
 0xbf9   : > { %11767 = vmatprep.subr.bf16.mxu0 %v12063_v9 }
 0xbfc   : > { %11768 = vmatpush3.bf16.msra.mxu0 %v12063_v9 }
 0xc41   : > { %v7360_v31 = vpop.f32.mrb[248].mxu0 }
 0xc42   : > { %v11661_v59 = vpop.f32.mrb[249].mxu0 }
 0xc43   : > { %v7363_v54 = vpop.f32.mrb[250].mxu0  ;;  %v16237_v59 = vld [vmem:[#allocation64_spill] sm:$0xff] }
 0xc44   : > { %v11662_v40 = vpop.f32.mrb[251].mxu0  ;;  %v16239_v54 = vpack.i.bf16 %v16237_v59, %v16238_v51 }
 0xc49   : > { %v7456_v50 = vpop.f32.mrb[252].mxu0 }
 0xc4a   : > { %v11673_v21 = vpop.f32.mrb[253].mxu0 }
 0xc4b   : > { %v7459_v6 = vpop.f32.mrb[254].mxu0 }
 0xc4c   : > { %v7408_v26 = vpop.f32.mrb[248].mxu1  ;;  %v11674_v33 = vpop.f32.mrb[255].mxu0 }
 0xc4d   : > { %v11924_v11 = vpack.i.bf16 %v7408_v26, %v7360_v31  ;;  %v11667_v20 = vpop.f32.mrb[249].mxu1  ;;  %v16240_v26 = vld [vmem:[#allocation66_spill] sm:$0xff]  ;;  %v16241_v33 = vld [vmem:[#allocation65_spill] sm:$0xff] }
 0xc4e   : > { %v7411_v36 = vpop.f32.mrb[250].mxu1 }
 0xc4f   : > { %11925 = vrot.lane.b32.xlu0 %v11924_v11, %s12714_s22  ;;  %v11668_v48 = vpop.f32.mrb[251].mxu1  ;;  %v16242_v11 = vpack.i.bf16 %v16240_v26, %v16241_v33 }
 0xc53   : > { %11935 = vrot.lane.b32.xlu0 %v16230_v1, %s12716_s25 }
 0xc54   : > { %v7504_v10 = vpop.f32.mrb[252].mxu1 }
 0xc55   : > { %v11929_v47 = vpack.i.bf16 %v7504_v10, %v7456_v50  ;;  %v11679_v12 = vpop.f32.mrb[253].mxu1 }
 0xc56   : > { %v7507_v41 = vpop.f32.mrb[254].mxu1 }
 0xc57   : > { %11945 = vrot.lane.b32.xlu0 %v11944_v42, %s12715_s21  ;;  %11930 = vrot.lane.b32.xlu1 %v11929_v47, %s12714_s22  ;;  %v11680_v3 = vpop.f32.mrb[255].mxu1 }
 0xc58   : > { %v7552_v29 = vpop.f32.mrb[0].mxu0 }
 0xc59   : > { %v11685_v61 = vpop.f32.mrb[1].mxu0 }
 0xc5a   : > { %v7555_v0 = vpop.f32.mrb[2].mxu0 }
 0xc5b   : > { %v11686_v55 = vpop.f32.mrb[3].mxu0  ;;  %11940 = vrot.lane.b32.xlu1 %v16233_v13, %s12716_s25 }
 0xc5d   : > { %v7600_v15 = vpop.f32.mrb[0].mxu1 }
 0xc5e   : > { %v11954_v35 = vpack.i.bf16 %v7600_v15, %v7552_v29  ;;  %v11691_v19 = vpop.f32.mrb[1].mxu1 }
 0xc5f   : > { %v7603_v56 = vpop.f32.mrb[2].mxu1  ;;  %11950 = vrot.lane.b32.xlu1 %v11949_v4, %s12715_s21  ;;  %v11908_v19 = vunpack.i.h.bf16 %v11906_v44 }
 0xc60   : > { %11955 = vrot.lane.b32.xlu0 %v11954_v35, %s12714_s22  ;;  %v11692_v28 = vpop.f32.mrb[3].mxu1  ;;  %v7648_v62 = vpop.f32.mrb[4].mxu0  ;;  %v11907_v56 = vunpack.i.l.bf16 %v11906_v44 }
 0xc61   : > { %v11697_v42 = vpop.f32.mrb[5].mxu0  ;;  %v11911_v35 = vpop.permute.xlu1 %11910 }
 0xc62   : > { %v7651_v30 = vpop.f32.mrb[6].mxu0  ;;  %v8278_v18 = vsel %vm1075_vm1, %v16247_v23, %v11907_v56 }
 0xc63   : > { %v11698_v25 = vpop.f32.mrb[7].mxu0  ;;  %v16246_v30 = vld [vmem:[#allocation21_spill] sm:$0xff] }
 0xc64   : > { %11965 = vrot.lane.b32.xlu0 %v16236_v5, %s12716_s25  ;;  %v8279_v25 = vsel %vm1075_vm1, %v16246_v30, %v11908_v19 }
 0xc65   : > { %v7696_v17 = vpop.f32.mrb[4].mxu1 }
 0xc66   : > { %v11959_v8 = vpack.i.bf16 %v7696_v17, %v7648_v62  ;;  %v11703_v60 = vpop.f32.mrb[5].mxu1 }
 0xc67   : > { %v7699_v32 = vpop.f32.mrb[6].mxu1 }
 0xc68   : > { %11975 = vrot.lane.b32.xlu0 %v11974_v7, %s12715_s21  ;;  %11960 = vrot.lane.b32.xlu1 %v11959_v8, %s12714_s22  ;;  %v11704_v38 = vpop.f32.mrb[7].mxu1  ;;  %v7744_v27 = vpop.f32.mrb[8].mxu0 }
 0xc69   : > { %v11709_v4 = vpop.f32.mrb[9].mxu0  ;;  %v11921_v32 = vpop.permute.xlu1 %11920 }
 0xc6a   : > { %v7747_v57 = vpop.f32.mrb[10].mxu0  ;;  %v11923_v59 = vunpack.i.h.bf16 %v11921_v32  ;;  %v11922_v51 = vunpack.i.l.bf16 %v11921_v32 }
 0xc6b   : > { %v11710_v31 = vpop.f32.mrb[11].mxu0  ;;  %v11913_v57 = vunpack.i.h.bf16 %v11911_v35 }
 0xc6c   : > { %11970 = vrot.lane.b32.xlu1 %v16239_v54, %s12716_s25  ;;  %v11912_v31 = vunpack.i.l.bf16 %v11911_v35 }
 0xc6d   : > { %v7792_v40 = vpop.f32.mrb[8].mxu1 }
 0xc6e   : > { %v11984_v39 = vpack.i.bf16 %v7792_v40, %v7744_v27  ;;  %v11715_v50 = vpop.f32.mrb[9].mxu1 }
 0xc6f   : > { %v7795_v21 = vpop.f32.mrb[10].mxu1 }
 0xc70   : > { %11980 = vrot.lane.b32.xlu1 %v11979_v37, %s12715_s21  ;;  %11985 = vrot.lane.b32.xlu0 %v11984_v39, %s12714_s22  ;;  %v11716_v43 = vpop.f32.mrb[11].mxu1  ;;  %v7840_v16 = vpop.f32.mrb[12].mxu0  ;;  %v16244_v37 = vld [vmem:[#allocation67_spill] sm:$0xff]  ;;  %v16249_v21 = vld [vmem:[#allocation26_spill] sm:$0xff] }
 0xc71   : > { %v11721_v7 = vpop.f32.mrb[13].mxu0  ;;  %v16245_v53 = vpack.i.bf16 %v16243_v52, %v16244_v37  ;;  %v16248_v39 = vld [vmem:[#allocation31_spill] sm:$0xff]  ;;  %v8280_v43 = vsel %vm1075_vm1, %v16249_v21, %v11912_v31 }
 0xc72   : > { %v7843_v6 = vpop.f32.mrb[14].mxu0  ;;  %v8281_v50 = vsel %vm1075_vm1, %v16248_v39, %v11913_v57 }
 0xc73   : > { %v11722_v9 = vpop.f32.mrb[15].mxu0  ;;  %v8297_v6 = vsel %vm8294_vm4, %v8280_v43, %v11922_v51 }
 0xc74   : > { %11995 = vrot.lane.b32.xlu0 %v16242_v11, %s12716_s25  ;;  %v8298_v9 = vsel %vm8294_vm4, %v8281_v50, %v11923_v59 }
 0xc75   : > { %v7888_v20 = vpop.f32.mrb[12].mxu1 }
 0xc76   : > { %v11989_v36 = vpack.i.bf16 %v7888_v20, %v7840_v16  ;;  %v11727_v48 = vpop.f32.mrb[13].mxu1 }
 0xc77   : > { %v7891_v45 = vpop.f32.mrb[14].mxu1 }
 0xc78   : > { %12005 = vrot.lane.b32.xlu0 %v12004_v63, %s12715_s21  ;;  %11990 = vrot.lane.b32.xlu1 %v11989_v36, %s12714_s22  ;;  %v11728_v22 = vpop.f32.mrb[15].mxu1 }
 0xc7c   : > { %12000 = vrot.lane.b32.xlu1 %v16245_v53, %s12716_s25  ;;  %v16250_v53 = vld [vmem:[#allocation33_spill] sm:$0xff] }
 0xc80   : > { %12010 = vrot.lane.b32.xlu1 %v12009_v46, %s12715_s21  ;;  %v11916_v46 = vpop.permute.xlu0 %11915  ;;  %s12717_s21 = smov [#allocation11]  }
 0xc81   : > { %v11918_v28 = vunpack.i.h.bf16 %v11916_v46  ;;  %v11917_v62 = vunpack.i.l.bf16 %v11916_v46  ;;  %s12626_s25 = sshll.u32 %s12717_s21, 4  ;;  %s12627_s25 = int_to_ptr.vmem [resolvable:$false] %s12626_s25 }
 0xc82   : > { %p12629_p12 = scmp.lt.s32.totalorder %s15924_s19, %s12627_s25 }
 0xc83   : > { %v8295_v8 = vsel %vm8294_vm4, %v8278_v18, %v11917_v62  ;;  %v8296_v60 = vsel %vm8294_vm4, %v8279_v25, %v11918_v28 }
 0xca1   : > { %v7936_v1 = vpop.f32.mrb[16].mxu0 }
 0xca2   : > { %v11733_v10 = vpop.f32.mrb[17].mxu0 }
 0xca3   : > { %v7939_v47 = vpop.f32.mrb[18].mxu0  ;;  %v16251_v10 = vld [vmem:[#allocation24_spill] sm:$0xff] }
 0xca4   : > { %v11734_v12 = vpop.f32.mrb[19].mxu0 }
 0xca9   : > { %v7984_v41 = vpop.f32.mrb[16].mxu1 }
 0xcaa   : > { %v12014_v2 = vpack.i.bf16 %v7984_v41, %v7936_v1  ;;  %v11739_v34 = vpop.f32.mrb[17].mxu1 }
 0xcab   : > { %v7987_v63 = vpop.f32.mrb[18].mxu1 }
 0xcac   : > { %12015 = vrot.lane.b32.xlu0 %v12014_v2, %s12714_s22  ;;  %v11740_v3 = vpop.f32.mrb[19].mxu1 }
 0xcb2   : > { %v8032_v29 = vpop.f32.mrb[20].mxu0 }
 0xcb3   : > { %v11745_v61 = vpop.f32.mrb[21].mxu0 }
 0xcb4   : > { %v8035_v0 = vpop.f32.mrb[22].mxu0 }
 0xcb5   : > { %v11746_v55 = vpop.f32.mrb[23].mxu0 }
 0xcb9   : > { %v8080_v49 = vpop.f32.mrb[20].mxu1 }
 0xcba   : > { %v12019_v13 = vpack.i.bf16 %v8080_v49, %v8032_v29  ;;  %v11751_v24 = vpop.f32.mrb[21].mxu1 }
 0xcbb   : > { %v8083_v58 = vpop.f32.mrb[22].mxu1 }
 0xcbc   : > { %12020 = vrot.lane.b32.xlu1 %v12019_v13, %s12714_s22  ;;  %v11752_v15 = vpop.f32.mrb[23].mxu1  ;;  %v16252_v58 = vld [vmem:[#allocation35_spill] sm:$0xff]  ;;  %s16266_s22 = sld [smem:[#allocation74_spill]] }
 0xcbd   : > { %v16253_v15 = vld [vmem:[#allocation28_spill] sm:$0xff] }
 0xcc1   : > { %v11926_v42 = vpop.permute.xlu0 %11925 }
 0xcc2   : > { %v11928_v5 = vunpack.i.h.bf16 %v11926_v42  ;;  %v11927_v17 = vunpack.i.l.bf16 %v11926_v42 }
 0xcc4   : > { %v8312_v38 = vsel %vm8311_vm5, %v8295_v8, %v11927_v17  ;;  %v8313_v27 = vsel %vm8311_vm5, %v8296_v60, %v11928_v5 }
 0xcc5   : > { %v8328_v4 = vpack.c.bf16 %v8313_v27, %v8312_v38  ;;  %v11936_v54 = vpop.permute.xlu0 %11935  ;;  %v16254_v38 = vld [vmem:[#allocation47_spill] sm:$0xff] }
 0xcc6   : > { %v11938_v36 = vunpack.i.h.bf16 %v11936_v54  ;;  %v11937_v48 = vunpack.i.l.bf16 %v11936_v54 }
 0xcc7   : > { %11769 = vmatprep.mubr.bf16.mxu0 %v8328_v4  ;;  %v16255_v4 = vld [vmem:[#allocation32_spill] sm:$0xff] }
 0xcc8   : > { %v8283_v1 = vsel %vm1075_vm1, %v16250_v53, %v11938_v36  ;;  %v8282_v47 = vsel %vm1075_vm1, %v16251_v10, %v11937_v48 }
 0xcc9   : > { %v11931_v40 = vpop.permute.xlu1 %11930  ;;  %v11946_v11 = vpop.permute.xlu0 %11945 }
 0xcca   : > { %v11933_v16 = vunpack.i.h.bf16 %v11931_v40  ;;  %v11932_v7 = vunpack.i.l.bf16 %v11931_v40  ;;  %v11948_v22 = vunpack.i.h.bf16 %v11946_v11  ;;  %v11947_v52 = vunpack.i.l.bf16 %v11946_v11  ;;  %v16257_v11 = vld [vmem:[#allocation20_spill] sm:$0xff] }
 0xccc   : > { %v8315_v26 = vsel %vm8311_vm5, %v8298_v9, %v11933_v16  ;;  %v8314_v33 = vsel %vm8311_vm5, %v8297_v6, %v11932_v7  ;;  %v8299_v2 = vsel %vm8294_vm4, %v8282_v47, %v11947_v52  ;;  %v8300_v34 = vsel %vm8294_vm4, %v8283_v1, %v11948_v22 }
 0xccd   : > { %v8329_v20 = vpack.c.bf16 %v8315_v26, %v8314_v33  ;;  %v11941_v45 = vpop.permute.xlu1 %11940  ;;  %v16256_v26 = vld [vmem:[#allocation49_spill] sm:$0xff] }
 0xcce   : > { %v11943_v0 = vunpack.i.h.bf16 %v11941_v45  ;;  %v11942_v55 = vunpack.i.l.bf16 %v11941_v45 }
 0xccf   : > { %11770 = vmatmul.mubr.bf16.vlgmr.msra.gmra.mrb[24].mxu0 %v8329_v20 }
 0xcd0   : > { %v8285_v46 = vsel %vm1075_vm1, %v16252_v58, %v11943_v0  ;;  %v8284_v35 = vsel %vm1075_vm1, %v16253_v15, %v11942_v55 }
 0xcd1   : > { %v11951_v63 = vpop.permute.xlu1 %11950 }
 0xcd2   : > { %v11956_v37 = vpop.permute.xlu0 %11955  ;;  %v11953_v49 = vunpack.i.h.bf16 %v11951_v63  ;;  %v11952_v13 = vunpack.i.l.bf16 %v11951_v63  ;;  %v16258_v63 = vld [vmem:[#allocation51_spill] sm:$0xff] }
 0xcd3   : > { %v11958_v12 = vunpack.i.h.bf16 %v11956_v37  ;;  %v11957_v41 = vunpack.i.l.bf16 %v11956_v37 }
 0xcd4   : > { %v8301_v28 = vsel %vm8294_vm4, %v8284_v35, %v11952_v13  ;;  %v8302_v62 = vsel %vm8294_vm4, %v8285_v46, %v11953_v49 }
 0xcd5   : > { %v8316_v3 = vsel %vm8311_vm5, %v8299_v2, %v11957_v41  ;;  %v8317_v29 = vsel %vm8311_vm5, %v8300_v34, %v11958_v12 }
 0xcd6   : > { %v8330_v61 = vpack.c.bf16 %v8317_v29, %v8316_v3  ;;  %v11966_v44 = vpop.permute.xlu0 %11965  ;;  %v16259_v29 = vld [vmem:[#allocation48_spill] sm:$0xff] }
 0xcd7   : > { %v11968_v18 = vunpack.i.h.bf16 %v11966_v44  ;;  %v11967_v5 = vunpack.i.l.bf16 %v11966_v44 }
 0xcd8   : > { %11773 = vmatprep.mubr.bf16.mxu0 %v8330_v61 }
 0xcd9   : > { %v8287_v27 = vsel %vm1075_vm1, %v16254_v38, %v11968_v18  ;;  %v8286_v57 = vsel %vm1075_vm1, %v16255_v4, %v11967_v5 }
 0xcda   : > { %v11961_v24 = vpop.permute.xlu1 %11960  ;;  %v11976_v42 = vpop.permute.xlu0 %11975 }
 0xcdb   : > { %v11963_v19 = vunpack.i.h.bf16 %v11961_v24  ;;  %v11962_v56 = vunpack.i.l.bf16 %v11961_v24  ;;  %v11978_v8 = vunpack.i.h.bf16 %v11976_v42  ;;  %v11977_v60 = vunpack.i.l.bf16 %v11976_v42  ;;  %v16260_v42 = vld [vmem:[#allocation52_spill] sm:$0xff] }
 0xcdd   : > { %v8319_v30 = vsel %vm8311_vm5, %v8302_v62, %v11963_v19  ;;  %v8318_v25 = vsel %vm8311_vm5, %v8301_v28, %v11962_v56  ;;  %v8303_v51 = vsel %vm8294_vm4, %v8286_v57, %v11977_v60  ;;  %v8304_v54 = vsel %vm8294_vm4, %v8287_v27, %v11978_v8  ;;  %v15270_v27 = vld [vmem:[%s15975_s4] ss:$0 sm:$0xff] }
 0xcde   : > { %v8331_v23 = vpack.c.bf16 %v8319_v30, %v8318_v25  ;;  %v11971_v17 = vpop.permute.xlu1 %11970  ;;  %v16261_v25 = vld [vmem:[#allocation50_spill] sm:$0xff] }
 0xcdf   : > { %v11973_v43 = vunpack.i.h.bf16 %v11971_v17  ;;  %v11972_v16 = vunpack.i.l.bf16 %v11971_v17 }
 0xce0   : > { %11774 = vmatmul.mubr.bf16.gmra.mrb[28].mxu0 %v8331_v23 }
 0xce1   : > { %v8289_v33 = vsel %vm1075_vm1, %v16256_v26, %v11973_v43  ;;  %v8288_v20 = vsel %vm1075_vm1, %v16257_v11, %v11972_v16  ;;  %v12467_v11 = vld [vmem:[%s13004_s17 + $0x10] sm:$0xff] }
 0xce2   : > { %v11986_v32 = vpop.permute.xlu0 %11985  ;;  %v11981_v40 = vpop.permute.xlu1 %11980 }
 0xce3   : > { %v11988_v31 = vunpack.i.h.bf16 %v11986_v32  ;;  %v11987_v59 = vunpack.i.l.bf16 %v11986_v32  ;;  %v11983_v7 = vunpack.i.h.bf16 %v11981_v40  ;;  %v11982_v6 = vunpack.i.l.bf16 %v11981_v40 }
 0xce5   : > { %v8320_v39 = vsel %vm8311_vm5, %v8303_v51, %v11987_v59  ;;  %v8321_v50 = vsel %vm8311_vm5, %v8304_v54, %v11988_v31  ;;  %v8305_v45 = vsel %vm8294_vm4, %v8288_v20, %v11982_v6  ;;  %v8306_v22 = vsel %vm8294_vm4, %v8289_v33, %v11983_v7  ;;  %v12464_v54 = vld [vmem:[%s13004_s17] sm:$0xff]  ;;  %v12466_v7 = vld [vmem:[%s13004_s17 + $0x18] sm:$0xff] }
 0xce6   : > { %v8332_v21 = vpack.c.bf16 %v8321_v50, %v8320_v39  ;;  %v11996_v1 = vpop.permute.xlu0 %11995 }
 0xce7   : > { %v11998_v47 = vunpack.i.h.bf16 %v11996_v1  ;;  %v11997_v12 = vunpack.i.l.bf16 %v11996_v1  ;;  %v12066_v1 = vld [vmem:[#allocation8 + $0x4] ss:$16 sps:$4 sm:$0xff]  }
 0xce8   : > { %11777 = vmatprep.mubr.bf16.mxu0 %v8332_v21  ;;  %v12465_v21 = vld [vmem:[%s13004_s17 + $0x8] sm:$0xff]  ;;  %8997 = vmatprep.subr.bf16.mxu1 %v12066_v1  ;;  %v12475_v1 = vld [vmem:[%s13004_s17 + $0x50] sm:$0xff] }
 0xce9   : > { %v8291_v3 = vsel %vm1075_vm1, %v16258_v63, %v11998_v47  ;;  %v8290_v61 = vsel %vm1075_vm1, %v16259_v29, %v11997_v12  ;;  %v12064_v47 = vld [vmem:[#allocation8] ss:$16 sps:$4 sm:$0xff]   ;;  %v12067_v12 = vld [vmem:[#allocation8 + $0x8] ss:$16 sps:$4 sm:$0xff]   ;;  %v12075_v29 = vld [vmem:[#allocation8 + $0x2c] ss:$16 sps:$4 sm:$0xff]  }
 0xcea   : > { %v11991_v9 = vpop.permute.xlu1 %11990  ;;  %v12006_v10 = vpop.permute.xlu0 %12005  ;;  %8998 = vmatpush1.bf16.msra.mxu1 %v12064_v47  ;;  %v12108_v47 = vld [vmem:[#allocation8 + $0xe4] ss:$16 sps:$4 sm:$0xff]  }
 0xceb   : > { %v11993_v36 = vunpack.i.h.bf16 %v11991_v9  ;;  %v11992_v48 = vunpack.i.l.bf16 %v11991_v9  ;;  %v12008_v41 = vunpack.i.h.bf16 %v12006_v10  ;;  %v12007_v2 = vunpack.i.l.bf16 %v12006_v10  ;;  %v12069_v10 = vld [vmem:[#allocation8 + $0xc] ss:$16 sps:$4 sm:$0xff]  }
 0xcec   : > { %9110 = vmatprep.subr.bf16.mxu0 %v12069_v10 }
 0xced   : > { %v8323_v52 = vsel %vm8311_vm5, %v8306_v22, %v11993_v36  ;;  %v8322_v37 = vsel %vm8311_vm5, %v8305_v45, %v11992_v48  ;;  %v8307_v44 = vsel %vm8294_vm4, %v8290_v61, %v12007_v2  ;;  %v8308_v49 = vsel %vm8294_vm4, %v8291_v3, %v12008_v41  ;;  %v12468_v41 = vld [vmem:[%s13004_s17 + $0x28] sm:$0xff]  ;;  %9111 = vmatpush1.bf16.msra.mxu0 %v12067_v12  ;;  %v12072_v3 = vld [vmem:[#allocation8 + $0x24] ss:$16 sps:$4 sm:$0xff]   ;;  %v12070_v61 = vld [vmem:[#allocation8 + $0x20] ss:$16 sps:$4 sm:$0xff]  }
 0xcee   : > { %v8333_v53 = vpack.c.bf16 %v8323_v52, %v8322_v37  ;;  %v12001_v46 = vpop.permute.xlu1 %12000  ;;  %8999 = vmatprep.subr.bf16.mxu1 %v12072_v3  ;;  %9112 = vmatprep.subr.bf16.mxu0 %v12075_v29  ;;  %v12111_v12 = vld [vmem:[#allocation8 + $0xec] ss:$16 sps:$4 sm:$0xff]  }
 0xcef   : > { %v12003_v35 = vunpack.i.h.bf16 %v12001_v46  ;;  %v12002_v19 = vunpack.i.l.bf16 %v12001_v46  ;;  %9000 = vmatpush1.bf16.msra.mxu1 %v12070_v61  ;;  %v12076_v46 = vld [vmem:[#allocation8 + $0x40] ss:$16 sps:$4 sm:$0xff]  }
 0xcf0   : > { %11778 = vmatmul.mubr.bf16.gmra.mrb[32].mxu0 %v8333_v53 }
 0xcf1   : > { %v8293_v30 = vsel %vm1075_vm1, %v16260_v42, %v12003_v35  ;;  %v8292_v23 = vsel %vm1075_vm1, %v16261_v25, %v12002_v19  ;;  %v12470_v35 = vld [vmem:[%s13004_s17 + $0x38] sm:$0xff]  ;;  %v12084_v42 = vld [vmem:[#allocation8 + $0x64] ss:$16 sps:$4 sm:$0xff]  }
 0xcf2   : > { %v12011_v15 = vpop.permute.xlu1 %12010 }
 0xcf3   : > { %v12013_v56 = vunpack.i.h.bf16 %v12011_v15  ;;  %v12012_v28 = vunpack.i.l.bf16 %v12011_v15  ;;  %v12079_v15 = vld [vmem:[#allocation8 + $0x48] ss:$16 sps:$4 sm:$0xff]  }
 0xcf5   : > { %v8309_v17 = vsel %vm8294_vm4, %v8292_v23, %v12012_v28  ;;  %v8310_v8 = vsel %vm8294_vm4, %v8293_v30, %v12013_v56  ;;  %v12471_v56 = vld [vmem:[%s13004_s17 + $0x30] sm:$0xff]  ;;  %v12087_v30 = vld [vmem:[#allocation8 + $0x6c] ss:$16 sps:$4 sm:$0xff]  }
 0xcf6   : > { %v12082_v23 = vld [vmem:[#allocation8 + $0x60] ss:$16 sps:$4 sm:$0xff]  }
 0xd1e   : > { %v12016_v34 = vpop.permute.xlu0 %12015 }
 0xd1f   : > { %v12018_v0 = vunpack.i.h.bf16 %v12016_v34  ;;  %v12017_v55 = vunpack.i.l.bf16 %v12016_v34  ;;  %v12469_v34 = vld [vmem:[%s13004_s17 + $0x20] sm:$0xff] }
 0xd21   : > { %v8324_v13 = vsel %vm8311_vm5, %v8307_v44, %v12017_v55  ;;  %v8325_v24 = vsel %vm8311_vm5, %v8308_v49, %v12018_v0  ;;  %v12073_v0 = vld [vmem:[#allocation8 + $0x28] ss:$16 sps:$4 sm:$0xff]  }
 0xd22   : > { %v8334_v58 = vpack.c.bf16 %v8325_v24, %v8324_v13  ;;  %9113 = vmatpush1.bf16.msra.mxu0 %v12073_v0  ;;  %v12078_v24 = vld [vmem:[#allocation8 + $0x44] ss:$16 sps:$4 sm:$0xff]  }
 0xd23   : > { %9001 = vmatprep.subr.bf16.mxu1 %v12078_v24 }
 0xd24   : > { %11781 = vmatprep.mubr.bf16.mxu0 %v8334_v58  ;;  %v12081_v58 = vld [vmem:[#allocation8 + $0x4c] ss:$16 sps:$4 sm:$0xff]   ;;  %9002 = vmatpush1.bf16.msra.mxu1 %v12076_v46 }
 0xd25   : > { %9114 = vmatprep.subr.bf16.mxu0 %v12081_v58  ;;  %9003 = vmatprep.subr.bf16.mxu1 %v12084_v42  ;;  %v12477_v46 = vld [vmem:[%s13004_s17 + $0x68] sm:$0xff] }
 0xd26   : > { %9115 = vmatpush1.bf16.msra.mxu0 %v12079_v15 }
 0xd27   : > { %9116 = vmatprep.subr.bf16.mxu0 %v12087_v30  ;;  %v12478_v30 = vld [vmem:[%s13004_s17 + $0x70] sm:$0xff] }
 0xd28   : > { %9004 = vmatpush1.bf16.msra.mxu1 %v12082_v23  ;;  %v12479_v23 = vld [vmem:[%s13004_s17 + $0x78] sm:$0xff] }
 0xd2e   : > { %v12021_v62 = vpop.permute.xlu1 %12020 }
 0xd2f   : > { %v12023_v18 = vunpack.i.h.bf16 %v12021_v62  ;;  %v12022_v5 = vunpack.i.l.bf16 %v12021_v62 }
 0xd31   : > { %v8327_v60 = vsel %vm8311_vm5, %v8310_v8, %v12023_v18  ;;  %v8326_v32 = vsel %vm8311_vm5, %v8309_v17, %v12022_v5  ;;  %v12085_v18 = vld [vmem:[#allocation8 + $0x68] ss:$16 sps:$4 sm:$0xff]  }
 0xd32   : > { %v8335_v38 = vpack.c.bf16 %v8327_v60, %v8326_v32  ;;  %9117 = vmatpush1.bf16.msra.mxu0 %v12085_v18 }
 0xd34   : > { %11782 = vmatmul.mubr.bf16.gmra.mrb[36].mxu0 %v8335_v38 }
 0xd35   : > { %9142 = vmatprep.mubr.bf16.mxu0 %v16227_v14 }
 0xda2   : > { %v11771_v4 = vpop.f32.mrb[24].mxu0 }
 0xda3   : > { %v8441_v57 = vpop.f32.mrb[25].mxu0  ;;  %v8450_v9 = vadd.f32 %v11771_v4, %v15270_v27  ;;  %v12090_v4 = vld [vmem:[#allocation8 + $0x84] ss:$16 sps:$4 sm:$0xff]  }
 0xda4   : > { %v8442_v31 = vadd.f32 %v15270_v27, %v8441_v57  ;;  %v11772_v59 = vpop.f32.mrb[26].mxu0  ;;  %v12093_v57 = vld [vmem:[#allocation8 + $0x8c] ss:$16 sps:$4 sm:$0xff]   ;;  %9005 = vmatprep.subr.bf16.mxu1 %v12090_v4 }
 0xda5   : > { %v8444_v51 = vpop.f32.mrb[27].mxu0  ;;  %v8453_v50 = vadd.f32 %v11772_v59, %v15270_v27  ;;  %v15295_v20 = vadd.f32 %v12467_v11, %v8450_v9  ;;  %v12091_v59 = vld [vmem:[#allocation8 + $0x88] ss:$16 sps:$4 sm:$0xff]   ;;  %9118 = vmatprep.subr.bf16.mxu0 %v12093_v57 }
 0xda6   : > { %v15274_v40 = vadd.f32 %v12464_v54, %v8442_v31  ;;  %v8445_v39 = vadd.f32 %v15270_v27, %v8444_v51  ;;  %v12088_v31 = vld [vmem:[#allocation8 + $0x80] ss:$16 sps:$4 sm:$0xff]   ;;  %v12472_v51 = vld [vmem:[%s13004_s17 + $0x48] sm:$0xff]  ;;  %9119 = vmatpush1.bf16.msra.mxu0 %v12091_v59 }
 0xda7   : > { %v15286_v6 = vadd.f32 %v12466_v7, %v8453_v50  ;;  %v8573_v37 = vmul.f32 %v15295_v20, %v15295_v20  ;;  %9006 = vmatpush1.bf16.msra.mxu1 %v12088_v31  ;;  %v12094_v7 = vld [vmem:[#allocation8 + $0xa0] ss:$16 sps:$4 sm:$0xff]   ;;  %v12097_v9 = vld [vmem:[#allocation8 + $0xa8] ss:$16 sps:$4 sm:$0xff]  }
 0xda8   : > { %v15279_v43 = vadd.f32 %v12465_v21, %v8445_v39  ;;  %8522 = vadd.xlane.f32.xlu0 %v15274_v40  ;;  %v8571_v16 = vmul.f32 %v15274_v40, %v15274_v40  ;;  %v12473_v39 = vld [vmem:[%s13004_s17 + $0x40] sm:$0xff] }
 0xda9   : > { %v8574_v33 = vmul.f32 %v15286_v6, %v15286_v6  ;;  %v12096_v21 = vld [vmem:[#allocation8 + $0xa4] ss:$16 sps:$4 sm:$0xff]  }
 0xdaa   : > { %8524 = vadd.xlane.f32.xlu1 %v15279_v43  ;;  %v8572_v26 = vmul.f32 %v15279_v43, %v15279_v43  ;;  %9007 = vmatprep.subr.bf16.mxu1 %v12096_v21 }
 0xdab   : > { %9008 = vmatpush1.bf16.msra.mxu1 %v12094_v7 }
 0xdac   : > { %8587 = vadd.xlane.f32.xlu0 %v8571_v16  ;;  %v12099_v16 = vld [vmem:[#allocation8 + $0xac] ss:$16 sps:$4 sm:$0xff]  }
 0xdad   : > { %9120 = vmatprep.subr.bf16.mxu0 %v12099_v16 }
 0xdae   : > { %8528 = vadd.xlane.f32.xlu1 %v15286_v6  ;;  %9121 = vmatpush1.bf16.msra.mxu0 %v12097_v9 }
 0xdb0   : > { %8589 = vadd.xlane.f32.xlu0 %v8572_v26 }
 0xdb2   : > { %8593 = vadd.xlane.f32.xlu1 %v8574_v33 }
 0xdb3   : > { %v11775_v36 = vpop.f32.mrb[28].mxu0 }
 0xdb4   : > { %v8457_v48 = vpop.f32.mrb[29].mxu0  ;;  %8526 = vadd.xlane.f32.xlu0 %v15295_v20  ;;  %v8466_v49 = vadd.f32 %v11775_v36, %v15270_v27 }
 0xdb5   : > { %v11776_v45 = vpop.f32.mrb[30].mxu0  ;;  %v8458_v22 = vadd.f32 %v15270_v27, %v8457_v48  ;;  %v12102_v48 = vld [vmem:[#allocation8 + $0xc4] ss:$16 sps:$4 sm:$0xff]  }
 0xdb6   : > { %v8460_v52 = vpop.f32.mrb[31].mxu0  ;;  %v8469_v55 = vadd.f32 %v11776_v45, %v15270_v27  ;;  %v15320_v28 = vadd.f32 %v12471_v56, %v8466_v49  ;;  %v12105_v45 = vld [vmem:[#allocation8 + $0xcc] ss:$16 sps:$4 sm:$0xff]   ;;  %9009 = vmatprep.subr.bf16.mxu1 %v12102_v48 }
 0xdb7   : > { %v8461_v53 = vadd.f32 %v15270_v27, %v8460_v52  ;;  %v15306_v63 = vadd.f32 %v12469_v34, %v8458_v22  ;;  %v12100_v22 = vld [vmem:[#allocation8 + $0xc0] ss:$16 sps:$4 sm:$0xff]   ;;  %v12103_v52 = vld [vmem:[#allocation8 + $0xc8] ss:$16 sps:$4 sm:$0xff]   ;;  %9122 = vmatprep.subr.bf16.mxu0 %v12105_v45 }
 0xdb8   : > { %8591 = vadd.xlane.f32.xlu0 %v8573_v37  ;;  %v15317_v19 = vadd.f32 %v12470_v35, %v8469_v55  ;;  %v8577_v32 = vmul.f32 %v15320_v28, %v15320_v28  ;;  %v12474_v37 = vld [vmem:[%s13004_s17 + $0x58] sm:$0xff]  ;;  %9010 = vmatpush1.bf16.msra.mxu1 %v12100_v22 }
 0xdb9   : > { %v15303_v2 = vadd.f32 %v12468_v41, %v8461_v53  ;;  %v8575_v13 = vmul.f32 %v15306_v63, %v15306_v63  ;;  %9123 = vmatpush1.bf16.msra.mxu0 %v12103_v52  ;;  %v12106_v41 = vld [vmem:[#allocation8 + $0xe0] ss:$16 sps:$4 sm:$0xff]   ;;  %v12109_v34 = vld [vmem:[#allocation8 + $0xe8] ss:$16 sps:$4 sm:$0xff]   ;;  %9011 = vmatprep.subr.bf16.mxu1 %v12108_v47 }
 0xdba   : > { %v8578_v17 = vmul.f32 %v15317_v19, %v15317_v19  ;;  %9124 = vmatprep.subr.bf16.mxu0 %v12111_v12  ;;  %v12112_v52 = vld [vmem:[#allocation10 + $0x40] sm:$0xff]  }
 0xdbb   : > { %8532 = vadd.xlane.f32.xlu1 %v15303_v2  ;;  %v8576_v44 = vmul.f32 %v15303_v2, %v15303_v2 }
 0xdbc   : > { %8530 = vadd.xlane.f32.xlu0 %v15306_v63  ;;  %9012 = vmatpush1.bf16.msra.mxu1 %v12106_v41 }
 0xdbd   : > { %9125 = vmatpush1.bf16.msra.mxu0 %v12109_v34  ;;  %10825 = vmatprep.subr.bf16.mxu1 %v12112_v52 }
 0xdbf   : > { %8597 = vadd.xlane.f32.xlu1 %v8576_v44 }
 0xdc0   : > { %8595 = vadd.xlane.f32.xlu0 %v8575_v13  ;;  %v12476_v13 = vld [vmem:[%s13004_s17 + $0x60] sm:$0xff] }
 0xdc3   : > { %v11779_v62 = vpop.f32.mrb[32].mxu0  ;;  %8536 = vadd.xlane.f32.xlu1 %v15317_v19 }
 0xdc4   : > { %v8473_v25 = vpop.f32.mrb[33].mxu0  ;;  %8534 = vadd.xlane.f32.xlu0 %v15320_v28  ;;  %v8482_v11 = vadd.f32 %v11779_v62, %v15270_v27 }
 0xdc5   : > { %v11780_v5 = vpop.f32.mrb[34].mxu0  ;;  %v8474_v8 = vadd.f32 %v15270_v27, %v8473_v25 }
 0xdc6   : > { %v8476_v60 = vpop.f32.mrb[35].mxu0  ;;  %v8485_v26 = vadd.f32 %v11780_v5, %v15270_v27  ;;  %v15348_v10 = vadd.f32 %v12475_v1, %v8482_v11 }
 0xdc7   : > { %v8477_v38 = vadd.f32 %v15270_v27, %v8476_v60  ;;  %8601 = vadd.xlane.f32.xlu1 %v8578_v17  ;;  %v15334_v50 = vadd.f32 %v12473_v39, %v8474_v8 }
 0xdc8   : > { %8599 = vadd.xlane.f32.xlu0 %v8577_v32  ;;  %v15345_v53 = vadd.f32 %v12474_v37, %v8485_v26  ;;  %v8581_v29 = vmul.f32 %v15348_v10, %v15348_v10  ;;  %v15386_v37 = vld [vmem:[#allocation10 + $0xc0] sm:$0xff]  }
 0xdc9   : > { %v15331_v54 = vadd.f32 %v12472_v51, %v8477_v38  ;;  %v8579_v36 = vmul.f32 %v15334_v50, %v15334_v50  ;;  %10889 = vmatprep.subr.bf16.mxu0 %v15386_v37 }
 0xdca   : > { %v8582_v3 = vmul.f32 %v15345_v53, %v15345_v53 }
 0xdcb   : > { %8540 = vadd.xlane.f32.xlu1 %v15331_v54  ;;  %v8580_v33 = vmul.f32 %v15331_v54, %v15331_v54 }
 0xdcc   : > { %8538 = vadd.xlane.f32.xlu0 %v15334_v50 }
 0xdcf   : > { %8605 = vadd.xlane.f32.xlu1 %v8580_v33 }
 0xdd0   : > { %8603 = vadd.xlane.f32.xlu0 %v8579_v36 }
 0xdd3   : > { %8544 = vadd.xlane.f32.xlu1 %v15345_v53 }
 0xdd4   : > { %8542 = vadd.xlane.f32.xlu0 %v15348_v10 }
 0xdd7   : > { %8609 = vadd.xlane.f32.xlu1 %v8582_v3 }
 0xdd8   : > { %8607 = vadd.xlane.f32.xlu0 %v8581_v29 }
 0xe07   : > { %v11783_v61 = vpop.f32.mrb[36].mxu0 }
 0xe08   : > { %v8489_v0 = vpop.f32.mrb[37].mxu0  ;;  %v8498_v35 = vadd.f32 %v11783_v61, %v15270_v27 }
 0xe09   : > { %v8490_v55 = vadd.f32 %v15270_v27, %v8489_v0  ;;  %v11784_v44 = vpop.f32.mrb[38].mxu0 }
 0xe0a   : > { %v8492_v49 = vpop.f32.mrb[39].mxu0  ;;  %v8501_v62 = vadd.f32 %v11784_v44, %v15270_v27  ;;  %v15373_v25 = vadd.f32 %v12478_v30, %v8498_v35 }
 0xe0b   : > { %v15358_v24 = vadd.f32 %v12476_v13, %v8490_v55  ;;  %v8493_v58 = vadd.f32 %v15270_v27, %v8492_v49 }
 0xe0c   : > { %v15376_v18 = vadd.f32 %v12479_v23, %v8501_v62  ;;  %v8585_v5 = vmul.f32 %v15373_v25, %v15373_v25 }
 0xe0d   : > { %v15362_v15 = vadd.f32 %v12477_v46, %v8493_v58  ;;  %8546 = vadd.xlane.f32.xlu0 %v15358_v24  ;;  %v8583_v56 = vmul.f32 %v15358_v24, %v15358_v24  ;;  %v15399_v58 = vld [vmem:[%s15976_s5] ss:$0 sm:$0xff] }
 0xe0e   : > { %v8586_v27 = vmul.f32 %v15376_v18, %v15376_v18 }
 0xe0f   : > { %8548 = vadd.xlane.f32.xlu1 %v15362_v15  ;;  %v8584_v42 = vmul.f32 %v15362_v15, %v15362_v15 }
 0xe11   : > { %8611 = vadd.xlane.f32.xlu0 %v8583_v56 }
 0xe13   : > { %8613 = vadd.xlane.f32.xlu1 %v8584_v42 }
 0xe15   : > { %8550 = vadd.xlane.f32.xlu0 %v15373_v25 }
 0xe17   : > { %8552 = vadd.xlane.f32.xlu1 %v15376_v18 }
 0xe19   : > { %8615 = vadd.xlane.f32.xlu0 %v8585_v5 }
 0xe1b   : > { %8617 = vadd.xlane.f32.xlu1 %v8586_v27 }
 0xe35   : > { %v8523_v17 = vpop.xlane.xlu0 %8522 }
 0xe36   : > { %v8555_v8 = vmul.f32 0.0078125, %v8523_v17 }
 0xe37   : > { %v8525_v60 = vpop.xlane.xlu1 %8524 }
 0xe38   : > { %v8635_v38 = vmul.f32 %v8555_v8, %v8555_v8  ;;  %v8556_v4 = vmul.f32 0.0078125, %v8525_v60  ;;  %v8667_v29 = vsub.f32 %v15274_v40, %v8555_v8  ;;  %v15410_v60 = vld [vmem:[%s15977_s6] ss:$0 sm:$0xff] }
 0xe39   : > { %v8588_v32 = vpop.xlane.xlu0 %8587 }
 0xe3a   : > { %v8619_v57 = vmul.f32 0.0078125, %v8588_v32  ;;  %v8636_v21 = vmul.f32 %v8556_v4, %v8556_v4  ;;  %v8668_v35 = vsub.f32 %v15279_v43, %v8556_v4 }
 0xe3b   : > { %v8529_v31 = vpop.xlane.xlu1 %8528 }
 0xe3c   : > { %v8651_v59 = vsub.f32 %v8619_v57, %v8635_v38  ;;  %v8558_v51 = vmul.f32 0.0078125, %v8529_v31 }
 0xe3d   : > { %v8590_v39 = vpop.xlane.xlu0 %8589 }
 0xe3e   : > { %v8683_v16 = vadd.f32 1e-05, %v8651_v59  ;;  %v8620_v7 = vmul.f32 0.0078125, %v8590_v39  ;;  %v8638_v26 = vmul.f32 %v8558_v51, %v8558_v51  ;;  %v8670_v38 = vsub.f32 %v15286_v6, %v8558_v51 }
 0xe3f   : > { %v8594_v9 = vpop.xlane.xlu1 %8593 }
 0xe40   : > { %12400 = vrsqrt.f32 %v8683_v16  ;;  %v8652_v33 = vsub.f32 %v8620_v7, %v8636_v21  ;;  %v8622_v11 = vmul.f32 0.0078125, %v8594_v9 }
 0xe41   : > { %v8527_v36 = vpop.xlane.xlu0 %8526 }
 0xe42   : > { %v8684_v48 = vadd.f32 1e-05, %v8652_v33  ;;  %v8654_v45 = vsub.f32 %v8622_v11, %v8638_v26  ;;  %v15384_v22 = vmul.f32 0.0078125, %v8527_v36 }
 0xe44   : > { %12402 = vrsqrt.f32 %v8684_v48  ;;  %v8686_v1 = vadd.f32 1e-05, %v8654_v45  ;;  %v8637_v12 = vmul.f32 %v15384_v22, %v15384_v22  ;;  %v8669_v51 = vsub.f32 %v15295_v20, %v15384_v22  ;;  %v12114_v48 = vld [vmem:[#allocation10] sm:$0xff]  }
 0xe45   : > { %v8592_v47 = vpop.xlane.xlu0 %8591  ;;  %v15430_v45 = vld [vmem:[#allocation10 + $0x80] sm:$0xff]  }
 0xe46   : > { %12404 = vrsqrt.f32 %v8686_v1  ;;  %v8621_v41 = vmul.f32 0.0078125, %v8592_v47 }
 0xe48   : > { %v8653_v34 = vsub.f32 %v8621_v41, %v8637_v12  ;;  %v8533_v3 = vpop.xlane.xlu1 %8532  ;;  %v12116_v12 = vld [vmem:[#allocation10 + $0x48] sm:$0xff]  }
 0xe49   : > { %v15392_v61 = vmul.f32 0.0078125, %v8533_v3  ;;  %v8531_v0 = vpop.xlane.xlu0 %8530  ;;  %v15434_v41 = vld [vmem:[#allocation10 + $0xc8] sm:$0xff]  }
 0xe4a   : > { %v12401_v55 = vpop.eup %12400  ;;  %v8685_v44 = vadd.f32 1e-05, %v8653_v34  ;;  %v15394_v49 = vmul.f32 0.0078125, %v8531_v0 }
 0xe4b   : > { %v8715_v13 = vmul.f32 %v12401_v55, %v8667_v29  ;;  %v8640_v40 = vmul.f32 %v15392_v61, %v15392_v61 }
 0xe4c   : > { %12406 = vrsqrt.f32 %v8685_v44  ;;  %v8598_v46 = vpop.xlane.xlu1 %8597  ;;  %v8639_v30 = vmul.f32 %v15394_v49, %v15394_v49 }
 0xe4d   : > { %v8624_v56 = vmul.f32 0.0078125, %v8598_v46  ;;  %v8596_v62 = vpop.xlane.xlu0 %8595  ;;  %v8737_v5 = vmul.f32 %v15399_v58, %v8715_v13  ;;  %v12118_v46 = vld [vmem:[#allocation10 + $0x8] sm:$0xff]  }
 0xe4e   : > { %v12403_v42 = vpop.eup %12402  ;;  %v8623_v23 = vmul.f32 0.0078125, %v8596_v62  ;;  %v12120_v62 = vld [vmem:[#allocation10 + $0x50] sm:$0xff]  }
 0xe4f   : > { %v8716_v27 = vmul.f32 %v12403_v42, %v8668_v35  ;;  %v8656_v17 = vsub.f32 %v8624_v56, %v8640_v40  ;;  %v15419_v16 = vadd.f32 %v15410_v60, %v8737_v5  ;;  %v15443_v35 = vld [vmem:[#allocation10 + $0x88] sm:$0xff]   ;;  %v15448_v42 = vld [vmem:[#allocation10 + $0xd0] sm:$0xff]   ;;  %v8672_v5 = vsub.f32 %v15303_v2, %v15392_v61 }
 0xe50   : > { %v12405_v8 = vpop.eup %12404  ;;  %v8655_v43 = vsub.f32 %v8623_v23, %v8639_v30  ;;  %v8537_v32 = vpop.xlane.xlu1 %8536 }
 0xe51   : > { %v8738_v4 = vmul.f32 %v15399_v58, %v8716_v27  ;;  %v8688_v57 = vadd.f32 1e-05, %v8656_v17  ;;  %v15414_v31 = vmul.f32 0.0078125, %v8537_v32  ;;  %v8535_v59 = vpop.xlane.xlu0 %8534  ;;  %v8718_v9 = vmul.f32 %v12405_v8, %v8670_v38 }
 0xe52   : > { %v8687_v39 = vadd.f32 1e-05, %v8655_v43  ;;  %v15416_v21 = vmul.f32 0.0078125, %v8535_v59  ;;  %v8671_v43 = vsub.f32 %v15306_v63, %v15394_v49  ;;  %v15465_v59 = vld [vmem:[#allocation10 + $0x90] sm:$0xff]   ;;  %v12124_v63 = vld [vmem:[#allocation10 + $0x58] sm:$0xff]  }
 0xe53   : > { %v15422_v7 = vadd.f32 %v15410_v60, %v8738_v4  ;;  %12408 = vrsqrt.f32 %v8688_v57  ;;  %v8642_v33 = vmul.f32 %v15414_v31, %v15414_v31  ;;  %v8740_v34 = vmul.f32 %v15399_v58, %v8718_v9  ;;  %v12122_v57 = vld [vmem:[#allocation10 + $0x10] sm:$0xff]   ;;  %v15470_v49 = vld [vmem:[#allocation10 + $0xd8] sm:$0xff]  }
 0xe54   : > { %12410 = vrsqrt.f32 %v8687_v39  ;;  %v8602_v26 = vpop.xlane.xlu1 %8601  ;;  %v8641_v1 = vmul.f32 %v15416_v21, %v15416_v21 }
 0xe55   : > { %v8775_v6 = vpack.c.bf16 %v15422_v7, %v15419_v16  ;;  %v8626_v11 = vmul.f32 0.0078125, %v8602_v26  ;;  %v8600_v36 = vpop.xlane.xlu0 %8599  ;;  %v15451_v30 = vadd.f32 %v15410_v60, %v8740_v34 }
 0xe56   : > { %v12407_v52 = vpop.eup %12406  ;;  %v8625_v47 = vmul.f32 0.0078125, %v8600_v36 }
 0xe57   : > { %v8717_v3 = vmul.f32 %v12407_v52, %v8669_v51  ;;  %v8658_v20 = vsub.f32 %v8626_v11, %v8642_v33  ;;  %9030 = vmatmul.mubr.bf16.vlgmr.msra.gmra.mrb[24].mxu1 %v8775_v6  ;;  %9143 = vmatmul.mubr.bf16.vlgmr.msra.gmra.mrb[40].mxu0 %v8775_v6 }
 0xe58   : > { %v8657_v22 = vsub.f32 %v8625_v47, %v8641_v1  ;;  %v8541_v29 = vpop.xlane.xlu1 %8540  ;;  %9039 = vmatprep.mubr.bf16.mxu1 %v16227_v14  ;;  %9152 = vmatprep.mubr.bf16.mxu0 %v16227_v14  ;;  %v12126_v47 = vld [vmem:[#allocation10 + $0x18] sm:$0xff]  }
 0xe59   : > { %v8739_v0 = vmul.f32 %v15399_v58, %v8717_v3  ;;  %v8690_v55 = vadd.f32 1e-05, %v8658_v20  ;;  %v15440_v44 = vmul.f32 0.0078125, %v8541_v29  ;;  %v8539_v13 = vpop.xlane.xlu0 %8538  ;;  %10826 = vmatpush3.bf16.msra.mxu1 %v12114_v48  ;;  %10890 = vmatpush3.bf16.msra.mxu0 %v15430_v45  ;;  %v12128_v20 = vld [vmem:[#allocation10 + $0x60] sm:$0xff]  }
 0xe5a   : > { %v8689_v40 = vadd.f32 1e-05, %v8657_v22  ;;  %v15445_v56 = vmul.f32 0.0078125, %v8539_v13  ;;  %10827 = vmatprep.subr.bf16.mxu1 %v12116_v12  ;;  %10891 = vmatprep.subr.bf16.mxu0 %v15434_v41  ;;  %v15479_v12 = vld [vmem:[#allocation10 + $0x98] sm:$0xff]   ;;  %v15484_v22 = vld [vmem:[#allocation10 + $0xe0] sm:$0xff]  }
 0xe5b   : > { %v15454_v23 = vadd.f32 %v15410_v60, %v8739_v0  ;;  %12412 = vrsqrt.f32 %v8690_v55  ;;  %v8644_v32 = vmul.f32 %v15440_v44, %v15440_v44  ;;  %v8674_v55 = vsub.f32 %v15317_v19, %v15414_v31 }
 0xe5c   : > { %12414 = vrsqrt.f32 %v8689_v40  ;;  %v8606_v27 = vpop.xlane.xlu1 %8605  ;;  %v8643_v39 = vmul.f32 %v15445_v56, %v15445_v56 }
 0xe5d   : > { %v12409_v17 = vpop.eup %12408  ;;  %v8776_v8 = vpack.c.bf16 %v15451_v30, %v15454_v23  ;;  %v8628_v38 = vmul.f32 0.0078125, %v8606_v27  ;;  %v8604_v4 = vpop.xlane.xlu0 %8603  ;;  %10828 = vmatpush3.bf16.msra.mxu1 %v12118_v46  ;;  %10892 = vmatpush3.bf16.msra.mxu0 %v15443_v35 }
 0xe5e   : > { %v12411_v2 = vpop.eup %12410  ;;  %v8720_v61 = vmul.f32 %v12409_v17, %v8672_v5  ;;  %v8627_v9 = vmul.f32 0.0078125, %v8604_v4  ;;  %10829 = vmatprep.subr.bf16.mxu1 %v12120_v62  ;;  %10893 = vmatprep.subr.bf16.mxu0 %v15448_v42  ;;  %v8673_v62 = vsub.f32 %v15320_v28, %v15416_v21  ;;  %v12132_v28 = vld [vmem:[#allocation10 + $0x68] sm:$0xff]  }
 0xe5f   : > { %v8719_v26 = vmul.f32 %v12411_v2, %v8671_v43  ;;  %v8660_v6 = vsub.f32 %v8628_v38, %v8644_v32  ;;  %9040 = vmatmul.mubr.bf16.gmra.mrb[28].mxu1 %v8776_v8  ;;  %9153 = vmatmul.mubr.bf16.gmra.mrb[44].mxu0 %v8776_v8  ;;  %v12130_v8 = vld [vmem:[#allocation10 + $0x20] sm:$0xff]   ;;  %v15506_v21 = vld [vmem:[#allocation10 + $0xe8] sm:$0xff]  }
 0xe60   : > { %v8742_v51 = vmul.f32 %v15399_v58, %v8720_v61  ;;  %v8659_v33 = vsub.f32 %v8627_v9, %v8643_v39  ;;  %v8545_v11 = vpop.xlane.xlu1 %8544  ;;  %9049 = vmatprep.mubr.bf16.mxu1 %v16227_v14  ;;  %9162 = vmatprep.mubr.bf16.mxu0 %v16227_v14  ;;  %v15501_v43 = vld [vmem:[#allocation10 + $0xa0] sm:$0xff]  }
 0xe61   : > { %v8741_v36 = vmul.f32 %v15399_v58, %v8719_v26  ;;  %v8692_v48 = vadd.f32 1e-05, %v8660_v6  ;;  %v15476_v52 = vmul.f32 0.0078125, %v8545_v11  ;;  %v8543_v1 = vpop.xlane.xlu0 %8542  ;;  %10830 = vmatpush3.bf16.msra.mxu1 %v12122_v57  ;;  %10894 = vmatpush3.bf16.msra.mxu0 %v15465_v59 }
 0xe62   : > { %v8691_v34 = vadd.f32 1e-05, %v8659_v33  ;;  %v15481_v3 = vmul.f32 0.0078125, %v8543_v1  ;;  %10831 = vmatprep.subr.bf16.mxu1 %v12124_v63  ;;  %10895 = vmatprep.subr.bf16.mxu0 %v15470_v49  ;;  %v15487_v29 = vadd.f32 %v15410_v60, %v8742_v51  ;;  %v8676_v51 = vsub.f32 %v15331_v54, %v15440_v44 }
 0xe63   : > { %v15490_v0 = vadd.f32 %v15410_v60, %v8741_v36  ;;  %12416 = vrsqrt.f32 %v8692_v48  ;;  %v8646_v5 = vmul.f32 %v15476_v52, %v15476_v52  ;;  %v8675_v36 = vsub.f32 %v15334_v50, %v15445_v56 }
 0xe64   : > { %12418 = vrsqrt.f32 %v8691_v34  ;;  %v8610_v13 = vpop.xlane.xlu1 %8609  ;;  %v8645_v32 = vmul.f32 %v15481_v3, %v15481_v3  ;;  %v8678_v50 = vsub.f32 %v15345_v53, %v15476_v52 }
 0xe65   : > { %v12413_v46 = vpop.eup %12412  ;;  %v8777_v40 = vpack.c.bf16 %v15487_v29, %v15490_v0  ;;  %v8630_v27 = vmul.f32 0.0078125, %v8610_v13  ;;  %v8608_v17 = vpop.xlane.xlu0 %8607  ;;  %10832 = vmatpush3.bf16.msra.mxu1 %v12126_v47  ;;  %10896 = vmatpush3.bf16.msra.mxu0 %v15479_v12  ;;  %v8677_v13 = vsub.f32 %v15348_v10, %v15481_v3 }
 0xe66   : > { %v12415_v19 = vpop.eup %12414  ;;  %v8722_v31 = vmul.f32 %v12413_v46, %v8674_v55  ;;  %v8629_v38 = vmul.f32 0.0078125, %v8608_v17  ;;  %10833 = vmatprep.subr.bf16.mxu1 %v12128_v20  ;;  %10897 = vmatprep.subr.bf16.mxu0 %v15484_v22 }
 0xe67   : > { %v8721_v4 = vmul.f32 %v12415_v19, %v8673_v62  ;;  %v8662_v57 = vsub.f32 %v8630_v27, %v8646_v5  ;;  %9050 = vmatmul.mubr.bf16.gmra.mrb[32].mxu1 %v8777_v40  ;;  %9163 = vmatmul.mubr.bf16.gmra.mrb[48].mxu0 %v8777_v40 }
 0xe68   : > { %v8744_v2 = vmul.f32 %v15399_v58, %v8722_v31  ;;  %v8661_v61 = vsub.f32 %v8629_v38, %v8645_v32  ;;  %9059 = vmatprep.mubr.bf16.mxu1 %v16227_v14  ;;  %9172 = vmatprep.mubr.bf16.mxu0 %v16227_v14 }
 0xe69   : > { %v8743_v39 = vmul.f32 %v15399_v58, %v8721_v4  ;;  %v8694_v9 = vadd.f32 1e-05, %v8662_v57  ;;  %10834 = vmatpush3.bf16.msra.mxu1 %v12130_v8  ;;  %10898 = vmatpush3.bf16.msra.mxu0 %v15501_v43 }
 0xe6a   : > { %v8693_v63 = vadd.f32 1e-05, %v8661_v61  ;;  %10835 = vmatprep.subr.bf16.mxu1 %v12132_v28  ;;  %10899 = vmatprep.subr.bf16.mxu0 %v15506_v21  ;;  %v15515_v26 = vadd.f32 %v15410_v60, %v8744_v2 }
 0xe6b   : > { %v15518_v6 = vadd.f32 %v15410_v60, %v8743_v39  ;;  %12420 = vrsqrt.f32 %v8694_v9 }
 0xe6c   : > { %12422 = vrsqrt.f32 %v8693_v63 }
 0xe6d   : > { %v12417_v33 = vpop.eup %12416  ;;  %v8778_v11 = vpack.c.bf16 %v15515_v26, %v15518_v6 }
 0xe6e   : > { %v12419_v48 = vpop.eup %12418  ;;  %v8724_v1 = vmul.f32 %v12417_v33, %v8676_v51 }
 0xe6f   : > { %v8723_v47 = vmul.f32 %v12419_v48, %v8675_v36  ;;  %9060 = vmatmul.mubr.bf16.gmra.mrb[36].mxu1 %v8778_v11  ;;  %9173 = vmatmul.mubr.bf16.gmra.mrb[52].mxu0 %v8778_v11 }
 0xe70   : > { %v8746_v34 = vmul.f32 %v15399_v58, %v8724_v1  ;;  %9069 = vmatprep.mubr.bf16.mxu1 %v16227_v14  ;;  %9182 = vmatprep.mubr.bf16.mxu0 %v16227_v14 }
 0xe71   : > { %v8745_v54 = vmul.f32 %v15399_v58, %v8723_v47 }
 0xe72   : > { %v15531_v44 = vadd.f32 %v15410_v60, %v8746_v34 }
 0xe73   : > { %v15534_v20 = vadd.f32 %v15410_v60, %v8745_v54 }
 0xe75   : > { %v12421_v56 = vpop.eup %12420  ;;  %v8779_v55 = vpack.c.bf16 %v15531_v44, %v15534_v20 }
 0xe76   : > { %v12423_v46 = vpop.eup %12422  ;;  %v8726_v40 = vmul.f32 %v12421_v56, %v8678_v50  ;;  %v12134_v56 = vld [vmem:[#allocation10 + $0x28] sm:$0xff]  }
 0xe77   : > { %v8725_v62 = vmul.f32 %v12423_v46, %v8677_v13  ;;  %9070 = vmatmul.mubr.bf16.gmra.mrb[40].mxu1 %v8779_v55  ;;  %9183 = vmatmul.mubr.bf16.gmra.mrb[56].mxu0 %v8779_v55  ;;  %v15556_v55 = vld [vmem:[#allocation10 + $0xa8] sm:$0xff]  }
 0xe78   : > { %v8748_v5 = vmul.f32 %v15399_v58, %v8726_v40  ;;  %9079 = vmatprep.mubr.bf16.mxu1 %v16227_v14  ;;  %9192 = vmatprep.mubr.bf16.mxu0 %v16227_v14 }
 0xe79   : > { %v8747_v53 = vmul.f32 %v15399_v58, %v8725_v62  ;;  %10836 = vmatpush3.bf16.msra.mxu1 %v12134_v56  ;;  %10900 = vmatpush3.bf16.msra.mxu0 %v15556_v55  ;;  %v12136_v62 = vld [vmem:[#allocation10 + $0x70] sm:$0xff]  }
 0xe7a   : > { %v15547_v52 = vadd.f32 %v15410_v60, %v8748_v5  ;;  %v15559_v5 = vld [vmem:[#allocation10 + $0xf0] sm:$0xff]   ;;  %10837 = vmatprep.subr.bf16.mxu1 %v12136_v62 }
 0xe7b   : > { %v15550_v27 = vadd.f32 %v15410_v60, %v8747_v53  ;;  %10901 = vmatprep.subr.bf16.mxu0 %v15559_v5 }
 0xe7d   : > { %v8780_v10 = vpack.c.bf16 %v15547_v52, %v15550_v27 }
 0xe7f   : > { %9080 = vmatmul.mubr.bf16.gmra.mrb[44].mxu1 %v8780_v10  ;;  %9193 = vmatmul.mubr.bf16.gmra.mrb[60].mxu0 %v8780_v10  ;;  %v12138_v10 = vld [vmem:[#allocation10 + $0x30] sm:$0xff]  }
 0xe80   : > { %9089 = vmatprep.mubr.bf16.mxu1 %v16227_v14  ;;  %9202 = vmatprep.mubr.bf16.mxu0 %v16227_v14 }
 0xe81   : > { %10838 = vmatpush3.bf16.msra.mxu1 %v12138_v10 }
 0xe9a   : > { %v8547_v3 = vpop.xlane.xlu0 %8546 }
 0xe9b   : > { %v8567_v17 = vmul.f32 0.0078125, %v8547_v3  ;;  %v15562_v3 = vld [vmem:[#allocation10 + $0xb0] sm:$0xff]  }
 0xe9c   : > { %v8549_v8 = vpop.xlane.xlu1 %8548  ;;  %10902 = vmatpush3.bf16.msra.mxu0 %v15562_v3 }
 0xe9d   : > { %v8568_v19 = vmul.f32 0.0078125, %v8549_v8  ;;  %v8647_v32 = vmul.f32 %v8567_v17, %v8567_v17  ;;  %v8679_v53 = vsub.f32 %v15358_v24, %v8567_v17 }
 0xe9e   : > { %v8612_v31 = vpop.xlane.xlu0 %8611 }
 0xe9f   : > { %v8631_v38 = vmul.f32 0.0078125, %v8612_v31  ;;  %v8648_v4 = vmul.f32 %v8568_v19, %v8568_v19  ;;  %v8680_v31 = vsub.f32 %v15362_v15, %v8568_v19 }
 0xea0   : > { %v8614_v28 = vpop.xlane.xlu1 %8613 }
 0xea1   : > { %v8663_v57 = vsub.f32 %v8631_v38, %v8647_v32  ;;  %v8632_v2 = vmul.f32 0.0078125, %v8614_v28  ;;  %v12140_v28 = vld [vmem:[#allocation10 + $0x78] sm:$0xff]  }
 0xea2   : > { %v8551_v61 = vpop.xlane.xlu0 %8550  ;;  %10839 = vmatprep.subr.bf16.mxu1 %v12140_v28 }
 0xea3   : > { %v8695_v39 = vadd.f32 1e-05, %v8663_v57  ;;  %v8664_v9 = vsub.f32 %v8632_v2, %v8648_v4  ;;  %v8569_v63 = vmul.f32 0.0078125, %v8551_v61  ;;  %v15567_v4 = vld [vmem:[#allocation10 + $0xf8] sm:$0xff]  }
 0xea4   : > { %v8553_v51 = vpop.xlane.xlu1 %8552  ;;  %v12142_v57 = vld [vmem:[#allocation10 + $0x38] sm:$0xff]   ;;  %10903 = vmatprep.subr.bf16.mxu0 %v15567_v4 }
 0xea5   : > { %12424 = vrsqrt.f32 %v8695_v39  ;;  %v8696_v33 = vadd.f32 1e-05, %v8664_v9  ;;  %v8570_v11 = vmul.f32 0.0078125, %v8553_v51  ;;  %v8649_v48 = vmul.f32 %v8569_v63, %v8569_v63  ;;  %v15570_v2 = vld [vmem:[#allocation10 + $0xb8] sm:$0xff]   ;;  %10840 = vmatpush3.bf16.msra.mxu1 %v12142_v57 }
 0xea6   : > { %v8616_v36 = vpop.xlane.xlu0 %8615  ;;  %10904 = vmatpush3.bf16.msra.mxu0 %v15570_v2  ;;  %11785 = vmatprep.subr.bf16.mxu1 %v15386_v37  ;;  %v8681_v39 = vsub.f32 %v15373_v25, %v8569_v63 }
 0xea7   : > { %12426 = vrsqrt.f32 %v8696_v33  ;;  %v8633_v1 = vmul.f32 0.0078125, %v8616_v36  ;;  %v8650_v34 = vmul.f32 %v8570_v11, %v8570_v11  ;;  %v8682_v33 = vsub.f32 %v15376_v18, %v8570_v11  ;;  %v8815_v11 = vld [vmem:[%s15979_s8] sm:$0xf] }
 0xea8   : > { %v8618_v47 = vpop.xlane.xlu1 %8617 }
 0xea9   : > { %v8665_v54 = vsub.f32 %v8633_v1, %v8649_v48  ;;  %v8634_v50 = vmul.f32 0.0078125, %v8618_v47 }
 0xeab   : > { %v8697_v13 = vadd.f32 1e-05, %v8665_v54  ;;  %v8666_v46 = vsub.f32 %v8634_v50, %v8650_v34  ;;  %v16262_v34 = vld [vmem:[#allocation18_spill] sm:$0xff] }
 0xeac   : > { %v8831_v54 = vsub.s32 3, %v16262_v34  ;;  %v16264_v50 = vsub.s32 2, %v16262_v34 }
 0xead   : > { %12428 = vrsqrt.f32 %v8697_v13  ;;  %v8698_v40 = vadd.f32 1e-05, %v8666_v46 }
 0xeae   : > { %v15608_v56 = vrot.slane %v8815_v11, %v16264_v50  ;;  %v15614_v46 = vrot.slane %v8815_v11, %v8831_v54 }
 0xeaf   : > { %v12425_v8 = vpop.eup %12424  ;;  %12430 = vrsqrt.f32 %v8698_v40 }
 0xeb0   : > { %v8727_v32 = vmul.f32 %v12425_v8, %v8679_v53 }
 0xeb1   : > { %v12427_v38 = vpop.eup %12426 }
 0xeb2   : > { %v8749_v24 = vmul.f32 %v15399_v58, %v8727_v32  ;;  %v8728_v17 = vmul.f32 %v12427_v38, %v8680_v31 }
 0xeb4   : > { %v8750_v61 = vmul.f32 %v15399_v58, %v8728_v17  ;;  %v15577_v15 = vadd.f32 %v15410_v60, %v8749_v24 }
 0xeb6   : > { %v15580_v19 = vadd.f32 %v15410_v60, %v8750_v61 }
 0xeb7   : > { %v12429_v9 = vpop.eup %12428 }
 0xeb8   : > { %v8781_v51 = vpack.c.bf16 %v15580_v19, %v15577_v15  ;;  %v8729_v36 = vmul.f32 %v12429_v9, %v8681_v39 }
 0xeb9   : > { %v12431_v48 = vpop.eup %12430 }
 0xeba   : > { %v8751_v1 = vmul.f32 %v15399_v58, %v8729_v36  ;;  %v8730_v47 = vmul.f32 %v12431_v48, %v8682_v33  ;;  %9090 = vmatmul.mubr.bf16.gmra.mrb[48].mxu1 %v8781_v51  ;;  %9203 = vmatmul.mubr.bf16.gmra.mrb[64].mxu0 %v8781_v51 }
 0xebb   : > { %9099 = vmatprep.mubr.bf16.mxu1 %v16227_v14  ;;  %9212 = vmatprep.mubr.bf16.mxu0 %v16227_v14  ;;  %v16263_v14 = vsub.s32 0, %v16262_v34 }
 0xebc   : > { %v8752_v37 = vmul.f32 %v15399_v58, %v8730_v47  ;;  %v15591_v25 = vadd.f32 %v15410_v60, %v8751_v1 }
 0xebd   : > { %v15604_v58 = vrot.slane %v8815_v11, %v16263_v14 }
 0xebe   : > { %v15594_v63 = vadd.f32 %v15410_v60, %v8752_v37  ;;  %v16265_v60 = vsub.s32 1, %v16262_v34 }
 0xec0   : > { %v8782_v18 = vpack.c.bf16 %v15594_v63, %v15591_v25  ;;  %v15612_v13 = vrot.slane %v8815_v11, %v16265_v60 }
 0xec2   : > { %9100 = vmatmul.mubr.bf16.gmra.mrb[52].mxu1 %v8782_v18  ;;  %9213 = vmatmul.mubr.bf16.gmra.mrb[68].mxu0 %v8782_v18 }
 0xf2a   : > { %v9031_v40 = vpop.f32.mrb[24].mxu1  ;;  %v9144_v62 = vpop.f32.mrb[40].mxu0 }
 0xf2b   : > { %v9032_v53 = vadd.f32 %v9031_v40, %v15604_v58  ;;  %v9145_v10 = vadd.f32 %v9144_v62, %v15608_v56  ;;  %v9033_v8 = vpop.f32.mrb[25].mxu1  ;;  %v9146_v31 = vpop.f32.mrb[41].mxu0 }
 0xf2c   : > { %v9034_v32 = vadd.f32 %v9033_v8, %v15612_v13  ;;  %v9147_v38 = vadd.f32 %v9146_v31, %v15614_v46  ;;  %v9035_v28 = vpop.f32.mrb[26].mxu1  ;;  %v9148_v24 = vpop.f32.mrb[42].mxu0 }
 0xf2d   : > { %v9036_v17 = vadd.f32 %v9035_v28, %v15604_v58  ;;  %v9149_v57 = vadd.f32 %v9148_v24, %v15608_v56  ;;  %v9037_v61 = vpop.f32.mrb[27].mxu1  ;;  %v9150_v39 = vpop.f32.mrb[43].mxu0  ;;  %v9223_v33 = vmax.f32 %v9032_v53, 0.0  ;;  %v9225_v36 = vmax.f32 %v9145_v10, 0.0 }
 0xf2e   : > { %v9038_v9 = vadd.f32 %v9037_v61, %v15612_v13  ;;  %v9151_v51 = vadd.f32 %v9150_v39, %v15614_v46  ;;  %v9224_v47 = vmax.f32 %v9034_v32, 0.0  ;;  %v9226_v37 = vmax.f32 %v9147_v38, 0.0 }
 0xf2f   : > { %v9227_v48 = vmax.f32 %v9036_v17, 0.0  ;;  %v9229_v1 = vmax.f32 %v9149_v57, 0.0 }
 0xf30   : > { %v9228_v18 = vmax.f32 %v9038_v9, 0.0  ;;  %v9230_v11 = vmax.f32 %v9151_v51, 0.0 }
 0xf31   : > { %v9287_v34 = vpack.c.bf16 %v9227_v48, %v9223_v33  ;;  %v9289_v54 = vpack.c.bf16 %v9229_v1, %v9225_v36 }
 0xf32   : > { %v9288_v14 = vpack.c.bf16 %v9228_v18, %v9224_v47  ;;  %v9290_v50 = vpack.c.bf16 %v9230_v11, %v9226_v37  ;;  %v9041_v60 = vpop.f32.mrb[28].mxu1  ;;  %v9154_v40 = vpop.f32.mrb[44].mxu0 }
 0xf33   : > { %v9042_v62 = vadd.f32 %v9041_v60, %v15604_v58  ;;  %v9155_v8 = vadd.f32 %v9154_v40, %v15608_v56  ;;  %v9043_v31 = vpop.f32.mrb[29].mxu1  ;;  %v9156_v28 = vpop.f32.mrb[45].mxu0 }
 0xf34   : > { %v9044_v53 = vadd.f32 %v9043_v31, %v15612_v13  ;;  %v9157_v10 = vadd.f32 %v9156_v28, %v15614_v46  ;;  %v9045_v32 = vpop.f32.mrb[30].mxu1  ;;  %v9158_v38 = vpop.f32.mrb[46].mxu0  ;;  %9614 = vmatprep.mubr.bf16.mxu1 %v9288_v14  ;;  %9711 = vmatprep.mubr.bf16.mxu0 %v9290_v50 }
 0xf35   : > { %v9046_v24 = vadd.f32 %v9045_v32, %v15604_v58  ;;  %v9159_v17 = vadd.f32 %v9158_v38, %v15608_v56  ;;  %v9047_v57 = vpop.f32.mrb[31].mxu1  ;;  %v9160_v61 = vpop.f32.mrb[47].mxu0  ;;  %9615 = vmatmul.mubr.bf16.vlgmr.msra.gmra.mrb[56].mxu1 %v9287_v34  ;;  %9712 = vmatmul.mubr.bf16.vlgmr.msra.gmra.mrb[72].mxu0 %v9289_v54  ;;  %v9231_v51 = vmax.f32 %v9042_v62, 0.0  ;;  %v9233_v33 = vmax.f32 %v9155_v8, 0.0 }
 0xf36   : > { %v9048_v39 = vadd.f32 %v9047_v57, %v15612_v13  ;;  %v9161_v9 = vadd.f32 %v9160_v61, %v15614_v46  ;;  %11793 = vmatpush3.bf16.msra.mxu1 %v15430_v45  ;;  %v9232_v1 = vmax.f32 %v9044_v53, 0.0  ;;  %v9234_v47 = vmax.f32 %v9157_v10, 0.0 }
 0xf37   : > { %v9235_v36 = vmax.f32 %v9046_v24, 0.0  ;;  %v9237_v48 = vmax.f32 %v9159_v17, 0.0  ;;  %11786 = vmatprep.subr.bf16.mxu1 %v15434_v41 }
 0xf38   : > { %v9236_v37 = vmax.f32 %v9048_v39, 0.0  ;;  %v9238_v18 = vmax.f32 %v9161_v9, 0.0 }
 0xf39   : > { %v9291_v11 = vpack.c.bf16 %v9235_v36, %v9231_v51  ;;  %v9293_v14 = vpack.c.bf16 %v9237_v48, %v9233_v33 }
 0xf3a   : > { %v9292_v34 = vpack.c.bf16 %v9236_v37, %v9232_v1  ;;  %v9294_v54 = vpack.c.bf16 %v9238_v18, %v9234_v47  ;;  %v9051_v50 = vpop.f32.mrb[32].mxu1  ;;  %v9164_v60 = vpop.f32.mrb[48].mxu0  ;;  %11794 = vmatpush3.bf16.msra.mxu1 %v15443_v35 }
 0xf3b   : > { %v9052_v45 = vadd.f32 %v9051_v50, %v15604_v58  ;;  %v9165_v40 = vadd.f32 %v9164_v60, %v15608_v56  ;;  %v9053_v62 = vpop.f32.mrb[33].mxu1  ;;  %v9166_v8 = vpop.f32.mrb[49].mxu0  ;;  %11787 = vmatprep.subr.bf16.mxu1 %v15448_v42 }
 0xf3c   : > { %v9054_v41 = vadd.f32 %v9053_v62, %v15612_v13  ;;  %v9167_v31 = vadd.f32 %v9166_v8, %v15614_v46  ;;  %v9055_v28 = vpop.f32.mrb[34].mxu1  ;;  %v9168_v53 = vpop.f32.mrb[50].mxu0  ;;  %9622 = vmatprep.mubr.bf16.mxu1 %v9292_v34  ;;  %9719 = vmatprep.mubr.bf16.mxu0 %v9294_v54 }
 0xf3d   : > { %v9056_v10 = vadd.f32 %v9055_v28, %v15604_v58  ;;  %v9169_v35 = vadd.f32 %v9168_v53, %v15608_v56  ;;  %v9057_v32 = vpop.f32.mrb[35].mxu1  ;;  %v9170_v38 = vpop.f32.mrb[51].mxu0  ;;  %9623 = vmatmul.mubr.bf16.gmra.mrb[60].mxu1 %v9291_v11  ;;  %9720 = vmatmul.mubr.bf16.gmra.mrb[76].mxu0 %v9293_v14  ;;  %v9239_v17 = vmax.f32 %v9052_v45, 0.0  ;;  %v9241_v57 = vmax.f32 %v9165_v40, 0.0 }
 0xf3e   : > { %v9058_v24 = vadd.f32 %v9057_v32, %v15612_v13  ;;  %v9171_v42 = vadd.f32 %v9170_v38, %v15614_v46  ;;  %11795 = vmatpush3.bf16.msra.mxu1 %v15465_v59  ;;  %v9240_v9 = vmax.f32 %v9054_v41, 0.0  ;;  %v9242_v51 = vmax.f32 %v9167_v31, 0.0 }
 0xf3f   : > { %v9243_v61 = vmax.f32 %v9056_v10, 0.0  ;;  %v9245_v39 = vmax.f32 %v9169_v35, 0.0  ;;  %11788 = vmatprep.subr.bf16.mxu1 %v15470_v49 }
 0xf40   : > { %v9244_v33 = vmax.f32 %v9058_v24, 0.0  ;;  %v9246_v36 = vmax.f32 %v9171_v42, 0.0 }
 0xf41   : > { %v9295_v48 = vpack.c.bf16 %v9243_v61, %v9239_v17  ;;  %v9297_v1 = vpack.c.bf16 %v9245_v39, %v9241_v57 }
 0xf42   : > { %v9296_v47 = vpack.c.bf16 %v9244_v33, %v9240_v9  ;;  %v9298_v37 = vpack.c.bf16 %v9246_v36, %v9242_v51  ;;  %v9061_v18 = vpop.f32.mrb[36].mxu1  ;;  %v9174_v11 = vpop.f32.mrb[52].mxu0  ;;  %11796 = vmatpush3.bf16.msra.mxu1 %v15479_v12 }
 0xf43   : > { %v9062_v59 = vadd.f32 %v9061_v18, %v15604_v58  ;;  %v9175_v14 = vadd.f32 %v9174_v11, %v15608_v56  ;;  %v9063_v34 = vpop.f32.mrb[37].mxu1  ;;  %v9176_v54 = vpop.f32.mrb[53].mxu0  ;;  %11789 = vmatprep.subr.bf16.mxu1 %v15484_v22 }
 0xf44   : > { %v9064_v49 = vadd.f32 %v9063_v34, %v15612_v13  ;;  %v9177_v50 = vadd.f32 %v9176_v54, %v15614_v46  ;;  %v9065_v60 = vpop.f32.mrb[38].mxu1  ;;  %v9178_v45 = vpop.f32.mrb[54].mxu0  ;;  %9630 = vmatprep.mubr.bf16.mxu1 %v9296_v47  ;;  %9727 = vmatprep.mubr.bf16.mxu0 %v9298_v37 }
 0xf45   : > { %v9066_v40 = vadd.f32 %v9065_v60, %v15604_v58  ;;  %v9179_v12 = vadd.f32 %v9178_v45, %v15608_v56  ;;  %v9067_v62 = vpop.f32.mrb[39].mxu1  ;;  %v9180_v8 = vpop.f32.mrb[55].mxu0  ;;  %9631 = vmatmul.mubr.bf16.gmra.mrb[64].mxu1 %v9295_v48  ;;  %9728 = vmatmul.mubr.bf16.gmra.mrb[80].mxu0 %v9297_v1  ;;  %v9247_v31 = vmax.f32 %v9062_v59, 0.0  ;;  %v9249_v28 = vmax.f32 %v9175_v14, 0.0 }
 0xf46   : > { %v9068_v41 = vadd.f32 %v9067_v62, %v15612_v13  ;;  %v9181_v22 = vadd.f32 %v9180_v8, %v15614_v46  ;;  %11797 = vmatpush3.bf16.msra.mxu1 %v15501_v43  ;;  %v9248_v35 = vmax.f32 %v9064_v49, 0.0  ;;  %v9250_v32 = vmax.f32 %v9177_v50, 0.0 }
 0xf47   : > { %v9251_v53 = vmax.f32 %v9066_v40, 0.0  ;;  %v9253_v10 = vmax.f32 %v9179_v12, 0.0  ;;  %11790 = vmatprep.subr.bf16.mxu1 %v15506_v21 }
 0xf48   : > { %v9252_v38 = vmax.f32 %v9068_v41, 0.0  ;;  %v9254_v24 = vmax.f32 %v9181_v22, 0.0 }
 0xf49   : > { %v9299_v42 = vpack.c.bf16 %v9251_v53, %v9247_v31  ;;  %v9301_v17 = vpack.c.bf16 %v9253_v10, %v9249_v28 }
 0xf4a   : > { %v9300_v57 = vpack.c.bf16 %v9252_v38, %v9248_v35  ;;  %v9302_v61 = vpack.c.bf16 %v9254_v24, %v9250_v32  ;;  %v9071_v39 = vpop.f32.mrb[40].mxu1  ;;  %v9184_v9 = vpop.f32.mrb[56].mxu0  ;;  %11798 = vmatpush3.bf16.msra.mxu1 %v15556_v55 }
 0xf4b   : > { %v9072_v43 = vadd.f32 %v9071_v39, %v15604_v58  ;;  %v9185_v51 = vadd.f32 %v9184_v9, %v15608_v56  ;;  %v9073_v33 = vpop.f32.mrb[41].mxu1  ;;  %v9186_v36 = vpop.f32.mrb[57].mxu0  ;;  %11791 = vmatprep.subr.bf16.mxu1 %v15559_v5 }
 0xf4c   : > { %v9074_v21 = vadd.f32 %v9073_v33, %v15612_v13  ;;  %v9187_v48 = vadd.f32 %v9186_v36, %v15614_v46  ;;  %v9075_v1 = vpop.f32.mrb[42].mxu1  ;;  %v9188_v47 = vpop.f32.mrb[58].mxu0  ;;  %9638 = vmatprep.mubr.bf16.mxu1 %v9300_v57  ;;  %9735 = vmatprep.mubr.bf16.mxu0 %v9302_v61 }
 0xf4d   : > { %v9076_v37 = vadd.f32 %v9075_v1, %v15604_v58  ;;  %v9189_v55 = vadd.f32 %v9188_v47, %v15608_v56  ;;  %v9077_v18 = vpop.f32.mrb[43].mxu1  ;;  %v9190_v11 = vpop.f32.mrb[59].mxu0  ;;  %9639 = vmatmul.mubr.bf16.gmra.mrb[68].mxu1 %v9299_v42  ;;  %9736 = vmatmul.mubr.bf16.gmra.mrb[84].mxu0 %v9301_v17  ;;  %v9255_v14 = vmax.f32 %v9072_v43, 0.0  ;;  %v9257_v34 = vmax.f32 %v9185_v51, 0.0 }
 0xf4e   : > { %v9078_v59 = vadd.f32 %v9077_v18, %v15612_v13  ;;  %v9191_v5 = vadd.f32 %v9190_v11, %v15614_v46  ;;  %11799 = vmatpush3.bf16.msra.mxu1 %v15562_v3  ;;  %v9256_v50 = vmax.f32 %v9074_v21, 0.0  ;;  %v9258_v60 = vmax.f32 %v9187_v48, 0.0 }
 0xf4f   : > { %v9259_v54 = vmax.f32 %v9076_v37, 0.0  ;;  %v9261_v49 = vmax.f32 %v9189_v55, 0.0  ;;  %11792 = vmatprep.subr.bf16.mxu1 %v15567_v4 }
 0xf50   : > { %v9260_v45 = vmax.f32 %v9078_v59, 0.0  ;;  %v9262_v40 = vmax.f32 %v9191_v5, 0.0 }
 0xf51   : > { %v9303_v12 = vpack.c.bf16 %v9259_v54, %v9255_v14  ;;  %v9305_v62 = vpack.c.bf16 %v9261_v49, %v9257_v34 }
 0xf52   : > { %v9304_v8 = vpack.c.bf16 %v9260_v45, %v9256_v50  ;;  %v9306_v41 = vpack.c.bf16 %v9262_v40, %v9258_v60  ;;  %v9081_v22 = vpop.f32.mrb[44].mxu1  ;;  %v9194_v31 = vpop.f32.mrb[60].mxu0  ;;  %11800 = vmatpush3.bf16.msra.mxu1 %v15570_v2 }
 0xf53   : > { %v9082_v3 = vadd.f32 %v9081_v22, %v15604_v58  ;;  %v9195_v28 = vadd.f32 %v9194_v31, %v15608_v56  ;;  %v9083_v53 = vpop.f32.mrb[45].mxu1  ;;  %v9196_v10 = vpop.f32.mrb[61].mxu0 }
 0xf54   : > { %v9084_v4 = vadd.f32 %v9083_v53, %v15612_v13  ;;  %v9197_v35 = vadd.f32 %v9196_v10, %v15614_v46  ;;  %v9085_v32 = vpop.f32.mrb[46].mxu1  ;;  %v9198_v38 = vpop.f32.mrb[62].mxu0  ;;  %9646 = vmatprep.mubr.bf16.mxu1 %v9304_v8  ;;  %9743 = vmatprep.mubr.bf16.mxu0 %v9306_v41 }
 0xf55   : > { %v9086_v24 = vadd.f32 %v9085_v32, %v15604_v58  ;;  %v9199_v42 = vadd.f32 %v9198_v38, %v15608_v56  ;;  %v9087_v17 = vpop.f32.mrb[47].mxu1  ;;  %v9200_v2 = vpop.f32.mrb[63].mxu0  ;;  %9647 = vmatmul.mubr.bf16.gmra.mrb[72].mxu1 %v9303_v12  ;;  %9744 = vmatmul.mubr.bf16.gmra.mrb[88].mxu0 %v9305_v62  ;;  %v9263_v39 = vmax.f32 %v9082_v3, 0.0  ;;  %v9265_v9 = vmax.f32 %v9195_v28, 0.0 }
 0xf56   : > { %v9088_v57 = vadd.f32 %v9087_v17, %v15612_v13  ;;  %v9201_v61 = vadd.f32 %v9200_v2, %v15614_v46  ;;  %v9264_v33 = vmax.f32 %v9084_v4, 0.0  ;;  %v9266_v36 = vmax.f32 %v9197_v35, 0.0 }
 0xf57   : > { %v9267_v43 = vmax.f32 %v9086_v24, 0.0  ;;  %v9269_v51 = vmax.f32 %v9199_v42, 0.0 }
 0xf58   : > { %v9268_v21 = vmax.f32 %v9088_v57, 0.0  ;;  %v9270_v48 = vmax.f32 %v9201_v61, 0.0 }
 0xf59   : > { %v9307_v1 = vpack.c.bf16 %v9267_v43, %v9263_v39  ;;  %v9309_v47 = vpack.c.bf16 %v9269_v51, %v9265_v9 }
 0xf5a   : > { %v9308_v37 = vpack.c.bf16 %v9268_v21, %v9264_v33  ;;  %v9310_v55 = vpack.c.bf16 %v9270_v48, %v9266_v36 }
 0xf5c   : > { %9654 = vmatprep.mubr.bf16.mxu1 %v9308_v37  ;;  %9751 = vmatprep.mubr.bf16.mxu0 %v9310_v55 }
 0xf5d   : > { %9655 = vmatmul.mubr.bf16.gmra.mrb[76].mxu1 %v9307_v1  ;;  %9752 = vmatmul.mubr.bf16.gmra.mrb[92].mxu0 %v9309_v47 }
 0xf8d   : > { %v9091_v18 = vpop.f32.mrb[48].mxu1  ;;  %v9204_v11 = vpop.f32.mrb[64].mxu0 }
 0xf8e   : > { %v9092_v59 = vadd.f32 %v9091_v18, %v15604_v58  ;;  %v9205_v5 = vadd.f32 %v9204_v11, %v15608_v56  ;;  %v9093_v14 = vpop.f32.mrb[49].mxu1  ;;  %v9206_v34 = vpop.f32.mrb[65].mxu0 }
 0xf8f   : > { %v9094_v54 = vadd.f32 %v9093_v14, %v15612_v13  ;;  %v9207_v49 = vadd.f32 %v9206_v34, %v15614_v46  ;;  %v9095_v50 = vpop.f32.mrb[50].mxu1  ;;  %v9208_v60 = vpop.f32.mrb[66].mxu0 }
 0xf90   : > { %v9096_v45 = vadd.f32 %v9095_v50, %v15604_v58  ;;  %v9209_v40 = vadd.f32 %v9208_v60, %v15608_v56  ;;  %v9097_v12 = vpop.f32.mrb[51].mxu1  ;;  %v9210_v62 = vpop.f32.mrb[67].mxu0  ;;  %v9271_v22 = vmax.f32 %v9092_v59, 0.0  ;;  %v9273_v31 = vmax.f32 %v9205_v5, 0.0 }
 0xf91   : > { %v9098_v8 = vadd.f32 %v9097_v12, %v15612_v13  ;;  %v9211_v41 = vadd.f32 %v9210_v62, %v15614_v46  ;;  %v9272_v53 = vmax.f32 %v9094_v54, 0.0  ;;  %v9274_v10 = vmax.f32 %v9207_v49, 0.0 }
 0xf92   : > { %v9275_v3 = vmax.f32 %v9096_v45, 0.0  ;;  %v9277_v28 = vmax.f32 %v9209_v40, 0.0 }
 0xf93   : > { %v9276_v4 = vmax.f32 %v9098_v8, 0.0  ;;  %v9278_v35 = vmax.f32 %v9211_v41, 0.0 }
 0xf94   : > { %v9311_v32 = vpack.c.bf16 %v9275_v3, %v9271_v22  ;;  %v9313_v38 = vpack.c.bf16 %v9277_v28, %v9273_v31 }
 0xf95   : > { %v9312_v24 = vpack.c.bf16 %v9276_v4, %v9272_v53  ;;  %v9314_v42 = vpack.c.bf16 %v9278_v35, %v9274_v10  ;;  %v9101_v17 = vpop.f32.mrb[52].mxu1  ;;  %v9214_v2 = vpop.f32.mrb[68].mxu0 }
 0xf96   : > { %v9102_v57 = vadd.f32 %v9101_v17, %v15604_v58  ;;  %v9215_v61 = vadd.f32 %v9214_v2, %v15608_v56  ;;  %v9103_v39 = vpop.f32.mrb[53].mxu1  ;;  %v9216_v9 = vpop.f32.mrb[69].mxu0 }
 0xf97   : > { %v9104_v43 = vadd.f32 %v9103_v39, %v15612_v13  ;;  %v9217_v51 = vadd.f32 %v9216_v9, %v15614_v46  ;;  %v9105_v33 = vpop.f32.mrb[54].mxu1  ;;  %v9218_v36 = vpop.f32.mrb[70].mxu0  ;;  %9662 = vmatprep.mubr.bf16.mxu1 %v9312_v24 }
 0xf98   : > { %v9106_v21 = vadd.f32 %v9105_v33, %v15604_v58  ;;  %v9219_v48 = vadd.f32 %v9218_v36, %v15608_v56  ;;  %v9107_v1 = vpop.f32.mrb[55].mxu1  ;;  %v9220_v47 = vpop.f32.mrb[71].mxu0  ;;  %9663 = vmatmul.mubr.bf16.gmra.mrb[80].mxu1 %v9311_v32  ;;  %v9279_v18 = vmax.f32 %v9102_v57, 0.0  ;;  %v9281_v11 = vmax.f32 %v9215_v61, 0.0 }
 0xf99   : > { %v9108_v37 = vadd.f32 %v9107_v1, %v15612_v13  ;;  %v9221_v55 = vadd.f32 %v9220_v47, %v15614_v46  ;;  %v9280_v14 = vmax.f32 %v9104_v43, 0.0  ;;  %v9282_v34 = vmax.f32 %v9217_v51, 0.0  ;;  %v15698_v46 = vld [vmem:[%s16266_s22] ss:$0 sm:$0xff]  ;;  %s12622_s22 = scalar_lea.vmem %s15924_s19, 2048 }
 0xf9a   : > { %v9283_v59 = vmax.f32 %v9106_v21, 0.0  ;;  %v9285_v5 = vmax.f32 %v9219_v48, 0.0  ;;  %p12623_p3 = scmp.ne.s32.totalorder %s15924_s19, %s12622_s22 }
 0xf9b   : > { %v9284_v54 = vmax.f32 %v9108_v37, 0.0  ;;  %v9286_v49 = vmax.f32 %v9221_v55, 0.0 }
 0xf9c   : > { %v9315_v50 = vpack.c.bf16 %v9283_v59, %v9279_v18  ;;  %v9317_v60 = vpack.c.bf16 %v9285_v5, %v9281_v11  ;;  %p12624_p5 = pnand %p12623_p3, %p12946_p10 }
 0xf9d   : > { %v9316_v58 = vpack.c.bf16 %v9284_v54, %v9280_v14  ;;  %v9318_v45 = vpack.c.bf16 %v9286_v49, %v9282_v34 }
 0xf9e   : > { %p12625_p7 = pneg %p12624_p5 }
 0xf9f   : > { %9670 = vmatprep.mubr.bf16.mxu1 %v9316_v58 }
 0xfa0   : > { %9671 = vmatmul.mubr.bf16.gmra.mrb[84].mxu1 %v9315_v50 }
 0xfa1   : > { %9759 = vmatprep.mubr.bf16.mxu1 %v9314_v42 }
 0xfa8   : > { %9760 = vmatmul.mubr.bf16.vlgmr.msra.gmra.mrb[88].mxu1 %v9313_v38 }
 0xfa9   : > { %9767 = vmatprep.mubr.bf16.mxu1 %v9318_v45 }
 0xfb0   : > { %9768 = vmatmul.mubr.bf16.gmra.mrb[92].mxu1 %v9317_v60 }
0x1008   : > { %v10841_v56 = vpop.f32.mrb[56].mxu1  ;;  %v10905_v13 = vpop.f32.mrb[72].mxu0 }
0x1009   : > { %v10842_v40 = vpop.f32.mrb[57].mxu1  ;;  %v10906_v12 = vpop.f32.mrb[73].mxu0 }
0x100a   : > { %v10843_v62 = vadd.f32 %v10842_v40, %v10841_v56  ;;  %v10907_v8 = vadd.f32 %v10906_v12, %v10905_v13  ;;  %v10844_v41 = vpop.f32.mrb[58].mxu1  ;;  %v10908_v22 = vpop.f32.mrb[74].mxu0 }
0x100b   : > { %v10845_v31 = vpop.f32.mrb[59].mxu1  ;;  %v10909_v3 = vpop.f32.mrb[75].mxu0 }
0x100c   : > { %v9617_v28 = vadd.f32 %v10843_v62, %v15698_v46  ;;  %v10846_v53 = vadd.f32 %v10845_v31, %v10844_v41  ;;  %v10910_v10 = vadd.f32 %v10909_v3, %v10908_v22 }
0x100e   : > { %v9714_v4 = vadd.f32 %v10907_v8, %v9617_v28  ;;  %v9620_v35 = vadd.f32 %v10846_v53, %v15698_v46 }
0x1010   : > { %v9717_v32 = vadd.f32 %v10910_v10, %v9620_v35  ;;  %v10847_v38 = vpop.f32.mrb[60].mxu1  ;;  %v10911_v24 = vpop.f32.mrb[76].mxu0  ;;  %v15703_v42 = vadd.f32 %v9714_v4, %v15419_v16 }
0x1011   : > { %v10848_v17 = vpop.f32.mrb[61].mxu1  ;;  %v10912_v2 = vpop.f32.mrb[77].mxu0 }
0x1012   : > { %v10849_v57 = vadd.f32 %v10848_v17, %v10847_v38  ;;  %v10913_v61 = vadd.f32 %v10912_v2, %v10911_v24  ;;  %v10850_v39 = vpop.f32.mrb[62].mxu1  ;;  %v10914_v9 = vpop.f32.mrb[78].mxu0  ;;  %9794 = vadd.xlane.f32.xlu0 %v15703_v42  ;;  %v15707_v43 = vadd.f32 %v9717_v32, %v15422_v7  ;;  %v9842_v16 = vmul.f32 %v15703_v42, %v15703_v42 }
0x1013   : > { %v10851_v51 = vpop.f32.mrb[63].mxu1  ;;  %v10915_v33 = vpop.f32.mrb[79].mxu0 }
0x1014   : > { %v9625_v36 = vadd.f32 %v10849_v57, %v15698_v46  ;;  %v10852_v21 = vadd.f32 %v10851_v51, %v10850_v39  ;;  %v10916_v48 = vadd.f32 %v10915_v33, %v10914_v9  ;;  %9796 = vadd.xlane.f32.xlu1 %v15707_v43  ;;  %v9843_v37 = vmul.f32 %v15707_v43, %v15707_v43 }
0x1016   : > { %v9722_v1 = vadd.f32 %v10913_v61, %v9625_v36  ;;  %v9628_v47 = vadd.f32 %v10852_v21, %v15698_v46  ;;  %9858 = vadd.xlane.f32.xlu0 %v9842_v16 }
0x1018   : > { %v9725_v7 = vadd.f32 %v10916_v48, %v9628_v47  ;;  %v10853_v55 = vpop.f32.mrb[64].mxu1  ;;  %v10917_v18 = vpop.f32.mrb[80].mxu0  ;;  %9860 = vadd.xlane.f32.xlu1 %v9843_v37  ;;  %v15717_v11 = vadd.f32 %v9722_v1, %v15454_v23 }
0x1019   : > { %v10854_v59 = vpop.f32.mrb[65].mxu1  ;;  %v10918_v5 = vpop.f32.mrb[81].mxu0 }
0x101a   : > { %v10855_v14 = vadd.f32 %v10854_v59, %v10853_v55  ;;  %v10919_v34 = vadd.f32 %v10918_v5, %v10917_v18  ;;  %v10856_v54 = vpop.f32.mrb[66].mxu1  ;;  %v10920_v49 = vpop.f32.mrb[82].mxu0  ;;  %9798 = vadd.xlane.f32.xlu0 %v15717_v11  ;;  %v15721_v50 = vadd.f32 %v9725_v7, %v15451_v30  ;;  %v9844_v23 = vmul.f32 %v15717_v11, %v15717_v11 }
0x101b   : > { %v10857_v60 = vpop.f32.mrb[67].mxu1  ;;  %v10921_v58 = vpop.f32.mrb[83].mxu0 }
0x101c   : > { %v9633_v45 = vadd.f32 %v10855_v14, %v15698_v46  ;;  %v10858_v56 = vadd.f32 %v10857_v60, %v10856_v54  ;;  %v10922_v13 = vadd.f32 %v10921_v58, %v10920_v49  ;;  %9800 = vadd.xlane.f32.xlu1 %v15721_v50  ;;  %v9845_v62 = vmul.f32 %v15721_v50, %v15721_v50 }
0x101e   : > { %v9730_v40 = vadd.f32 %v10919_v34, %v9633_v45  ;;  %v9636_v12 = vadd.f32 %v10858_v56, %v15698_v46  ;;  %9862 = vadd.xlane.f32.xlu0 %v9844_v23 }
0x1020   : > { %v9733_v30 = vadd.f32 %v10922_v13, %v9636_v12  ;;  %v10859_v8 = vpop.f32.mrb[68].mxu1  ;;  %v10923_v41 = vpop.f32.mrb[84].mxu0  ;;  %9864 = vadd.xlane.f32.xlu1 %v9845_v62  ;;  %v15731_v22 = vadd.f32 %v9730_v40, %v15490_v0 }
0x1021   : > { %v10860_v31 = vpop.f32.mrb[69].mxu1  ;;  %v10924_v3 = vpop.f32.mrb[85].mxu0 }
0x1022   : > { %v10861_v28 = vadd.f32 %v10860_v31, %v10859_v8  ;;  %v10925_v53 = vadd.f32 %v10924_v3, %v10923_v41  ;;  %v10862_v10 = vpop.f32.mrb[70].mxu1  ;;  %v10926_v4 = vpop.f32.mrb[86].mxu0  ;;  %9802 = vadd.xlane.f32.xlu0 %v15731_v22  ;;  %v15735_v35 = vadd.f32 %v9733_v30, %v15487_v29  ;;  %v9846_v0 = vmul.f32 %v15731_v22, %v15731_v22 }
0x1023   : > { %v10863_v32 = vpop.f32.mrb[71].mxu1  ;;  %v10927_v38 = vpop.f32.mrb[87].mxu0 }
0x1024   : > { %v9641_v24 = vadd.f32 %v10861_v28, %v15698_v46  ;;  %v10864_v17 = vadd.f32 %v10863_v32, %v10862_v10  ;;  %v10928_v2 = vadd.f32 %v10927_v38, %v10926_v4  ;;  %9804 = vadd.xlane.f32.xlu1 %v15735_v35  ;;  %v9847_v39 = vmul.f32 %v15735_v35, %v15735_v35 }
0x1026   : > { %v9738_v57 = vadd.f32 %v10925_v53, %v9641_v24  ;;  %v9644_v61 = vadd.f32 %v10864_v17, %v15698_v46  ;;  %9866 = vadd.xlane.f32.xlu0 %v9846_v0 }
0x1028   : > { %v9741_v29 = vadd.f32 %v10928_v2, %v9644_v61  ;;  %v10865_v9 = vpop.f32.mrb[72].mxu1  ;;  %v10929_v51 = vpop.f32.mrb[88].mxu0  ;;  %9868 = vadd.xlane.f32.xlu1 %v9847_v39  ;;  %v15745_v33 = vadd.f32 %v9738_v57, %v15518_v6 }
0x1029   : > { %v10866_v36 = vpop.f32.mrb[73].mxu1  ;;  %v10930_v21 = vpop.f32.mrb[89].mxu0 }
0x102a   : > { %v10867_v48 = vadd.f32 %v10866_v36, %v10865_v9  ;;  %v10931_v16 = vadd.f32 %v10930_v21, %v10929_v51  ;;  %v10868_v1 = vpop.f32.mrb[74].mxu1  ;;  %v10932_v47 = vpop.f32.mrb[90].mxu0  ;;  %9806 = vadd.xlane.f32.xlu0 %v15745_v33  ;;  %v15749_v37 = vadd.f32 %v9741_v29, %v15515_v26  ;;  %v9848_v6 = vmul.f32 %v15745_v33, %v15745_v33 }
0x102b   : > { %v10869_v7 = vpop.f32.mrb[75].mxu1  ;;  %v10933_v55 = vpop.f32.mrb[91].mxu0 }
0x102c   : > { %v9649_v18 = vadd.f32 %v10867_v48, %v15698_v46  ;;  %v10870_v59 = vadd.f32 %v10869_v7, %v10868_v1  ;;  %v10934_v5 = vadd.f32 %v10933_v55, %v10932_v47  ;;  %9808 = vadd.xlane.f32.xlu1 %v15749_v37  ;;  %v9849_v54 = vmul.f32 %v15749_v37, %v15749_v37 }
0x102e   : > { %v9746_v14 = vadd.f32 %v10931_v16, %v9649_v18  ;;  %v9652_v34 = vadd.f32 %v10870_v59, %v15698_v46  ;;  %9870 = vadd.xlane.f32.xlu0 %v9848_v6 }
0x1030   : > { %v9749_v26 = vadd.f32 %v10934_v5, %v9652_v34  ;;  %v10871_v49 = vpop.f32.mrb[76].mxu1  ;;  %v10935_v60 = vpop.f32.mrb[92].mxu0  ;;  %9872 = vadd.xlane.f32.xlu1 %v9849_v54  ;;  %v15759_v58 = vadd.f32 %v9746_v14, %v15534_v20 }
0x1031   : > { %v10872_v45 = vpop.f32.mrb[77].mxu1  ;;  %v10936_v56 = vpop.f32.mrb[93].mxu0 }
0x1032   : > { %v10873_v13 = vadd.f32 %v10872_v45, %v10871_v49  ;;  %v10937_v23 = vadd.f32 %v10936_v56, %v10935_v60  ;;  %v10874_v40 = vpop.f32.mrb[78].mxu1  ;;  %v10938_v12 = vpop.f32.mrb[94].mxu0  ;;  %9810 = vadd.xlane.f32.xlu0 %v15759_v58  ;;  %v15763_v62 = vadd.f32 %v9749_v26, %v15531_v44  ;;  %v9850_v20 = vmul.f32 %v15759_v58, %v15759_v58 }
0x1033   : > { %v10875_v30 = vpop.f32.mrb[79].mxu1  ;;  %v10939_v8 = vpop.f32.mrb[95].mxu0 }
0x1034   : > { %v9657_v41 = vadd.f32 %v10873_v13, %v15698_v46  ;;  %v10876_v31 = vadd.f32 %v10875_v30, %v10874_v40  ;;  %v10940_v3 = vadd.f32 %v10939_v8, %v10938_v12  ;;  %9812 = vadd.xlane.f32.xlu1 %v15763_v62  ;;  %v9851_v10 = vmul.f32 %v15763_v62, %v15763_v62 }
0x1036   : > { %v9754_v28 = vadd.f32 %v10937_v23, %v9657_v41  ;;  %v9660_v53 = vadd.f32 %v10876_v31, %v15698_v46  ;;  %9874 = vadd.xlane.f32.xlu0 %v9850_v20 }
0x1038   : > { %v9757_v44 = vadd.f32 %v10940_v3, %v9660_v53  ;;  %9876 = vadd.xlane.f32.xlu1 %v9851_v10  ;;  %v15773_v4 = vadd.f32 %v9754_v28, %v15550_v27 }
0x103a   : > { %9814 = vadd.xlane.f32.xlu0 %v15773_v4  ;;  %v15777_v32 = vadd.f32 %v9757_v44, %v15547_v52  ;;  %v9852_v38 = vmul.f32 %v15773_v4, %v15773_v4 }
0x103c   : > { %9816 = vadd.xlane.f32.xlu1 %v15777_v32  ;;  %v9853_v24 = vmul.f32 %v15777_v32, %v15777_v32 }
0x103e   : > { %9878 = vadd.xlane.f32.xlu0 %v9852_v38 }
0x1040   : > { %9880 = vadd.xlane.f32.xlu1 %v9853_v24 }
0x106b   : > { %v10877_v17 = vpop.f32.mrb[80].mxu1 }
0x106c   : > { %v10878_v2 = vpop.f32.mrb[81].mxu1 }
0x106d   : > { %v10879_v0 = vadd.f32 %v10878_v2, %v10877_v17  ;;  %v10880_v27 = vpop.f32.mrb[82].mxu1 }
0x106e   : > { %v10881_v57 = vpop.f32.mrb[83].mxu1 }
0x106f   : > { %v10882_v61 = vadd.f32 %v10881_v57, %v10880_v27  ;;  %v9665_v16 = vadd.f32 %v10879_v0, %v15698_v46 }
0x1071   : > { %v9668_v55 = vadd.f32 %v10882_v61, %v15698_v46 }
0x1073   : > { %v10883_v39 = vpop.f32.mrb[84].mxu1 }
0x1074   : > { %v10884_v29 = vpop.f32.mrb[85].mxu1 }
0x1075   : > { %v10885_v52 = vadd.f32 %v10884_v29, %v10883_v39  ;;  %v10886_v9 = vpop.f32.mrb[86].mxu1 }
0x1076   : > { %v10887_v51 = vpop.f32.mrb[87].mxu1 }
0x1077   : > { %v10888_v36 = vadd.f32 %v10887_v51, %v10886_v9  ;;  %v9673_v26 = vadd.f32 %v10885_v52, %v15698_v46 }
0x107b   : > { %v10941_v21 = vpop.f32.mrb[88].mxu1 }
0x107c   : > { %v10942_v48 = vpop.f32.mrb[89].mxu1 }
0x107d   : > { %v10943_v1 = vadd.f32 %v10942_v48, %v10941_v21  ;;  %v10944_v47 = vpop.f32.mrb[90].mxu1 }
0x107e   : > { %v10945_v7 = vpop.f32.mrb[91].mxu1 }
0x107f   : > { %v9762_v18 = vadd.f32 %v10943_v1, %v9665_v16  ;;  %v10946_v59 = vadd.f32 %v10945_v7, %v10944_v47 }
0x1081   : > { %v9765_v5 = vadd.f32 %v10946_v59, %v9668_v55  ;;  %v15787_v6 = vadd.f32 %v9762_v18, %v15577_v15  ;;  %v9676_v15 = vadd.f32 %v10888_v36, %v15698_v46 }
0x1083   : > { %v10947_v14 = vpop.f32.mrb[92].mxu1  ;;  %9818 = vadd.xlane.f32.xlu0 %v15787_v6  ;;  %v15791_v34 = vadd.f32 %v9765_v5, %v15580_v19  ;;  %v9854_v45 = vmul.f32 %v15787_v6, %v15787_v6 }
0x1084   : > { %v10948_v54 = vpop.f32.mrb[93].mxu1 }
0x1085   : > { %v10949_v49 = vadd.f32 %v10948_v54, %v10947_v14  ;;  %v10950_v60 = vpop.f32.mrb[94].mxu1  ;;  %9820 = vadd.xlane.f32.xlu1 %v15791_v34  ;;  %v9855_v19 = vmul.f32 %v15791_v34, %v15791_v34  ;;  %v15824_v54 = vld [vmem:[%s16267_s1] ss:$0 sm:$0xff]  ;;  %s12628_s1 = scalar_lea.vmem %s12627_s25, 4096 }
0x1086   : > { %v10951_v56 = vpop.f32.mrb[95].mxu1  ;;  %p12630_p2 = scmp.lt.s32.totalorder %s12628_s1, %s12622_s22 }
0x1087   : > { %v9770_v13 = vadd.f32 %v10949_v49, %v9673_v26  ;;  %v10952_v23 = vadd.f32 %v10951_v56, %v10950_v60  ;;  %9882 = vadd.xlane.f32.xlu0 %v9854_v45 }
0x1088   : > { %p12631_p1 = por %p12630_p2, %p12629_p12 }
0x1089   : > { %v9773_v40 = vadd.f32 %v10952_v23, %v9676_v15  ;;  %9884 = vadd.xlane.f32.xlu1 %v9855_v19  ;;  %v15801_v12 = vadd.f32 %v9770_v13, %v15591_v25 }
0x108a   : > { %p12632_p13 = pnand %p12631_p1, %p12625_p7 }
0x108b   : > { %9822 = vadd.xlane.f32.xlu0 %v15801_v12  ;;  %v15805_v30 = vadd.f32 %v9773_v40, %v15594_v63  ;;  %v9856_v46 = vmul.f32 %v15801_v12, %v15801_v12 }
0x108d   : > { %9824 = vadd.xlane.f32.xlu1 %v15805_v30  ;;  %v9857_v8 = vmul.f32 %v15805_v30, %v15805_v30 }
0x108f   : > { %9886 = vadd.xlane.f32.xlu0 %v9856_v46 }
0x1091   : > { %9888 = vadd.xlane.f32.xlu1 %v9857_v8 }
0x109f   : > { %v9795_v41 = vpop.xlane.xlu0 %9794 }
0x10a0   : > { %v9826_v31 = vmul.f32 0.0078125, %v9795_v41 }
0x10a1   : > { %v9797_v3 = vpop.xlane.xlu1 %9796 }
0x10a2   : > { %v9827_v25 = vmul.f32 0.0078125, %v9797_v3  ;;  %v9906_v28 = vmul.f32 %v9826_v31, %v9826_v31  ;;  %v9938_v18 = vsub.f32 %v15703_v42, %v9826_v31  ;;  %v15832_v42 = vld [vmem:[%s16268_s13] ss:$0 sm:$0xff] }
0x10a3   : > { %v9859_v20 = vpop.xlane.xlu0 %9858 }
0x10a4   : > { %v9890_v53 = vmul.f32 0.0078125, %v9859_v20  ;;  %v9907_v63 = vmul.f32 %v9827_v25, %v9827_v25  ;;  %v9939_v60 = vsub.f32 %v15707_v43, %v9827_v25 }
0x10a5   : > { %v9861_v10 = vpop.xlane.xlu1 %9860 }
0x10a6   : > { %v9922_v44 = vsub.f32 %v9890_v53, %v9906_v28  ;;  %v9891_v38 = vmul.f32 0.0078125, %v9861_v10 }
0x10a7   : > { %v9799_v24 = vpop.xlane.xlu0 %9798 }
0x10a8   : > { %v9954_v17 = vadd.f32 1e-05, %v9922_v44  ;;  %v9923_v2 = vsub.f32 %v9891_v38, %v9907_v63  ;;  %v9828_v0 = vmul.f32 0.0078125, %v9799_v24 }
0x10a9   : > { %v9801_v27 = vpop.xlane.xlu1 %9800 }
0x10aa   : > { %12432 = vrsqrt.f32 %v9954_v17  ;;  %v9955_v57 = vadd.f32 1e-05, %v9923_v2  ;;  %v15812_v61 = vmul.f32 0.0078125, %v9801_v27  ;;  %v9908_v29 = vmul.f32 %v9828_v0, %v9828_v0 }
0x10ab   : > { %v9863_v39 = vpop.xlane.xlu0 %9862  ;;  %v9940_v10 = vsub.f32 %v15717_v11, %v9828_v0 }
0x10ac   : > { %12434 = vrsqrt.f32 %v9955_v57  ;;  %v9892_v52 = vmul.f32 0.0078125, %v9863_v39  ;;  %v9909_v51 = vmul.f32 %v15812_v61, %v15812_v61  ;;  %v9941_v2 = vsub.f32 %v15721_v50, %v15812_v61 }
0x10ad   : > { %v9865_v9 = vpop.xlane.xlu1 %9864 }
0x10ae   : > { %v9924_v36 = vsub.f32 %v9892_v52, %v9908_v29  ;;  %v9893_v21 = vmul.f32 0.0078125, %v9865_v9 }
0x10af   : > { %v9803_v48 = vpop.xlane.xlu0 %9802 }
0x10b0   : > { %v9956_v16 = vadd.f32 1e-05, %v9924_v36  ;;  %v9925_v1 = vsub.f32 %v9893_v21, %v9909_v51  ;;  %v15816_v47 = vmul.f32 0.0078125, %v9803_v48 }
0x10b1   : > { %v9805_v7 = vpop.xlane.xlu1 %9804 }
0x10b2   : > { %12436 = vrsqrt.f32 %v9956_v16  ;;  %v9957_v55 = vadd.f32 1e-05, %v9925_v1  ;;  %v15819_v59 = vmul.f32 0.0078125, %v9805_v7  ;;  %v9910_v26 = vmul.f32 %v15816_v47, %v15816_v47 }
0x10b3   : > { %v9867_v5 = vpop.xlane.xlu0 %9866 }
0x10b4   : > { %v12433_v14 = vpop.eup %12432  ;;  %12438 = vrsqrt.f32 %v9957_v55  ;;  %v9894_v49 = vmul.f32 0.0078125, %v9867_v5  ;;  %v9911_v13 = vmul.f32 %v15819_v59, %v15819_v59  ;;  %v9942_v55 = vsub.f32 %v15731_v22, %v15816_v47 }
0x10b5   : > { %v9986_v45 = vmul.f32 %v12433_v14, %v9938_v18  ;;  %v9869_v56 = vpop.xlane.xlu1 %9868 }
0x10b6   : > { %v12435_v15 = vpop.eup %12434  ;;  %v9926_v23 = vsub.f32 %v9894_v49, %v9910_v26  ;;  %v9895_v19 = vmul.f32 0.0078125, %v9869_v56 }
0x10b7   : > { %v10008_v40 = vmul.f32 %v15824_v54, %v9986_v45  ;;  %v9987_v46 = vmul.f32 %v12435_v15, %v9939_v60  ;;  %v9807_v8 = vpop.xlane.xlu0 %9806  ;;  %v9943_v60 = vsub.f32 %v15735_v35, %v15819_v59 }
0x10b8   : > { %v9958_v41 = vadd.f32 1e-05, %v9926_v23  ;;  %v9927_v43 = vsub.f32 %v9895_v19, %v9911_v13  ;;  %v15837_v31 = vmul.f32 0.0078125, %v9807_v8 }
0x10b9   : > { %v10030_v3 = vadd.f32 %v15832_v42, %v10008_v40  ;;  %v10009_v25 = vmul.f32 %v15824_v54, %v9987_v46  ;;  %v9809_v20 = vpop.xlane.xlu1 %9808 }
0x10ba   : > { %12440 = vrsqrt.f32 %v9958_v41  ;;  %v9959_v28 = vadd.f32 1e-05, %v9927_v43  ;;  %v15848_v63 = vmul.f32 0.0078125, %v9809_v20  ;;  %v9912_v24 = vmul.f32 %v15837_v31, %v15837_v31 }
0x10bb   : > { %10046 = vst [vmem:[%s15843_s12] sm:$0xff] %v10030_v3  ;;  %v10031_v53 = vadd.f32 %v15832_v42, %v10009_v25  ;;  %v9871_v44 = vpop.xlane.xlu0 %9870  ;;  %v9944_v20 = vsub.f32 %v15745_v33, %v15837_v31 }
0x10bc   : > { %v12437_v38 = vpop.eup %12436  ;;  %12442 = vrsqrt.f32 %v9959_v28  ;;  %v9896_v17 = vmul.f32 0.0078125, %v9871_v44  ;;  %v9913_v11 = vmul.f32 %v15848_v63, %v15848_v63 }
0x10bd   : > { %10047 = vst [vmem:[%s15843_s12 + $0x8] sm:$0xff] %v10031_v53  ;;  %v9988_v27 = vmul.f32 %v12437_v38, %v9940_v10  ;;  %v9873_v57 = vpop.xlane.xlu1 %9872 }
0x10be   : > { %v12439_v39 = vpop.eup %12438  ;;  %v9928_v0 = vsub.f32 %v9896_v17, %v9912_v24  ;;  %v9897_v29 = vmul.f32 0.0078125, %v9873_v57  ;;  %v9945_v24 = vsub.f32 %v15749_v37, %v15848_v63 }
0x10bf   : > { %v10010_v52 = vmul.f32 %v15824_v54, %v9988_v27  ;;  %v9989_v9 = vmul.f32 %v12439_v39, %v9941_v2  ;;  %v9811_v51 = vpop.xlane.xlu0 %9810 }
0x10c0   : > { %v9960_v36 = vadd.f32 1e-05, %v9928_v0  ;;  %v9929_v21 = vsub.f32 %v9897_v29, %v9913_v11  ;;  %v15858_v48 = vmul.f32 0.0078125, %v9811_v51 }
0x10c1   : > { %v10032_v50 = vadd.f32 %v15832_v42, %v10010_v52  ;;  %v10011_v61 = vmul.f32 %v15824_v54, %v9989_v9  ;;  %v9813_v16 = vpop.xlane.xlu1 %9812 }
0x10c2   : > { %12444 = vrsqrt.f32 %v9960_v36  ;;  %v9961_v1 = vadd.f32 1e-05, %v9929_v21  ;;  %v9835_v18 = vmul.f32 0.0078125, %v9813_v16  ;;  %v9914_v26 = vmul.f32 %v15858_v48, %v15858_v48 }
0x10c3   : > { %10048 = vst [vmem:[%s15843_s12 + $0x10] sm:$0xff] %v10032_v50  ;;  %v10033_v7 = vadd.f32 %v15832_v42, %v10011_v61  ;;  %v9875_v5 = vpop.xlane.xlu0 %9874  ;;  %v9946_v63 = vsub.f32 %v15759_v58, %v15858_v48 }
0x10c4   : > { %v12441_v14 = vpop.eup %12440  ;;  %12446 = vrsqrt.f32 %v9961_v1  ;;  %v9898_v49 = vmul.f32 0.0078125, %v9875_v5  ;;  %v9915_v13 = vmul.f32 %v9835_v18, %v9835_v18  ;;  %v9947_v21 = vsub.f32 %v15763_v62, %v9835_v18 }
0x10c5   : > { %10049 = vst [vmem:[%s15843_s12 + $0x18] sm:$0xff] %v10033_v7  ;;  %v9990_v45 = vmul.f32 %v12441_v14, %v9942_v55  ;;  %v9877_v56 = vpop.xlane.xlu1 %9876 }
0x10c6   : > { %v12443_v15 = vpop.eup %12442  ;;  %v9930_v23 = vsub.f32 %v9898_v49, %v9914_v26  ;;  %v9899_v19 = vmul.f32 0.0078125, %v9877_v56 }
0x10c7   : > { %v10012_v22 = vmul.f32 %v15824_v54, %v9990_v45  ;;  %v9991_v47 = vmul.f32 %v12443_v15, %v9943_v60  ;;  %v9815_v40 = vpop.xlane.xlu0 %9814 }
0x10c8   : > { %v9962_v46 = vadd.f32 1e-05, %v9930_v23  ;;  %v9931_v8 = vsub.f32 %v9899_v19, %v9915_v13  ;;  %v9836_v41 = vmul.f32 0.0078125, %v9815_v40 }
0x10c9   : > { %v10034_v43 = vadd.f32 %v15832_v42, %v10012_v22  ;;  %v10013_v3 = vmul.f32 %v15824_v54, %v9991_v47  ;;  %v9817_v35 = vpop.xlane.xlu1 %9816 }
0x10ca   : > { %12448 = vrsqrt.f32 %v9962_v46  ;;  %v9963_v59 = vadd.f32 1e-05, %v9931_v8  ;;  %v9837_v28 = vmul.f32 0.0078125, %v9817_v35  ;;  %v9916_v44 = vmul.f32 %v9836_v41, %v9836_v41 }
0x10cb   : > { %10050 = vst [vmem:[%s15843_s12 + $0x20] sm:$0xff] %v10034_v43  ;;  %v10035_v25 = vadd.f32 %v15832_v42, %v10013_v3  ;;  %v9879_v53 = vpop.xlane.xlu0 %9878  ;;  %v9948_v58 = vsub.f32 %v15773_v4, %v9836_v41 }
0x10cc   : > { %v12445_v10 = vpop.eup %12444  ;;  %12450 = vrsqrt.f32 %v9963_v59  ;;  %v9900_v38 = vmul.f32 0.0078125, %v9879_v53  ;;  %v9917_v57 = vmul.f32 %v9837_v28, %v9837_v28  ;;  %v9949_v62 = vsub.f32 %v15777_v32, %v9837_v28 }
0x10cd   : > { %10051 = vst [vmem:[%s15843_s12 + $0x28] sm:$0xff] %v10035_v25  ;;  %v9992_v17 = vmul.f32 %v12445_v10, %v9944_v20  ;;  %v9881_v2 = vpop.xlane.xlu1 %9880 }
0x10ce   : > { %v12447_v27 = vpop.eup %12446  ;;  %v9932_v39 = vsub.f32 %v9900_v38, %v9916_v44  ;;  %v9901_v11 = vmul.f32 0.0078125, %v9881_v2 }
0x10cf   : > { %v10014_v33 = vmul.f32 %v15824_v54, %v9992_v17  ;;  %v9993_v31 = vmul.f32 %v12447_v27, %v9945_v24 }
0x10d0   : > { %v9964_v0 = vadd.f32 1e-05, %v9932_v39  ;;  %v9933_v29 = vsub.f32 %v9901_v11, %v9917_v57 }
0x10d1   : > { %v10036_v52 = vadd.f32 %v15832_v42, %v10014_v33  ;;  %v10015_v9 = vmul.f32 %v15824_v54, %v9993_v31 }
0x10d2   : > { %12452 = vrsqrt.f32 %v9964_v0  ;;  %v9965_v51 = vadd.f32 1e-05, %v9933_v29 }
0x10d3   : > { %10052 = vst [vmem:[%s15843_s12 + $0x30] sm:$0xff] %v10036_v52  ;;  %v10037_v37 = vadd.f32 %v15832_v42, %v10015_v9 }
0x10d4   : > { %v12449_v36 = vpop.eup %12448  ;;  %12454 = vrsqrt.f32 %v9965_v51 }
0x10d5   : > { %10053 = vst [vmem:[%s15843_s12 + $0x38] sm:$0xff] %v10037_v37  ;;  %v9994_v50 = vmul.f32 %v12449_v36, %v9946_v63 }
0x10d6   : > { %v12451_v61 = vpop.eup %12450 }
0x10d7   : > { %v10016_v16 = vmul.f32 %v15824_v54, %v9994_v50  ;;  %v9995_v1 = vmul.f32 %v12451_v61, %v9947_v21 }
0x10d9   : > { %v10038_v7 = vadd.f32 %v15832_v42, %v10016_v16  ;;  %v10017_v55 = vmul.f32 %v15824_v54, %v9995_v1 }
0x10db   : > { %10054 = vst [vmem:[%s15843_s12 + $0x40] sm:$0xff] %v10038_v7  ;;  %v10039_v5 = vadd.f32 %v15832_v42, %v10017_v55 }
0x10dc   : > { %v12453_v48 = vpop.eup %12452 }
0x10dd   : > { %10055 = vst [vmem:[%s15843_s12 + $0x48] sm:$0xff] %v10039_v5  ;;  %v9996_v18 = vmul.f32 %v12453_v48, %v9948_v58 }
0x10de   : > { %v12455_v14 = vpop.eup %12454 }
0x10df   : > { %v10018_v26 = vmul.f32 %v15824_v54, %v9996_v18  ;;  %v9997_v49 = vmul.f32 %v12455_v14, %v9949_v62 }
0x10e1   : > { %v10040_v60 = vadd.f32 %v15832_v42, %v10018_v26  ;;  %v10019_v45 = vmul.f32 %v15824_v54, %v9997_v49 }
0x10e3   : > { %10056 = vst [vmem:[%s15843_s12 + $0x50] sm:$0xff] %v10040_v60  ;;  %v10041_v56 = vadd.f32 %v15832_v42, %v10019_v45 }
0x10e5   : > { %10057 = vst [vmem:[%s15843_s12 + $0x58] sm:$0xff] %v10041_v56 }
0x1110   : > { %v9819_v15 = vpop.xlane.xlu0 %9818 }
0x1111   : > { %v9838_v13 = vmul.f32 0.0078125, %v9819_v15 }
0x1112   : > { %v9821_v4 = vpop.xlane.xlu1 %9820 }
0x1113   : > { %v9839_v23 = vmul.f32 0.0078125, %v9821_v4  ;;  %v9918_v22 = vmul.f32 %v9838_v13, %v9838_v13  ;;  %v9950_v39 = vsub.f32 %v15787_v6, %v9838_v13 }
0x1114   : > { %v9883_v19 = vpop.xlane.xlu0 %9882 }
0x1115   : > { %v9902_v32 = vmul.f32 0.0078125, %v9883_v19  ;;  %v9919_v40 = vmul.f32 %v9839_v23, %v9839_v23  ;;  %v9951_v33 = vsub.f32 %v15791_v34, %v9839_v23 }
0x1116   : > { %v9885_v47 = vpop.xlane.xlu1 %9884 }
0x1117   : > { %v9934_v46 = vsub.f32 %v9902_v32, %v9918_v22  ;;  %v9903_v8 = vmul.f32 0.0078125, %v9885_v47 }
0x1118   : > { %v9823_v41 = vpop.xlane.xlu0 %9822 }
0x1119   : > { %v9966_v43 = vadd.f32 1e-05, %v9934_v46  ;;  %v9935_v3 = vsub.f32 %v9903_v8, %v9919_v40  ;;  %v9840_v35 = vmul.f32 0.0078125, %v9823_v41 }
0x111a   : > { %v9825_v59 = vpop.xlane.xlu1 %9824 }
0x111b   : > { %12456 = vrsqrt.f32 %v9966_v43  ;;  %v9967_v25 = vadd.f32 1e-05, %v9935_v3  ;;  %v9841_v20 = vmul.f32 0.0078125, %v9825_v59  ;;  %v9920_v53 = vmul.f32 %v9840_v35, %v9840_v35 }
0x111c   : > { %v9887_v28 = vpop.xlane.xlu0 %9886  ;;  %v9952_v6 = vsub.f32 %v15801_v12, %v9840_v35 }
0x111d   : > { %12458 = vrsqrt.f32 %v9967_v25  ;;  %v9904_v10 = vmul.f32 0.0078125, %v9887_v28  ;;  %v9921_v38 = vmul.f32 %v9841_v20, %v9841_v20  ;;  %v9953_v34 = vsub.f32 %v15805_v30, %v9841_v20 }
0x111e   : > { %v9889_v44 = vpop.xlane.xlu1 %9888 }
0x111f   : > { %v9936_v24 = vsub.f32 %v9904_v10, %v9920_v53  ;;  %v9905_v17 = vmul.f32 0.0078125, %v9889_v44 }
0x1121   : > { %v9968_v2 = vadd.f32 1e-05, %v9936_v24  ;;  %v9937_v27 = vsub.f32 %v9905_v17, %v9921_v38 }
0x1123   : > { %12460 = vrsqrt.f32 %v9968_v2  ;;  %v9969_v57 = vadd.f32 1e-05, %v9937_v27 }
0x1125   : > { %v12457_v11 = vpop.eup %12456  ;;  %12462 = vrsqrt.f32 %v9969_v57 }
0x1126   : > { %v9998_v31 = vmul.f32 %v12457_v11, %v9950_v39 }
0x1127   : > { %v12459_v0 = vpop.eup %12458 }
0x1128   : > { %v10020_v29 = vmul.f32 %v15824_v54, %v9998_v31  ;;  %v9999_v52 = vmul.f32 %v12459_v0, %v9951_v33 }
0x112a   : > { %v10042_v9 = vadd.f32 %v15832_v42, %v10020_v29  ;;  %v10021_v51 = vmul.f32 %v15824_v54, %v9999_v52 }
0x112c   : > { %10058 = vst [vmem:[%s15843_s12 + $0x60] sm:$0xff] %v10042_v9  ;;  %v10043_v37 = vadd.f32 %v15832_v42, %v10021_v51 }
0x112d   : > { %v12461_v63 = vpop.eup %12460 }
0x112e   : > { %10059 = vst [vmem:[%s15843_s12 + $0x68] sm:$0xff] %v10043_v37  ;;  %v10000_v36 = vmul.f32 %v12461_v63, %v9952_v6 }
0x112f   : > { %v12463_v21 = vpop.eup %12462 }
0x1130   : > { %v10022_v50 = vmul.f32 %v15824_v54, %v10000_v36  ;;  %v10001_v61 = vmul.f32 %v12463_v21, %v9953_v34 }
0x1132   : > { %v10044_v16 = vadd.f32 %v15832_v42, %v10022_v50  ;;  %v10023_v1 = vmul.f32 %v15824_v54, %v10001_v61 }
0x1134   : > { %10060 = vst [vmem:[%s15843_s12 + $0x70] sm:$0xff] %v10044_v16  ;;  %v10045_v12 = vadd.f32 %v15832_v42, %v10023_v1 }
0x1136   : > { %10061 = vst [vmem:[%s15843_s12 + $0x78] sm:$0xff] %v10045_v12 }
0x1137   : > { %12635 = shalt.err (!%p12632_p13)
}
0x1138   : > { %s12636_s23 = scalar_lea.hbm %s15922_s16, 2048  ;;  %s12640_s12 = scalar_lea.hbm %s16269_s14, 4096 }
0x1139   : > { %p12637_p9 = scmp.ne.s32.totalorder %s15922_s16, %s12636_s23  ;;  %p12641_p4 = scmp.lt.u32.totalorder %s15922_s16, %s16269_s14 }
0x113a   : > { %p12642_p8 = scmp.lt.u32.totalorder %s12640_s12, %s12636_s23  ;;  %p12644_p3 = scmp.lt.u32.totalorder %s12636_s23, %s15922_s16 }
0x113b   : > { %p12638_p0 = pnand %p12637_p9, %p12946_p10 }
0x113c   : > { %p12643_p6 = por %p12642_p8, %p12641_p4 }
0x113d   : > { %p12639_p11 = pneg %p12638_p0 }
0x113e   : > { %p12645_p5 = por %p12644_p3, %p12643_p6 }
0x1140   : > { %p12646_p7 = pnand %p12645_p5, %p12639_p11 }
0x1142   : > { %12649 = shalt.err (!%p12646_p7)
}
0x1143   : > { %s12718_s17 = smov 128   ;;  %s12719_s22 = smov 8  }
0x1144   : > { %11819 = dma.vmem_to_hbm [thread:$0]  (%p12946_p10), %s15924_s19, 2048, %s15922_s16, %s10063_s29, %s12718_s17, %s12718_s17, %s12719_s22  }
0x1145 PF: > { %s16270_s21 = sld [smem:[#allocation16_spill]]  ;;  %s16271_s25 = sld [smem:[#allocation17_spill]] }
0x1146   : > { %p16273_p2 = scmp.ge.s32.totalorder %s12696_s28, 2 }
0x114b   : > { %s10091_s1 = sand.u32 1, %s16270_s21   ;;  %p16272_p12 = scmp.ne.s32.totalorder %s16271_s25, 0 }
0x114c   : > { %s10092_s23 = scalar_lea.sflag [#allocation4], %s10091_s1 }
0x114d   : > { %p11839_p1 = pnand %p16273_p2, %p16272_p12 }
0x114f   : > { %12679 = dma.done.wait (!%p11839_p1), %s10092_s23, 2048  }
0x1150   : > { %12681 = vsyncadd (!%p11839_p1), %s10092_s23, 4294965248  ;;  %p28_p13 = scmp.ge.s32.totalorder %s12936_s15, 4   ;;  %s16274_s25 = smov %s12688_s26 }
0x1151   : > { %s16275_s26 = smov %s12692_s27  ;;  %s16276_s27 = smov %s12952_s30 }
0x1152   : > { %s16277_s28 = smov %s12936_s15  ;;  %30 = sbr.rel (!%p28_p13) target bundleno = 13 (0xd), region = 133 }
0x1159   :  { %10097 = vsyncpa [#allocation3], 1 }
0x115a   :  { %10099 = vsyncpa [#allocation3 + $0x1], 1 }
0x115b   :  { %10100 = vsyncpa [#allocation6], 1 }
0x115c   :  { %10101 = vsyncpa [#allocation9], 1 }
0x115d   :  { %10102 = vsyncpa [#allocation4], 1 }
0x115e   :  { %10104 = vsyncpa [#allocation4 + $0x1], 1 }

</bundles_post_ra>
